<compile_context>
chip_gen: v7x
topology: tpu7x:2x2x1
jax: 0.10.0
libtpu: 0.0.40
codegen_flags: <defaults>
</compile_context>

<pallas_src>
import functools

import jax
import jax.numpy as jnp
from jax.experimental import pallas as pl
from jax.experimental.pallas import tpu as pltpu

_ROW_TILE = 256


def _ceil_to(n, m):
    return ((n + m - 1) // m) * m


def _resident(shape):
    """BlockSpec for an array kept resident in VMEM across all grid steps."""
    zeros = (0,) * len(shape)
    return pl.BlockSpec(shape, lambda *_: zeros)


# ----------------------------- row-tiled throughput kernels -----------------------------

def _row_tiled_call(kernel, x2, resident, out_cols):
    """Tile (rows, Cin) over row blocks; `resident` inputs stay in VMEM (constant maps)."""
    rows, cin = x2.shape
    tile = min(_ROW_TILE, _ceil_to(rows, 8))
    rows_p = _ceil_to(rows, tile)
    if rows_p != rows:
        x2 = jnp.pad(x2, ((0, rows_p - rows), (0, 0)))
    out = pl.pallas_call(
        kernel,
        out_shape=jax.ShapeDtypeStruct((rows_p, out_cols), jnp.float32),
        grid=(rows_p // tile,),
        in_specs=[pl.BlockSpec((tile, cin), lambda i: (i, 0))]
        + [_resident(w.shape) for w in resident],
        out_specs=pl.BlockSpec((tile, out_cols), lambda i: (i, 0)),
        compiler_params=pltpu.CompilerParams(dimension_semantics=("parallel",)),
    )(x2, *resident)
    return out if rows_p == rows else out[:rows]


def _matmul_rows_kernel(x_ref, w_ref, o_ref):
    o_ref[...] = jnp.dot(x_ref[...].astype(jnp.bfloat16), w_ref[...],
                         preferred_element_type=jnp.float32)


def _matmul_bias_rows_kernel(x_ref, w_ref, b_ref, o_ref):
    o_ref[...] = jnp.dot(x_ref[...].astype(jnp.bfloat16), w_ref[...],
                         preferred_element_type=jnp.float32) + b_ref[...]


def _prenet_rows_kernel(x_ref, w1, b1, w2, b2, o_ref):
    # two fused FC+ReLU layers (dropout p=0 -> identity)
    h = jnp.maximum(jnp.dot(x_ref[...].astype(jnp.bfloat16), w1[...],
                            preferred_element_type=jnp.float32) + b1[...], 0.0)
    o_ref[...] = jnp.maximum(jnp.dot(h.astype(jnp.bfloat16), w2[...],
                                     preferred_element_type=jnp.float32) + b2[...], 0.0)


def _highway_chain(x, w_ref, b_ref, n_layers, C):
    for li in range(n_layers):
        h = jnp.dot(x.astype(jnp.bfloat16), w_ref[li],
                    preferred_element_type=jnp.float32) + b_ref[li]
        g = jax.nn.sigmoid(h[:, C:])
        x = g * jnp.maximum(h[:, :C], 0.0) + (1.0 - g) * x
    return x


def _highway_rows_kernel(x_ref, w_ref, b_ref, o_ref, *, n_layers, C):
    o_ref[...] = _highway_chain(x_ref[...], w_ref, b_ref, n_layers, C)


def _highway_pre_rows_kernel(x_ref, wpre_ref, w_ref, b_ref, o_ref, *, n_layers, C):
    x = jnp.dot(x_ref[...].astype(jnp.bfloat16), wpre_ref[...],
                preferred_element_type=jnp.float32)
    o_ref[...] = _highway_chain(x, w_ref, b_ref, n_layers, C)


def _bn_apply_rows_kernel(y_ref, stats_ref, o_ref):
    o_ref[...] = y_ref[...] * stats_ref[0:1, :] + stats_ref[1:2, :]


def linear_nobias(x, w):
    lead, cin = x.shape[:-1], x.shape[-1]
    out = _row_tiled_call(_matmul_rows_kernel, x.reshape(-1, cin), [w], w.shape[1])
    return out.reshape(lead + (w.shape[1],))


def prenet2(x, w1, b1, w2, b2):
    lead, cin = x.shape[:-1], x.shape[-1]
    out = _row_tiled_call(_prenet_rows_kernel, x.reshape(-1, cin),
                          [w1, b1, w2, b2], w2.shape[1])
    return out.reshape(lead + (w2.shape[1],))


def highway_stack(x, p, channels):
    """pre_highway (if present) + all highway layers, row-tiled, weights resident."""
    B, T, cin = x.shape
    x2 = x.reshape(B * T, cin)
    n_layers = p["hw_w"].shape[0]
    if "pre_highway" in p:
        kern = functools.partial(_highway_pre_rows_kernel, n_layers=n_layers, C=channels)
        out = _row_tiled_call(kern, x2, [p["pre_highway"], p["hw_w"], p["hw_b"]], channels)
    else:
        kern = functools.partial(_highway_rows_kernel, n_layers=n_layers, C=channels)
        out = _row_tiled_call(kern, x2, [p["hw_w"], p["hw_b"]], channels)
    return out.reshape(B, T, channels)


# ----------------------------- Conv1d + ReLU + BatchNorm (two-pass) -----------------------------

def _conv_stats_kernel(x_ref, w_ref, g_ref, b_ref, y_ref, stats_ref, ssum, ssq,
                       *, K, relu, inv_cnt):
    b = pl.program_id(0)

    @pl.when(b == 0)
    def _():
        ssum[...] = jnp.zeros_like(ssum)
        ssq[...] = jnp.zeros_like(ssq)

    T_out = x_ref.shape[1] - K + 1              # full PyTorch conv length (T or T+1)
    Cout = w_ref.shape[2]
    xb = x_ref[0].astype(jnp.bfloat16)          # (Tpad, Cin)
    acc = jnp.zeros((T_out, Cout), jnp.float32)
    for k in range(K):                          # conv = K shifted matmuls (no im2col)
        acc = acc + jnp.dot(xb[k:k + T_out, :], w_ref[k],
                            preferred_element_type=jnp.float32)
    if relu:
        acc = jnp.maximum(acc, 0.0)
    y_ref[0] = acc[: y_ref.shape[1]]            # CBHG truncates to T
    # training-mode BN stats over the FULL (batch, conv-time) extent (incl. extra frame
    # of even-K convs, matching PyTorch).  TODO(synk): shifted/Welford variance for
    # large-magnitude activations (E[x^2]-E[x]^2 cancellation).
    ssum[...] = ssum[...] + jnp.sum(acc, axis=0, keepdims=True)
    ssq[...] = ssq[...] + jnp.sum(acc * acc, axis=0, keepdims=True)

    @pl.when(b == pl.num_programs(0) - 1)
    def _():
        mean = ssum[...] * inv_cnt
        var = ssq[...] * inv_cnt - mean * mean
        scale = g_ref[...] * jax.lax.rsqrt(var + 1e-5)
        shift = b_ref[...] - mean * scale
        stats_ref[...] = jnp.concatenate([scale, shift], axis=0)


def conv_bn(x, p, relu):
    """Fused Conv1d(bias=False) [+ ReLU] with global training-mode BatchNorm1d.
    Pass 1: per-batch conv + stat accumulation.  Pass 2: row-tiled scale/shift."""
    B, T, Cin = x.shape
    w = p["w"]                                  # (K, Cin, Cout) bf16
    K, _, Cout = w.shape
    pad = K // 2
    xp = jnp.pad(x, ((0, 0), (pad, pad), (0, 0))) if pad else x
    Tpad = T + 2 * pad
    T_out = Tpad - K + 1
    inv_cnt = 1.0 / float(B * T_out)

    y_pre, stats = pl.pallas_call(
        functools.partial(_conv_stats_kernel, K=K, relu=relu, inv_cnt=inv_cnt),
        out_shape=(jax.ShapeDtypeStruct((B, T, Cout), jnp.float32),
                   jax.ShapeDtypeStruct((2, Cout), jnp.float32)),
        grid=(B,),
        in_specs=[pl.BlockSpec((1, Tpad, Cin), lambda b: (b, 0, 0)),
                  _resident(w.shape),
                  _resident(p["gamma"].shape),
                  _resident(p["beta"].shape)],
        out_specs=(pl.BlockSpec((1, T, Cout), lambda b: (b, 0, 0)),
                   _resident((2, Cout))),
        scratch_shapes=[pltpu.VMEM((1, Cout), jnp.float32),
                        pltpu.VMEM((1, Cout), jnp.float32)],
        compiler_params=pltpu.CompilerParams(dimension_semantics=("arbitrary",)),
        # TODO(synk): tile the time axis too for very long T on v7x (64 MiB VMEM).
    )(xp, w, p["gamma"], p["beta"])

    out = _row_tiled_call(_bn_apply_rows_kernel, y_pre.reshape(B * T, Cout),
                          [stats], Cout)
    return out.reshape(B, T, Cout)


# ----------------------------- bidirectional GRU -----------------------------

def _bigru_rec_kernel(gi_ref, whh_ref, bhh_ref, o_ref, h_ref, *, H):
    @pl.when(pl.program_id(1) == 0)
    def _init():
        h_ref[...] = jnp.zeros_like(h_ref)

    Tc = gi_ref.shape[1]
    whh = whh_ref[0]
    bhh = bhh_ref[0]
    h = h_ref[...]
    for j in range(Tc):                         # statically unrolled (Tc <= 32)
        gi = gi_ref[0, j]                       # precomputed x @ W_ih + b_ih
        gh = jnp.dot(h, whh, preferred_element_type=jnp.float32) + bhh
        r = jax.nn.sigmoid(gi[:, :H] + gh[:, :H])
        z = jax.nn.sigmoid(gi[:, H:2 * H] + gh[:, H:2 * H])
        n = jnp.tanh(gi[:, 2 * H:] + r * gh[:, 2 * H:])
        h = (1.0 - z) * n + z * h
        o_ref[0, j] = h
    h_ref[...] = h


def bigru(x, p, hidden):
    """Bidirectional single-layer GRU.  Input projection hoisted into one big matmul;
    recurrence is time-chunked (grid=(direction, T//Tc)), weights resident, hidden state
    in VMEM scratch.  x: (B, T, C) -> (B, T, 2*hidden)."""
    B, T, C = x.shape
    H = hidden
    xs = jnp.transpose(x, (1, 0, 2)).reshape(T * B, C)       # (T*B, C), t-major

    # --- time-invariant input projection for BOTH directions: one row-tiled matmul ---
    gi = _row_tiled_call(_matmul_bias_rows_kernel, xs, [p["wih6"], p["bih6"]], 6 * H)
    gi = gi.reshape(T, B, 6 * H)
    gi_fwd = gi[:, :, :3 * H]
    gi_bwd = gi[::-1, :, 3 * H:]                              # backward processing order
    gi_proc = jnp.stack([gi_fwd, gi_bwd], axis=0)             # (2, T, B, 3H)

    Tc = min(T, 32)
    T_pad = _ceil_to(T, Tc)
    if T_pad != T:                                            # pad at end of processing
        gi_proc = jnp.pad(gi_proc, ((0, 0), (0, T_pad - T), (0, 0), (0, 0)))

    out = pl.pallas_call(
        functools.partial(_bigru_rec_kernel, H=H),
        out_shape=jax.ShapeDtypeStruct((2, T_pad, B, H), jnp.float32),
        grid=(2, T_pad // Tc),
        in_specs=[pl.BlockSpec((1, Tc, B, 3 * H), lambda d, c: (d, c, 0, 0)),
                  pl.BlockSpec((1, H, 3 * H), lambda d, c: (d, 0, 0)),
                  pl.BlockSpec((1, 1, 3 * H), lambda d, c: (d, 0, 0))],
        out_specs=pl.BlockSpec((1, Tc, B, H), lambda d, c: (d, c, 0, 0)),
        scratch_shapes=[pltpu.VMEM((B, H), jnp.float32)],
        compiler_params=pltpu.CompilerParams(
            dimension_semantics=("parallel", "arbitrary")),
    )(gi_proc, p["whh"], p["bhh"])

    fwd = out[0, :T]                                          # (T, B, H)
    bwd = out[1, :T][::-1]                                    # back to logical time
    return jnp.transpose(jnp.concatenate([fwd, bwd], axis=-1), (1, 0, 2))


# ----------------------------- fully fused, chunked decoder -----------------------------

def _decoder_kernel(pn_ref, enc_ref, encp_ref, mask_ref,
                    pw1, pb1, pw2, pb2,
                    awih_c, awih_p, awhh, abih, abhh,
                    ww, wb, wloc, lbias, v_ref,
                    riw_c, riw_h, rib,
                    l1wx, l1wh, l1b, l2wx, l2wh, l2b,
                    melw, stwx, stwc, stb,
                    o_mel, o_sc, o_stop,
                    attn_h, r1h, r1c, r2h, r2c, ctx, cum,
                    *, D, L, K_loc):
    Sc = pn_ref.shape[0]
    B, T_enc = mask_ref.shape
    half = (K_loc - 1) // 2

    @pl.when(pl.program_id(0) == 0)
    def _init():
        attn_h[...] = jnp.zeros_like(attn_h)
        r1h[...] = jnp.zeros_like(r1h)
        r1c[...] = jnp.zeros_like(r1c)
        r2h[...] = jnp.zeros_like(r2h)
        r2c[...] = jnp.zeros_like(r2c)
        ctx[...] = jnp.zeros_like(ctx)
        cum[...] = jnp.zeros_like(cum)

    enc = enc_ref[...]                                        # (B, T_enc, E) resident
    encp = encp_ref[...]                                      # (B, T_enc, D)
    mask = mask_ref[...]                                      # (B, T_enc)

    @pl.loop(0, Sc)
    def _step(j):
        # ---- decoder PreNet (dropout p=0 -> identity) ----
        x0 = pn_ref[j]                                        # (B, n_mels)
        p1 = jnp.maximum(jnp.dot(x0, pw1[...],
                                 preferred_element_type=jnp.float32) + pb1[...], 0.0)
        p2 = jnp.maximum(jnp.dot(p1, pw2[...],
                                 preferred_element_type=jnp.float32) + pb2[...], 0.0)

        # ---- attention GRU cell (concat-free: split-weight dots; gate order r,z,n) ----
        h_prev = attn_h[...]
        gi = (jnp.dot(ctx[...], awih_c[...], preferred_element_type=jnp.float32)
              + jnp.dot(p2, awih_p[...], preferred_element_type=jnp.float32) + abih[...])
        gh = jnp.dot(h_prev, awhh[...], preferred_element_type=jnp.float32) + abhh[...]
        r_g = jax.nn.sigmoid(gi[:, :D] + gh[:, :D])
        z_g = jax.nn.sigmoid(gi[:, D:2 * D] + gh[:, D:2 * D])
        n_g = jnp.tanh(gi[:, 2 * D:] + r_g * gh[:, 2 * D:])
        ah = (1.0 - z_g) * n_g + z_g * h_prev
        attn_h[...] = ah

        # ---- location-sensitive attention, lane-dense (B, T_enc) ----
        q = jnp.dot(ah, ww[...], preferred_element_type=jnp.float32) + wb[...]
        cum_prev = cum[...]                                   # (B, T_enc)
        zpad = jnp.zeros((B, half), jnp.float32)
        cum_pad = jnp.concatenate([zpad, cum_prev, zpad], axis=1)   # (B, T+K-1)
        # location conv + L folded into one (K, D) operator; computed as an MXU matmul
        win = jnp.concatenate(
            [cum_pad[:, k:k + T_enc][:, :, None] for k in range(K_loc)], axis=-1)
        loc = jnp.dot(win.reshape(B * T_enc, K_loc), wloc[...],
                      preferred_element_type=jnp.float32).reshape(B, T_enc, D)
        e = jnp.tanh(q[:, None, :] + encp + loc + lbias[...])        # (B, T_enc, D)
        u = jnp.sum(e * v_ref[...], axis=-1)                         # (B, T_enc)
        u = u * mask                      # zero-padding-char mask (as fatchord reference)
        mx = jnp.max(u, axis=1, keepdims=True)
        ex = jnp.exp(u - mx)
        scores = ex * pl.reciprocal(jnp.sum(ex, axis=1, keepdims=True), approx=True)
        cum[...] = cum_prev + scores

        # ---- context vector ----
        c = jnp.einsum("bqt,bte->bqe", scores[:, None, :], enc,
                       preferred_element_type=jnp.float32)[:, 0, :]  # (B, E)
        ctx[...] = c

        # ---- rnn_input + residual LSTMs (concat-free gate matmuls) ----
        x = (jnp.dot(c, riw_c[...], preferred_element_type=jnp.float32)
             + jnp.dot(ah, riw_h[...], preferred_element_type=jnp.float32) + rib[...])

        g1 = (jnp.dot(x, l1wx[...], preferred_element_type=jnp.float32)
              + jnp.dot(r1h[...], l1wh[...], preferred_element_type=jnp.float32)
              + l1b[...])
        i1 = jax.nn.sigmoid(g1[:, :L])
        f1 = jax.nn.sigmoid(g1[:, L:2 * L])
        gg1 = jnp.tanh(g1[:, 2 * L:3 * L])
        o1 = jax.nn.sigmoid(g1[:, 3 * L:])
        c1 = f1 * r1c[...] + i1 * gg1
        h1 = o1 * jnp.tanh(c1)
        r1h[...] = h1
        r1c[...] = c1
        x = x + h1

        g2 = (jnp.dot(x, l2wx[...], preferred_element_type=jnp.float32)
              + jnp.dot(r2h[...], l2wh[...], preferred_element_type=jnp.float32)
              + l2b[...])
        i2 = jax.nn.sigmoid(g2[:, :L])
        f2 = jax.nn.sigmoid(g2[:, L:2 * L])
        gg2 = jnp.tanh(g2[:, 2 * L:3 * L])
        o2 = jax.nn.sigmoid(g2[:, 3 * L:])
        c2 = f2 * r2c[...] + i2 * gg2
        h2 = o2 * jnp.tanh(c2)
        r2h[...] = h2
        r2c[...] = c2
        x = x + h2

        # ---- output projections (mel weight pre-sliced to the used columns) ----
        mels = jnp.dot(x, melw[...], preferred_element_type=jnp.float32)   # (B, n_mels*r)
        stop = jax.nn.sigmoid(
            jnp.dot(x, stwx[...], preferred_element_type=jnp.float32)
            + jnp.dot(c, stwc[...], preferred_element_type=jnp.float32) + stb[...])

        o_mel[j] = mels
        o_sc[j] = scores
        o_stop[j] = stop


def run_decoder(dp, encoder_seq, encoder_seq_proj, m, chars_mask, hp):
    B, n_mels, steps = m.shape
    r = hp["r"]
    S = steps // r
    T_enc, E = encoder_seq.shape[1], encoder_seq.shape[2]
    D, L = hp["decoder_dims"], hp["lstm_dims"]

    # teacher-forced prenet inputs: step s uses m[:, :, s*r - 1] (go-frame at s=0)
    go = jnp.zeros((B, n_mels), jnp.float32)
    if S > 1:
        idx = jnp.arange(1, S) * r - 1
        rest = jnp.transpose(m[:, :, idx], (2, 0, 1))          # (S-1, B, n_mels)
        pn_seq = jnp.concatenate([go[None], rest], axis=0)     # (S, B, n_mels)
    else:
        pn_seq = go[None]

    Sc = min(S, 32)
    S_pad = _ceil_to(S, Sc)
    if S_pad != S:
        pn_seq = jnp.pad(pn_seq, ((0, S_pad - S), (0, 0), (0, 0)))

    names = ["pw1", "pb1", "pw2", "pb2",
             "awih_c", "awih_p", "awhh", "abih", "abhh",
             "Ww", "Wb", "wlocL", "biasL", "v",
             "riw_c", "riw_h", "rib",
             "l1w_x", "l1w_h", "l1b",
             "l2w_x", "l2w_h", "l2b",
             "melw", "stw_x", "stw_c", "stb"]
    weights = [dp[n] for n in names]
    nm_r = dp["melw"].shape[1]

    in_specs = ([pl.BlockSpec((Sc, B, n_mels), lambda i: (i, 0, 0)),
                 _resident(encoder_seq.shape),
                 _resident(encoder_seq_proj.shape),
                 _resident(chars_mask.shape)]
                + [_resident(w.shape) for w in weights])
    out_shape = (jax.ShapeDtypeStruct((S_pad, B, nm_r), jnp.float32),
                 jax.ShapeDtypeStruct((S_pad, B, T_enc), jnp.float32),
                 jax.ShapeDtypeStruct((S_pad, B, 1), jnp.float32))
    out_specs = (pl.BlockSpec((Sc, B, nm_r), lambda i: (i, 0, 0)),
                 pl.BlockSpec((Sc, B, T_enc), lambda i: (i, 0, 0)),
                 pl.BlockSpec((Sc, B, 1), lambda i: (i, 0, 0)))
    scratch = [pltpu.VMEM((B, D), jnp.float32),        # attention GRU hidden
               pltpu.VMEM((B, L), jnp.float32),        # rnn1 hidden
               pltpu.VMEM((B, L), jnp.float32),        # rnn1 cell
               pltpu.VMEM((B, L), jnp.float32),        # rnn2 hidden
               pltpu.VMEM((B, L), jnp.float32),        # rnn2 cell
               pltpu.VMEM((B, E), jnp.float32),        # context vector
               pltpu.VMEM((B, T_enc), jnp.float32)]    # cumulative attention (lane-dense)

    mel_s, sc_s, stop_s = pl.pallas_call(
        functools.partial(_decoder_kernel, D=D, L=L, K_loc=dp["wlocL"].shape[0]),
        out_shape=out_shape,
        grid=(S_pad // Sc,),
        in_specs=in_specs,
        out_specs=out_specs,
        scratch_shapes=scratch,
        compiler_params=pltpu.CompilerParams(dimension_semantics=("arbitrary",)),
        # TODO(synk): set vmem_limit_bytes and single-buffer (pl.Buffered(1)) the resident
        #             weight/encoder inputs on v7x for realistic shapes.
    )(pn_seq, encoder_seq, encoder_seq_proj, chars_mask, *weights)
    return mel_s[:S], sc_s[:S], stop_s[:S]


# ----------------------------- composite modules -----------------------------

def cbhg_forward(x, p, channels):
    """CBHG in NWC layout.  x: (B, T, C_in) -> (B, T, channels)."""
    B, T, _ = x.shape
    residual = x
    bank = [conv_bn(x, c, relu=True) for c in p["bank"]]
    conv_bank = jnp.concatenate(bank, axis=-1)                 # (B, T, K*channels)
    # MaxPool1d(kernel=2, stride=1, padding=1) truncated to T
    # TODO(synk): fuse pool into proj1's input stage to skip one HBM round trip.
    xp = jnp.pad(conv_bank, ((0, 0), (1, 0), (0, 0)), constant_values=-jnp.inf)
    pooled = jnp.maximum(xp[:, :T, :], xp[:, 1:T + 1, :])
    y = conv_bn(pooled, p["proj1"], relu=True)
    y = conv_bn(y, p["proj2"], relu=False)
    y = y + residual
    y = highway_stack(y, p, channels)
    return bigru(y, p["gru"], channels // 2)


def encoder_forward(e, hp, x_ids, speaker_embedding):
    x = jnp.take(e["embedding"], x_ids, axis=0)                # (B, T, embed) gather (glue)
    x = prenet2(x, e["pw1"], e["pb1"], e["pw2"], e["pb2"])
    x = cbhg_forward(x, e["cbhg"], hp["encoder_dims"])         # (B, T, enc)
    B, T, _ = x.shape
    se = jnp.broadcast_to(speaker_embedding[:, None, :],
                          (B, T, speaker_embedding.shape[-1]))
    return jnp.concatenate([x, se], axis=2)                    # (B, T, enc + spk)


def tacotron_forward(pp, x_ids, m, speaker_embedding, hp):
    B, n_mels, steps = m.shape
    r = hp["r"]
    S = steps // r

    encoder_seq = encoder_forward(pp["encoder"], hp, x_ids, speaker_embedding)
    encoder_seq_proj = linear_nobias(encoder_seq, pp["encoder_proj_w"])
    chars_mask = (x_ids != 0).astype(jnp.float32)              # (B, T_enc) lane-dense

    mel_steps, score_steps, stop_steps = run_decoder(
        pp["decoder"], encoder_seq, encoder_seq_proj, m, chars_mask, hp)

    mel_outputs = (mel_steps.reshape(S, B, n_mels, r)
                   .transpose(1, 2, 0, 3).reshape(B, n_mels, S * r))    # (B, n_mels, steps)
    postnet_out = cbhg_forward(mel_outputs.transpose(0, 2, 1),
                               pp["postnet"], hp["postnet_dims"])
    lin = linear_nobias(postnet_out, pp["post_proj_w"]).transpose(0, 2, 1)
    attn_scores = score_steps.transpose(1, 0, 2)                        # (B, S, T_enc)
    stop_outputs = jnp.repeat(stop_steps[:, :, 0].T, r, axis=1)         # (B, steps)
    return mel_outputs, lin, attn_scores, stop_outputs


# ----------------------------- parameter init (PyTorch-style layout) -----------------------------

class KeyGen:
    def __init__(self, seed):
        self._key = jax.random.PRNGKey(seed)

    def __call__(self):
        self._key, sub = jax.random.split(self._key)
        return sub


def _w(kg, shape, scale=0.1):
    return (scale * jax.random.normal(kg(), shape)).astype(jnp.float32)


def init_highway(kg, size):
    return dict(w1=_w(kg, (size, size)), b1=jnp.zeros((size,), jnp.float32),
                w2=_w(kg, (size, size)), b2=jnp.zeros((size,), jnp.float32))


def init_gru(kg, in_dim, hidden):
    return dict(wih=_w(kg, (in_dim, 3 * hidden)), whh=_w(kg, (hidden, 3 * hidden)),
                bih=jnp.zeros((3 * hidden,), jnp.float32),
                bhh=jnp.zeros((3 * hidden,), jnp.float32))


def init_lstm(kg, in_dim, hidden):
    return dict(wih=_w(kg, (in_dim, 4 * hidden)), whh=_w(kg, (hidden, 4 * hidden)),
                bih=jnp.zeros((4 * hidden,), jnp.float32),
                bhh=jnp.zeros((4 * hidden,), jnp.float32))


def init_bnconv(kg, cin, cout, k):
    return dict(w=_w(kg, (cout, cin, k)), gamma=jnp.ones((cout,), jnp.float32),
                beta=jnp.zeros((cout,), jnp.float32))


def init_cbhg(kg, K, in_channels, channels, proj_channels, num_highways):
    p = dict(bank=[init_bnconv(kg, in_channels, channels, k) for k in range(1, K + 1)],
             proj1=init_bnconv(kg, K * channels, proj_channels[0], 3),
             proj2=init_bnconv(kg, proj_channels[0], proj_channels[1], 3),
             highways=[init_highway(kg, channels) for _ in range(num_highways)],
             gru=dict(fwd=init_gru(kg, channels, channels // 2),
                      bwd=init_gru(kg, channels, channels // 2)))
    if proj_channels[-1] != channels:
        p["pre_highway"] = _w(kg, (proj_channels[-1], channels))
    return p


def init_params(hp, seed=1):
    kg = KeyGen(seed)
    enc, dec = hp["encoder_dims"], hp["decoder_dims"]
    spk, lstm, n_mels = hp["speaker_embedding_size"], hp["lstm_dims"], hp["n_mels"]

    encoder = dict(
        embedding=_w(kg, (hp["num_chars"], hp["embed_dims"]), 1.0),
        prenet_fc1_w=_w(kg, (hp["embed_dims"], enc)),
        prenet_fc1_b=jnp.zeros((enc,), jnp.float32),
        prenet_fc2_w=_w(kg, (enc, enc)),
        prenet_fc2_b=jnp.zeros((enc,), jnp.float32),
        cbhg=init_cbhg(kg, hp["encoder_K"], enc, enc, [enc, enc], hp["num_highways"]))

    prenet_dims = 2 * dec
    decoder = dict(
        prenet_fc1_w=_w(kg, (n_mels, prenet_dims)),
        prenet_fc1_b=jnp.zeros((prenet_dims,), jnp.float32),
        prenet_fc2_w=_w(kg, (prenet_dims, prenet_dims)),
        prenet_fc2_b=jnp.zeros((prenet_dims,), jnp.float32),
        lsa=dict(conv_w=_w(kg, (32, 1, 31)), conv_b=jnp.zeros((32,), jnp.float32),
                 L_w=_w(kg, (32, dec)),
                 W_w=_w(kg, (dec, dec)), W_b=jnp.zeros((dec,), jnp.float32),
                 v_w=_w(kg, (dec, 1))),
        attn_rnn=init_gru(kg, enc + prenet_dims + spk, dec),
        rnn_input_w=_w(kg, (enc + dec + spk, lstm)),
        rnn_input_b=jnp.zeros((lstm,), jnp.float32),
        lstm1=init_lstm(kg, lstm, lstm),
        lstm2=init_lstm(kg, lstm, lstm),
        mel_proj_w=_w(kg, (lstm, n_mels * hp["max_r"])),
        stop_proj_w=_w(kg, (enc + spk + lstm, 1)),
        stop_proj_b=jnp.zeros((1,), jnp.float32))

    return dict(
        encoder=encoder,
        encoder_proj_w=_w(kg, (enc + spk, dec)),
        decoder=decoder,
        postnet=init_cbhg(kg, hp["postnet_K"], n_mels, hp["postnet_dims"],
                          [hp["postnet_dims"], hp["fft_bins"]], hp["num_highways"]),
        post_proj_w=_w(kg, (hp["postnet_dims"], hp["fft_bins"])))


# ----------------------------- one-time parameter re-layout -----------------------------

def prepare_params(params, hp):
    """Re-layout PyTorch-style params into the fused-kernel layout: NWC conv weights
    (bf16), stacked GRU input projections / per-direction recurrent weights, split
    (concat-free) decoder weights, folded LSA conv+L operator, column-sliced mel
    projection, stacked bf16 highway weights."""
    dec, lstm, n_mels = hp["decoder_dims"], hp["lstm_dims"], hp["n_mels"]
    r, max_r = hp["r"], hp["max_r"]
    E = hp["encoder_dims"] + hp["speaker_embedding_size"]
    bf = jnp.bfloat16

    def conv_prep(c):
        return dict(w=jnp.transpose(c["w"], (2, 1, 0)).astype(bf),   # (K, Cin, Cout)
                    gamma=c["gamma"].reshape(1, -1),
                    beta=c["beta"].reshape(1, -1))

    def gru_prep(g):
        return dict(
            wih6=jnp.concatenate([g["fwd"]["wih"], g["bwd"]["wih"]], axis=1).astype(bf),
            bih6=jnp.concatenate([g["fwd"]["bih"], g["bwd"]["bih"]])[None, :],
            whh=jnp.stack([g["fwd"]["whh"], g["bwd"]["whh"]]),
            bhh=jnp.stack([g["fwd"]["bhh"][None, :], g["bwd"]["bhh"][None, :]]))

    def cbhg_prep(p):
        q = dict(bank=[conv_prep(c) for c in p["bank"]],
                 proj1=conv_prep(p["proj1"]),
                 proj2=conv_prep(p["proj2"]),
                 hw_w=jnp.stack([jnp.concatenate([h["w1"], h["w2"]], axis=1)
                                 for h in p["highways"]]).astype(bf),
                 hw_b=jnp.stack([jnp.concatenate([h["b1"], h["b2"]])[None, :]
                                 for h in p["highways"]]),
                 gru=gru_prep(p["gru"]))
        if "pre_highway" in p:
            q["pre_highway"] = p["pre_highway"].astype(bf)
        return q

    e = params["encoder"]
    encoder = dict(embedding=e["embedding"],
                   pw1=e["prenet_fc1_w"].astype(bf), pb1=e["prenet_fc1_b"].reshape(1, -1),
                   pw2=e["prenet_fc2_w"].astype(bf), pb2=e["prenet_fc2_b"].reshape(1, -1),
                   cbhg=cbhg_prep(e["cbhg"]))

    d = params["decoder"]
    lsa = d["lsa"]
    # Fold the 1->32 location conv and the 32->dec L projection into one (31, dec)
    # linear operator (exact: both are linear, L has no bias).
    wlocL = jnp.einsum("fk,fd->kd", lsa["conv_w"][:, 0, :], lsa["L_w"])
    biasL = (lsa["conv_b"] @ lsa["L_w"]).reshape(1, 1, dec)
    # mel_proj: PyTorch does view(B, n_mels, max_r)[:, :, :r]; select the equivalent
    # weight columns statically.
    melw = d["mel_proj_w"].reshape(lstm, n_mels, max_r)[:, :, :r].reshape(lstm, n_mels * r)
    awih, riw, stw = d["attn_rnn"]["wih"], d["rnn_input_w"], d["stop_proj_w"]
    decoder = dict(
        pw1=d["prenet_fc1_w"], pb1=d["prenet_fc1_b"].reshape(1, -1),
        pw2=d["prenet_fc2_w"], pb2=d["prenet_fc2_b"].reshape(1, -1),
        awih_c=awih[:E], awih_p=awih[E:],                     # split: [ctx | prenet]
        awhh=d["attn_rnn"]["whh"],
        abih=d["attn_rnn"]["bih"].reshape(1, -1),
        abhh=d["attn_rnn"]["bhh"].reshape(1, -1),
        Ww=lsa["W_w"], Wb=lsa["W_b"].reshape(1, -1),
        wlocL=wlocL, biasL=biasL, v=lsa["v_w"].reshape(1, 1, dec),
        riw_c=riw[:E], riw_h=riw[E:], rib=d["rnn_input_b"].reshape(1, -1),
        l1w_x=d["lstm1"]["wih"], l1w_h=d["lstm1"]["whh"],
        l1b=(d["lstm1"]["bih"] + d["lstm1"]["bhh"]).reshape(1, -1),
        l2w_x=d["lstm2"]["wih"], l2w_h=d["lstm2"]["whh"],
        l2b=(d["lstm2"]["bih"] + d["lstm2"]["bhh"]).reshape(1, -1),
        melw=melw,
        stw_x=stw[:lstm], stw_c=stw[lstm:],                   # split: [x | ctx]
        stb=d["stop_proj_b"].reshape(1, 1))

    return dict(encoder=encoder,
                encoder_proj_w=params["encoder_proj_w"].astype(bf),
                decoder=decoder,
                postnet=cbhg_prep(params["postnet"]),
                post_proj_w=params["post_proj_w"].astype(bf))


# ----------------------------- main -----------------------------

if __name__ == "__main__":
    HP = dict(embed_dims=32, num_chars=30, encoder_dims=32, decoder_dims=32,
              n_mels=16, fft_bins=16,     # fft_bins == n_mels -> CBHG residual well-formed
              postnet_dims=32, encoder_K=4, lstm_dims=32, postnet_K=4,
              num_highways=2, dropout=0.0, stop_threshold=-3.4,
              speaker_embedding_size=16, r=2, max_r=20)

    key = jax.random.PRNGKey(0)
    k1, k2, k3 = jax.random.split(key, 3)
    B, T_text, steps = 2, 8, 8
    x_ids = jax.random.randint(k1, (B, T_text), 1, HP["num_chars"], dtype=jnp.int32)
    m = jax.random.normal(k2, (B, HP["n_mels"], steps), dtype=jnp.float32)
    speaker_embedding = jax.random.normal(
        k3, (B, HP["speaker_embedding_size"]), dtype=jnp.float32)

    params = init_params(HP, seed=1)
    prepped = prepare_params(params, HP)

    fwd = jax.jit(functools.partial(tacotron_forward, hp=HP))
    mel_out, linear_out, attn, stop = fwd(prepped, x_ids, m, speaker_embedding)
    jax.block_until_ready((mel_out, linear_out, attn, stop))

    assert mel_out.shape == (B, HP["n_mels"], steps)
    assert linear_out.shape == (B, HP["fft_bins"], steps)
    assert attn.shape == (B, steps // HP["r"], T_text)
    assert stop.shape == (B, steps)
    print("KERNEL_OK")
</pallas_src>

<mosaic_0001>
module attributes {stable_mosaic.version = 11 : i64} {
  func.func @_prenet_rows_kernel(%arg0: i32, %arg1: memref<16x32xf32, #tpu.memory_space<vmem>>, %arg2: memref<32x32xbf16, #tpu.memory_space<vmem>>, %arg3: memref<1x32xf32, #tpu.memory_space<vmem>>, %arg4: memref<32x32xbf16, #tpu.memory_space<vmem>>, %arg5: memref<1x32xf32, #tpu.memory_space<vmem>>, %arg6: memref<16x32xf32, #tpu.memory_space<vmem>>) attributes {dimension_semantics = [#tpu.dimension_semantics<parallel>], iteration_bounds = array<i64: 1>, scalar_prefetch = 0 : i64, scratch_operands = 0 : i64, tpu.core_type = #tpu.core_type<tc>, window_params = [{transform_indices = @transform_0, window_bounds = array<i64: 16, 32>}, {pipeline_mode = #tpu.pipeline_mode<synchronous>, transform_indices = @transform_1, window_bounds = array<i64: 32, 32>}, {pipeline_mode = #tpu.pipeline_mode<synchronous>, transform_indices = @transform_2, window_bounds = array<i64: 1, 32>}, {pipeline_mode = #tpu.pipeline_mode<synchronous>, transform_indices = @transform_3, window_bounds = array<i64: 32, 32>}, {pipeline_mode = #tpu.pipeline_mode<synchronous>, transform_indices = @transform_4, window_bounds = array<i64: 1, 32>}, {transform_indices = @transform_5, window_bounds = array<i64: 16, 32>}]} {
    %c0 = arith.constant 0 : index
    %c0_0 = arith.constant 0 : index
    %0 = vector.load %arg1[%c0, %c0_0] : memref<16x32xf32, #tpu.memory_space<vmem>>, vector<16x32xf32>
    %1 = arith.truncf %0 : vector<16x32xf32> to vector<16x32xbf16>
    %c0_1 = arith.constant 0 : index
    %c0_2 = arith.constant 0 : index
    %2 = vector.load %arg2[%c0_1, %c0_2] : memref<32x32xbf16, #tpu.memory_space<vmem>>, vector<32x32xbf16>
    %cst = arith.constant dense<0.000000e+00> : vector<16x32xf32>
    %3 = tpu.matmul %1, %2, %cst {dimension_numbers = #tpu.dot_dimension_numbers<[1], [0], [0], [1], [0, 0, 1, 1], [], []>} : vector<16x32xbf16>, vector<32x32xbf16>, vector<16x32xf32> -> vector<16x32xf32>
    %c0_3 = arith.constant 0 : index
    %c0_4 = arith.constant 0 : index
    %4 = vector.load %arg3[%c0_3, %c0_4] : memref<1x32xf32, #tpu.memory_space<vmem>>, vector<1x32xf32>
    %5 = vector.broadcast %4 : vector<1x32xf32> to vector<16x32xf32>
    %6 = arith.addf %3, %5 : vector<16x32xf32>
    %cst_5 = arith.constant 0.000000e+00 : f32
    %7 = vector.broadcast %cst_5 : f32 to vector<16x32xf32>
    %8 = arith.maximumf %6, %7 : vector<16x32xf32>
    %9 = arith.truncf %8 : vector<16x32xf32> to vector<16x32xbf16>
    %c0_6 = arith.constant 0 : index
    %c0_7 = arith.constant 0 : index
    %10 = vector.load %arg4[%c0_6, %c0_7] : memref<32x32xbf16, #tpu.memory_space<vmem>>, vector<32x32xbf16>
    %cst_8 = arith.constant dense<0.000000e+00> : vector<16x32xf32>
    %11 = tpu.matmul %9, %10, %cst_8 {dimension_numbers = #tpu.dot_dimension_numbers<[1], [0], [0], [1], [0, 0, 1, 1], [], []>} : vector<16x32xbf16>, vector<32x32xbf16>, vector<16x32xf32> -> vector<16x32xf32>
    %c0_9 = arith.constant 0 : index
    %c0_10 = arith.constant 0 : index
    %12 = vector.load %arg5[%c0_9, %c0_10] : memref<1x32xf32, #tpu.memory_space<vmem>>, vector<1x32xf32>
    %13 = vector.broadcast %12 : vector<1x32xf32> to vector<16x32xf32>
    %14 = arith.addf %11, %13 : vector<16x32xf32>
    %cst_11 = arith.constant 0.000000e+00 : f32
    %15 = vector.broadcast %cst_11 : f32 to vector<16x32xf32>
    %16 = arith.maximumf %14, %15 : vector<16x32xf32>
    %c0_12 = arith.constant 0 : index
    %c0_13 = arith.constant 0 : index
    %17 = vector.load %arg6[%c0_12, %c0_13] : memref<16x32xf32, #tpu.memory_space<vmem>>, vector<16x32xf32>
    tpu.vector_store %arg6[%c0_12, %c0_13], %16 {strides = array<i32>} : memref<16x32xf32, #tpu.memory_space<vmem>>, vector<16x32xf32>,
    return
  }
  func.func @transform_0(%arg0: i32) -> (i32, i32) {
    %c0_i32 = arith.constant 0 : i32
    %c0_i32_0 = arith.constant 0 : i32
    return %arg0, %c0_i32 : i32, i32
  }
  func.func @transform_1(%arg0: i32) -> (i32, i32) {
    %c0_i32 = arith.constant 0 : i32
    %c0_i32_0 = arith.constant 0 : i32
    %c0_i32_1 = arith.constant 0 : i32
    return %c0_i32, %c0_i32_0 : i32, i32
  }
  func.func @transform_2(%arg0: i32) -> (i32, i32) {
    %c0_i32 = arith.constant 0 : i32
    %c0_i32_0 = arith.constant 0 : i32
    %c0_i32_1 = arith.constant 0 : i32
    return %c0_i32, %c0_i32_0 : i32, i32
  }
  func.func @transform_3(%arg0: i32) -> (i32, i32) {
    %c0_i32 = arith.constant 0 : i32
    %c0_i32_0 = arith.constant 0 : i32
    %c0_i32_1 = arith.constant 0 : i32
    return %c0_i32, %c0_i32_0 : i32, i32
  }
  func.func @transform_4(%arg0: i32) -> (i32, i32) {
    %c0_i32 = arith.constant 0 : i32
    %c0_i32_0 = arith.constant 0 : i32
    %c0_i32_1 = arith.constant 0 : i32
    return %c0_i32, %c0_i32_0 : i32, i32
  }
  func.func @transform_5(%arg0: i32) -> (i32, i32) {
    %c0_i32 = arith.constant 0 : i32
    %c0_i32_0 = arith.constant 0 : i32
    return %arg0, %c0_i32 : i32, i32
  }
}

module attributes {stable_mosaic.version = 11 : i64} {
  func.func @_conv_stats_kernel(%arg0: i32, %arg1: memref<1x10x32xf32, #tpu.memory_space<vmem>>, %arg2: memref<2x32x32xbf16, #tpu.memory_space<vmem>>, %arg3: memref<1x32xf32, #tpu.memory_space<vmem>>, %arg4: memref<1x32xf32, #tpu.memory_space<vmem>>, %arg5: memref<1x8x32xf32, #tpu.memory_space<vmem>>, %arg6: memref<2x32xf32, #tpu.memory_space<vmem>>, %arg7: memref<1x32xf32, #tpu.memory_space<vmem>>, %arg8: memref<1x32xf32, #tpu.memory_space<vmem>>) attributes {dimension_semantics = [#tpu.dimension_semantics<arbitrary>], iteration_bounds = array<i64: 2>, scalar_prefetch = 0 : i64, scratch_operands = 2 : i64, tpu.core_type = #tpu.core_type<tc>, window_params = [{transform_indices = @transform_0, window_bounds = array<i64: 1, 10, 32>}, {pipeline_mode = #tpu.pipeline_mode<synchronous>, transform_indices = @transform_1, window_bounds = array<i64: 2, 32, 32>}, {pipeline_mode = #tpu.pipeline_mode<synchronous>, transform_indices = @transform_2, window_bounds = array<i64: 1, 32>}, {pipeline_mode = #tpu.pipeline_mode<synchronous>, transform_indices = @transform_3, window_bounds = array<i64: 1, 32>}, {transform_indices = @transform_4, window_bounds = array<i64: 1, 8, 32>}, {pipeline_mode = #tpu.pipeline_mode<synchronous>, transform_indices = @transform_5, window_bounds = array<i64: 2, 32>}]} {
    %c0_i32 = arith.constant 0 : i32
    %0 = arith.cmpi eq, %arg0, %c0_i32 : i32
    %1 = arith.extui %0 : i1 to i32
    %c0_i32_0 = arith.constant 0 : i32
    %2 = arith.cmpi ne, %1, %c0_i32_0 : i32
    scf.if %2 {
      %cst_25 = arith.constant 0.000000e+00 : f32
      %37 = vector.broadcast %cst_25 : f32 to vector<1x32xf32>
      %c0_26 = arith.constant 0 : index
      %c0_27 = arith.constant 0 : index
      %38 = vector.load %arg7[%c0_26, %c0_27] : memref<1x32xf32, #tpu.memory_space<vmem>>, vector<1x32xf32>
      tpu.vector_store %arg7[%c0_26, %c0_27], %37 {strides = array<i32>} : memref<1x32xf32, #tpu.memory_space<vmem>>, vector<1x32xf32>,
      %cst_28 = arith.constant 0.000000e+00 : f32
      %39 = vector.broadcast %cst_28 : f32 to vector<1x32xf32>
      %c0_29 = arith.constant 0 : index
      %c0_30 = arith.constant 0 : index
      %40 = vector.load %arg8[%c0_29, %c0_30] : memref<1x32xf32, #tpu.memory_space<vmem>>, vector<1x32xf32>
      tpu.vector_store %arg8[%c0_29, %c0_30], %39 {strides = array<i32>} : memref<1x32xf32, #tpu.memory_space<vmem>>, vector<1x32xf32>,
    } else {
    }
    %c0 = arith.constant 0 : index
    %c0_1 = arith.constant 0 : index
    %c0_2 = arith.constant 0 : index
    %3 = vector.load %arg1[%c0, %c0_1, %c0_2] : memref<1x10x32xf32, #tpu.memory_space<vmem>>, vector<1x10x32xf32>
    %4 = vector.shape_cast %3 : vector<1x10x32xf32> to vector<10x32xf32>
    %5 = arith.truncf %4 : vector<10x32xf32> to vector<10x32xbf16>
    %cst = arith.constant 0.000000e+00 : f32
    %6 = vector.broadcast %cst : f32 to vector<9x32xf32>
    %7 = vector.extract_strided_slice %5 {offsets = [0, 0], sizes = [9, 32], strides = [1, 1]} : vector<10x32xbf16> to vector<9x32xbf16>
    %c0_3 = arith.constant 0 : index
    %c0_4 = arith.constant 0 : index
    %c0_5 = arith.constant 0 : index
    %8 = vector.load %arg2[%c0_3, %c0_4, %c0_5] : memref<2x32x32xbf16, #tpu.memory_space<vmem>>, vector<1x32x32xbf16>
    %9 = vector.shape_cast %8 : vector<1x32x32xbf16> to vector<32x32xbf16>
    %cst_6 = arith.constant dense<0.000000e+00> : vector<9x32xf32>
    %10 = tpu.matmul %7, %9, %cst_6 {dimension_numbers = #tpu.dot_dimension_numbers<[1], [0], [0], [1], [0, 0, 1, 1], [], []>} : vector<9x32xbf16>, vector<32x32xbf16>, vector<9x32xf32> -> vector<9x32xf32>
    %11 = arith.addf %6, %10 : vector<9x32xf32>
    %12 = vector.extract_strided_slice %5 {offsets = [1, 0], sizes = [9, 32], strides = [1, 1]} : vector<10x32xbf16> to vector<9x32xbf16>
    %c1 = arith.constant 1 : index
    %c0_7 = arith.constant 0 : index
    %c0_8 = arith.constant 0 : index
    %13 = vector.load %arg2[%c1, %c0_7, %c0_8] : memref<2x32x32xbf16, #tpu.memory_space<vmem>>, vector<1x32x32xbf16>
    %14 = vector.shape_cast %13 : vector<1x32x32xbf16> to vector<32x32xbf16>
    %cst_9 = arith.constant dense<0.000000e+00> : vector<9x32xf32>
    %15 = tpu.matmul %12, %14, %cst_9 {dimension_numbers = #tpu.dot_dimension_numbers<[1], [0], [0], [1], [0, 0, 1, 1], [], []>} : vector<9x32xbf16>, vector<32x32xbf16>, vector<9x32xf32> -> vector<9x32xf32>
    %16 = arith.addf %11, %15 : vector<9x32xf32>
    %cst_10 = arith.constant 0.000000e+00 : f32
    %17 = vector.broadcast %cst_10 : f32 to vector<9x32xf32>
    %18 = arith.maximumf %16, %17 : vector<9x32xf32>
    %19 = vector.extract_strided_slice %18 {offsets = [0, 0], sizes = [8, 32], strides = [1, 1]} : vector<9x32xf32> to vector<8x32xf32>
    %c0_11 = arith.constant 0 : index
    %c0_12 = arith.constant 0 : index
    %c0_13 = arith.constant 0 : index
    %20 = vector.load %arg5[%c0_11, %c0_12, %c0_13] : memref<1x8x32xf32, #tpu.memory_space<vmem>>, vector<1x8x32xf32>
    %21 = vector.shape_cast %20 : vector<1x8x32xf32> to vector<8x32xf32>
    %22 = vector.shape_cast %19 : vector<8x32xf32> to vector<1x8x32xf32>
    tpu.vector_store %arg5[%c0_11, %c0_12, %c0_13], %22 {strides = array<i32>} : memref<1x8x32xf32, #tpu.memory_space<vmem>>, vector<1x8x32xf32>,
    %c0_14 = arith.constant 0 : index
    %c0_15 = arith.constant 0 : index
    %23 = vector.load %arg7[%c0_14, %c0_15] : memref<1x32xf32, #tpu.memory_space<vmem>>, vector<1x32xf32>
    %cst_16 = arith.constant dense<0.000000e+00> : vector<32xf32>
    %24 = vector.multi_reduction <add>, %18, %cst_16 [0] : vector<9x32xf32> to vector<32xf32>
    %25 = vector.shape_cast %24 : vector<32xf32> to vector<1x32xf32>
    %26 = arith.addf %23, %25 : vector<1x32xf32>
    %c0_17 = arith.constant 0 : index
    %c0_18 = arith.constant 0 : index
    %27 = vector.load %arg7[%c0_17, %c0_18] : memref<1x32xf32, #tpu.memory_space<vmem>>, vector<1x32xf32>
    tpu.vector_store %arg7[%c0_17, %c0_18], %26 {strides = array<i32>} : memref<1x32xf32, #tpu.memory_space<vmem>>, vector<1x32xf32>,
    %c0_19 = arith.constant 0 : index
    %c0_20 = arith.constant 0 : index
    %28 = vector.load %arg8[%c0_19, %c0_20] : memref<1x32xf32, #tpu.memory_space<vmem>>, vector<1x32xf32>
    %29 = arith.mulf %18, %18 : vector<9x32xf32>
    %cst_21 = arith.constant dense<0.000000e+00> : vector<32xf32>
    %30 = vector.multi_reduction <add>, %29, %cst_21 [0] : vector<9x32xf32> to vector<32xf32>
    %31 = vector.shape_cast %30 : vector<32xf32> to vector<1x32xf32>
    %32 = arith.addf %28, %31 : vector<1x32xf32>
    %c0_22 = arith.constant 0 : index
    %c0_23 = arith.constant 0 : index
    %33 = vector.load %arg8[%c0_22, %c0_23] : memref<1x32xf32, #tpu.memory_space<vmem>>, vector<1x32xf32>
    tpu.vector_store %arg8[%c0_22, %c0_23], %32 {strides = array<i32>} : memref<1x32xf32, #tpu.memory_space<vmem>>, vector<1x32xf32>,
    %c1_i32 = arith.constant 1 : i32
    %34 = arith.cmpi eq, %arg0, %c1_i32 : i32
    %35 = arith.extui %34 : i1 to i32
    %c0_i32_24 = arith.constant 0 : i32
    %36 = arith.cmpi ne, %35, %c0_i32_24 : i32
    scf.if %36 {
      %c0_25 = arith.constant 0 : index
      %c0_26 = arith.constant 0 : index
      %37 = vector.load %arg7[%c0_25, %c0_26] : memref<1x32xf32, #tpu.memory_space<vmem>>, vector<1x32xf32>
      %cst_27 = arith.constant 0.055555556 : f32
      %38 = vector.broadcast %cst_27 : f32 to vector<1x32xf32>
      %39 = arith.mulf %37, %38 : vector<1x32xf32>
      %c0_28 = arith.constant 0 : index
      %c0_29 = arith.constant 0 : index
      %40 = vector.load %arg8[%c0_28, %c0_29] : memref<1x32xf32, #tpu.memory_space<vmem>>, vector<1x32xf32>
      %cst_30 = arith.constant 0.055555556 : f32
      %41 = vector.broadcast %cst_30 : f32 to vector<1x32xf32>
      %42 = arith.mulf %40, %41 : vector<1x32xf32>
      %43 = arith.mulf %39, %39 : vector<1x32xf32>
      %44 = arith.subf %42, %43 : vector<1x32xf32>
      %c0_31 = arith.constant 0 : index
      %c0_32 = arith.constant 0 : index
      %45 = vector.load %arg3[%c0_31, %c0_32] : memref<1x32xf32, #tpu.memory_space<vmem>>, vector<1x32xf32>
      %cst_33 = arith.constant 9.99999974E-6 : f32
      %46 = vector.broadcast %cst_33 : f32 to vector<1x32xf32>
      %47 = arith.addf %44, %46 : vector<1x32xf32>
      %48 = math.rsqrt %47 : vector<1x32xf32>
      %49 = arith.mulf %45, %48 : vector<1x32xf32>
      %c0_34 = arith.constant 0 : index
      %c0_35 = arith.constant 0 : index
      %50 = vector.load %arg4[%c0_34, %c0_35] : memref<1x32xf32, #tpu.memory_space<vmem>>, vector<1x32xf32>
      %51 = arith.mulf %39, %49 : vector<1x32xf32>
      %52 = arith.subf %50, %51 : vector<1x32xf32>
      %53 = tpu.concatenate %49, %52 in 0 : vector<1x32xf32>, vector<1x32xf32> -> vector<2x32xf32>
      %c0_36 = arith.constant 0 : index
      %c0_37 = arith.constant 0 : index
      %54 = vector.load %arg6[%c0_36, %c0_37] : memref<2x32xf32, #tpu.memory_space<vmem>>, vector<2x32xf32>
      tpu.vector_store %arg6[%c0_36, %c0_37], %53 {strides = array<i32>} : memref<2x32xf32, #tpu.memory_space<vmem>>, vector<2x32xf32>,
    } else {
    }
    return
  }
  func.func @transform_0(%arg0: i32) -> (i32, i32, i32) {
    %c0_i32 = arith.constant 0 : i32
    %c0_i32_0 = arith.constant 0 : i32
    %c0_i32_1 = arith.constant 0 : i32
    return %arg0, %c0_i32, %c0_i32_0 : i32, i32, i32
  }
  func.func @transform_1(%arg0: i32) -> (i32, i32, i32) {
    %c0_i32 = arith.constant 0 : i32
    %c0_i32_0 = arith.constant 0 : i32
    %c0_i32_1 = arith.constant 0 : i32
    %c0_i32_2 = arith.constant 0 : i32
    return %c0_i32, %c0_i32_0, %c0_i32_1 : i32, i32, i32
  }
  func.func @transform_2(%arg0: i32) -> (i32, i32) {
    %c0_i32 = arith.constant 0 : i32
    %c0_i32_0 = arith.constant 0 : i32
    %c0_i32_1 = arith.constant 0 : i32
    return %c0_i32, %c0_i32_0 : i32, i32
  }
  func.func @transform_3(%arg0: i32) -> (i32, i32) {
    %c0_i32 = arith.constant 0 : i32
    %c0_i32_0 = arith.constant 0 : i32
    %c0_i32_1 = arith.constant 0 : i32
    return %c0_i32, %c0_i32_0 : i32, i32
  }
  func.func @transform_4(%arg0: i32) -> (i32, i32, i32) {
    %c0_i32 = arith.constant 0 : i32
    %c0_i32_0 = arith.constant 0 : i32
    %c0_i32_1 = arith.constant 0 : i32
    return %arg0, %c0_i32, %c0_i32_0 : i32, i32, i32
  }
  func.func @transform_5(%arg0: i32) -> (i32, i32) {
    %c0_i32 = arith.constant 0 : i32
    %c0_i32_0 = arith.constant 0 : i32
    %c0_i32_1 = arith.constant 0 : i32
    return %c0_i32, %c0_i32_0 : i32, i32
  }
}

module attributes {stable_mosaic.version = 11 : i64} {
  func.func @_bn_apply_rows_kernel(%arg0: i32, %arg1: memref<16x32xf32, #tpu.memory_space<vmem>>, %arg2: memref<2x32xf32, #tpu.memory_space<vmem>>, %arg3: memref<16x32xf32, #tpu.memory_space<vmem>>) attributes {dimension_semantics = [#tpu.dimension_semantics<parallel>], iteration_bounds = array<i64: 1>, scalar_prefetch = 0 : i64, scratch_operands = 0 : i64, tpu.core_type = #tpu.core_type<tc>, window_params = [{transform_indices = @transform_0, window_bounds = array<i64: 16, 32>}, {pipeline_mode = #tpu.pipeline_mode<synchronous>, transform_indices = @transform_1, window_bounds = array<i64: 2, 32>}, {transform_indices = @transform_2, window_bounds = array<i64: 16, 32>}]} {
    %c0 = arith.constant 0 : index
    %c0_0 = arith.constant 0 : index
    %0 = vector.load %arg1[%c0, %c0_0] : memref<16x32xf32, #tpu.memory_space<vmem>>, vector<16x32xf32>
    %c0_1 = arith.constant 0 : index
    %c0_2 = arith.constant 0 : index
    %1 = vector.load %arg2[%c0_1, %c0_2] : memref<2x32xf32, #tpu.memory_space<vmem>>, vector<1x32xf32>
    %2 = vector.broadcast %1 : vector<1x32xf32> to vector<16x32xf32>
    %3 = arith.mulf %0, %2 : vector<16x32xf32>
    %c1 = arith.constant 1 : index
    %c0_3 = arith.constant 0 : index
    %4 = vector.load %arg2[%c1, %c0_3] : memref<2x32xf32, #tpu.memory_space<vmem>>, vector<1x32xf32>
    %5 = vector.broadcast %4 : vector<1x32xf32> to vector<16x32xf32>
    %6 = arith.addf %3, %5 : vector<16x32xf32>
    %c0_4 = arith.constant 0 : index
    %c0_5 = arith.constant 0 : index
    %7 = vector.load %arg3[%c0_4, %c0_5] : memref<16x32xf32, #tpu.memory_space<vmem>>, vector<16x32xf32>
    tpu.vector_store %arg3[%c0_4, %c0_5], %6 {strides = array<i32>} : memref<16x32xf32, #tpu.memory_space<vmem>>, vector<16x32xf32>,
    return
  }
  func.func @transform_0(%arg0: i32) -> (i32, i32) {
    %c0_i32 = arith.constant 0 : i32
    %c0_i32_0 = arith.constant 0 : i32
    return %arg0, %c0_i32 : i32, i32
  }
  func.func @transform_1(%arg0: i32) -> (i32, i32) {
    %c0_i32 = arith.constant 0 : i32
    %c0_i32_0 = arith.constant 0 : i32
    %c0_i32_1 = arith.constant 0 : i32
    return %c0_i32, %c0_i32_0 : i32, i32
  }
  func.func @transform_2(%arg0: i32) -> (i32, i32) {
    %c0_i32 = arith.constant 0 : i32
    %c0_i32_0 = arith.constant 0 : i32
    return %arg0, %c0_i32 : i32, i32
  }
}

module attributes {stable_mosaic.version = 11 : i64} {
  func.func @_conv_stats_kernel(%arg0: i32, %arg1: memref<1x10x32xf32, #tpu.memory_space<vmem>>, %arg2: memref<3x32x32xbf16, #tpu.memory_space<vmem>>, %arg3: memref<1x32xf32, #tpu.memory_space<vmem>>, %arg4: memref<1x32xf32, #tpu.memory_space<vmem>>, %arg5: memref<1x8x32xf32, #tpu.memory_space<vmem>>, %arg6: memref<2x32xf32, #tpu.memory_space<vmem>>, %arg7: memref<1x32xf32, #tpu.memory_space<vmem>>, %arg8: memref<1x32xf32, #tpu.memory_space<vmem>>) attributes {dimension_semantics = [#tpu.dimension_semantics<arbitrary>], iteration_bounds = array<i64: 2>, scalar_prefetch = 0 : i64, scratch_operands = 2 : i64, tpu.core_type = #tpu.core_type<tc>, window_params = [{transform_indices = @transform_0, window_bounds = array<i64: 1, 10, 32>}, {pipeline_mode = #tpu.pipeline_mode<synchronous>, transform_indices = @transform_1, window_bounds = array<i64: 3, 32, 32>}, {pipeline_mode = #tpu.pipeline_mode<synchronous>, transform_indices = @transform_2, window_bounds = array<i64: 1, 32>}, {pipeline_mode = #tpu.pipeline_mode<synchronous>, transform_indices = @transform_3, window_bounds = array<i64: 1, 32>}, {transform_indices = @transform_4, window_bounds = array<i64: 1, 8, 32>}, {pipeline_mode = #tpu.pipeline_mode<synchronous>, transform_indices = @transform_5, window_bounds = array<i64: 2, 32>}]} {
    %c0_i32 = arith.constant 0 : i32
    %0 = arith.cmpi eq, %arg0, %c0_i32 : i32
    %1 = arith.extui %0 : i1 to i32
    %c0_i32_0 = arith.constant 0 : i32
    %2 = arith.cmpi ne, %1, %c0_i32_0 : i32
    scf.if %2 {
      %cst_28 = arith.constant 0.000000e+00 : f32
      %41 = vector.broadcast %cst_28 : f32 to vector<1x32xf32>
      %c0_29 = arith.constant 0 : index
      %c0_30 = arith.constant 0 : index
      %42 = vector.load %arg7[%c0_29, %c0_30] : memref<1x32xf32, #tpu.memory_space<vmem>>, vector<1x32xf32>
      tpu.vector_store %arg7[%c0_29, %c0_30], %41 {strides = array<i32>} : memref<1x32xf32, #tpu.memory_space<vmem>>, vector<1x32xf32>,
      %cst_31 = arith.constant 0.000000e+00 : f32
      %43 = vector.broadcast %cst_31 : f32 to vector<1x32xf32>
      %c0_32 = arith.constant 0 : index
      %c0_33 = arith.constant 0 : index
      %44 = vector.load %arg8[%c0_32, %c0_33] : memref<1x32xf32, #tpu.memory_space<vmem>>, vector<1x32xf32>
      tpu.vector_store %arg8[%c0_32, %c0_33], %43 {strides = array<i32>} : memref<1x32xf32, #tpu.memory_space<vmem>>, vector<1x32xf32>,
    } else {
    }
    %c0 = arith.constant 0 : index
    %c0_1 = arith.constant 0 : index
    %c0_2 = arith.constant 0 : index
    %3 = vector.load %arg1[%c0, %c0_1, %c0_2] : memref<1x10x32xf32, #tpu.memory_space<vmem>>, vector<1x10x32xf32>
    %4 = vector.shape_cast %3 : vector<1x10x32xf32> to vector<10x32xf32>
    %5 = arith.truncf %4 : vector<10x32xf32> to vector<10x32xbf16>
    %cst = arith.constant 0.000000e+00 : f32
    %6 = vector.broadcast %cst : f32 to vector<8x32xf32>
    %7 = vector.extract_strided_slice %5 {offsets = [0, 0], sizes = [8, 32], strides = [1, 1]} : vector<10x32xbf16> to vector<8x32xbf16>
    %c0_3 = arith.constant 0 : index
    %c0_4 = arith.constant 0 : index
    %c0_5 = arith.constant 0 : index
    %8 = vector.load %arg2[%c0_3, %c0_4, %c0_5] : memref<3x32x32xbf16, #tpu.memory_space<vmem>>, vector<1x32x32xbf16>
    %9 = vector.shape_cast %8 : vector<1x32x32xbf16> to vector<32x32xbf16>
    %cst_6 = arith.constant dense<0.000000e+00> : vector<8x32xf32>
    %10 = tpu.matmul %7, %9, %cst_6 {dimension_numbers = #tpu.dot_dimension_numbers<[1], [0], [0], [1], [0, 0, 1, 1], [], []>} : vector<8x32xbf16>, vector<32x32xbf16>, vector<8x32xf32> -> vector<8x32xf32>
    %11 = arith.addf %6, %10 : vector<8x32xf32>
    %12 = vector.extract_strided_slice %5 {offsets = [1, 0], sizes = [8, 32], strides = [1, 1]} : vector<10x32xbf16> to vector<8x32xbf16>
    %c1 = arith.constant 1 : index
    %c0_7 = arith.constant 0 : index
    %c0_8 = arith.constant 0 : index
    %13 = vector.load %arg2[%c1, %c0_7, %c0_8] : memref<3x32x32xbf16, #tpu.memory_space<vmem>>, vector<1x32x32xbf16>
    %14 = vector.shape_cast %13 : vector<1x32x32xbf16> to vector<32x32xbf16>
    %cst_9 = arith.constant dense<0.000000e+00> : vector<8x32xf32>
    %15 = tpu.matmul %12, %14, %cst_9 {dimension_numbers = #tpu.dot_dimension_numbers<[1], [0], [0], [1], [0, 0, 1, 1], [], []>} : vector<8x32xbf16>, vector<32x32xbf16>, vector<8x32xf32> -> vector<8x32xf32>
    %16 = arith.addf %11, %15 : vector<8x32xf32>
    %17 = vector.extract_strided_slice %5 {offsets = [2, 0], sizes = [8, 32], strides = [1, 1]} : vector<10x32xbf16> to vector<8x32xbf16>
    %c2 = arith.constant 2 : index
    %c0_10 = arith.constant 0 : index
    %c0_11 = arith.constant 0 : index
    %18 = vector.load %arg2[%c2, %c0_10, %c0_11] : memref<3x32x32xbf16, #tpu.memory_space<vmem>>, vector<1x32x32xbf16>
    %19 = vector.shape_cast %18 : vector<1x32x32xbf16> to vector<32x32xbf16>
    %cst_12 = arith.constant dense<0.000000e+00> : vector<8x32xf32>
    %20 = tpu.matmul %17, %19, %cst_12 {dimension_numbers = #tpu.dot_dimension_numbers<[1], [0], [0], [1], [0, 0, 1, 1], [], []>} : vector<8x32xbf16>, vector<32x32xbf16>, vector<8x32xf32> -> vector<8x32xf32>
    %21 = arith.addf %16, %20 : vector<8x32xf32>
    %cst_13 = arith.constant 0.000000e+00 : f32
    %22 = vector.broadcast %cst_13 : f32 to vector<8x32xf32>
    %23 = arith.maximumf %21, %22 : vector<8x32xf32>
    %c0_14 = arith.constant 0 : index
    %c0_15 = arith.constant 0 : index
    %c0_16 = arith.constant 0 : index
    %24 = vector.load %arg5[%c0_14, %c0_15, %c0_16] : memref<1x8x32xf32, #tpu.memory_space<vmem>>, vector<1x8x32xf32>
    %25 = vector.shape_cast %24 : vector<1x8x32xf32> to vector<8x32xf32>
    %26 = vector.shape_cast %23 : vector<8x32xf32> to vector<1x8x32xf32>
    tpu.vector_store %arg5[%c0_14, %c0_15, %c0_16], %26 {strides = array<i32>} : memref<1x8x32xf32, #tpu.memory_space<vmem>>, vector<1x8x32xf32>,
    %c0_17 = arith.constant 0 : index
    %c0_18 = arith.constant 0 : index
    %27 = vector.load %arg7[%c0_17, %c0_18] : memref<1x32xf32, #tpu.memory_space<vmem>>, vector<1x32xf32>
    %cst_19 = arith.constant dense<0.000000e+00> : vector<32xf32>
    %28 = vector.multi_reduction <add>, %23, %cst_19 [0] : vector<8x32xf32> to vector<32xf32>
    %29 = vector.shape_cast %28 : vector<32xf32> to vector<1x32xf32>
    %30 = arith.addf %27, %29 : vector<1x32xf32>
    %c0_20 = arith.constant 0 : index
    %c0_21 = arith.constant 0 : index
    %31 = vector.load %arg7[%c0_20, %c0_21] : memref<1x32xf32, #tpu.memory_space<vmem>>, vector<1x32xf32>
    tpu.vector_store %arg7[%c0_20, %c0_21], %30 {strides = array<i32>} : memref<1x32xf32, #tpu.memory_space<vmem>>, vector<1x32xf32>,
    %c0_22 = arith.constant 0 : index
    %c0_23 = arith.constant 0 : index
    %32 = vector.load %arg8[%c0_22, %c0_23] : memref<1x32xf32, #tpu.memory_space<vmem>>, vector<1x32xf32>
    %33 = arith.mulf %23, %23 : vector<8x32xf32>
    %cst_24 = arith.constant dense<0.000000e+00> : vector<32xf32>
    %34 = vector.multi_reduction <add>, %33, %cst_24 [0] : vector<8x32xf32> to vector<32xf32>
    %35 = vector.shape_cast %34 : vector<32xf32> to vector<1x32xf32>
    %36 = arith.addf %32, %35 : vector<1x32xf32>
    %c0_25 = arith.constant 0 : index
    %c0_26 = arith.constant 0 : index
    %37 = vector.load %arg8[%c0_25, %c0_26] : memref<1x32xf32, #tpu.memory_space<vmem>>, vector<1x32xf32>
    tpu.vector_store %arg8[%c0_25, %c0_26], %36 {strides = array<i32>} : memref<1x32xf32, #tpu.memory_space<vmem>>, vector<1x32xf32>,
    %c1_i32 = arith.constant 1 : i32
    %38 = arith.cmpi eq, %arg0, %c1_i32 : i32
    %39 = arith.extui %38 : i1 to i32
    %c0_i32_27 = arith.constant 0 : i32
    %40 = arith.cmpi ne, %39, %c0_i32_27 : i32
    scf.if %40 {
      %c0_28 = arith.constant 0 : index
      %c0_29 = arith.constant 0 : index
      %41 = vector.load %arg7[%c0_28, %c0_29] : memref<1x32xf32, #tpu.memory_space<vmem>>, vector<1x32xf32>
      %cst_30 = arith.constant 6.250000e-02 : f32
      %42 = vector.broadcast %cst_30 : f32 to vector<1x32xf32>
      %43 = arith.mulf %41, %42 : vector<1x32xf32>
      %c0_31 = arith.constant 0 : index
      %c0_32 = arith.constant 0 : index
      %44 = vector.load %arg8[%c0_31, %c0_32] : memref<1x32xf32, #tpu.memory_space<vmem>>, vector<1x32xf32>
      %cst_33 = arith.constant 6.250000e-02 : f32
      %45 = vector.broadcast %cst_33 : f32 to vector<1x32xf32>
      %46 = arith.mulf %44, %45 : vector<1x32xf32>
      %47 = arith.mulf %43, %43 : vector<1x32xf32>
      %48 = arith.subf %46, %47 : vector<1x32xf32>
      %c0_34 = arith.constant 0 : index
      %c0_35 = arith.constant 0 : index
      %49 = vector.load %arg3[%c0_34, %c0_35] : memref<1x32xf32, #tpu.memory_space<vmem>>, vector<1x32xf32>
      %cst_36 = arith.constant 9.99999974E-6 : f32
      %50 = vector.broadcast %cst_36 : f32 to vector<1x32xf32>
      %51 = arith.addf %48, %50 : vector<1x32xf32>
      %52 = math.rsqrt %51 : vector<1x32xf32>
      %53 = arith.mulf %49, %52 : vector<1x32xf32>
      %c0_37 = arith.constant 0 : index
      %c0_38 = arith.constant 0 : index
      %54 = vector.load %arg4[%c0_37, %c0_38] : memref<1x32xf32, #tpu.memory_space<vmem>>, vector<1x32xf32>
      %55 = arith.mulf %43, %53 : vector<1x32xf32>
      %56 = arith.subf %54, %55 : vector<1x32xf32>
      %57 = tpu.concatenate %53, %56 in 0 : vector<1x32xf32>, vector<1x32xf32> -> vector<2x32xf32>
      %c0_39 = arith.constant 0 : index
      %c0_40 = arith.constant 0 : index
      %58 = vector.load %arg6[%c0_39, %c0_40] : memref<2x32xf32, #tpu.memory_space<vmem>>, vector<2x32xf32>
      tpu.vector_store %arg6[%c0_39, %c0_40], %57 {strides = array<i32>} : memref<2x32xf32, #tpu.memory_space<vmem>>, vector<2x32xf32>,
    } else {
    }
    return
  }
  func.func @transform_0(%arg0: i32) -> (i32, i32, i32) {
    %c0_i32 = arith.constant 0 : i32
    %c0_i32_0 = arith.constant 0 : i32
    %c0_i32_1 = arith.constant 0 : i32
    return %arg0, %c0_i32, %c0_i32_0 : i32, i32, i32
  }
  func.func @transform_1(%arg0: i32) -> (i32, i32, i32) {
    %c0_i32 = arith.constant 0 : i32
    %c0_i32_0 = arith.constant 0 : i32
    %c0_i32_1 = arith.constant 0 : i32
    %c0_i32_2 = arith.constant 0 : i32
    return %c0_i32, %c0_i32_0, %c0_i32_1 : i32, i32, i32
  }
  func.func @transform_2(%arg0: i32) -> (i32, i32) {
    %c0_i32 = arith.constant 0 : i32
    %c0_i32_0 = arith.constant 0 : i32
    %c0_i32_1 = arith.constant 0 : i32
    return %c0_i32, %c0_i32_0 : i32, i32
  }
  func.func @transform_3(%arg0: i32) -> (i32, i32) {
    %c0_i32 = arith.constant 0 : i32
    %c0_i32_0 = arith.constant 0 : i32
    %c0_i32_1 = arith.constant 0 : i32
    return %c0_i32, %c0_i32_0 : i32, i32
  }
  func.func @transform_4(%arg0: i32) -> (i32, i32, i32) {
    %c0_i32 = arith.constant 0 : i32
    %c0_i32_0 = arith.constant 0 : i32
    %c0_i32_1 = arith.constant 0 : i32
    return %arg0, %c0_i32, %c0_i32_0 : i32, i32, i32
  }
  func.func @transform_5(%arg0: i32) -> (i32, i32) {
    %c0_i32 = arith.constant 0 : i32
    %c0_i32_0 = arith.constant 0 : i32
    %c0_i32_1 = arith.constant 0 : i32
    return %c0_i32, %c0_i32_0 : i32, i32
  }
}

module attributes {stable_mosaic.version = 11 : i64} {
  func.func @_conv_stats_kernel(%arg0: i32, %arg1: memref<1x12x32xf32, #tpu.memory_space<vmem>>, %arg2: memref<4x32x32xbf16, #tpu.memory_space<vmem>>, %arg3: memref<1x32xf32, #tpu.memory_space<vmem>>, %arg4: memref<1x32xf32, #tpu.memory_space<vmem>>, %arg5: memref<1x8x32xf32, #tpu.memory_space<vmem>>, %arg6: memref<2x32xf32, #tpu.memory_space<vmem>>, %arg7: memref<1x32xf32, #tpu.memory_space<vmem>>, %arg8: memref<1x32xf32, #tpu.memory_space<vmem>>) attributes {dimension_semantics = [#tpu.dimension_semantics<arbitrary>], iteration_bounds = array<i64: 2>, scalar_prefetch = 0 : i64, scratch_operands = 2 : i64, tpu.core_type = #tpu.core_type<tc>, window_params = [{transform_indices = @transform_0, window_bounds = array<i64: 1, 12, 32>}, {pipeline_mode = #tpu.pipeline_mode<synchronous>, transform_indices = @transform_1, window_bounds = array<i64: 4, 32, 32>}, {pipeline_mode = #tpu.pipeline_mode<synchronous>, transform_indices = @transform_2, window_bounds = array<i64: 1, 32>}, {pipeline_mode = #tpu.pipeline_mode<synchronous>, transform_indices = @transform_3, window_bounds = array<i64: 1, 32>}, {transform_indices = @transform_4, window_bounds = array<i64: 1, 8, 32>}, {pipeline_mode = #tpu.pipeline_mode<synchronous>, transform_indices = @transform_5, window_bounds = array<i64: 2, 32>}]} {
    %c0_i32 = arith.constant 0 : i32
    %0 = arith.cmpi eq, %arg0, %c0_i32 : i32
    %1 = arith.extui %0 : i1 to i32
    %c0_i32_0 = arith.constant 0 : i32
    %2 = arith.cmpi ne, %1, %c0_i32_0 : i32
    scf.if %2 {
      %cst_31 = arith.constant 0.000000e+00 : f32
      %47 = vector.broadcast %cst_31 : f32 to vector<1x32xf32>
      %c0_32 = arith.constant 0 : index
      %c0_33 = arith.constant 0 : index
      %48 = vector.load %arg7[%c0_32, %c0_33] : memref<1x32xf32, #tpu.memory_space<vmem>>, vector<1x32xf32>
      tpu.vector_store %arg7[%c0_32, %c0_33], %47 {strides = array<i32>} : memref<1x32xf32, #tpu.memory_space<vmem>>, vector<1x32xf32>,
      %cst_34 = arith.constant 0.000000e+00 : f32
      %49 = vector.broadcast %cst_34 : f32 to vector<1x32xf32>
      %c0_35 = arith.constant 0 : index
      %c0_36 = arith.constant 0 : index
      %50 = vector.load %arg8[%c0_35, %c0_36] : memref<1x32xf32, #tpu.memory_space<vmem>>, vector<1x32xf32>
      tpu.vector_store %arg8[%c0_35, %c0_36], %49 {strides = array<i32>} : memref<1x32xf32, #tpu.memory_space<vmem>>, vector<1x32xf32>,
    } else {
    }
    %c0 = arith.constant 0 : index
    %c0_1 = arith.constant 0 : index
    %c0_2 = arith.constant 0 : index
    %3 = vector.load %arg1[%c0, %c0_1, %c0_2] : memref<1x12x32xf32, #tpu.memory_space<vmem>>, vector<1x12x32xf32>
    %4 = vector.shape_cast %3 : vector<1x12x32xf32> to vector<12x32xf32>
    %5 = arith.truncf %4 : vector<12x32xf32> to vector<12x32xbf16>
    %cst = arith.constant 0.000000e+00 : f32
    %6 = vector.broadcast %cst : f32 to vector<9x32xf32>
    %7 = vector.extract_strided_slice %5 {offsets = [0, 0], sizes = [9, 32], strides = [1, 1]} : vector<12x32xbf16> to vector<9x32xbf16>
    %c0_3 = arith.constant 0 : index
    %c0_4 = arith.constant 0 : index
    %c0_5 = arith.constant 0 : index
    %8 = vector.load %arg2[%c0_3, %c0_4, %c0_5] : memref<4x32x32xbf16, #tpu.memory_space<vmem>>, vector<1x32x32xbf16>
    %9 = vector.shape_cast %8 : vector<1x32x32xbf16> to vector<32x32xbf16>
    %cst_6 = arith.constant dense<0.000000e+00> : vector<9x32xf32>
    %10 = tpu.matmul %7, %9, %cst_6 {dimension_numbers = #tpu.dot_dimension_numbers<[1], [0], [0], [1], [0, 0, 1, 1], [], []>} : vector<9x32xbf16>, vector<32x32xbf16>, vector<9x32xf32> -> vector<9x32xf32>
    %11 = arith.addf %6, %10 : vector<9x32xf32>
    %12 = vector.extract_strided_slice %5 {offsets = [1, 0], sizes = [9, 32], strides = [1, 1]} : vector<12x32xbf16> to vector<9x32xbf16>
    %c1 = arith.constant 1 : index
    %c0_7 = arith.constant 0 : index
    %c0_8 = arith.constant 0 : index
    %13 = vector.load %arg2[%c1, %c0_7, %c0_8] : memref<4x32x32xbf16, #tpu.memory_space<vmem>>, vector<1x32x32xbf16>
    %14 = vector.shape_cast %13 : vector<1x32x32xbf16> to vector<32x32xbf16>
    %cst_9 = arith.constant dense<0.000000e+00> : vector<9x32xf32>
    %15 = tpu.matmul %12, %14, %cst_9 {dimension_numbers = #tpu.dot_dimension_numbers<[1], [0], [0], [1], [0, 0, 1, 1], [], []>} : vector<9x32xbf16>, vector<32x32xbf16>, vector<9x32xf32> -> vector<9x32xf32>
    %16 = arith.addf %11, %15 : vector<9x32xf32>
    %17 = vector.extract_strided_slice %5 {offsets = [2, 0], sizes = [9, 32], strides = [1, 1]} : vector<12x32xbf16> to vector<9x32xbf16>
    %c2 = arith.constant 2 : index
    %c0_10 = arith.constant 0 : index
    %c0_11 = arith.constant 0 : index
    %18 = vector.load %arg2[%c2, %c0_10, %c0_11] : memref<4x32x32xbf16, #tpu.memory_space<vmem>>, vector<1x32x32xbf16>
    %19 = vector.shape_cast %18 : vector<1x32x32xbf16> to vector<32x32xbf16>
    %cst_12 = arith.constant dense<0.000000e+00> : vector<9x32xf32>
    %20 = tpu.matmul %17, %19, %cst_12 {dimension_numbers = #tpu.dot_dimension_numbers<[1], [0], [0], [1], [0, 0, 1, 1], [], []>} : vector<9x32xbf16>, vector<32x32xbf16>, vector<9x32xf32> -> vector<9x32xf32>
    %21 = arith.addf %16, %20 : vector<9x32xf32>
    %22 = vector.extract_strided_slice %5 {offsets = [3, 0], sizes = [9, 32], strides = [1, 1]} : vector<12x32xbf16> to vector<9x32xbf16>
    %c3 = arith.constant 3 : index
    %c0_13 = arith.constant 0 : index
    %c0_14 = arith.constant 0 : index
    %23 = vector.load %arg2[%c3, %c0_13, %c0_14] : memref<4x32x32xbf16, #tpu.memory_space<vmem>>, vector<1x32x32xbf16>
    %24 = vector.shape_cast %23 : vector<1x32x32xbf16> to vector<32x32xbf16>
    %cst_15 = arith.constant dense<0.000000e+00> : vector<9x32xf32>
    %25 = tpu.matmul %22, %24, %cst_15 {dimension_numbers = #tpu.dot_dimension_numbers<[1], [0], [0], [1], [0, 0, 1, 1], [], []>} : vector<9x32xbf16>, vector<32x32xbf16>, vector<9x32xf32> -> vector<9x32xf32>
    %26 = arith.addf %21, %25 : vector<9x32xf32>
    %cst_16 = arith.constant 0.000000e+00 : f32
    %27 = vector.broadcast %cst_16 : f32 to vector<9x32xf32>
    %28 = arith.maximumf %26, %27 : vector<9x32xf32>
    %29 = vector.extract_strided_slice %28 {offsets = [0, 0], sizes = [8, 32], strides = [1, 1]} : vector<9x32xf32> to vector<8x32xf32>
    %c0_17 = arith.constant 0 : index
    %c0_18 = arith.constant 0 : index
    %c0_19 = arith.constant 0 : index
    %30 = vector.load %arg5[%c0_17, %c0_18, %c0_19] : memref<1x8x32xf32, #tpu.memory_space<vmem>>, vector<1x8x32xf32>
    %31 = vector.shape_cast %30 : vector<1x8x32xf32> to vector<8x32xf32>
    %32 = vector.shape_cast %29 : vector<8x32xf32> to vector<1x8x32xf32>
    tpu.vector_store %arg5[%c0_17, %c0_18, %c0_19], %32 {strides = array<i32>} : memref<1x8x32xf32, #tpu.memory_space<vmem>>, vector<1x8x32xf32>,
    %c0_20 = arith.constant 0 : index
    %c0_21 = arith.constant 0 : index
    %33 = vector.load %arg7[%c0_20, %c0_21] : memref<1x32xf32, #tpu.memory_space<vmem>>, vector<1x32xf32>
    %cst_22 = arith.constant dense<0.000000e+00> : vector<32xf32>
    %34 = vector.multi_reduction <add>, %28, %cst_22 [0] : vector<9x32xf32> to vector<32xf32>
    %35 = vector.shape_cast %34 : vector<32xf32> to vector<1x32xf32>
    %36 = arith.addf %33, %35 : vector<1x32xf32>
    %c0_23 = arith.constant 0 : index
    %c0_24 = arith.constant 0 : index
    %37 = vector.load %arg7[%c0_23, %c0_24] : memref<1x32xf32, #tpu.memory_space<vmem>>, vector<1x32xf32>
    tpu.vector_store %arg7[%c0_23, %c0_24], %36 {strides = array<i32>} : memref<1x32xf32, #tpu.memory_space<vmem>>, vector<1x32xf32>,
    %c0_25 = arith.constant 0 : index
    %c0_26 = arith.constant 0 : index
    %38 = vector.load %arg8[%c0_25, %c0_26] : memref<1x32xf32, #tpu.memory_space<vmem>>, vector<1x32xf32>
    %39 = arith.mulf %28, %28 : vector<9x32xf32>
    %cst_27 = arith.constant dense<0.000000e+00> : vector<32xf32>
    %40 = vector.multi_reduction <add>, %39, %cst_27 [0] : vector<9x32xf32> to vector<32xf32>
    %41 = vector.shape_cast %40 : vector<32xf32> to vector<1x32xf32>
    %42 = arith.addf %38, %41 : vector<1x32xf32>
    %c0_28 = arith.constant 0 : index
    %c0_29 = arith.constant 0 : index
    %43 = vector.load %arg8[%c0_28, %c0_29] : memref<1x32xf32, #tpu.memory_space<vmem>>, vector<1x32xf32>
    tpu.vector_store %arg8[%c0_28, %c0_29], %42 {strides = array<i32>} : memref<1x32xf32, #tpu.memory_space<vmem>>, vector<1x32xf32>,
    %c1_i32 = arith.constant 1 : i32
    %44 = arith.cmpi eq, %arg0, %c1_i32 : i32
    %45 = arith.extui %44 : i1 to i32
    %c0_i32_30 = arith.constant 0 : i32
    %46 = arith.cmpi ne, %45, %c0_i32_30 : i32
    scf.if %46 {
      %c0_31 = arith.constant 0 : index
      %c0_32 = arith.constant 0 : index
      %47 = vector.load %arg7[%c0_31, %c0_32] : memref<1x32xf32, #tpu.memory_space<vmem>>, vector<1x32xf32>
      %cst_33 = arith.constant 0.055555556 : f32
      %48 = vector.broadcast %cst_33 : f32 to vector<1x32xf32>
      %49 = arith.mulf %47, %48 : vector<1x32xf32>
      %c0_34 = arith.constant 0 : index
      %c0_35 = arith.constant 0 : index
      %50 = vector.load %arg8[%c0_34, %c0_35] : memref<1x32xf32, #tpu.memory_space<vmem>>, vector<1x32xf32>
      %cst_36 = arith.constant 0.055555556 : f32
      %51 = vector.broadcast %cst_36 : f32 to vector<1x32xf32>
      %52 = arith.mulf %50, %51 : vector<1x32xf32>
      %53 = arith.mulf %49, %49 : vector<1x32xf32>
      %54 = arith.subf %52, %53 : vector<1x32xf32>
      %c0_37 = arith.constant 0 : index
      %c0_38 = arith.constant 0 : index
      %55 = vector.load %arg3[%c0_37, %c0_38] : memref<1x32xf32, #tpu.memory_space<vmem>>, vector<1x32xf32>
      %cst_39 = arith.constant 9.99999974E-6 : f32
      %56 = vector.broadcast %cst_39 : f32 to vector<1x32xf32>
      %57 = arith.addf %54, %56 : vector<1x32xf32>
      %58 = math.rsqrt %57 : vector<1x32xf32>
      %59 = arith.mulf %55, %58 : vector<1x32xf32>
      %c0_40 = arith.constant 0 : index
      %c0_41 = arith.constant 0 : index
      %60 = vector.load %arg4[%c0_40, %c0_41] : memref<1x32xf32, #tpu.memory_space<vmem>>, vector<1x32xf32>
      %61 = arith.mulf %49, %59 : vector<1x32xf32>
      %62 = arith.subf %60, %61 : vector<1x32xf32>
      %63 = tpu.concatenate %59, %62 in 0 : vector<1x32xf32>, vector<1x32xf32> -> vector<2x32xf32>
      %c0_42 = arith.constant 0 : index
      %c0_43 = arith.constant 0 : index
      %64 = vector.load %arg6[%c0_42, %c0_43] : memref<2x32xf32, #tpu.memory_space<vmem>>, vector<2x32xf32>
      tpu.vector_store %arg6[%c0_42, %c0_43], %63 {strides = array<i32>} : memref<2x32xf32, #tpu.memory_space<vmem>>, vector<2x32xf32>,
    } else {
    }
    return
  }
  func.func @transform_0(%arg0: i32) -> (i32, i32, i32) {
    %c0_i32 = arith.constant 0 : i32
    %c0_i32_0 = arith.constant 0 : i32
    %c0_i32_1 = arith.constant 0 : i32
    return %arg0, %c0_i32, %c0_i32_0 : i32, i32, i32
  }
  func.func @transform_1(%arg0: i32) -> (i32, i32, i32) {
    %c0_i32 = arith.constant 0 : i32
    %c0_i32_0 = arith.constant 0 : i32
    %c0_i32_1 = arith.constant 0 : i32
    %c0_i32_2 = arith.constant 0 : i32
    return %c0_i32, %c0_i32_0, %c0_i32_1 : i32, i32, i32
  }
  func.func @transform_2(%arg0: i32) -> (i32, i32) {
    %c0_i32 = arith.constant 0 : i32
    %c0_i32_0 = arith.constant 0 : i32
    %c0_i32_1 = arith.constant 0 : i32
    return %c0_i32, %c0_i32_0 : i32, i32
  }
  func.func @transform_3(%arg0: i32) -> (i32, i32) {
    %c0_i32 = arith.constant 0 : i32
    %c0_i32_0 = arith.constant 0 : i32
    %c0_i32_1 = arith.constant 0 : i32
    return %c0_i32, %c0_i32_0 : i32, i32
  }
  func.func @transform_4(%arg0: i32) -> (i32, i32, i32) {
    %c0_i32 = arith.constant 0 : i32
    %c0_i32_0 = arith.constant 0 : i32
    %c0_i32_1 = arith.constant 0 : i32
    return %arg0, %c0_i32, %c0_i32_0 : i32, i32, i32
  }
  func.func @transform_5(%arg0: i32) -> (i32, i32) {
    %c0_i32 = arith.constant 0 : i32
    %c0_i32_0 = arith.constant 0 : i32
    %c0_i32_1 = arith.constant 0 : i32
    return %c0_i32, %c0_i32_0 : i32, i32
  }
}

module attributes {stable_mosaic.version = 11 : i64} {
  func.func @_conv_stats_kernel(%arg0: i32, %arg1: memref<1x8x32xf32, #tpu.memory_space<vmem>>, %arg2: memref<1x32x32xbf16, #tpu.memory_space<vmem>>, %arg3: memref<1x32xf32, #tpu.memory_space<vmem>>, %arg4: memref<1x32xf32, #tpu.memory_space<vmem>>, %arg5: memref<1x8x32xf32, #tpu.memory_space<vmem>>, %arg6: memref<2x32xf32, #tpu.memory_space<vmem>>, %arg7: memref<1x32xf32, #tpu.memory_space<vmem>>, %arg8: memref<1x32xf32, #tpu.memory_space<vmem>>) attributes {dimension_semantics = [#tpu.dimension_semantics<arbitrary>], iteration_bounds = array<i64: 2>, scalar_prefetch = 0 : i64, scratch_operands = 2 : i64, tpu.core_type = #tpu.core_type<tc>, window_params = [{transform_indices = @transform_0, window_bounds = array<i64: 1, 8, 32>}, {pipeline_mode = #tpu.pipeline_mode<synchronous>, transform_indices = @transform_1, window_bounds = array<i64: 1, 32, 32>}, {pipeline_mode = #tpu.pipeline_mode<synchronous>, transform_indices = @transform_2, window_bounds = array<i64: 1, 32>}, {pipeline_mode = #tpu.pipeline_mode<synchronous>, transform_indices = @transform_3, window_bounds = array<i64: 1, 32>}, {transform_indices = @transform_4, window_bounds = array<i64: 1, 8, 32>}, {pipeline_mode = #tpu.pipeline_mode<synchronous>, transform_indices = @transform_5, window_bounds = array<i64: 2, 32>}]} {
    %c0_i32 = arith.constant 0 : i32
    %0 = arith.cmpi eq, %arg0, %c0_i32 : i32
    %1 = arith.extui %0 : i1 to i32
    %c0_i32_0 = arith.constant 0 : i32
    %2 = arith.cmpi ne, %1, %c0_i32_0 : i32
    scf.if %2 {
      %cst_22 = arith.constant 0.000000e+00 : f32
      %30 = vector.broadcast %cst_22 : f32 to vector<1x32xf32>
      %c0_23 = arith.constant 0 : index
      %c0_24 = arith.constant 0 : index
      %31 = vector.load %arg7[%c0_23, %c0_24] : memref<1x32xf32, #tpu.memory_space<vmem>>, vector<1x32xf32>
      tpu.vector_store %arg7[%c0_23, %c0_24], %30 {strides = array<i32>} : memref<1x32xf32, #tpu.memory_space<vmem>>, vector<1x32xf32>,
      %cst_25 = arith.constant 0.000000e+00 : f32
      %32 = vector.broadcast %cst_25 : f32 to vector<1x32xf32>
      %c0_26 = arith.constant 0 : index
      %c0_27 = arith.constant 0 : index
      %33 = vector.load %arg8[%c0_26, %c0_27] : memref<1x32xf32, #tpu.memory_space<vmem>>, vector<1x32xf32>
      tpu.vector_store %arg8[%c0_26, %c0_27], %32 {strides = array<i32>} : memref<1x32xf32, #tpu.memory_space<vmem>>, vector<1x32xf32>,
    } else {
    }
    %c0 = arith.constant 0 : index
    %c0_1 = arith.constant 0 : index
    %c0_2 = arith.constant 0 : index
    %3 = vector.load %arg1[%c0, %c0_1, %c0_2] : memref<1x8x32xf32, #tpu.memory_space<vmem>>, vector<1x8x32xf32>
    %4 = vector.shape_cast %3 : vector<1x8x32xf32> to vector<8x32xf32>
    %5 = arith.truncf %4 : vector<8x32xf32> to vector<8x32xbf16>
    %cst = arith.constant 0.000000e+00 : f32
    %6 = vector.broadcast %cst : f32 to vector<8x32xf32>
    %c0_3 = arith.constant 0 : index
    %c0_4 = arith.constant 0 : index
    %c0_5 = arith.constant 0 : index
    %7 = vector.load %arg2[%c0_3, %c0_4, %c0_5] : memref<1x32x32xbf16, #tpu.memory_space<vmem>>, vector<1x32x32xbf16>
    %8 = vector.shape_cast %7 : vector<1x32x32xbf16> to vector<32x32xbf16>
    %cst_6 = arith.constant dense<0.000000e+00> : vector<8x32xf32>
    %9 = tpu.matmul %5, %8, %cst_6 {dimension_numbers = #tpu.dot_dimension_numbers<[1], [0], [0], [1], [0, 0, 1, 1], [], []>} : vector<8x32xbf16>, vector<32x32xbf16>, vector<8x32xf32> -> vector<8x32xf32>
    %10 = arith.addf %6, %9 : vector<8x32xf32>
    %cst_7 = arith.constant 0.000000e+00 : f32
    %11 = vector.broadcast %cst_7 : f32 to vector<8x32xf32>
    %12 = arith.maximumf %10, %11 : vector<8x32xf32>
    %c0_8 = arith.constant 0 : index
    %c0_9 = arith.constant 0 : index
    %c0_10 = arith.constant 0 : index
    %13 = vector.load %arg5[%c0_8, %c0_9, %c0_10] : memref<1x8x32xf32, #tpu.memory_space<vmem>>, vector<1x8x32xf32>
    %14 = vector.shape_cast %13 : vector<1x8x32xf32> to vector<8x32xf32>
    %15 = vector.shape_cast %12 : vector<8x32xf32> to vector<1x8x32xf32>
    tpu.vector_store %arg5[%c0_8, %c0_9, %c0_10], %15 {strides = array<i32>} : memref<1x8x32xf32, #tpu.memory_space<vmem>>, vector<1x8x32xf32>,
    %c0_11 = arith.constant 0 : index
    %c0_12 = arith.constant 0 : index
    %16 = vector.load %arg7[%c0_11, %c0_12] : memref<1x32xf32, #tpu.memory_space<vmem>>, vector<1x32xf32>
    %cst_13 = arith.constant dense<0.000000e+00> : vector<32xf32>
    %17 = vector.multi_reduction <add>, %12, %cst_13 [0] : vector<8x32xf32> to vector<32xf32>
    %18 = vector.shape_cast %17 : vector<32xf32> to vector<1x32xf32>
    %19 = arith.addf %16, %18 : vector<1x32xf32>
    %c0_14 = arith.constant 0 : index
    %c0_15 = arith.constant 0 : index
    %20 = vector.load %arg7[%c0_14, %c0_15] : memref<1x32xf32, #tpu.memory_space<vmem>>, vector<1x32xf32>
    tpu.vector_store %arg7[%c0_14, %c0_15], %19 {strides = array<i32>} : memref<1x32xf32, #tpu.memory_space<vmem>>, vector<1x32xf32>,
    %c0_16 = arith.constant 0 : index
    %c0_17 = arith.constant 0 : index
    %21 = vector.load %arg8[%c0_16, %c0_17] : memref<1x32xf32, #tpu.memory_space<vmem>>, vector<1x32xf32>
    %22 = arith.mulf %12, %12 : vector<8x32xf32>
    %cst_18 = arith.constant dense<0.000000e+00> : vector<32xf32>
    %23 = vector.multi_reduction <add>, %22, %cst_18 [0] : vector<8x32xf32> to vector<32xf32>
    %24 = vector.shape_cast %23 : vector<32xf32> to vector<1x32xf32>
    %25 = arith.addf %21, %24 : vector<1x32xf32>
    %c0_19 = arith.constant 0 : index
    %c0_20 = arith.constant 0 : index
    %26 = vector.load %arg8[%c0_19, %c0_20] : memref<1x32xf32, #tpu.memory_space<vmem>>, vector<1x32xf32>
    tpu.vector_store %arg8[%c0_19, %c0_20], %25 {strides = array<i32>} : memref<1x32xf32, #tpu.memory_space<vmem>>, vector<1x32xf32>,
    %c1_i32 = arith.constant 1 : i32
    %27 = arith.cmpi eq, %arg0, %c1_i32 : i32
    %28 = arith.extui %27 : i1 to i32
    %c0_i32_21 = arith.constant 0 : i32
    %29 = arith.cmpi ne, %28, %c0_i32_21 : i32
    scf.if %29 {
      %c0_22 = arith.constant 0 : index
      %c0_23 = arith.constant 0 : index
      %30 = vector.load %arg7[%c0_22, %c0_23] : memref<1x32xf32, #tpu.memory_space<vmem>>, vector<1x32xf32>
      %cst_24 = arith.constant 6.250000e-02 : f32
      %31 = vector.broadcast %cst_24 : f32 to vector<1x32xf32>
      %32 = arith.mulf %30, %31 : vector<1x32xf32>
      %c0_25 = arith.constant 0 : index
      %c0_26 = arith.constant 0 : index
      %33 = vector.load %arg8[%c0_25, %c0_26] : memref<1x32xf32, #tpu.memory_space<vmem>>, vector<1x32xf32>
      %cst_27 = arith.constant 6.250000e-02 : f32
      %34 = vector.broadcast %cst_27 : f32 to vector<1x32xf32>
      %35 = arith.mulf %33, %34 : vector<1x32xf32>
      %36 = arith.mulf %32, %32 : vector<1x32xf32>
      %37 = arith.subf %35, %36 : vector<1x32xf32>
      %c0_28 = arith.constant 0 : index
      %c0_29 = arith.constant 0 : index
      %38 = vector.load %arg3[%c0_28, %c0_29] : memref<1x32xf32, #tpu.memory_space<vmem>>, vector<1x32xf32>
      %cst_30 = arith.constant 9.99999974E-6 : f32
      %39 = vector.broadcast %cst_30 : f32 to vector<1x32xf32>
      %40 = arith.addf %37, %39 : vector<1x32xf32>
      %41 = math.rsqrt %40 : vector<1x32xf32>
      %42 = arith.mulf %38, %41 : vector<1x32xf32>
      %c0_31 = arith.constant 0 : index
      %c0_32 = arith.constant 0 : index
      %43 = vector.load %arg4[%c0_31, %c0_32] : memref<1x32xf32, #tpu.memory_space<vmem>>, vector<1x32xf32>
      %44 = arith.mulf %32, %42 : vector<1x32xf32>
      %45 = arith.subf %43, %44 : vector<1x32xf32>
      %46 = tpu.concatenate %42, %45 in 0 : vector<1x32xf32>, vector<1x32xf32> -> vector<2x32xf32>
      %c0_33 = arith.constant 0 : index
      %c0_34 = arith.constant 0 : index
      %47 = vector.load %arg6[%c0_33, %c0_34] : memref<2x32xf32, #tpu.memory_space<vmem>>, vector<2x32xf32>
      tpu.vector_store %arg6[%c0_33, %c0_34], %46 {strides = array<i32>} : memref<2x32xf32, #tpu.memory_space<vmem>>, vector<2x32xf32>,
    } else {
    }
    return
  }
  func.func @transform_0(%arg0: i32) -> (i32, i32, i32) {
    %c0_i32 = arith.constant 0 : i32
    %c0_i32_0 = arith.constant 0 : i32
    %c0_i32_1 = arith.constant 0 : i32
    return %arg0, %c0_i32, %c0_i32_0 : i32, i32, i32
  }
  func.func @transform_1(%arg0: i32) -> (i32, i32, i32) {
    %c0_i32 = arith.constant 0 : i32
    %c0_i32_0 = arith.constant 0 : i32
    %c0_i32_1 = arith.constant 0 : i32
    %c0_i32_2 = arith.constant 0 : i32
    return %c0_i32, %c0_i32_0, %c0_i32_1 : i32, i32, i32
  }
  func.func @transform_2(%arg0: i32) -> (i32, i32) {
    %c0_i32 = arith.constant 0 : i32
    %c0_i32_0 = arith.constant 0 : i32
    %c0_i32_1 = arith.constant 0 : i32
    return %c0_i32, %c0_i32_0 : i32, i32
  }
  func.func @transform_3(%arg0: i32) -> (i32, i32) {
    %c0_i32 = arith.constant 0 : i32
    %c0_i32_0 = arith.constant 0 : i32
    %c0_i32_1 = arith.constant 0 : i32
    return %c0_i32, %c0_i32_0 : i32, i32
  }
  func.func @transform_4(%arg0: i32) -> (i32, i32, i32) {
    %c0_i32 = arith.constant 0 : i32
    %c0_i32_0 = arith.constant 0 : i32
    %c0_i32_1 = arith.constant 0 : i32
    return %arg0, %c0_i32, %c0_i32_0 : i32, i32, i32
  }
  func.func @transform_5(%arg0: i32) -> (i32, i32) {
    %c0_i32 = arith.constant 0 : i32
    %c0_i32_0 = arith.constant 0 : i32
    %c0_i32_1 = arith.constant 0 : i32
    return %c0_i32, %c0_i32_0 : i32, i32
  }
}

module attributes {stable_mosaic.version = 11 : i64} {
  func.func @_conv_stats_kernel(%arg0: i32, %arg1: memref<1x10x128xf32, #tpu.memory_space<vmem>>, %arg2: memref<3x128x32xbf16, #tpu.memory_space<vmem>>, %arg3: memref<1x32xf32, #tpu.memory_space<vmem>>, %arg4: memref<1x32xf32, #tpu.memory_space<vmem>>, %arg5: memref<1x8x32xf32, #tpu.memory_space<vmem>>, %arg6: memref<2x32xf32, #tpu.memory_space<vmem>>, %arg7: memref<1x32xf32, #tpu.memory_space<vmem>>, %arg8: memref<1x32xf32, #tpu.memory_space<vmem>>) attributes {dimension_semantics = [#tpu.dimension_semantics<arbitrary>], iteration_bounds = array<i64: 2>, scalar_prefetch = 0 : i64, scratch_operands = 2 : i64, tpu.core_type = #tpu.core_type<tc>, window_params = [{transform_indices = @transform_0, window_bounds = array<i64: 1, 10, 128>}, {pipeline_mode = #tpu.pipeline_mode<synchronous>, transform_indices = @transform_1, window_bounds = array<i64: 3, 128, 32>}, {pipeline_mode = #tpu.pipeline_mode<synchronous>, transform_indices = @transform_2, window_bounds = array<i64: 1, 32>}, {pipeline_mode = #tpu.pipeline_mode<synchronous>, transform_indices = @transform_3, window_bounds = array<i64: 1, 32>}, {transform_indices = @transform_4, window_bounds = array<i64: 1, 8, 32>}, {pipeline_mode = #tpu.pipeline_mode<synchronous>, transform_indices = @transform_5, window_bounds = array<i64: 2, 32>}]} {
    %c0_i32 = arith.constant 0 : i32
    %0 = arith.cmpi eq, %arg0, %c0_i32 : i32
    %1 = arith.extui %0 : i1 to i32
    %c0_i32_0 = arith.constant 0 : i32
    %2 = arith.cmpi ne, %1, %c0_i32_0 : i32
    scf.if %2 {
      %cst_28 = arith.constant 0.000000e+00 : f32
      %41 = vector.broadcast %cst_28 : f32 to vector<1x32xf32>
      %c0_29 = arith.constant 0 : index
      %c0_30 = arith.constant 0 : index
      %42 = vector.load %arg7[%c0_29, %c0_30] : memref<1x32xf32, #tpu.memory_space<vmem>>, vector<1x32xf32>
      tpu.vector_store %arg7[%c0_29, %c0_30], %41 {strides = array<i32>} : memref<1x32xf32, #tpu.memory_space<vmem>>, vector<1x32xf32>,
      %cst_31 = arith.constant 0.000000e+00 : f32
      %43 = vector.broadcast %cst_31 : f32 to vector<1x32xf32>
      %c0_32 = arith.constant 0 : index
      %c0_33 = arith.constant 0 : index
      %44 = vector.load %arg8[%c0_32, %c0_33] : memref<1x32xf32, #tpu.memory_space<vmem>>, vector<1x32xf32>
      tpu.vector_store %arg8[%c0_32, %c0_33], %43 {strides = array<i32>} : memref<1x32xf32, #tpu.memory_space<vmem>>, vector<1x32xf32>,
    } else {
    }
    %c0 = arith.constant 0 : index
    %c0_1 = arith.constant 0 : index
    %c0_2 = arith.constant 0 : index
    %3 = vector.load %arg1[%c0, %c0_1, %c0_2] : memref<1x10x128xf32, #tpu.memory_space<vmem>>, vector<1x10x128xf32>
    %4 = vector.shape_cast %3 : vector<1x10x128xf32> to vector<10x128xf32>
    %5 = arith.truncf %4 : vector<10x128xf32> to vector<10x128xbf16>
    %cst = arith.constant 0.000000e+00 : f32
    %6 = vector.broadcast %cst : f32 to vector<8x32xf32>
    %7 = vector.extract_strided_slice %5 {offsets = [0, 0], sizes = [8, 128], strides = [1, 1]} : vector<10x128xbf16> to vector<8x128xbf16>
    %c0_3 = arith.constant 0 : index
    %c0_4 = arith.constant 0 : index
    %c0_5 = arith.constant 0 : index
    %8 = vector.load %arg2[%c0_3, %c0_4, %c0_5] : memref<3x128x32xbf16, #tpu.memory_space<vmem>>, vector<1x128x32xbf16>
    %9 = vector.shape_cast %8 : vector<1x128x32xbf16> to vector<128x32xbf16>
    %cst_6 = arith.constant dense<0.000000e+00> : vector<8x32xf32>
    %10 = tpu.matmul %7, %9, %cst_6 {dimension_numbers = #tpu.dot_dimension_numbers<[1], [0], [0], [1], [0, 0, 1, 1], [], []>} : vector<8x128xbf16>, vector<128x32xbf16>, vector<8x32xf32> -> vector<8x32xf32>
    %11 = arith.addf %6, %10 : vector<8x32xf32>
    %12 = vector.extract_strided_slice %5 {offsets = [1, 0], sizes = [8, 128], strides = [1, 1]} : vector<10x128xbf16> to vector<8x128xbf16>
    %c1 = arith.constant 1 : index
    %c0_7 = arith.constant 0 : index
    %c0_8 = arith.constant 0 : index
    %13 = vector.load %arg2[%c1, %c0_7, %c0_8] : memref<3x128x32xbf16, #tpu.memory_space<vmem>>, vector<1x128x32xbf16>
    %14 = vector.shape_cast %13 : vector<1x128x32xbf16> to vector<128x32xbf16>
    %cst_9 = arith.constant dense<0.000000e+00> : vector<8x32xf32>
    %15 = tpu.matmul %12, %14, %cst_9 {dimension_numbers = #tpu.dot_dimension_numbers<[1], [0], [0], [1], [0, 0, 1, 1], [], []>} : vector<8x128xbf16>, vector<128x32xbf16>, vector<8x32xf32> -> vector<8x32xf32>
    %16 = arith.addf %11, %15 : vector<8x32xf32>
    %17 = vector.extract_strided_slice %5 {offsets = [2, 0], sizes = [8, 128], strides = [1, 1]} : vector<10x128xbf16> to vector<8x128xbf16>
    %c2 = arith.constant 2 : index
    %c0_10 = arith.constant 0 : index
    %c0_11 = arith.constant 0 : index
    %18 = vector.load %arg2[%c2, %c0_10, %c0_11] : memref<3x128x32xbf16, #tpu.memory_space<vmem>>, vector<1x128x32xbf16>
    %19 = vector.shape_cast %18 : vector<1x128x32xbf16> to vector<128x32xbf16>
    %cst_12 = arith.constant dense<0.000000e+00> : vector<8x32xf32>
    %20 = tpu.matmul %17, %19, %cst_12 {dimension_numbers = #tpu.dot_dimension_numbers<[1], [0], [0], [1], [0, 0, 1, 1], [], []>} : vector<8x128xbf16>, vector<128x32xbf16>, vector<8x32xf32> -> vector<8x32xf32>
    %21 = arith.addf %16, %20 : vector<8x32xf32>
    %cst_13 = arith.constant 0.000000e+00 : f32
    %22 = vector.broadcast %cst_13 : f32 to vector<8x32xf32>
    %23 = arith.maximumf %21, %22 : vector<8x32xf32>
    %c0_14 = arith.constant 0 : index
    %c0_15 = arith.constant 0 : index
    %c0_16 = arith.constant 0 : index
    %24 = vector.load %arg5[%c0_14, %c0_15, %c0_16] : memref<1x8x32xf32, #tpu.memory_space<vmem>>, vector<1x8x32xf32>
    %25 = vector.shape_cast %24 : vector<1x8x32xf32> to vector<8x32xf32>
    %26 = vector.shape_cast %23 : vector<8x32xf32> to vector<1x8x32xf32>
    tpu.vector_store %arg5[%c0_14, %c0_15, %c0_16], %26 {strides = array<i32>} : memref<1x8x32xf32, #tpu.memory_space<vmem>>, vector<1x8x32xf32>,
    %c0_17 = arith.constant 0 : index
    %c0_18 = arith.constant 0 : index
    %27 = vector.load %arg7[%c0_17, %c0_18] : memref<1x32xf32, #tpu.memory_space<vmem>>, vector<1x32xf32>
    %cst_19 = arith.constant dense<0.000000e+00> : vector<32xf32>
    %28 = vector.multi_reduction <add>, %23, %cst_19 [0] : vector<8x32xf32> to vector<32xf32>
    %29 = vector.shape_cast %28 : vector<32xf32> to vector<1x32xf32>
    %30 = arith.addf %27, %29 : vector<1x32xf32>
    %c0_20 = arith.constant 0 : index
    %c0_21 = arith.constant 0 : index
    %31 = vector.load %arg7[%c0_20, %c0_21] : memref<1x32xf32, #tpu.memory_space<vmem>>, vector<1x32xf32>
    tpu.vector_store %arg7[%c0_20, %c0_21], %30 {strides = array<i32>} : memref<1x32xf32, #tpu.memory_space<vmem>>, vector<1x32xf32>,
    %c0_22 = arith.constant 0 : index
    %c0_23 = arith.constant 0 : index
    %32 = vector.load %arg8[%c0_22, %c0_23] : memref<1x32xf32, #tpu.memory_space<vmem>>, vector<1x32xf32>
    %33 = arith.mulf %23, %23 : vector<8x32xf32>
    %cst_24 = arith.constant dense<0.000000e+00> : vector<32xf32>
    %34 = vector.multi_reduction <add>, %33, %cst_24 [0] : vector<8x32xf32> to vector<32xf32>
    %35 = vector.shape_cast %34 : vector<32xf32> to vector<1x32xf32>
    %36 = arith.addf %32, %35 : vector<1x32xf32>
    %c0_25 = arith.constant 0 : index
    %c0_26 = arith.constant 0 : index
    %37 = vector.load %arg8[%c0_25, %c0_26] : memref<1x32xf32, #tpu.memory_space<vmem>>, vector<1x32xf32>
    tpu.vector_store %arg8[%c0_25, %c0_26], %36 {strides = array<i32>} : memref<1x32xf32, #tpu.memory_space<vmem>>, vector<1x32xf32>,
    %c1_i32 = arith.constant 1 : i32
    %38 = arith.cmpi eq, %arg0, %c1_i32 : i32
    %39 = arith.extui %38 : i1 to i32
    %c0_i32_27 = arith.constant 0 : i32
    %40 = arith.cmpi ne, %39, %c0_i32_27 : i32
    scf.if %40 {
      %c0_28 = arith.constant 0 : index
      %c0_29 = arith.constant 0 : index
      %41 = vector.load %arg7[%c0_28, %c0_29] : memref<1x32xf32, #tpu.memory_space<vmem>>, vector<1x32xf32>
      %cst_30 = arith.constant 6.250000e-02 : f32
      %42 = vector.broadcast %cst_30 : f32 to vector<1x32xf32>
      %43 = arith.mulf %41, %42 : vector<1x32xf32>
      %c0_31 = arith.constant 0 : index
      %c0_32 = arith.constant 0 : index
      %44 = vector.load %arg8[%c0_31, %c0_32] : memref<1x32xf32, #tpu.memory_space<vmem>>, vector<1x32xf32>
      %cst_33 = arith.constant 6.250000e-02 : f32
      %45 = vector.broadcast %cst_33 : f32 to vector<1x32xf32>
      %46 = arith.mulf %44, %45 : vector<1x32xf32>
      %47 = arith.mulf %43, %43 : vector<1x32xf32>
      %48 = arith.subf %46, %47 : vector<1x32xf32>
      %c0_34 = arith.constant 0 : index
      %c0_35 = arith.constant 0 : index
      %49 = vector.load %arg3[%c0_34, %c0_35] : memref<1x32xf32, #tpu.memory_space<vmem>>, vector<1x32xf32>
      %cst_36 = arith.constant 9.99999974E-6 : f32
      %50 = vector.broadcast %cst_36 : f32 to vector<1x32xf32>
      %51 = arith.addf %48, %50 : vector<1x32xf32>
      %52 = math.rsqrt %51 : vector<1x32xf32>
      %53 = arith.mulf %49, %52 : vector<1x32xf32>
      %c0_37 = arith.constant 0 : index
      %c0_38 = arith.constant 0 : index
      %54 = vector.load %arg4[%c0_37, %c0_38] : memref<1x32xf32, #tpu.memory_space<vmem>>, vector<1x32xf32>
      %55 = arith.mulf %43, %53 : vector<1x32xf32>
      %56 = arith.subf %54, %55 : vector<1x32xf32>
      %57 = tpu.concatenate %53, %56 in 0 : vector<1x32xf32>, vector<1x32xf32> -> vector<2x32xf32>
      %c0_39 = arith.constant 0 : index
      %c0_40 = arith.constant 0 : index
      %58 = vector.load %arg6[%c0_39, %c0_40] : memref<2x32xf32, #tpu.memory_space<vmem>>, vector<2x32xf32>
      tpu.vector_store %arg6[%c0_39, %c0_40], %57 {strides = array<i32>} : memref<2x32xf32, #tpu.memory_space<vmem>>, vector<2x32xf32>,
    } else {
    }
    return
  }
  func.func @transform_0(%arg0: i32) -> (i32, i32, i32) {
    %c0_i32 = arith.constant 0 : i32
    %c0_i32_0 = arith.constant 0 : i32
    %c0_i32_1 = arith.constant 0 : i32
    return %arg0, %c0_i32, %c0_i32_0 : i32, i32, i32
  }
  func.func @transform_1(%arg0: i32) -> (i32, i32, i32) {
    %c0_i32 = arith.constant 0 : i32
    %c0_i32_0 = arith.constant 0 : i32
    %c0_i32_1 = arith.constant 0 : i32
    %c0_i32_2 = arith.constant 0 : i32
    return %c0_i32, %c0_i32_0, %c0_i32_1 : i32, i32, i32
  }
  func.func @transform_2(%arg0: i32) -> (i32, i32) {
    %c0_i32 = arith.constant 0 : i32
    %c0_i32_0 = arith.constant 0 : i32
    %c0_i32_1 = arith.constant 0 : i32
    return %c0_i32, %c0_i32_0 : i32, i32
  }
  func.func @transform_3(%arg0: i32) -> (i32, i32) {
    %c0_i32 = arith.constant 0 : i32
    %c0_i32_0 = arith.constant 0 : i32
    %c0_i32_1 = arith.constant 0 : i32
    return %c0_i32, %c0_i32_0 : i32, i32
  }
  func.func @transform_4(%arg0: i32) -> (i32, i32, i32) {
    %c0_i32 = arith.constant 0 : i32
    %c0_i32_0 = arith.constant 0 : i32
    %c0_i32_1 = arith.constant 0 : i32
    return %arg0, %c0_i32, %c0_i32_0 : i32, i32, i32
  }
  func.func @transform_5(%arg0: i32) -> (i32, i32) {
    %c0_i32 = arith.constant 0 : i32
    %c0_i32_0 = arith.constant 0 : i32
    %c0_i32_1 = arith.constant 0 : i32
    return %c0_i32, %c0_i32_0 : i32, i32
  }
}

module attributes {stable_mosaic.version = 11 : i64} {
  func.func @_conv_stats_kernel(%arg0: i32, %arg1: memref<1x10x32xf32, #tpu.memory_space<vmem>>, %arg2: memref<3x32x32xbf16, #tpu.memory_space<vmem>>, %arg3: memref<1x32xf32, #tpu.memory_space<vmem>>, %arg4: memref<1x32xf32, #tpu.memory_space<vmem>>, %arg5: memref<1x8x32xf32, #tpu.memory_space<vmem>>, %arg6: memref<2x32xf32, #tpu.memory_space<vmem>>, %arg7: memref<1x32xf32, #tpu.memory_space<vmem>>, %arg8: memref<1x32xf32, #tpu.memory_space<vmem>>) attributes {dimension_semantics = [#tpu.dimension_semantics<arbitrary>], iteration_bounds = array<i64: 2>, scalar_prefetch = 0 : i64, scratch_operands = 2 : i64, tpu.core_type = #tpu.core_type<tc>, window_params = [{transform_indices = @transform_0, window_bounds = array<i64: 1, 10, 32>}, {pipeline_mode = #tpu.pipeline_mode<synchronous>, transform_indices = @transform_1, window_bounds = array<i64: 3, 32, 32>}, {pipeline_mode = #tpu.pipeline_mode<synchronous>, transform_indices = @transform_2, window_bounds = array<i64: 1, 32>}, {pipeline_mode = #tpu.pipeline_mode<synchronous>, transform_indices = @transform_3, window_bounds = array<i64: 1, 32>}, {transform_indices = @transform_4, window_bounds = array<i64: 1, 8, 32>}, {pipeline_mode = #tpu.pipeline_mode<synchronous>, transform_indices = @transform_5, window_bounds = array<i64: 2, 32>}]} {
    %c0_i32 = arith.constant 0 : i32
    %0 = arith.cmpi eq, %arg0, %c0_i32 : i32
    %1 = arith.extui %0 : i1 to i32
    %c0_i32_0 = arith.constant 0 : i32
    %2 = arith.cmpi ne, %1, %c0_i32_0 : i32
    scf.if %2 {
      %cst_27 = arith.constant 0.000000e+00 : f32
      %39 = vector.broadcast %cst_27 : f32 to vector<1x32xf32>
      %c0_28 = arith.constant 0 : index
      %c0_29 = arith.constant 0 : index
      %40 = vector.load %arg7[%c0_28, %c0_29] : memref<1x32xf32, #tpu.memory_space<vmem>>, vector<1x32xf32>
      tpu.vector_store %arg7[%c0_28, %c0_29], %39 {strides = array<i32>} : memref<1x32xf32, #tpu.memory_space<vmem>>, vector<1x32xf32>,
      %cst_30 = arith.constant 0.000000e+00 : f32
      %41 = vector.broadcast %cst_30 : f32 to vector<1x32xf32>
      %c0_31 = arith.constant 0 : index
      %c0_32 = arith.constant 0 : index
      %42 = vector.load %arg8[%c0_31, %c0_32] : memref<1x32xf32, #tpu.memory_space<vmem>>, vector<1x32xf32>
      tpu.vector_store %arg8[%c0_31, %c0_32], %41 {strides = array<i32>} : memref<1x32xf32, #tpu.memory_space<vmem>>, vector<1x32xf32>,
    } else {
    }
    %c0 = arith.constant 0 : index
    %c0_1 = arith.constant 0 : index
    %c0_2 = arith.constant 0 : index
    %3 = vector.load %arg1[%c0, %c0_1, %c0_2] : memref<1x10x32xf32, #tpu.memory_space<vmem>>, vector<1x10x32xf32>
    %4 = vector.shape_cast %3 : vector<1x10x32xf32> to vector<10x32xf32>
    %5 = arith.truncf %4 : vector<10x32xf32> to vector<10x32xbf16>
    %cst = arith.constant 0.000000e+00 : f32
    %6 = vector.broadcast %cst : f32 to vector<8x32xf32>
    %7 = vector.extract_strided_slice %5 {offsets = [0, 0], sizes = [8, 32], strides = [1, 1]} : vector<10x32xbf16> to vector<8x32xbf16>
    %c0_3 = arith.constant 0 : index
    %c0_4 = arith.constant 0 : index
    %c0_5 = arith.constant 0 : index
    %8 = vector.load %arg2[%c0_3, %c0_4, %c0_5] : memref<3x32x32xbf16, #tpu.memory_space<vmem>>, vector<1x32x32xbf16>
    %9 = vector.shape_cast %8 : vector<1x32x32xbf16> to vector<32x32xbf16>
    %cst_6 = arith.constant dense<0.000000e+00> : vector<8x32xf32>
    %10 = tpu.matmul %7, %9, %cst_6 {dimension_numbers = #tpu.dot_dimension_numbers<[1], [0], [0], [1], [0, 0, 1, 1], [], []>} : vector<8x32xbf16>, vector<32x32xbf16>, vector<8x32xf32> -> vector<8x32xf32>
    %11 = arith.addf %6, %10 : vector<8x32xf32>
    %12 = vector.extract_strided_slice %5 {offsets = [1, 0], sizes = [8, 32], strides = [1, 1]} : vector<10x32xbf16> to vector<8x32xbf16>
    %c1 = arith.constant 1 : index
    %c0_7 = arith.constant 0 : index
    %c0_8 = arith.constant 0 : index
    %13 = vector.load %arg2[%c1, %c0_7, %c0_8] : memref<3x32x32xbf16, #tpu.memory_space<vmem>>, vector<1x32x32xbf16>
    %14 = vector.shape_cast %13 : vector<1x32x32xbf16> to vector<32x32xbf16>
    %cst_9 = arith.constant dense<0.000000e+00> : vector<8x32xf32>
    %15 = tpu.matmul %12, %14, %cst_9 {dimension_numbers = #tpu.dot_dimension_numbers<[1], [0], [0], [1], [0, 0, 1, 1], [], []>} : vector<8x32xbf16>, vector<32x32xbf16>, vector<8x32xf32> -> vector<8x32xf32>
    %16 = arith.addf %11, %15 : vector<8x32xf32>
    %17 = vector.extract_strided_slice %5 {offsets = [2, 0], sizes = [8, 32], strides = [1, 1]} : vector<10x32xbf16> to vector<8x32xbf16>
    %c2 = arith.constant 2 : index
    %c0_10 = arith.constant 0 : index
    %c0_11 = arith.constant 0 : index
    %18 = vector.load %arg2[%c2, %c0_10, %c0_11] : memref<3x32x32xbf16, #tpu.memory_space<vmem>>, vector<1x32x32xbf16>
    %19 = vector.shape_cast %18 : vector<1x32x32xbf16> to vector<32x32xbf16>
    %cst_12 = arith.constant dense<0.000000e+00> : vector<8x32xf32>
    %20 = tpu.matmul %17, %19, %cst_12 {dimension_numbers = #tpu.dot_dimension_numbers<[1], [0], [0], [1], [0, 0, 1, 1], [], []>} : vector<8x32xbf16>, vector<32x32xbf16>, vector<8x32xf32> -> vector<8x32xf32>
    %21 = arith.addf %16, %20 : vector<8x32xf32>
    %c0_13 = arith.constant 0 : index
    %c0_14 = arith.constant 0 : index
    %c0_15 = arith.constant 0 : index
    %22 = vector.load %arg5[%c0_13, %c0_14, %c0_15] : memref<1x8x32xf32, #tpu.memory_space<vmem>>, vector<1x8x32xf32>
    %23 = vector.shape_cast %22 : vector<1x8x32xf32> to vector<8x32xf32>
    %24 = vector.shape_cast %21 : vector<8x32xf32> to vector<1x8x32xf32>
    tpu.vector_store %arg5[%c0_13, %c0_14, %c0_15], %24 {strides = array<i32>} : memref<1x8x32xf32, #tpu.memory_space<vmem>>, vector<1x8x32xf32>,
    %c0_16 = arith.constant 0 : index
    %c0_17 = arith.constant 0 : index
    %25 = vector.load %arg7[%c0_16, %c0_17] : memref<1x32xf32, #tpu.memory_space<vmem>>, vector<1x32xf32>
    %cst_18 = arith.constant dense<0.000000e+00> : vector<32xf32>
    %26 = vector.multi_reduction <add>, %21, %cst_18 [0] : vector<8x32xf32> to vector<32xf32>
    %27 = vector.shape_cast %26 : vector<32xf32> to vector<1x32xf32>
    %28 = arith.addf %25, %27 : vector<1x32xf32>
    %c0_19 = arith.constant 0 : index
    %c0_20 = arith.constant 0 : index
    %29 = vector.load %arg7[%c0_19, %c0_20] : memref<1x32xf32, #tpu.memory_space<vmem>>, vector<1x32xf32>
    tpu.vector_store %arg7[%c0_19, %c0_20], %28 {strides = array<i32>} : memref<1x32xf32, #tpu.memory_space<vmem>>, vector<1x32xf32>,
    %c0_21 = arith.constant 0 : index
    %c0_22 = arith.constant 0 : index
    %30 = vector.load %arg8[%c0_21, %c0_22] : memref<1x32xf32, #tpu.memory_space<vmem>>, vector<1x32xf32>
    %31 = arith.mulf %21, %21 : vector<8x32xf32>
    %cst_23 = arith.constant dense<0.000000e+00> : vector<32xf32>
    %32 = vector.multi_reduction <add>, %31, %cst_23 [0] : vector<8x32xf32> to vector<32xf32>
    %33 = vector.shape_cast %32 : vector<32xf32> to vector<1x32xf32>
    %34 = arith.addf %30, %33 : vector<1x32xf32>
    %c0_24 = arith.constant 0 : index
    %c0_25 = arith.constant 0 : index
    %35 = vector.load %arg8[%c0_24, %c0_25] : memref<1x32xf32, #tpu.memory_space<vmem>>, vector<1x32xf32>
    tpu.vector_store %arg8[%c0_24, %c0_25], %34 {strides = array<i32>} : memref<1x32xf32, #tpu.memory_space<vmem>>, vector<1x32xf32>,
    %c1_i32 = arith.constant 1 : i32
    %36 = arith.cmpi eq, %arg0, %c1_i32 : i32
    %37 = arith.extui %36 : i1 to i32
    %c0_i32_26 = arith.constant 0 : i32
    %38 = arith.cmpi ne, %37, %c0_i32_26 : i32
    scf.if %38 {
      %c0_27 = arith.constant 0 : index
      %c0_28 = arith.constant 0 : index
      %39 = vector.load %arg7[%c0_27, %c0_28] : memref<1x32xf32, #tpu.memory_space<vmem>>, vector<1x32xf32>
      %cst_29 = arith.constant 6.250000e-02 : f32
      %40 = vector.broadcast %cst_29 : f32 to vector<1x32xf32>
      %41 = arith.mulf %39, %40 : vector<1x32xf32>
      %c0_30 = arith.constant 0 : index
      %c0_31 = arith.constant 0 : index
      %42 = vector.load %arg8[%c0_30, %c0_31] : memref<1x32xf32, #tpu.memory_space<vmem>>, vector<1x32xf32>
      %cst_32 = arith.constant 6.250000e-02 : f32
      %43 = vector.broadcast %cst_32 : f32 to vector<1x32xf32>
      %44 = arith.mulf %42, %43 : vector<1x32xf32>
      %45 = arith.mulf %41, %41 : vector<1x32xf32>
      %46 = arith.subf %44, %45 : vector<1x32xf32>
      %c0_33 = arith.constant 0 : index
      %c0_34 = arith.constant 0 : index
      %47 = vector.load %arg3[%c0_33, %c0_34] : memref<1x32xf32, #tpu.memory_space<vmem>>, vector<1x32xf32>
      %cst_35 = arith.constant 9.99999974E-6 : f32
      %48 = vector.broadcast %cst_35 : f32 to vector<1x32xf32>
      %49 = arith.addf %46, %48 : vector<1x32xf32>
      %50 = math.rsqrt %49 : vector<1x32xf32>
      %51 = arith.mulf %47, %50 : vector<1x32xf32>
      %c0_36 = arith.constant 0 : index
      %c0_37 = arith.constant 0 : index
      %52 = vector.load %arg4[%c0_36, %c0_37] : memref<1x32xf32, #tpu.memory_space<vmem>>, vector<1x32xf32>
      %53 = arith.mulf %41, %51 : vector<1x32xf32>
      %54 = arith.subf %52, %53 : vector<1x32xf32>
      %55 = tpu.concatenate %51, %54 in 0 : vector<1x32xf32>, vector<1x32xf32> -> vector<2x32xf32>
      %c0_38 = arith.constant 0 : index
      %c0_39 = arith.constant 0 : index
      %56 = vector.load %arg6[%c0_38, %c0_39] : memref<2x32xf32, #tpu.memory_space<vmem>>, vector<2x32xf32>
      tpu.vector_store %arg6[%c0_38, %c0_39], %55 {strides = array<i32>} : memref<2x32xf32, #tpu.memory_space<vmem>>, vector<2x32xf32>,
    } else {
    }
    return
  }
  func.func @transform_0(%arg0: i32) -> (i32, i32, i32) {
    %c0_i32 = arith.constant 0 : i32
    %c0_i32_0 = arith.constant 0 : i32
    %c0_i32_1 = arith.constant 0 : i32
    return %arg0, %c0_i32, %c0_i32_0 : i32, i32, i32
  }
  func.func @transform_1(%arg0: i32) -> (i32, i32, i32) {
    %c0_i32 = arith.constant 0 : i32
    %c0_i32_0 = arith.constant 0 : i32
    %c0_i32_1 = arith.constant 0 : i32
    %c0_i32_2 = arith.constant 0 : i32
    return %c0_i32, %c0_i32_0, %c0_i32_1 : i32, i32, i32
  }
  func.func @transform_2(%arg0: i32) -> (i32, i32) {
    %c0_i32 = arith.constant 0 : i32
    %c0_i32_0 = arith.constant 0 : i32
    %c0_i32_1 = arith.constant 0 : i32
    return %c0_i32, %c0_i32_0 : i32, i32
  }
  func.func @transform_3(%arg0: i32) -> (i32, i32) {
    %c0_i32 = arith.constant 0 : i32
    %c0_i32_0 = arith.constant 0 : i32
    %c0_i32_1 = arith.constant 0 : i32
    return %c0_i32, %c0_i32_0 : i32, i32
  }
  func.func @transform_4(%arg0: i32) -> (i32, i32, i32) {
    %c0_i32 = arith.constant 0 : i32
    %c0_i32_0 = arith.constant 0 : i32
    %c0_i32_1 = arith.constant 0 : i32
    return %arg0, %c0_i32, %c0_i32_0 : i32, i32, i32
  }
  func.func @transform_5(%arg0: i32) -> (i32, i32) {
    %c0_i32 = arith.constant 0 : i32
    %c0_i32_0 = arith.constant 0 : i32
    %c0_i32_1 = arith.constant 0 : i32
    return %c0_i32, %c0_i32_0 : i32, i32
  }
}

module attributes {stable_mosaic.version = 11 : i64} {
  func.func @_matmul_bias_rows_kernel(%arg0: i32, %arg1: memref<16x32xf32, #tpu.memory_space<vmem>>, %arg2: memref<32x96xbf16, #tpu.memory_space<vmem>>, %arg3: memref<1x96xf32, #tpu.memory_space<vmem>>, %arg4: memref<16x96xf32, #tpu.memory_space<vmem>>) attributes {dimension_semantics = [#tpu.dimension_semantics<parallel>], iteration_bounds = array<i64: 1>, scalar_prefetch = 0 : i64, scratch_operands = 0 : i64, tpu.core_type = #tpu.core_type<tc>, window_params = [{transform_indices = @transform_0, window_bounds = array<i64: 16, 32>}, {pipeline_mode = #tpu.pipeline_mode<synchronous>, transform_indices = @transform_1, window_bounds = array<i64: 32, 96>}, {pipeline_mode = #tpu.pipeline_mode<synchronous>, transform_indices = @transform_2, window_bounds = array<i64: 1, 96>}, {transform_indices = @transform_3, window_bounds = array<i64: 16, 96>}]} {
    %c0 = arith.constant 0 : index
    %c0_0 = arith.constant 0 : index
    %0 = vector.load %arg1[%c0, %c0_0] : memref<16x32xf32, #tpu.memory_space<vmem>>, vector<16x32xf32>
    %1 = arith.truncf %0 : vector<16x32xf32> to vector<16x32xbf16>
    %c0_1 = arith.constant 0 : index
    %c0_2 = arith.constant 0 : index
    %2 = vector.load %arg2[%c0_1, %c0_2] : memref<32x96xbf16, #tpu.memory_space<vmem>>, vector<32x96xbf16>
    %cst = arith.constant dense<0.000000e+00> : vector<16x96xf32>
    %3 = tpu.matmul %1, %2, %cst {dimension_numbers = #tpu.dot_dimension_numbers<[1], [0], [0], [1], [0, 0, 1, 1], [], []>} : vector<16x32xbf16>, vector<32x96xbf16>, vector<16x96xf32> -> vector<16x96xf32>
    %c0_3 = arith.constant 0 : index
    %c0_4 = arith.constant 0 : index
    %4 = vector.load %arg3[%c0_3, %c0_4] : memref<1x96xf32, #tpu.memory_space<vmem>>, vector<1x96xf32>
    %5 = vector.broadcast %4 : vector<1x96xf32> to vector<16x96xf32>
    %6 = arith.addf %3, %5 : vector<16x96xf32>
    %c0_5 = arith.constant 0 : index
    %c0_6 = arith.constant 0 : index
    %7 = vector.load %arg4[%c0_5, %c0_6] : memref<16x96xf32, #tpu.memory_space<vmem>>, vector<16x96xf32>
    tpu.vector_store %arg4[%c0_5, %c0_6], %6 {strides = array<i32>} : memref<16x96xf32, #tpu.memory_space<vmem>>, vector<16x96xf32>,
    return
  }
  func.func @transform_0(%arg0: i32) -> (i32, i32) {
    %c0_i32 = arith.constant 0 : i32
    %c0_i32_0 = arith.constant 0 : i32
    return %arg0, %c0_i32 : i32, i32
  }
  func.func @transform_1(%arg0: i32) -> (i32, i32) {
    %c0_i32 = arith.constant 0 : i32
    %c0_i32_0 = arith.constant 0 : i32
    %c0_i32_1 = arith.constant 0 : i32
    return %c0_i32, %c0_i32_0 : i32, i32
  }
  func.func @transform_2(%arg0: i32) -> (i32, i32) {
    %c0_i32 = arith.constant 0 : i32
    %c0_i32_0 = arith.constant 0 : i32
    %c0_i32_1 = arith.constant 0 : i32
    return %c0_i32, %c0_i32_0 : i32, i32
  }
  func.func @transform_3(%arg0: i32) -> (i32, i32) {
    %c0_i32 = arith.constant 0 : i32
    %c0_i32_0 = arith.constant 0 : i32
    return %arg0, %c0_i32 : i32, i32
  }
}

module attributes {stable_mosaic.version = 11 : i64} {
  func.func @_highway_rows_kernel(%arg0: i32, %arg1: memref<16x32xf32, #tpu.memory_space<vmem>>, %arg2: memref<2x32x64xbf16, #tpu.memory_space<vmem>>, %arg3: memref<2x1x64xf32, #tpu.memory_space<vmem>>, %arg4: memref<16x32xf32, #tpu.memory_space<vmem>>) attributes {dimension_semantics = [#tpu.dimension_semantics<parallel>], iteration_bounds = array<i64: 1>, scalar_prefetch = 0 : i64, scratch_operands = 0 : i64, tpu.core_type = #tpu.core_type<tc>, window_params = [{transform_indices = @transform_0, window_bounds = array<i64: 16, 32>}, {pipeline_mode = #tpu.pipeline_mode<synchronous>, transform_indices = @transform_1, window_bounds = array<i64: 2, 32, 64>}, {pipeline_mode = #tpu.pipeline_mode<synchronous>, transform_indices = @transform_2, window_bounds = array<i64: 2, 1, 64>}, {transform_indices = @transform_3, window_bounds = array<i64: 16, 32>}]} {
    %c0 = arith.constant 0 : index
    %c0_0 = arith.constant 0 : index
    %0 = vector.load %arg1[%c0, %c0_0] : memref<16x32xf32, #tpu.memory_space<vmem>>, vector<16x32xf32>
    %1 = arith.truncf %0 : vector<16x32xf32> to vector<16x32xbf16>
    %c0_1 = arith.constant 0 : index
    %c0_2 = arith.constant 0 : index
    %c0_3 = arith.constant 0 : index
    %2 = vector.load %arg2[%c0_1, %c0_2, %c0_3] : memref<2x32x64xbf16, #tpu.memory_space<vmem>>, vector<1x32x64xbf16>
    %3 = vector.shape_cast %2 : vector<1x32x64xbf16> to vector<32x64xbf16>
    %cst = arith.constant dense<0.000000e+00> : vector<16x64xf32>
    %4 = tpu.matmul %1, %3, %cst {dimension_numbers = #tpu.dot_dimension_numbers<[1], [0], [0], [1], [0, 0, 1, 1], [], []>} : vector<16x32xbf16>, vector<32x64xbf16>, vector<16x64xf32> -> vector<16x64xf32>
    %c0_4 = arith.constant 0 : index
    %c0_5 = arith.constant 0 : index
    %c0_6 = arith.constant 0 : index
    %5 = vector.load %arg3[%c0_4, %c0_5, %c0_6] : memref<2x1x64xf32, #tpu.memory_space<vmem>>, vector<1x1x64xf32>
    %6 = vector.shape_cast %5 : vector<1x1x64xf32> to vector<1x64xf32>
    %7 = vector.broadcast %6 : vector<1x64xf32> to vector<16x64xf32>
    %8 = arith.addf %4, %7 : vector<16x64xf32>
    %9 = vector.extract_strided_slice %8 {offsets = [0, 32], sizes = [16, 32], strides = [1, 1]} : vector<16x64xf32> to vector<16x32xf32>
    %10 = arith.negf %9 : vector<16x32xf32>
    %11 = math.exp %10 : vector<16x32xf32>
    %cst_7 = arith.constant 1.000000e+00 : f32
    %12 = vector.broadcast %cst_7 : f32 to vector<16x32xf32>
    %13 = arith.addf %12, %11 : vector<16x32xf32>
    %14 = arith.divf %12, %13 : vector<16x32xf32>
    %15 = vector.extract_strided_slice %8 {offsets = [0, 0], sizes = [16, 32], strides = [1, 1]} : vector<16x64xf32> to vector<16x32xf32>
    %cst_8 = arith.constant 0.000000e+00 : f32
    %16 = vector.broadcast %cst_8 : f32 to vector<16x32xf32>
    %17 = arith.maximumf %15, %16 : vector<16x32xf32>
    %18 = arith.mulf %14, %17 : vector<16x32xf32>
    %cst_9 = arith.constant 1.000000e+00 : f32
    %19 = vector.broadcast %cst_9 : f32 to vector<16x32xf32>
    %20 = arith.subf %19, %14 : vector<16x32xf32>
    %21 = arith.mulf %20, %0 : vector<16x32xf32>
    %22 = arith.addf %18, %21 : vector<16x32xf32>
    %23 = arith.truncf %22 : vector<16x32xf32> to vector<16x32xbf16>
    %c1 = arith.constant 1 : index
    %c0_10 = arith.constant 0 : index
    %c0_11 = arith.constant 0 : index
    %24 = vector.load %arg2[%c1, %c0_10, %c0_11] : memref<2x32x64xbf16, #tpu.memory_space<vmem>>, vector<1x32x64xbf16>
    %25 = vector.shape_cast %24 : vector<1x32x64xbf16> to vector<32x64xbf16>
    %cst_12 = arith.constant dense<0.000000e+00> : vector<16x64xf32>
    %26 = tpu.matmul %23, %25, %cst_12 {dimension_numbers = #tpu.dot_dimension_numbers<[1], [0], [0], [1], [0, 0, 1, 1], [], []>} : vector<16x32xbf16>, vector<32x64xbf16>, vector<16x64xf32> -> vector<16x64xf32>
    %c1_13 = arith.constant 1 : index
    %c0_14 = arith.constant 0 : index
    %c0_15 = arith.constant 0 : index
    %27 = vector.load %arg3[%c1_13, %c0_14, %c0_15] : memref<2x1x64xf32, #tpu.memory_space<vmem>>, vector<1x1x64xf32>
    %28 = vector.shape_cast %27 : vector<1x1x64xf32> to vector<1x64xf32>
    %29 = vector.broadcast %28 : vector<1x64xf32> to vector<16x64xf32>
    %30 = arith.addf %26, %29 : vector<16x64xf32>
    %31 = vector.extract_strided_slice %30 {offsets = [0, 32], sizes = [16, 32], strides = [1, 1]} : vector<16x64xf32> to vector<16x32xf32>
    %32 = arith.negf %31 : vector<16x32xf32>
    %33 = math.exp %32 : vector<16x32xf32>
    %cst_16 = arith.constant 1.000000e+00 : f32
    %34 = vector.broadcast %cst_16 : f32 to vector<16x32xf32>
    %35 = arith.addf %34, %33 : vector<16x32xf32>
    %36 = arith.divf %34, %35 : vector<16x32xf32>
    %37 = vector.extract_strided_slice %30 {offsets = [0, 0], sizes = [16, 32], strides = [1, 1]} : vector<16x64xf32> to vector<16x32xf32>
    %cst_17 = arith.constant 0.000000e+00 : f32
    %38 = vector.broadcast %cst_17 : f32 to vector<16x32xf32>
    %39 = arith.maximumf %37, %38 : vector<16x32xf32>
    %40 = arith.mulf %36, %39 : vector<16x32xf32>
    %cst_18 = arith.constant 1.000000e+00 : f32
    %41 = vector.broadcast %cst_18 : f32 to vector<16x32xf32>
    %42 = arith.subf %41, %36 : vector<16x32xf32>
    %43 = arith.mulf %42, %22 : vector<16x32xf32>
    %44 = arith.addf %40, %43 : vector<16x32xf32>
    %c0_19 = arith.constant 0 : index
    %c0_20 = arith.constant 0 : index
    %45 = vector.load %arg4[%c0_19, %c0_20] : memref<16x32xf32, #tpu.memory_space<vmem>>, vector<16x32xf32>
    tpu.vector_store %arg4[%c0_19, %c0_20], %44 {strides = array<i32>} : memref<16x32xf32, #tpu.memory_space<vmem>>, vector<16x32xf32>,
    return
  }
  func.func @transform_0(%arg0: i32) -> (i32, i32) {
    %c0_i32 = arith.constant 0 : i32
    %c0_i32_0 = arith.constant 0 : i32
    return %arg0, %c0_i32 : i32, i32
  }
  func.func @transform_1(%arg0: i32) -> (i32, i32, i32) {
    %c0_i32 = arith.constant 0 : i32
    %c0_i32_0 = arith.constant 0 : i32
    %c0_i32_1 = arith.constant 0 : i32
    %c0_i32_2 = arith.constant 0 : i32
    return %c0_i32, %c0_i32_0, %c0_i32_1 : i32, i32, i32
  }
  func.func @transform_2(%arg0: i32) -> (i32, i32, i32) {
    %c0_i32 = arith.constant 0 : i32
    %c0_i32_0 = arith.constant 0 : i32
    %c0_i32_1 = arith.constant 0 : i32
    %c0_i32_2 = arith.constant 0 : i32
    return %c0_i32, %c0_i32_0, %c0_i32_1 : i32, i32, i32
  }
  func.func @transform_3(%arg0: i32) -> (i32, i32) {
    %c0_i32 = arith.constant 0 : i32
    %c0_i32_0 = arith.constant 0 : i32
    return %arg0, %c0_i32 : i32, i32
  }
}

module attributes {stable_mosaic.version = 11 : i64} {
  func.func @_bigru_rec_kernel(%arg0: i32, %arg1: i32, %arg2: memref<1x8x2x48xf32, #tpu.memory_space<vmem>>, %arg3: memref<1x16x48xf32, #tpu.memory_space<vmem>>, %arg4: memref<1x1x48xf32, #tpu.memory_space<vmem>>, %arg5: memref<1x8x2x16xf32, #tpu.memory_space<vmem>>, %arg6: memref<2x16xf32, #tpu.memory_space<vmem>>) attributes {dimension_semantics = [#tpu.dimension_semantics<parallel>, #tpu.dimension_semantics<arbitrary>], iteration_bounds = array<i64: 2, 1>, scalar_prefetch = 0 : i64, scratch_operands = 1 : i64, tpu.core_type = #tpu.core_type<tc>, window_params = [{transform_indices = @transform_0, window_bounds = array<i64: 1, 8, 2, 48>}, {transform_indices = @transform_1, window_bounds = array<i64: 1, 16, 48>}, {transform_indices = @transform_2, window_bounds = array<i64: 1, 1, 48>}, {transform_indices = @transform_3, window_bounds = array<i64: 1, 8, 2, 16>}]} {
    %c0_i32 = arith.constant 0 : i32
    %0 = arith.cmpi eq, %arg1, %c0_i32 : i32
    %1 = arith.extui %0 : i1 to i32
    %c0_i32_0 = arith.constant 0 : i32
    %2 = arith.cmpi ne, %1, %c0_i32_0 : i32
    scf.if %2 {
      %cst_98 = arith.constant 0.000000e+00 : f32
      %281 = vector.broadcast %cst_98 : f32 to vector<2x16xf32>
      %c0_99 = arith.constant 0 : index
      %c0_100 = arith.constant 0 : index
      %282 = vector.load %arg6[%c0_99, %c0_100] : memref<2x16xf32, #tpu.memory_space<vmem>>, vector<2x16xf32>
      tpu.vector_store %arg6[%c0_99, %c0_100], %281 {strides = array<i32>} : memref<2x16xf32, #tpu.memory_space<vmem>>, vector<2x16xf32>,
    } else {
    }
    %c0 = arith.constant 0 : index
    %c0_1 = arith.constant 0 : index
    %c0_2 = arith.constant 0 : index
    %3 = vector.load %arg3[%c0, %c0_1, %c0_2] : memref<1x16x48xf32, #tpu.memory_space<vmem>>, vector<1x16x48xf32>
    %4 = vector.shape_cast %3 : vector<1x16x48xf32> to vector<16x48xf32>
    %c0_3 = arith.constant 0 : index
    %c0_4 = arith.constant 0 : index
    %c0_5 = arith.constant 0 : index
    %5 = vector.load %arg4[%c0_3, %c0_4, %c0_5] : memref<1x1x48xf32, #tpu.memory_space<vmem>>, vector<1x1x48xf32>
    %6 = vector.shape_cast %5 : vector<1x1x48xf32> to vector<1x48xf32>
    %c0_6 = arith.constant 0 : index
    %c0_7 = arith.constant 0 : index
    %7 = vector.load %arg6[%c0_6, %c0_7] : memref<2x16xf32, #tpu.memory_space<vmem>>, vector<2x16xf32>
    %c0_8 = arith.constant 0 : index
    %c0_9 = arith.constant 0 : index
    %c0_10 = arith.constant 0 : index
    %c0_11 = arith.constant 0 : index
    %8 = vector.load %arg2[%c0_8, %c0_9, %c0_10, %c0_11] : memref<1x8x2x48xf32, #tpu.memory_space<vmem>>, vector<1x1x2x48xf32>
    %9 = vector.shape_cast %8 : vector<1x1x2x48xf32> to vector<2x48xf32>
    %cst = arith.constant dense<0.000000e+00> : vector<2x48xf32>
    %10 = tpu.matmul %7, %4, %cst {dimension_numbers = #tpu.dot_dimension_numbers<[1], [0], [0], [1], [0, 0, 1, 1], [], []>} : vector<2x16xf32>, vector<16x48xf32>, vector<2x48xf32> -> vector<2x48xf32>
    %11 = vector.broadcast %6 : vector<1x48xf32> to vector<2x48xf32>
    %12 = arith.addf %10, %11 : vector<2x48xf32>
    %13 = vector.extract_strided_slice %9 {offsets = [0, 0], sizes = [2, 16], strides = [1, 1]} : vector<2x48xf32> to vector<2x16xf32>
    %14 = vector.extract_strided_slice %12 {offsets = [0, 0], sizes = [2, 16], strides = [1, 1]} : vector<2x48xf32> to vector<2x16xf32>
    %15 = arith.addf %13, %14 : vector<2x16xf32>
    %16 = arith.negf %15 : vector<2x16xf32>
    %17 = math.exp %16 : vector<2x16xf32>
    %cst_12 = arith.constant 1.000000e+00 : f32
    %18 = vector.broadcast %cst_12 : f32 to vector<2x16xf32>
    %19 = arith.addf %18, %17 : vector<2x16xf32>
    %20 = arith.divf %18, %19 : vector<2x16xf32>
    %21 = vector.extract_strided_slice %9 {offsets = [0, 16], sizes = [2, 16], strides = [1, 1]} : vector<2x48xf32> to vector<2x16xf32>
    %22 = vector.extract_strided_slice %12 {offsets = [0, 16], sizes = [2, 16], strides = [1, 1]} : vector<2x48xf32> to vector<2x16xf32>
    %23 = arith.addf %21, %22 : vector<2x16xf32>
    %24 = arith.negf %23 : vector<2x16xf32>
    %25 = math.exp %24 : vector<2x16xf32>
    %cst_13 = arith.constant 1.000000e+00 : f32
    %26 = vector.broadcast %cst_13 : f32 to vector<2x16xf32>
    %27 = arith.addf %26, %25 : vector<2x16xf32>
    %28 = arith.divf %26, %27 : vector<2x16xf32>
    %29 = vector.extract_strided_slice %9 {offsets = [0, 32], sizes = [2, 16], strides = [1, 1]} : vector<2x48xf32> to vector<2x16xf32>
    %30 = vector.extract_strided_slice %12 {offsets = [0, 32], sizes = [2, 16], strides = [1, 1]} : vector<2x48xf32> to vector<2x16xf32>
    %31 = arith.mulf %20, %30 : vector<2x16xf32>
    %32 = arith.addf %29, %31 : vector<2x16xf32>
    %33 = math.tanh %32 : vector<2x16xf32>
    %cst_14 = arith.constant 1.000000e+00 : f32
    %34 = vector.broadcast %cst_14 : f32 to vector<2x16xf32>
    %35 = arith.subf %34, %28 : vector<2x16xf32>
    %36 = arith.mulf %35, %33 : vector<2x16xf32>
    %37 = arith.mulf %28, %7 : vector<2x16xf32>
    %38 = arith.addf %36, %37 : vector<2x16xf32>
    %c0_15 = arith.constant 0 : index
    %c0_16 = arith.constant 0 : index
    %c0_17 = arith.constant 0 : index
    %c0_18 = arith.constant 0 : index
    %39 = vector.load %arg5[%c0_15, %c0_16, %c0_17, %c0_18] : memref<1x8x2x16xf32, #tpu.memory_space<vmem>>, vector<1x1x2x16xf32>
    %40 = vector.shape_cast %39 : vector<1x1x2x16xf32> to vector<2x16xf32>
    %41 = vector.shape_cast %38 : vector<2x16xf32> to vector<1x1x2x16xf32>
    tpu.vector_store %arg5[%c0_15, %c0_16, %c0_17, %c0_18], %41 {strides = array<i32>} : memref<1x8x2x16xf32, #tpu.memory_space<vmem>>, vector<1x1x2x16xf32>,
    %c0_19 = arith.constant 0 : index
    %c1 = arith.constant 1 : index
    %c0_20 = arith.constant 0 : index
    %c0_21 = arith.constant 0 : index
    %42 = vector.load %arg2[%c0_19, %c1, %c0_20, %c0_21] : memref<1x8x2x48xf32, #tpu.memory_space<vmem>>, vector<1x1x2x48xf32>
    %43 = vector.shape_cast %42 : vector<1x1x2x48xf32> to vector<2x48xf32>
    %cst_22 = arith.constant dense<0.000000e+00> : vector<2x48xf32>
    %44 = tpu.matmul %38, %4, %cst_22 {dimension_numbers = #tpu.dot_dimension_numbers<[1], [0], [0], [1], [0, 0, 1, 1], [], []>} : vector<2x16xf32>, vector<16x48xf32>, vector<2x48xf32> -> vector<2x48xf32>
    %45 = vector.broadcast %6 : vector<1x48xf32> to vector<2x48xf32>
    %46 = arith.addf %44, %45 : vector<2x48xf32>
    %47 = vector.extract_strided_slice %43 {offsets = [0, 0], sizes = [2, 16], strides = [1, 1]} : vector<2x48xf32> to vector<2x16xf32>
    %48 = vector.extract_strided_slice %46 {offsets = [0, 0], sizes = [2, 16], strides = [1, 1]} : vector<2x48xf32> to vector<2x16xf32>
    %49 = arith.addf %47, %48 : vector<2x16xf32>
    %50 = arith.negf %49 : vector<2x16xf32>
    %51 = math.exp %50 : vector<2x16xf32>
    %cst_23 = arith.constant 1.000000e+00 : f32
    %52 = vector.broadcast %cst_23 : f32 to vector<2x16xf32>
    %53 = arith.addf %52, %51 : vector<2x16xf32>
    %54 = arith.divf %52, %53 : vector<2x16xf32>
    %55 = vector.extract_strided_slice %43 {offsets = [0, 16], sizes = [2, 16], strides = [1, 1]} : vector<2x48xf32> to vector<2x16xf32>
    %56 = vector.extract_strided_slice %46 {offsets = [0, 16], sizes = [2, 16], strides = [1, 1]} : vector<2x48xf32> to vector<2x16xf32>
    %57 = arith.addf %55, %56 : vector<2x16xf32>
    %58 = arith.negf %57 : vector<2x16xf32>
    %59 = math.exp %58 : vector<2x16xf32>
    %cst_24 = arith.constant 1.000000e+00 : f32
    %60 = vector.broadcast %cst_24 : f32 to vector<2x16xf32>
    %61 = arith.addf %60, %59 : vector<2x16xf32>
    %62 = arith.divf %60, %61 : vector<2x16xf32>
    %63 = vector.extract_strided_slice %43 {offsets = [0, 32], sizes = [2, 16], strides = [1, 1]} : vector<2x48xf32> to vector<2x16xf32>
    %64 = vector.extract_strided_slice %46 {offsets = [0, 32], sizes = [2, 16], strides = [1, 1]} : vector<2x48xf32> to vector<2x16xf32>
    %65 = arith.mulf %54, %64 : vector<2x16xf32>
    %66 = arith.addf %63, %65 : vector<2x16xf32>
    %67 = math.tanh %66 : vector<2x16xf32>
    %cst_25 = arith.constant 1.000000e+00 : f32
    %68 = vector.broadcast %cst_25 : f32 to vector<2x16xf32>
    %69 = arith.subf %68, %62 : vector<2x16xf32>
    %70 = arith.mulf %69, %67 : vector<2x16xf32>
    %71 = arith.mulf %62, %38 : vector<2x16xf32>
    %72 = arith.addf %70, %71 : vector<2x16xf32>
    %c0_26 = arith.constant 0 : index
    %c1_27 = arith.constant 1 : index
    %c0_28 = arith.constant 0 : index
    %c0_29 = arith.constant 0 : index
    %73 = vector.load %arg5[%c0_26, %c1_27, %c0_28, %c0_29] : memref<1x8x2x16xf32, #tpu.memory_space<vmem>>, vector<1x1x2x16xf32>
    %74 = vector.shape_cast %73 : vector<1x1x2x16xf32> to vector<2x16xf32>
    %75 = vector.shape_cast %72 : vector<2x16xf32> to vector<1x1x2x16xf32>
    tpu.vector_store %arg5[%c0_26, %c1_27, %c0_28, %c0_29], %75 {strides = array<i32>} : memref<1x8x2x16xf32, #tpu.memory_space<vmem>>, vector<1x1x2x16xf32>,
    %c0_30 = arith.constant 0 : index
    %c2 = arith.constant 2 : index
    %c0_31 = arith.constant 0 : index
    %c0_32 = arith.constant 0 : index
    %76 = vector.load %arg2[%c0_30, %c2, %c0_31, %c0_32] : memref<1x8x2x48xf32, #tpu.memory_space<vmem>>, vector<1x1x2x48xf32>
    %77 = vector.shape_cast %76 : vector<1x1x2x48xf32> to vector<2x48xf32>
    %cst_33 = arith.constant dense<0.000000e+00> : vector<2x48xf32>
    %78 = tpu.matmul %72, %4, %cst_33 {dimension_numbers = #tpu.dot_dimension_numbers<[1], [0], [0], [1], [0, 0, 1, 1], [], []>} : vector<2x16xf32>, vector<16x48xf32>, vector<2x48xf32> -> vector<2x48xf32>
    %79 = vector.broadcast %6 : vector<1x48xf32> to vector<2x48xf32>
    %80 = arith.addf %78, %79 : vector<2x48xf32>
    %81 = vector.extract_strided_slice %77 {offsets = [0, 0], sizes = [2, 16], strides = [1, 1]} : vector<2x48xf32> to vector<2x16xf32>
    %82 = vector.extract_strided_slice %80 {offsets = [0, 0], sizes = [2, 16], strides = [1, 1]} : vector<2x48xf32> to vector<2x16xf32>
    %83 = arith.addf %81, %82 : vector<2x16xf32>
    %84 = arith.negf %83 : vector<2x16xf32>
    %85 = math.exp %84 : vector<2x16xf32>
    %cst_34 = arith.constant 1.000000e+00 : f32
    %86 = vector.broadcast %cst_34 : f32 to vector<2x16xf32>
    %87 = arith.addf %86, %85 : vector<2x16xf32>
    %88 = arith.divf %86, %87 : vector<2x16xf32>
    %89 = vector.extract_strided_slice %77 {offsets = [0, 16], sizes = [2, 16], strides = [1, 1]} : vector<2x48xf32> to vector<2x16xf32>
    %90 = vector.extract_strided_slice %80 {offsets = [0, 16], sizes = [2, 16], strides = [1, 1]} : vector<2x48xf32> to vector<2x16xf32>
    %91 = arith.addf %89, %90 : vector<2x16xf32>
    %92 = arith.negf %91 : vector<2x16xf32>
    %93 = math.exp %92 : vector<2x16xf32>
    %cst_35 = arith.constant 1.000000e+00 : f32
    %94 = vector.broadcast %cst_35 : f32 to vector<2x16xf32>
    %95 = arith.addf %94, %93 : vector<2x16xf32>
    %96 = arith.divf %94, %95 : vector<2x16xf32>
    %97 = vector.extract_strided_slice %77 {offsets = [0, 32], sizes = [2, 16], strides = [1, 1]} : vector<2x48xf32> to vector<2x16xf32>
    %98 = vector.extract_strided_slice %80 {offsets = [0, 32], sizes = [2, 16], strides = [1, 1]} : vector<2x48xf32> to vector<2x16xf32>
    %99 = arith.mulf %88, %98 : vector<2x16xf32>
    %100 = arith.addf %97, %99 : vector<2x16xf32>
    %101 = math.tanh %100 : vector<2x16xf32>
    %cst_36 = arith.constant 1.000000e+00 : f32
    %102 = vector.broadcast %cst_36 : f32 to vector<2x16xf32>
    %103 = arith.subf %102, %96 : vector<2x16xf32>
    %104 = arith.mulf %103, %101 : vector<2x16xf32>
    %105 = arith.mulf %96, %72 : vector<2x16xf32>
    %106 = arith.addf %104, %105 : vector<2x16xf32>
    %c0_37 = arith.constant 0 : index
    %c2_38 = arith.constant 2 : index
    %c0_39 = arith.constant 0 : index
    %c0_40 = arith.constant 0 : index
    %107 = vector.load %arg5[%c0_37, %c2_38, %c0_39, %c0_40] : memref<1x8x2x16xf32, #tpu.memory_space<vmem>>, vector<1x1x2x16xf32>
    %108 = vector.shape_cast %107 : vector<1x1x2x16xf32> to vector<2x16xf32>
    %109 = vector.shape_cast %106 : vector<2x16xf32> to vector<1x1x2x16xf32>
    tpu.vector_store %arg5[%c0_37, %c2_38, %c0_39, %c0_40], %109 {strides = array<i32>} : memref<1x8x2x16xf32, #tpu.memory_space<vmem>>, vector<1x1x2x16xf32>,
    %c0_41 = arith.constant 0 : index
    %c3 = arith.constant 3 : index
    %c0_42 = arith.constant 0 : index
    %c0_43 = arith.constant 0 : index
    %110 = vector.load %arg2[%c0_41, %c3, %c0_42, %c0_43] : memref<1x8x2x48xf32, #tpu.memory_space<vmem>>, vector<1x1x2x48xf32>
    %111 = vector.shape_cast %110 : vector<1x1x2x48xf32> to vector<2x48xf32>
    %cst_44 = arith.constant dense<0.000000e+00> : vector<2x48xf32>
    %112 = tpu.matmul %106, %4, %cst_44 {dimension_numbers = #tpu.dot_dimension_numbers<[1], [0], [0], [1], [0, 0, 1, 1], [], []>} : vector<2x16xf32>, vector<16x48xf32>, vector<2x48xf32> -> vector<2x48xf32>
    %113 = vector.broadcast %6 : vector<1x48xf32> to vector<2x48xf32>
    %114 = arith.addf %112, %113 : vector<2x48xf32>
    %115 = vector.extract_strided_slice %111 {offsets = [0, 0], sizes = [2, 16], strides = [1, 1]} : vector<2x48xf32> to vector<2x16xf32>
    %116 = vector.extract_strided_slice %114 {offsets = [0, 0], sizes = [2, 16], strides = [1, 1]} : vector<2x48xf32> to vector<2x16xf32>
    %117 = arith.addf %115, %116 : vector<2x16xf32>
    %118 = arith.negf %117 : vector<2x16xf32>
    %119 = math.exp %118 : vector<2x16xf32>
    %cst_45 = arith.constant 1.000000e+00 : f32
    %120 = vector.broadcast %cst_45 : f32 to vector<2x16xf32>
    %121 = arith.addf %120, %119 : vector<2x16xf32>
    %122 = arith.divf %120, %121 : vector<2x16xf32>
    %123 = vector.extract_strided_slice %111 {offsets = [0, 16], sizes = [2, 16], strides = [1, 1]} : vector<2x48xf32> to vector<2x16xf32>
    %124 = vector.extract_strided_slice %114 {offsets = [0, 16], sizes = [2, 16], strides = [1, 1]} : vector<2x48xf32> to vector<2x16xf32>
    %125 = arith.addf %123, %124 : vector<2x16xf32>
    %126 = arith.negf %125 : vector<2x16xf32>
    %127 = math.exp %126 : vector<2x16xf32>
    %cst_46 = arith.constant 1.000000e+00 : f32
    %128 = vector.broadcast %cst_46 : f32 to vector<2x16xf32>
    %129 = arith.addf %128, %127 : vector<2x16xf32>
    %130 = arith.divf %128, %129 : vector<2x16xf32>
    %131 = vector.extract_strided_slice %111 {offsets = [0, 32], sizes = [2, 16], strides = [1, 1]} : vector<2x48xf32> to vector<2x16xf32>
    %132 = vector.extract_strided_slice %114 {offsets = [0, 32], sizes = [2, 16], strides = [1, 1]} : vector<2x48xf32> to vector<2x16xf32>
    %133 = arith.mulf %122, %132 : vector<2x16xf32>
    %134 = arith.addf %131, %133 : vector<2x16xf32>
    %135 = math.tanh %134 : vector<2x16xf32>
    %cst_47 = arith.constant 1.000000e+00 : f32
    %136 = vector.broadcast %cst_47 : f32 to vector<2x16xf32>
    %137 = arith.subf %136, %130 : vector<2x16xf32>
    %138 = arith.mulf %137, %135 : vector<2x16xf32>
    %139 = arith.mulf %130, %106 : vector<2x16xf32>
    %140 = arith.addf %138, %139 : vector<2x16xf32>
    %c0_48 = arith.constant 0 : index
    %c3_49 = arith.constant 3 : index
    %c0_50 = arith.constant 0 : index
    %c0_51 = arith.constant 0 : index
    %141 = vector.load %arg5[%c0_48, %c3_49, %c0_50, %c0_51] : memref<1x8x2x16xf32, #tpu.memory_space<vmem>>, vector<1x1x2x16xf32>
    %142 = vector.shape_cast %141 : vector<1x1x2x16xf32> to vector<2x16xf32>
    %143 = vector.shape_cast %140 : vector<2x16xf32> to vector<1x1x2x16xf32>
    tpu.vector_store %arg5[%c0_48, %c3_49, %c0_50, %c0_51], %143 {strides = array<i32>} : memref<1x8x2x16xf32, #tpu.memory_space<vmem>>, vector<1x1x2x16xf32>,
    %c0_52 = arith.constant 0 : index
    %c4 = arith.constant 4 : index
    %c0_53 = arith.constant 0 : index
    %c0_54 = arith.constant 0 : index
    %144 = vector.load %arg2[%c0_52, %c4, %c0_53, %c0_54] : memref<1x8x2x48xf32, #tpu.memory_space<vmem>>, vector<1x1x2x48xf32>
    %145 = vector.shape_cast %144 : vector<1x1x2x48xf32> to vector<2x48xf32>
    %cst_55 = arith.constant dense<0.000000e+00> : vector<2x48xf32>
    %146 = tpu.matmul %140, %4, %cst_55 {dimension_numbers = #tpu.dot_dimension_numbers<[1], [0], [0], [1], [0, 0, 1, 1], [], []>} : vector<2x16xf32>, vector<16x48xf32>, vector<2x48xf32> -> vector<2x48xf32>
    %147 = vector.broadcast %6 : vector<1x48xf32> to vector<2x48xf32>
    %148 = arith.addf %146, %147 : vector<2x48xf32>
    %149 = vector.extract_strided_slice %145 {offsets = [0, 0], sizes = [2, 16], strides = [1, 1]} : vector<2x48xf32> to vector<2x16xf32>
    %150 = vector.extract_strided_slice %148 {offsets = [0, 0], sizes = [2, 16], strides = [1, 1]} : vector<2x48xf32> to vector<2x16xf32>
    %151 = arith.addf %149, %150 : vector<2x16xf32>
    %152 = arith.negf %151 : vector<2x16xf32>
    %153 = math.exp %152 : vector<2x16xf32>
    %cst_56 = arith.constant 1.000000e+00 : f32
    %154 = vector.broadcast %cst_56 : f32 to vector<2x16xf32>
    %155 = arith.addf %154, %153 : vector<2x16xf32>
    %156 = arith.divf %154, %155 : vector<2x16xf32>
    %157 = vector.extract_strided_slice %145 {offsets = [0, 16], sizes = [2, 16], strides = [1, 1]} : vector<2x48xf32> to vector<2x16xf32>
    %158 = vector.extract_strided_slice %148 {offsets = [0, 16], sizes = [2, 16], strides = [1, 1]} : vector<2x48xf32> to vector<2x16xf32>
    %159 = arith.addf %157, %158 : vector<2x16xf32>
    %160 = arith.negf %159 : vector<2x16xf32>
    %161 = math.exp %160 : vector<2x16xf32>
    %cst_57 = arith.constant 1.000000e+00 : f32
    %162 = vector.broadcast %cst_57 : f32 to vector<2x16xf32>
    %163 = arith.addf %162, %161 : vector<2x16xf32>
    %164 = arith.divf %162, %163 : vector<2x16xf32>
    %165 = vector.extract_strided_slice %145 {offsets = [0, 32], sizes = [2, 16], strides = [1, 1]} : vector<2x48xf32> to vector<2x16xf32>
    %166 = vector.extract_strided_slice %148 {offsets = [0, 32], sizes = [2, 16], strides = [1, 1]} : vector<2x48xf32> to vector<2x16xf32>
    %167 = arith.mulf %156, %166 : vector<2x16xf32>
    %168 = arith.addf %165, %167 : vector<2x16xf32>
    %169 = math.tanh %168 : vector<2x16xf32>
    %cst_58 = arith.constant 1.000000e+00 : f32
    %170 = vector.broadcast %cst_58 : f32 to vector<2x16xf32>
    %171 = arith.subf %170, %164 : vector<2x16xf32>
    %172 = arith.mulf %171, %169 : vector<2x16xf32>
    %173 = arith.mulf %164, %140 : vector<2x16xf32>
    %174 = arith.addf %172, %173 : vector<2x16xf32>
    %c0_59 = arith.constant 0 : index
    %c4_60 = arith.constant 4 : index
    %c0_61 = arith.constant 0 : index
    %c0_62 = arith.constant 0 : index
    %175 = vector.load %arg5[%c0_59, %c4_60, %c0_61, %c0_62] : memref<1x8x2x16xf32, #tpu.memory_space<vmem>>, vector<1x1x2x16xf32>
    %176 = vector.shape_cast %175 : vector<1x1x2x16xf32> to vector<2x16xf32>
    %177 = vector.shape_cast %174 : vector<2x16xf32> to vector<1x1x2x16xf32>
    tpu.vector_store %arg5[%c0_59, %c4_60, %c0_61, %c0_62], %177 {strides = array<i32>} : memref<1x8x2x16xf32, #tpu.memory_space<vmem>>, vector<1x1x2x16xf32>,
    %c0_63 = arith.constant 0 : index
    %c5 = arith.constant 5 : index
    %c0_64 = arith.constant 0 : index
    %c0_65 = arith.constant 0 : index
    %178 = vector.load %arg2[%c0_63, %c5, %c0_64, %c0_65] : memref<1x8x2x48xf32, #tpu.memory_space<vmem>>, vector<1x1x2x48xf32>
    %179 = vector.shape_cast %178 : vector<1x1x2x48xf32> to vector<2x48xf32>
    %cst_66 = arith.constant dense<0.000000e+00> : vector<2x48xf32>
    %180 = tpu.matmul %174, %4, %cst_66 {dimension_numbers = #tpu.dot_dimension_numbers<[1], [0], [0], [1], [0, 0, 1, 1], [], []>} : vector<2x16xf32>, vector<16x48xf32>, vector<2x48xf32> -> vector<2x48xf32>
    %181 = vector.broadcast %6 : vector<1x48xf32> to vector<2x48xf32>
    %182 = arith.addf %180, %181 : vector<2x48xf32>
    %183 = vector.extract_strided_slice %179 {offsets = [0, 0], sizes = [2, 16], strides = [1, 1]} : vector<2x48xf32> to vector<2x16xf32>
    %184 = vector.extract_strided_slice %182 {offsets = [0, 0], sizes = [2, 16], strides = [1, 1]} : vector<2x48xf32> to vector<2x16xf32>
    %185 = arith.addf %183, %184 : vector<2x16xf32>
    %186 = arith.negf %185 : vector<2x16xf32>
    %187 = math.exp %186 : vector<2x16xf32>
    %cst_67 = arith.constant 1.000000e+00 : f32
    %188 = vector.broadcast %cst_67 : f32 to vector<2x16xf32>
    %189 = arith.addf %188, %187 : vector<2x16xf32>
    %190 = arith.divf %188, %189 : vector<2x16xf32>
    %191 = vector.extract_strided_slice %179 {offsets = [0, 16], sizes = [2, 16], strides = [1, 1]} : vector<2x48xf32> to vector<2x16xf32>
    %192 = vector.extract_strided_slice %182 {offsets = [0, 16], sizes = [2, 16], strides = [1, 1]} : vector<2x48xf32> to vector<2x16xf32>
    %193 = arith.addf %191, %192 : vector<2x16xf32>
    %194 = arith.negf %193 : vector<2x16xf32>
    %195 = math.exp %194 : vector<2x16xf32>
    %cst_68 = arith.constant 1.000000e+00 : f32
    %196 = vector.broadcast %cst_68 : f32 to vector<2x16xf32>
    %197 = arith.addf %196, %195 : vector<2x16xf32>
    %198 = arith.divf %196, %197 : vector<2x16xf32>
    %199 = vector.extract_strided_slice %179 {offsets = [0, 32], sizes = [2, 16], strides = [1, 1]} : vector<2x48xf32> to vector<2x16xf32>
    %200 = vector.extract_strided_slice %182 {offsets = [0, 32], sizes = [2, 16], strides = [1, 1]} : vector<2x48xf32> to vector<2x16xf32>
    %201 = arith.mulf %190, %200 : vector<2x16xf32>
    %202 = arith.addf %199, %201 : vector<2x16xf32>
    %203 = math.tanh %202 : vector<2x16xf32>
    %cst_69 = arith.constant 1.000000e+00 : f32
    %204 = vector.broadcast %cst_69 : f32 to vector<2x16xf32>
    %205 = arith.subf %204, %198 : vector<2x16xf32>
    %206 = arith.mulf %205, %203 : vector<2x16xf32>
    %207 = arith.mulf %198, %174 : vector<2x16xf32>
    %208 = arith.addf %206, %207 : vector<2x16xf32>
    %c0_70 = arith.constant 0 : index
    %c5_71 = arith.constant 5 : index
    %c0_72 = arith.constant 0 : index
    %c0_73 = arith.constant 0 : index
    %209 = vector.load %arg5[%c0_70, %c5_71, %c0_72, %c0_73] : memref<1x8x2x16xf32, #tpu.memory_space<vmem>>, vector<1x1x2x16xf32>
    %210 = vector.shape_cast %209 : vector<1x1x2x16xf32> to vector<2x16xf32>
    %211 = vector.shape_cast %208 : vector<2x16xf32> to vector<1x1x2x16xf32>
    tpu.vector_store %arg5[%c0_70, %c5_71, %c0_72, %c0_73], %211 {strides = array<i32>} : memref<1x8x2x16xf32, #tpu.memory_space<vmem>>, vector<1x1x2x16xf32>,
    %c0_74 = arith.constant 0 : index
    %c6 = arith.constant 6 : index
    %c0_75 = arith.constant 0 : index
    %c0_76 = arith.constant 0 : index
    %212 = vector.load %arg2[%c0_74, %c6, %c0_75, %c0_76] : memref<1x8x2x48xf32, #tpu.memory_space<vmem>>, vector<1x1x2x48xf32>
    %213 = vector.shape_cast %212 : vector<1x1x2x48xf32> to vector<2x48xf32>
    %cst_77 = arith.constant dense<0.000000e+00> : vector<2x48xf32>
    %214 = tpu.matmul %208, %4, %cst_77 {dimension_numbers = #tpu.dot_dimension_numbers<[1], [0], [0], [1], [0, 0, 1, 1], [], []>} : vector<2x16xf32>, vector<16x48xf32>, vector<2x48xf32> -> vector<2x48xf32>
    %215 = vector.broadcast %6 : vector<1x48xf32> to vector<2x48xf32>
    %216 = arith.addf %214, %215 : vector<2x48xf32>
    %217 = vector.extract_strided_slice %213 {offsets = [0, 0], sizes = [2, 16], strides = [1, 1]} : vector<2x48xf32> to vector<2x16xf32>
    %218 = vector.extract_strided_slice %216 {offsets = [0, 0], sizes = [2, 16], strides = [1, 1]} : vector<2x48xf32> to vector<2x16xf32>
    %219 = arith.addf %217, %218 : vector<2x16xf32>
    %220 = arith.negf %219 : vector<2x16xf32>
    %221 = math.exp %220 : vector<2x16xf32>
    %cst_78 = arith.constant 1.000000e+00 : f32
    %222 = vector.broadcast %cst_78 : f32 to vector<2x16xf32>
    %223 = arith.addf %222, %221 : vector<2x16xf32>
    %224 = arith.divf %222, %223 : vector<2x16xf32>
    %225 = vector.extract_strided_slice %213 {offsets = [0, 16], sizes = [2, 16], strides = [1, 1]} : vector<2x48xf32> to vector<2x16xf32>
    %226 = vector.extract_strided_slice %216 {offsets = [0, 16], sizes = [2, 16], strides = [1, 1]} : vector<2x48xf32> to vector<2x16xf32>
    %227 = arith.addf %225, %226 : vector<2x16xf32>
    %228 = arith.negf %227 : vector<2x16xf32>
    %229 = math.exp %228 : vector<2x16xf32>
    %cst_79 = arith.constant 1.000000e+00 : f32
    %230 = vector.broadcast %cst_79 : f32 to vector<2x16xf32>
    %231 = arith.addf %230, %229 : vector<2x16xf32>
    %232 = arith.divf %230, %231 : vector<2x16xf32>
    %233 = vector.extract_strided_slice %213 {offsets = [0, 32], sizes = [2, 16], strides = [1, 1]} : vector<2x48xf32> to vector<2x16xf32>
    %234 = vector.extract_strided_slice %216 {offsets = [0, 32], sizes = [2, 16], strides = [1, 1]} : vector<2x48xf32> to vector<2x16xf32>
    %235 = arith.mulf %224, %234 : vector<2x16xf32>
    %236 = arith.addf %233, %235 : vector<2x16xf32>
    %237 = math.tanh %236 : vector<2x16xf32>
    %cst_80 = arith.constant 1.000000e+00 : f32
    %238 = vector.broadcast %cst_80 : f32 to vector<2x16xf32>
    %239 = arith.subf %238, %232 : vector<2x16xf32>
    %240 = arith.mulf %239, %237 : vector<2x16xf32>
    %241 = arith.mulf %232, %208 : vector<2x16xf32>
    %242 = arith.addf %240, %241 : vector<2x16xf32>
    %c0_81 = arith.constant 0 : index
    %c6_82 = arith.constant 6 : index
    %c0_83 = arith.constant 0 : index
    %c0_84 = arith.constant 0 : index
    %243 = vector.load %arg5[%c0_81, %c6_82, %c0_83, %c0_84] : memref<1x8x2x16xf32, #tpu.memory_space<vmem>>, vector<1x1x2x16xf32>
    %244 = vector.shape_cast %243 : vector<1x1x2x16xf32> to vector<2x16xf32>
    %245 = vector.shape_cast %242 : vector<2x16xf32> to vector<1x1x2x16xf32>
    tpu.vector_store %arg5[%c0_81, %c6_82, %c0_83, %c0_84], %245 {strides = array<i32>} : memref<1x8x2x16xf32, #tpu.memory_space<vmem>>, vector<1x1x2x16xf32>,
    %c0_85 = arith.constant 0 : index
    %c7 = arith.constant 7 : index
    %c0_86 = arith.constant 0 : index
    %c0_87 = arith.constant 0 : index
    %246 = vector.load %arg2[%c0_85, %c7, %c0_86, %c0_87] : memref<1x8x2x48xf32, #tpu.memory_space<vmem>>, vector<1x1x2x48xf32>
    %247 = vector.shape_cast %246 : vector<1x1x2x48xf32> to vector<2x48xf32>
    %cst_88 = arith.constant dense<0.000000e+00> : vector<2x48xf32>
    %248 = tpu.matmul %242, %4, %cst_88 {dimension_numbers = #tpu.dot_dimension_numbers<[1], [0], [0], [1], [0, 0, 1, 1], [], []>} : vector<2x16xf32>, vector<16x48xf32>, vector<2x48xf32> -> vector<2x48xf32>
    %249 = vector.broadcast %6 : vector<1x48xf32> to vector<2x48xf32>
    %250 = arith.addf %248, %249 : vector<2x48xf32>
    %251 = vector.extract_strided_slice %247 {offsets = [0, 0], sizes = [2, 16], strides = [1, 1]} : vector<2x48xf32> to vector<2x16xf32>
    %252 = vector.extract_strided_slice %250 {offsets = [0, 0], sizes = [2, 16], strides = [1, 1]} : vector<2x48xf32> to vector<2x16xf32>
    %253 = arith.addf %251, %252 : vector<2x16xf32>
    %254 = arith.negf %253 : vector<2x16xf32>
    %255 = math.exp %254 : vector<2x16xf32>
    %cst_89 = arith.constant 1.000000e+00 : f32
    %256 = vector.broadcast %cst_89 : f32 to vector<2x16xf32>
    %257 = arith.addf %256, %255 : vector<2x16xf32>
    %258 = arith.divf %256, %257 : vector<2x16xf32>
    %259 = vector.extract_strided_slice %247 {offsets = [0, 16], sizes = [2, 16], strides = [1, 1]} : vector<2x48xf32> to vector<2x16xf32>
    %260 = vector.extract_strided_slice %250 {offsets = [0, 16], sizes = [2, 16], strides = [1, 1]} : vector<2x48xf32> to vector<2x16xf32>
    %261 = arith.addf %259, %260 : vector<2x16xf32>
    %262 = arith.negf %261 : vector<2x16xf32>
    %263 = math.exp %262 : vector<2x16xf32>
    %cst_90 = arith.constant 1.000000e+00 : f32
    %264 = vector.broadcast %cst_90 : f32 to vector<2x16xf32>
    %265 = arith.addf %264, %263 : vector<2x16xf32>
    %266 = arith.divf %264, %265 : vector<2x16xf32>
    %267 = vector.extract_strided_slice %247 {offsets = [0, 32], sizes = [2, 16], strides = [1, 1]} : vector<2x48xf32> to vector<2x16xf32>
    %268 = vector.extract_strided_slice %250 {offsets = [0, 32], sizes = [2, 16], strides = [1, 1]} : vector<2x48xf32> to vector<2x16xf32>
    %269 = arith.mulf %258, %268 : vector<2x16xf32>
    %270 = arith.addf %267, %269 : vector<2x16xf32>
    %271 = math.tanh %270 : vector<2x16xf32>
    %cst_91 = arith.constant 1.000000e+00 : f32
    %272 = vector.broadcast %cst_91 : f32 to vector<2x16xf32>
    %273 = arith.subf %272, %266 : vector<2x16xf32>
    %274 = arith.mulf %273, %271 : vector<2x16xf32>
    %275 = arith.mulf %266, %242 : vector<2x16xf32>
    %276 = arith.addf %274, %275 : vector<2x16xf32>
    %c0_92 = arith.constant 0 : index
    %c7_93 = arith.constant 7 : index
    %c0_94 = arith.constant 0 : index
    %c0_95 = arith.constant 0 : index
    %277 = vector.load %arg5[%c0_92, %c7_93, %c0_94, %c0_95] : memref<1x8x2x16xf32, #tpu.memory_space<vmem>>, vector<1x1x2x16xf32>
    %278 = vector.shape_cast %277 : vector<1x1x2x16xf32> to vector<2x16xf32>
    %279 = vector.shape_cast %276 : vector<2x16xf32> to vector<1x1x2x16xf32>
    tpu.vector_store %arg5[%c0_92, %c7_93, %c0_94, %c0_95], %279 {strides = array<i32>} : memref<1x8x2x16xf32, #tpu.memory_space<vmem>>, vector<1x1x2x16xf32>,
    %c0_96 = arith.constant 0 : index
    %c0_97 = arith.constant 0 : index
    %280 = vector.load %arg6[%c0_96, %c0_97] : memref<2x16xf32, #tpu.memory_space<vmem>>, vector<2x16xf32>
    tpu.vector_store %arg6[%c0_96, %c0_97], %276 {strides = array<i32>} : memref<2x16xf32, #tpu.memory_space<vmem>>, vector<2x16xf32>,
    return
  }
  func.func @transform_0(%arg0: i32, %arg1: i32) -> (i32, i32, i32, i32) {
    %c0_i32 = arith.constant 0 : i32
    %c0_i32_0 = arith.constant 0 : i32
    %c0_i32_1 = arith.constant 0 : i32
    return %arg0, %arg1, %c0_i32, %c0_i32_0 : i32, i32, i32, i32
  }
  func.func @transform_1(%arg0: i32, %arg1: i32) -> (i32, i32, i32) {
    %c0_i32 = arith.constant 0 : i32
    %c0_i32_0 = arith.constant 0 : i32
    %c0_i32_1 = arith.constant 0 : i32
    return %arg0, %c0_i32, %c0_i32_0 : i32, i32, i32
  }
  func.func @transform_2(%arg0: i32, %arg1: i32) -> (i32, i32, i32) {
    %c0_i32 = arith.constant 0 : i32
    %c0_i32_0 = arith.constant 0 : i32
    %c0_i32_1 = arith.constant 0 : i32
    return %arg0, %c0_i32, %c0_i32_0 : i32, i32, i32
  }
  func.func @transform_3(%arg0: i32, %arg1: i32) -> (i32, i32, i32, i32) {
    %c0_i32 = arith.constant 0 : i32
    %c0_i32_0 = arith.constant 0 : i32
    %c0_i32_1 = arith.constant 0 : i32
    return %arg0, %arg1, %c0_i32, %c0_i32_0 : i32, i32, i32, i32
  }
}

module attributes {stable_mosaic.version = 11 : i64} {
  func.func @_matmul_rows_kernel(%arg0: i32, %arg1: memref<16x48xf32, #tpu.memory_space<vmem>>, %arg2: memref<48x32xbf16, #tpu.memory_space<vmem>>, %arg3: memref<16x32xf32, #tpu.memory_space<vmem>>) attributes {dimension_semantics = [#tpu.dimension_semantics<parallel>], iteration_bounds = array<i64: 1>, scalar_prefetch = 0 : i64, scratch_operands = 0 : i64, tpu.core_type = #tpu.core_type<tc>, window_params = [{transform_indices = @transform_0, window_bounds = array<i64: 16, 48>}, {pipeline_mode = #tpu.pipeline_mode<synchronous>, transform_indices = @transform_1, window_bounds = array<i64: 48, 32>}, {transform_indices = @transform_2, window_bounds = array<i64: 16, 32>}]} {
    %c0 = arith.constant 0 : index
    %c0_0 = arith.constant 0 : index
    %0 = vector.load %arg1[%c0, %c0_0] : memref<16x48xf32, #tpu.memory_space<vmem>>, vector<16x48xf32>
    %1 = arith.truncf %0 : vector<16x48xf32> to vector<16x48xbf16>
    %c0_1 = arith.constant 0 : index
    %c0_2 = arith.constant 0 : index
    %2 = vector.load %arg2[%c0_1, %c0_2] : memref<48x32xbf16, #tpu.memory_space<vmem>>, vector<48x32xbf16>
    %cst = arith.constant dense<0.000000e+00> : vector<16x32xf32>
    %3 = tpu.matmul %1, %2, %cst {dimension_numbers = #tpu.dot_dimension_numbers<[1], [0], [0], [1], [0, 0, 1, 1], [], []>} : vector<16x48xbf16>, vector<48x32xbf16>, vector<16x32xf32> -> vector<16x32xf32>
    %c0_3 = arith.constant 0 : index
    %c0_4 = arith.constant 0 : index
    %4 = vector.load %arg3[%c0_3, %c0_4] : memref<16x32xf32, #tpu.memory_space<vmem>>, vector<16x32xf32>
    tpu.vector_store %arg3[%c0_3, %c0_4], %3 {strides = array<i32>} : memref<16x32xf32, #tpu.memory_space<vmem>>, vector<16x32xf32>,
    return
  }
  func.func @transform_0(%arg0: i32) -> (i32, i32) {
    %c0_i32 = arith.constant 0 : i32
    %c0_i32_0 = arith.constant 0 : i32
    return %arg0, %c0_i32 : i32, i32
  }
  func.func @transform_1(%arg0: i32) -> (i32, i32) {
    %c0_i32 = arith.constant 0 : i32
    %c0_i32_0 = arith.constant 0 : i32
    %c0_i32_1 = arith.constant 0 : i32
    return %c0_i32, %c0_i32_0 : i32, i32
  }
  func.func @transform_2(%arg0: i32) -> (i32, i32) {
    %c0_i32 = arith.constant 0 : i32
    %c0_i32_0 = arith.constant 0 : i32
    return %arg0, %c0_i32 : i32, i32
  }
}

module attributes {stable_mosaic.version = 11 : i64} {
  func.func @_decoder_kernel(%arg0: i32, %arg1: memref<4x2x16xf32, #tpu.memory_space<vmem>>, %arg2: memref<2x8x48xf32, #tpu.memory_space<vmem>>, %arg3: memref<2x8x32xf32, #tpu.memory_space<vmem>>, %arg4: memref<2x8xf32, #tpu.memory_space<vmem>>, %arg5: memref<16x64xf32, #tpu.memory_space<vmem>>, %arg6: memref<1x64xf32, #tpu.memory_space<vmem>>, %arg7: memref<64x64xf32, #tpu.memory_space<vmem>>, %arg8: memref<1x64xf32, #tpu.memory_space<vmem>>, %arg9: memref<48x96xf32, #tpu.memory_space<vmem>>, %arg10: memref<64x96xf32, #tpu.memory_space<vmem>>, %arg11: memref<32x96xf32, #tpu.memory_space<vmem>>, %arg12: memref<1x96xf32, #tpu.memory_space<vmem>>, %arg13: memref<1x96xf32, #tpu.memory_space<vmem>>, %arg14: memref<32x32xf32, #tpu.memory_space<vmem>>, %arg15: memref<1x32xf32, #tpu.memory_space<vmem>>, %arg16: memref<31x32xf32, #tpu.memory_space<vmem>>, %arg17: memref<1x1x32xf32, #tpu.memory_space<vmem>>, %arg18: memref<1x1x32xf32, #tpu.memory_space<vmem>>, %arg19: memref<48x32xf32, #tpu.memory_space<vmem>>, %arg20: memref<32x32xf32, #tpu.memory_space<vmem>>, %arg21: memref<1x32xf32, #tpu.memory_space<vmem>>, %arg22: memref<32x128xf32, #tpu.memory_space<vmem>>, %arg23: memref<32x128xf32, #tpu.memory_space<vmem>>, %arg24: memref<1x128xf32, #tpu.memory_space<vmem>>, %arg25: memref<32x128xf32, #tpu.memory_space<vmem>>, %arg26: memref<32x128xf32, #tpu.memory_space<vmem>>, %arg27: memref<1x128xf32, #tpu.memory_space<vmem>>, %arg28: memref<32x32xf32, #tpu.memory_space<vmem>>, %arg29: memref<32x1xf32, #tpu.memory_space<vmem>>, %arg30: memref<48x1xf32, #tpu.memory_space<vmem>>, %arg31: memref<1x1xf32, #tpu.memory_space<vmem>>, %arg32: memref<4x2x32xf32, #tpu.memory_space<vmem>>, %arg33: memref<4x2x8xf32, #tpu.memory_space<vmem>>, %arg34: memref<4x2x1xf32, #tpu.memory_space<vmem>>, %arg35: memref<2x32xf32, #tpu.memory_space<vmem>>, %arg36: memref<2x32xf32, #tpu.memory_space<vmem>>, %arg37: memref<2x32xf32, #tpu.memory_space<vmem>>, %arg38: memref<2x32xf32, #tpu.memory_space<vmem>>, %arg39: memref<2x32xf32, #tpu.memory_space<vmem>>, %arg40: memref<2x48xf32, #tpu.memory_space<vmem>>, %arg41: memref<2x8xf32, #tpu.memory_space<vmem>>) attributes {dimension_semantics = [#tpu.dimension_semantics<arbitrary>], iteration_bounds = array<i64: 1>, scalar_prefetch = 0 : i64, scratch_operands = 7 : i64, tpu.core_type = #tpu.core_type<tc>, window_params = [{transform_indices = @transform_0, window_bounds = array<i64: 4, 2, 16>}, {pipeline_mode = #tpu.pipeline_mode<synchronous>, transform_indices = @transform_1, window_bounds = array<i64: 2, 8, 48>}, {pipeline_mode = #tpu.pipeline_mode<synchronous>, transform_indices = @transform_2, window_bounds = array<i64: 2, 8, 32>}, {pipeline_mode = #tpu.pipeline_mode<synchronous>, transform_indices = @transform_3, window_bounds = array<i64: 2, 8>}, {pipeline_mode = #tpu.pipeline_mode<synchronous>, transform_indices = @transform_4, window_bounds = array<i64: 16, 64>}, {pipeline_mode = #tpu.pipeline_mode<synchronous>, transform_indices = @transform_5, window_bounds = array<i64: 1, 64>}, {pipeline_mode = #tpu.pipeline_mode<synchronous>, transform_indices = @transform_6, window_bounds = array<i64: 64, 64>}, {pipeline_mode = #tpu.pipeline_mode<synchronous>, transform_indices = @transform_7, window_bounds = array<i64: 1, 64>}, {pipeline_mode = #tpu.pipeline_mode<synchronous>, transform_indices = @transform_8, window_bounds = array<i64: 48, 96>}, {pipeline_mode = #tpu.pipeline_mode<synchronous>, transform_indices = @transform_9, window_bounds = array<i64: 64, 96>}, {pipeline_mode = #tpu.pipeline_mode<synchronous>, transform_indices = @transform_10, window_bounds = array<i64: 32, 96>}, {pipeline_mode = #tpu.pipeline_mode<synchronous>, transform_indices = @transform_11, window_bounds = array<i64: 1, 96>}, {pipeline_mode = #tpu.pipeline_mode<synchronous>, transform_indices = @transform_12, window_bounds = array<i64: 1, 96>}, {pipeline_mode = #tpu.pipeline_mode<synchronous>, transform_indices = @transform_13, window_bounds = array<i64: 32, 32>}, {pipeline_mode = #tpu.pipeline_mode<synchronous>, transform_indices = @transform_14, window_bounds = array<i64: 1, 32>}, {pipeline_mode = #tpu.pipeline_mode<synchronous>, transform_indices = @transform_15, window_bounds = array<i64: 31, 32>}, {pipeline_mode = #tpu.pipeline_mode<synchronous>, transform_indices = @transform_16, window_bounds = array<i64: 1, 1, 32>}, {pipeline_mode = #tpu.pipeline_mode<synchronous>, transform_indices = @transform_17, window_bounds = array<i64: 1, 1, 32>}, {pipeline_mode = #tpu.pipeline_mode<synchronous>, transform_indices = @transform_18, window_bounds = array<i64: 48, 32>}, {pipeline_mode = #tpu.pipeline_mode<synchronous>, transform_indices = @transform_19, window_bounds = array<i64: 32, 32>}, {pipeline_mode = #tpu.pipeline_mode<synchronous>, transform_indices = @transform_20, window_bounds = array<i64: 1, 32>}, {pipeline_mode = #tpu.pipeline_mode<synchronous>, transform_indices = @transform_21, window_bounds = array<i64: 32, 128>}, {pipeline_mode = #tpu.pipeline_mode<synchronous>, transform_indices = @transform_22, window_bounds = array<i64: 32, 128>}, {pipeline_mode = #tpu.pipeline_mode<synchronous>, transform_indices = @transform_23, window_bounds = array<i64: 1, 128>}, {pipeline_mode = #tpu.pipeline_mode<synchronous>, transform_indices = @transform_24, window_bounds = array<i64: 32, 128>}, {pipeline_mode = #tpu.pipeline_mode<synchronous>, transform_indices = @transform_25, window_bounds = array<i64: 32, 128>}, {pipeline_mode = #tpu.pipeline_mode<synchronous>, transform_indices = @transform_26, window_bounds = array<i64: 1, 128>}, {pipeline_mode = #tpu.pipeline_mode<synchronous>, transform_indices = @transform_27, window_bounds = array<i64: 32, 32>}, {pipeline_mode = #tpu.pipeline_mode<synchronous>, transform_indices = @transform_28, window_bounds = array<i64: 32, 1>}, {pipeline_mode = #tpu.pipeline_mode<synchronous>, transform_indices = @transform_29, window_bounds = array<i64: 48, 1>}, {pipeline_mode = #tpu.pipeline_mode<synchronous>, transform_indices = @transform_30, window_bounds = array<i64: 1, 1>}, {transform_indices = @transform_31, window_bounds = array<i64: 4, 2, 32>}, {transform_indices = @transform_32, window_bounds = array<i64: 4, 2, 8>}, {transform_indices = @transform_33, window_bounds = array<i64: 4, 2, 1>}]} {
    %c0_i32 = arith.constant 0 : i32
    %0 = arith.cmpi eq, %arg0, %c0_i32 : i32
    %1 = arith.extui %0 : i1 to i32
    %c0_i32_0 = arith.constant 0 : i32
    %2 = arith.cmpi ne, %1, %c0_i32_0 : i32
    scf.if %2 {
      %cst = arith.constant 0.000000e+00 : f32
      %7 = vector.broadcast %cst : f32 to vector<2x32xf32>
      %c0_10 = arith.constant 0 : index
      %c0_11 = arith.constant 0 : index
      %8 = vector.load %arg35[%c0_10, %c0_11] : memref<2x32xf32, #tpu.memory_space<vmem>>, vector<2x32xf32>
      tpu.vector_store %arg35[%c0_10, %c0_11], %7 {strides = array<i32>} : memref<2x32xf32, #tpu.memory_space<vmem>>, vector<2x32xf32>,
      %cst_12 = arith.constant 0.000000e+00 : f32
      %9 = vector.broadcast %cst_12 : f32 to vector<2x32xf32>
      %c0_13 = arith.constant 0 : index
      %c0_14 = arith.constant 0 : index
      %10 = vector.load %arg36[%c0_13, %c0_14] : memref<2x32xf32, #tpu.memory_space<vmem>>, vector<2x32xf32>
      tpu.vector_store %arg36[%c0_13, %c0_14], %9 {strides = array<i32>} : memref<2x32xf32, #tpu.memory_space<vmem>>, vector<2x32xf32>,
      %cst_15 = arith.constant 0.000000e+00 : f32
      %11 = vector.broadcast %cst_15 : f32 to vector<2x32xf32>
      %c0_16 = arith.constant 0 : index
      %c0_17 = arith.constant 0 : index
      %12 = vector.load %arg37[%c0_16, %c0_17] : memref<2x32xf32, #tpu.memory_space<vmem>>, vector<2x32xf32>
      tpu.vector_store %arg37[%c0_16, %c0_17], %11 {strides = array<i32>} : memref<2x32xf32, #tpu.memory_space<vmem>>, vector<2x32xf32>,
      %cst_18 = arith.constant 0.000000e+00 : f32
      %13 = vector.broadcast %cst_18 : f32 to vector<2x32xf32>
      %c0_19 = arith.constant 0 : index
      %c0_20 = arith.constant 0 : index
      %14 = vector.load %arg38[%c0_19, %c0_20] : memref<2x32xf32, #tpu.memory_space<vmem>>, vector<2x32xf32>
      tpu.vector_store %arg38[%c0_19, %c0_20], %13 {strides = array<i32>} : memref<2x32xf32, #tpu.memory_space<vmem>>, vector<2x32xf32>,
      %cst_21 = arith.constant 0.000000e+00 : f32
      %15 = vector.broadcast %cst_21 : f32 to vector<2x32xf32>
      %c0_22 = arith.constant 0 : index
      %c0_23 = arith.constant 0 : index
      %16 = vector.load %arg39[%c0_22, %c0_23] : memref<2x32xf32, #tpu.memory_space<vmem>>, vector<2x32xf32>
      tpu.vector_store %arg39[%c0_22, %c0_23], %15 {strides = array<i32>} : memref<2x32xf32, #tpu.memory_space<vmem>>, vector<2x32xf32>,
      %cst_24 = arith.constant 0.000000e+00 : f32
      %17 = vector.broadcast %cst_24 : f32 to vector<2x48xf32>
      %c0_25 = arith.constant 0 : index
      %c0_26 = arith.constant 0 : index
      %18 = vector.load %arg40[%c0_25, %c0_26] : memref<2x48xf32, #tpu.memory_space<vmem>>, vector<2x48xf32>
      tpu.vector_store %arg40[%c0_25, %c0_26], %17 {strides = array<i32>} : memref<2x48xf32, #tpu.memory_space<vmem>>, vector<2x48xf32>,
      %cst_27 = arith.constant 0.000000e+00 : f32
      %19 = vector.broadcast %cst_27 : f32 to vector<2x8xf32>
      %c0_28 = arith.constant 0 : index
      %c0_29 = arith.constant 0 : index
      %20 = vector.load %arg41[%c0_28, %c0_29] : memref<2x8xf32, #tpu.memory_space<vmem>>, vector<2x8xf32>
      tpu.vector_store %arg41[%c0_28, %c0_29], %19 {strides = array<i32>} : memref<2x8xf32, #tpu.memory_space<vmem>>, vector<2x8xf32>,
    } else {
    }
    %c0 = arith.constant 0 : index
    %c0_1 = arith.constant 0 : index
    %c0_2 = arith.constant 0 : index
    %3 = vector.load %arg2[%c0, %c0_1, %c0_2] : memref<2x8x48xf32, #tpu.memory_space<vmem>>, vector<2x8x48xf32>
    %c0_3 = arith.constant 0 : index
    %c0_4 = arith.constant 0 : index
    %c0_5 = arith.constant 0 : index
    %4 = vector.load %arg3[%c0_3, %c0_4, %c0_5] : memref<2x8x32xf32, #tpu.memory_space<vmem>>, vector<2x8x32xf32>
    %c0_6 = arith.constant 0 : index
    %c0_7 = arith.constant 0 : index
    %5 = vector.load %arg4[%c0_6, %c0_7] : memref<2x8xf32, #tpu.memory_space<vmem>>, vector<2x8xf32>
    %c0_i32_8 = arith.constant 0 : i32
    %c4_i32 = arith.constant 4 : i32
    %6 = arith.addi %c0_i32_8, %c4_i32 : i32
    %c1_i32 = arith.constant 1 : i32
    scf.for %arg42 = %c0_i32_8 to %6 step %c1_i32  : i32 {
      %c1_i32_10 = arith.constant 1 : i32
      %7 = arith.muli %arg42, %c1_i32_10 : i32
      %c0_i32_11 = arith.constant 0 : i32
      %8 = arith.addi %c0_i32_11, %7 : i32
      %9 = arith.index_cast %8 : i32 to index
      %c0_12 = arith.constant 0 : index
      %c0_13 = arith.constant 0 : index
      %10 = vector.load %arg1[%9, %c0_12, %c0_13] : memref<4x2x16xf32, #tpu.memory_space<vmem>>, vector<1x2x16xf32>
      %11 = vector.shape_cast %10 : vector<1x2x16xf32> to vector<2x16xf32>
      %c0_14 = arith.constant 0 : index
      %c0_15 = arith.constant 0 : index
      %12 = vector.load %arg5[%c0_14, %c0_15] : memref<16x64xf32, #tpu.memory_space<vmem>>, vector<16x64xf32>
      %cst = arith.constant dense<0.000000e+00> : vector<2x64xf32>
      %13 = tpu.matmul %11, %12, %cst {dimension_numbers = #tpu.dot_dimension_numbers<[1], [0], [0], [1], [0, 0, 1, 1], [], []>} : vector<2x16xf32>, vector<16x64xf32>, vector<2x64xf32> -> vector<2x64xf32>
      %c0_16 = arith.constant 0 : index
      %c0_17 = arith.constant 0 : index
      %14 = vector.load %arg6[%c0_16, %c0_17] : memref<1x64xf32, #tpu.memory_space<vmem>>, vector<1x64xf32>
      %15 = vector.broadcast %14 : vector<1x64xf32> to vector<2x64xf32>
      %16 = arith.addf %13, %15 : vector<2x64xf32>
      %cst_18 = arith.constant 0.000000e+00 : f32
      %17 = vector.broadcast %cst_18 : f32 to vector<2x64xf32>
      %18 = arith.maximumf %16, %17 : vector<2x64xf32>
      %c0_19 = arith.constant 0 : index
      %c0_20 = arith.constant 0 : index
      %19 = vector.load %arg7[%c0_19, %c0_20] : memref<64x64xf32, #tpu.memory_space<vmem>>, vector<64x64xf32>
      %cst_21 = arith.constant dense<0.000000e+00> : vector<2x64xf32>
      %20 = tpu.matmul %18, %19, %cst_21 {dimension_numbers = #tpu.dot_dimension_numbers<[1], [0], [0], [1], [0, 0, 1, 1], [], []>} : vector<2x64xf32>, vector<64x64xf32>, vector<2x64xf32> -> vector<2x64xf32>
      %c0_22 = arith.constant 0 : index
      %c0_23 = arith.constant 0 : index
      %21 = vector.load %arg8[%c0_22, %c0_23] : memref<1x64xf32, #tpu.memory_space<vmem>>, vector<1x64xf32>
      %22 = vector.broadcast %21 : vector<1x64xf32> to vector<2x64xf32>
      %23 = arith.addf %20, %22 : vector<2x64xf32>
      %cst_24 = arith.constant 0.000000e+00 : f32
      %24 = vector.broadcast %cst_24 : f32 to vector<2x64xf32>
      %25 = arith.maximumf %23, %24 : vector<2x64xf32>
      %c0_25 = arith.constant 0 : index
      %c0_26 = arith.constant 0 : index
      %26 = vector.load %arg35[%c0_25, %c0_26] : memref<2x32xf32, #tpu.memory_space<vmem>>, vector<2x32xf32>
      %c0_27 = arith.constant 0 : index
      %c0_28 = arith.constant 0 : index
      %27 = vector.load %arg40[%c0_27, %c0_28] : memref<2x48xf32, #tpu.memory_space<vmem>>, vector<2x48xf32>
      %c0_29 = arith.constant 0 : index
      %c0_30 = arith.constant 0 : index
      %28 = vector.load %arg9[%c0_29, %c0_30] : memref<48x96xf32, #tpu.memory_space<vmem>>, vector<48x96xf32>
      %cst_31 = arith.constant dense<0.000000e+00> : vector<2x96xf32>
      %29 = tpu.matmul %27, %28, %cst_31 {dimension_numbers = #tpu.dot_dimension_numbers<[1], [0], [0], [1], [0, 0, 1, 1], [], []>} : vector<2x48xf32>, vector<48x96xf32>, vector<2x96xf32> -> vector<2x96xf32>
      %c0_32 = arith.constant 0 : index
      %c0_33 = arith.constant 0 : index
      %30 = vector.load %arg10[%c0_32, %c0_33] : memref<64x96xf32, #tpu.memory_space<vmem>>, vector<64x96xf32>
      %cst_34 = arith.constant dense<0.000000e+00> : vector<2x96xf32>
      %31 = tpu.matmul %25, %30, %cst_34 {dimension_numbers = #tpu.dot_dimension_numbers<[1], [0], [0], [1], [0, 0, 1, 1], [], []>} : vector<2x64xf32>, vector<64x96xf32>, vector<2x96xf32> -> vector<2x96xf32>
      %32 = arith.addf %29, %31 : vector<2x96xf32>
      %c0_35 = arith.constant 0 : index
      %c0_36 = arith.constant 0 : index
      %33 = vector.load %arg12[%c0_35, %c0_36] : memref<1x96xf32, #tpu.memory_space<vmem>>, vector<1x96xf32>
      %34 = vector.broadcast %33 : vector<1x96xf32> to vector<2x96xf32>
      %35 = arith.addf %32, %34 : vector<2x96xf32>
      %c0_37 = arith.constant 0 : index
      %c0_38 = arith.constant 0 : index
      %36 = vector.load %arg11[%c0_37, %c0_38] : memref<32x96xf32, #tpu.memory_space<vmem>>, vector<32x96xf32>
      %cst_39 = arith.constant dense<0.000000e+00> : vector<2x96xf32>
      %37 = tpu.matmul %26, %36, %cst_39 {dimension_numbers = #tpu.dot_dimension_numbers<[1], [0], [0], [1], [0, 0, 1, 1], [], []>} : vector<2x32xf32>, vector<32x96xf32>, vector<2x96xf32> -> vector<2x96xf32>
      %c0_40 = arith.constant 0 : index
      %c0_41 = arith.constant 0 : index
      %38 = vector.load %arg13[%c0_40, %c0_41] : memref<1x96xf32, #tpu.memory_space<vmem>>, vector<1x96xf32>
      %39 = vector.broadcast %38 : vector<1x96xf32> to vector<2x96xf32>
      %40 = arith.addf %37, %39 : vector<2x96xf32>
      %41 = vector.extract_strided_slice %35 {offsets = [0, 0], sizes = [2, 32], strides = [1, 1]} : vector<2x96xf32> to vector<2x32xf32>
      %42 = vector.extract_strided_slice %40 {offsets = [0, 0], sizes = [2, 32], strides = [1, 1]} : vector<2x96xf32> to vector<2x32xf32>
      %43 = arith.addf %41, %42 : vector<2x32xf32>
      %44 = arith.negf %43 : vector<2x32xf32>
      %45 = math.exp %44 : vector<2x32xf32>
      %cst_42 = arith.constant 1.000000e+00 : f32
      %46 = vector.broadcast %cst_42 : f32 to vector<2x32xf32>
      %47 = arith.addf %46, %45 : vector<2x32xf32>
      %48 = arith.divf %46, %47 : vector<2x32xf32>
      %49 = vector.extract_strided_slice %35 {offsets = [0, 32], sizes = [2, 32], strides = [1, 1]} : vector<2x96xf32> to vector<2x32xf32>
      %50 = vector.extract_strided_slice %40 {offsets = [0, 32], sizes = [2, 32], strides = [1, 1]} : vector<2x96xf32> to vector<2x32xf32>
      %51 = arith.addf %49, %50 : vector<2x32xf32>
      %52 = arith.negf %51 : vector<2x32xf32>
      %53 = math.exp %52 : vector<2x32xf32>
      %cst_43 = arith.constant 1.000000e+00 : f32
      %54 = vector.broadcast %cst_43 : f32 to vector<2x32xf32>
      %55 = arith.addf %54, %53 : vector<2x32xf32>
      %56 = arith.divf %54, %55 : vector<2x32xf32>
      %57 = vector.extract_strided_slice %35 {offsets = [0, 64], sizes = [2, 32], strides = [1, 1]} : vector<2x96xf32> to vector<2x32xf32>
      %58 = vector.extract_strided_slice %40 {offsets = [0, 64], sizes = [2, 32], strides = [1, 1]} : vector<2x96xf32> to vector<2x32xf32>
      %59 = arith.mulf %48, %58 : vector<2x32xf32>
      %60 = arith.addf %57, %59 : vector<2x32xf32>
      %61 = math.tanh %60 : vector<2x32xf32>
      %cst_44 = arith.constant 1.000000e+00 : f32
      %62 = vector.broadcast %cst_44 : f32 to vector<2x32xf32>
      %63 = arith.subf %62, %56 : vector<2x32xf32>
      %64 = arith.mulf %63, %61 : vector<2x32xf32>
      %65 = arith.mulf %56, %26 : vector<2x32xf32>
      %66 = arith.addf %64, %65 : vector<2x32xf32>
      %c0_45 = arith.constant 0 : index
      %c0_46 = arith.constant 0 : index
      %67 = vector.load %arg35[%c0_45, %c0_46] : memref<2x32xf32, #tpu.memory_space<vmem>>, vector<2x32xf32>
      tpu.vector_store %arg35[%c0_45, %c0_46], %66 {strides = array<i32>} : memref<2x32xf32, #tpu.memory_space<vmem>>, vector<2x32xf32>,
      %c0_47 = arith.constant 0 : index
      %c0_48 = arith.constant 0 : index
      %68 = vector.load %arg14[%c0_47, %c0_48] : memref<32x32xf32, #tpu.memory_space<vmem>>, vector<32x32xf32>
      %cst_49 = arith.constant dense<0.000000e+00> : vector<2x32xf32>
      %69 = tpu.matmul %66, %68, %cst_49 {dimension_numbers = #tpu.dot_dimension_numbers<[1], [0], [0], [1], [0, 0, 1, 1], [], []>} : vector<2x32xf32>, vector<32x32xf32>, vector<2x32xf32> -> vector<2x32xf32>
      %c0_50 = arith.constant 0 : index
      %c0_51 = arith.constant 0 : index
      %70 = vector.load %arg15[%c0_50, %c0_51] : memref<1x32xf32, #tpu.memory_space<vmem>>, vector<1x32xf32>
      %71 = vector.broadcast %70 : vector<1x32xf32> to vector<2x32xf32>
      %72 = arith.addf %69, %71 : vector<2x32xf32>
      %c0_52 = arith.constant 0 : index
      %c0_53 = arith.constant 0 : index
      %73 = vector.load %arg41[%c0_52, %c0_53] : memref<2x8xf32, #tpu.memory_space<vmem>>, vector<2x8xf32>
      %cst_54 = arith.constant 0.000000e+00 : f32
      %74 = vector.broadcast %cst_54 : f32 to vector<2x15xf32>
      %75 = tpu.concatenate %74, %73, %74 in 1 : vector<2x15xf32>, vector<2x8xf32>, vector<2x15xf32> -> vector<2x38xf32>
      %76 = vector.extract_strided_slice %75 {offsets = [0, 0], sizes = [2, 8], strides = [1, 1]} : vector<2x38xf32> to vector<2x8xf32>
      %77 = vector.shape_cast %76 : vector<2x8xf32> to vector<2x8x1xf32>
      %78 = vector.extract_strided_slice %75 {offsets = [0, 1], sizes = [2, 8], strides = [1, 1]} : vector<2x38xf32> to vector<2x8xf32>
      %79 = vector.shape_cast %78 : vector<2x8xf32> to vector<2x8x1xf32>
      %80 = vector.extract_strided_slice %75 {offsets = [0, 2], sizes = [2, 8], strides = [1, 1]} : vector<2x38xf32> to vector<2x8xf32>
      %81 = vector.shape_cast %80 : vector<2x8xf32> to vector<2x8x1xf32>
      %82 = vector.extract_strided_slice %75 {offsets = [0, 3], sizes = [2, 8], strides = [1, 1]} : vector<2x38xf32> to vector<2x8xf32>
      %83 = vector.shape_cast %82 : vector<2x8xf32> to vector<2x8x1xf32>
      %84 = vector.extract_strided_slice %75 {offsets = [0, 4], sizes = [2, 8], strides = [1, 1]} : vector<2x38xf32> to vector<2x8xf32>
      %85 = vector.shape_cast %84 : vector<2x8xf32> to vector<2x8x1xf32>
      %86 = vector.extract_strided_slice %75 {offsets = [0, 5], sizes = [2, 8], strides = [1, 1]} : vector<2x38xf32> to vector<2x8xf32>
      %87 = vector.shape_cast %86 : vector<2x8xf32> to vector<2x8x1xf32>
      %88 = vector.extract_strided_slice %75 {offsets = [0, 6], sizes = [2, 8], strides = [1, 1]} : vector<2x38xf32> to vector<2x8xf32>
      %89 = vector.shape_cast %88 : vector<2x8xf32> to vector<2x8x1xf32>
      %90 = vector.extract_strided_slice %75 {offsets = [0, 7], sizes = [2, 8], strides = [1, 1]} : vector<2x38xf32> to vector<2x8xf32>
      %91 = vector.shape_cast %90 : vector<2x8xf32> to vector<2x8x1xf32>
      %92 = vector.extract_strided_slice %75 {offsets = [0, 8], sizes = [2, 8], strides = [1, 1]} : vector<2x38xf32> to vector<2x8xf32>
      %93 = vector.shape_cast %92 : vector<2x8xf32> to vector<2x8x1xf32>
      %94 = vector.extract_strided_slice %75 {offsets = [0, 9], sizes = [2, 8], strides = [1, 1]} : vector<2x38xf32> to vector<2x8xf32>
      %95 = vector.shape_cast %94 : vector<2x8xf32> to vector<2x8x1xf32>
      %96 = vector.extract_strided_slice %75 {offsets = [0, 10], sizes = [2, 8], strides = [1, 1]} : vector<2x38xf32> to vector<2x8xf32>
      %97 = vector.shape_cast %96 : vector<2x8xf32> to vector<2x8x1xf32>
      %98 = vector.extract_strided_slice %75 {offsets = [0, 11], sizes = [2, 8], strides = [1, 1]} : vector<2x38xf32> to vector<2x8xf32>
      %99 = vector.shape_cast %98 : vector<2x8xf32> to vector<2x8x1xf32>
      %100 = vector.extract_strided_slice %75 {offsets = [0, 12], sizes = [2, 8], strides = [1, 1]} : vector<2x38xf32> to vector<2x8xf32>
      %101 = vector.shape_cast %100 : vector<2x8xf32> to vector<2x8x1xf32>
      %102 = vector.extract_strided_slice %75 {offsets = [0, 13], sizes = [2, 8], strides = [1, 1]} : vector<2x38xf32> to vector<2x8xf32>
      %103 = vector.shape_cast %102 : vector<2x8xf32> to vector<2x8x1xf32>
      %104 = vector.extract_strided_slice %75 {offsets = [0, 14], sizes = [2, 8], strides = [1, 1]} : vector<2x38xf32> to vector<2x8xf32>
      %105 = vector.shape_cast %104 : vector<2x8xf32> to vector<2x8x1xf32>
      %106 = vector.extract_strided_slice %75 {offsets = [0, 15], sizes = [2, 8], strides = [1, 1]} : vector<2x38xf32> to vector<2x8xf32>
      %107 = vector.shape_cast %106 : vector<2x8xf32> to vector<2x8x1xf32>
      %108 = vector.extract_strided_slice %75 {offsets = [0, 16], sizes = [2, 8], strides = [1, 1]} : vector<2x38xf32> to vector<2x8xf32>
      %109 = vector.shape_cast %108 : vector<2x8xf32> to vector<2x8x1xf32>
      %110 = vector.extract_strided_slice %75 {offsets = [0, 17], sizes = [2, 8], strides = [1, 1]} : vector<2x38xf32> to vector<2x8xf32>
      %111 = vector.shape_cast %110 : vector<2x8xf32> to vector<2x8x1xf32>
      %112 = vector.extract_strided_slice %75 {offsets = [0, 18], sizes = [2, 8], strides = [1, 1]} : vector<2x38xf32> to vector<2x8xf32>
      %113 = vector.shape_cast %112 : vector<2x8xf32> to vector<2x8x1xf32>
      %114 = vector.extract_strided_slice %75 {offsets = [0, 19], sizes = [2, 8], strides = [1, 1]} : vector<2x38xf32> to vector<2x8xf32>
      %115 = vector.shape_cast %114 : vector<2x8xf32> to vector<2x8x1xf32>
      %116 = vector.extract_strided_slice %75 {offsets = [0, 20], sizes = [2, 8], strides = [1, 1]} : vector<2x38xf32> to vector<2x8xf32>
      %117 = vector.shape_cast %116 : vector<2x8xf32> to vector<2x8x1xf32>
      %118 = vector.extract_strided_slice %75 {offsets = [0, 21], sizes = [2, 8], strides = [1, 1]} : vector<2x38xf32> to vector<2x8xf32>
      %119 = vector.shape_cast %118 : vector<2x8xf32> to vector<2x8x1xf32>
      %120 = vector.extract_strided_slice %75 {offsets = [0, 22], sizes = [2, 8], strides = [1, 1]} : vector<2x38xf32> to vector<2x8xf32>
      %121 = vector.shape_cast %120 : vector<2x8xf32> to vector<2x8x1xf32>
      %122 = vector.extract_strided_slice %75 {offsets = [0, 23], sizes = [2, 8], strides = [1, 1]} : vector<2x38xf32> to vector<2x8xf32>
      %123 = vector.shape_cast %122 : vector<2x8xf32> to vector<2x8x1xf32>
      %124 = vector.extract_strided_slice %75 {offsets = [0, 24], sizes = [2, 8], strides = [1, 1]} : vector<2x38xf32> to vector<2x8xf32>
      %125 = vector.shape_cast %124 : vector<2x8xf32> to vector<2x8x1xf32>
      %126 = vector.extract_strided_slice %75 {offsets = [0, 25], sizes = [2, 8], strides = [1, 1]} : vector<2x38xf32> to vector<2x8xf32>
      %127 = vector.shape_cast %126 : vector<2x8xf32> to vector<2x8x1xf32>
      %128 = vector.extract_strided_slice %75 {offsets = [0, 26], sizes = [2, 8], strides = [1, 1]} : vector<2x38xf32> to vector<2x8xf32>
      %129 = vector.shape_cast %128 : vector<2x8xf32> to vector<2x8x1xf32>
      %130 = vector.extract_strided_slice %75 {offsets = [0, 27], sizes = [2, 8], strides = [1, 1]} : vector<2x38xf32> to vector<2x8xf32>
      %131 = vector.shape_cast %130 : vector<2x8xf32> to vector<2x8x1xf32>
      %132 = vector.extract_strided_slice %75 {offsets = [0, 28], sizes = [2, 8], strides = [1, 1]} : vector<2x38xf32> to vector<2x8xf32>
      %133 = vector.shape_cast %132 : vector<2x8xf32> to vector<2x8x1xf32>
      %134 = vector.extract_strided_slice %75 {offsets = [0, 29], sizes = [2, 8], strides = [1, 1]} : vector<2x38xf32> to vector<2x8xf32>
      %135 = vector.shape_cast %134 : vector<2x8xf32> to vector<2x8x1xf32>
      %136 = vector.extract_strided_slice %75 {offsets = [0, 30], sizes = [2, 8], strides = [1, 1]} : vector<2x38xf32> to vector<2x8xf32>
      %137 = vector.shape_cast %136 : vector<2x8xf32> to vector<2x8x1xf32>
      %138 = tpu.concatenate %77, %79, %81, %83, %85, %87, %89, %91, %93, %95, %97, %99, %101, %103, %105, %107 in 2 : vector<2x8x1xf32>, vector<2x8x1xf32>, vector<2x8x1xf32>, vector<2x8x1xf32>, vector<2x8x1xf32>, vector<2x8x1xf32>, vector<2x8x1xf32>, vector<2x8x1xf32>, vector<2x8x1xf32>, vector<2x8x1xf32>, vector<2x8x1xf32>, vector<2x8x1xf32>, vector<2x8x1xf32>, vector<2x8x1xf32>, vector<2x8x1xf32>, vector<2x8x1xf32> -> vector<2x8x16xf32>
      %139 = tpu.concatenate %109, %111, %113, %115, %117, %119, %121, %123, %125, %127, %129, %131, %133, %135, %137 in 2 : vector<2x8x1xf32>, vector<2x8x1xf32>, vector<2x8x1xf32>, vector<2x8x1xf32>, vector<2x8x1xf32>, vector<2x8x1xf32>, vector<2x8x1xf32>, vector<2x8x1xf32>, vector<2x8x1xf32>, vector<2x8x1xf32>, vector<2x8x1xf32>, vector<2x8x1xf32>, vector<2x8x1xf32>, vector<2x8x1xf32>, vector<2x8x1xf32> -> vector<2x8x15xf32>
      %140 = tpu.concatenate %138, %139 in 2 : vector<2x8x16xf32>, vector<2x8x15xf32> -> vector<2x8x31xf32>
      %141 = vector.shape_cast %140 : vector<2x8x31xf32> to vector<16x31xf32>
      %c0_55 = arith.constant 0 : index
      %c0_56 = arith.constant 0 : index
      %142 = vector.load %arg16[%c0_55, %c0_56] : memref<31x32xf32, #tpu.memory_space<vmem>>, vector<31x32xf32>
      %cst_57 = arith.constant dense<0.000000e+00> : vector<16x32xf32>
      %143 = tpu.matmul %141, %142, %cst_57 {dimension_numbers = #tpu.dot_dimension_numbers<[1], [0], [0], [1], [0, 0, 1, 1], [], []>} : vector<16x31xf32>, vector<31x32xf32>, vector<16x32xf32> -> vector<16x32xf32>
      %144 = vector.shape_cast %143 : vector<16x32xf32> to vector<2x8x32xf32>
      %145 = vector.shape_cast %72 : vector<2x32xf32> to vector<2x1x32xf32>
      %146 = vector.broadcast %145 : vector<2x1x32xf32> to vector<2x8x32xf32>
      %147 = arith.addf %146, %4 : vector<2x8x32xf32>
      %148 = arith.addf %147, %144 : vector<2x8x32xf32>
      %c0_58 = arith.constant 0 : index
      %c0_59 = arith.constant 0 : index
      %c0_60 = arith.constant 0 : index
      %149 = vector.load %arg17[%c0_58, %c0_59, %c0_60] : memref<1x1x32xf32, #tpu.memory_space<vmem>>, vector<1x1x32xf32>
      %150 = vector.broadcast %149 : vector<1x1x32xf32> to vector<2x8x32xf32>
      %151 = arith.addf %148, %150 : vector<2x8x32xf32>
      %152 = math.tanh %151 : vector<2x8x32xf32>
      %c0_61 = arith.constant 0 : index
      %c0_62 = arith.constant 0 : index
      %c0_63 = arith.constant 0 : index
      %153 = vector.load %arg18[%c0_61, %c0_62, %c0_63] : memref<1x1x32xf32, #tpu.memory_space<vmem>>, vector<1x1x32xf32>
      %154 = vector.broadcast %153 : vector<1x1x32xf32> to vector<2x8x32xf32>
      %155 = arith.mulf %152, %154 : vector<2x8x32xf32>
      %cst_64 = arith.constant dense<0.000000e+00> : vector<2x8xf32>
      %156 = vector.multi_reduction <add>, %155, %cst_64 [2] : vector<2x8x32xf32> to vector<2x8xf32>
      %157 = arith.mulf %156, %5 : vector<2x8xf32>
      %cst_65 = arith.constant dense<0xFF800000> : vector<2xf32>
      %158 = vector.multi_reduction <maximumf>, %157, %cst_65 [1] : vector<2x8xf32> to vector<2xf32>
      %159 = vector.shape_cast %158 : vector<2xf32> to vector<2x1xf32>
      %160 = vector.broadcast %159 : vector<2x1xf32> to vector<2x8xf32>
      %161 = arith.subf %157, %160 : vector<2x8xf32>
      %162 = math.exp %161 : vector<2x8xf32>
      %cst_66 = arith.constant dense<0.000000e+00> : vector<2xf32>
      %163 = vector.multi_reduction <add>, %162, %cst_66 [1] : vector<2x8xf32> to vector<2xf32>
      %164 = vector.shape_cast %163 : vector<2xf32> to vector<2x1xf32>
      %165 = tpu.reciprocal %164 {approx = true} : vector<2x1xf32> -> vector<2x1xf32>
      %166 = vector.broadcast %165 : vector<2x1xf32> to vector<2x8xf32>
      %167 = arith.mulf %162, %166 : vector<2x8xf32>
      %168 = arith.addf %73, %167 : vector<2x8xf32>
      %c0_67 = arith.constant 0 : index
      %c0_68 = arith.constant 0 : index
      %169 = vector.load %arg41[%c0_67, %c0_68] : memref<2x8xf32, #tpu.memory_space<vmem>>, vector<2x8xf32>
      tpu.vector_store %arg41[%c0_67, %c0_68], %168 {strides = array<i32>} : memref<2x8xf32, #tpu.memory_space<vmem>>, vector<2x8xf32>,
      %170 = vector.shape_cast %167 : vector<2x8xf32> to vector<2x1x8xf32>
      "tpu.trace_start"() <{level = 10 : i32, message = "bqt,bte->bqe"}> : () -> ()
      %cst_69 = arith.constant dense<0.000000e+00> : vector<2x1x48xf32>
      %171 = tpu.matmul %170, %3, %cst_69 {dimension_numbers = #tpu.dot_dimension_numbers<[2], [1], [1], [2], [0, 0, 0, 1, 1, 2], [0], [0]>} : vector<2x1x8xf32>, vector<2x8x48xf32>, vector<2x1x48xf32> -> vector<2x1x48xf32>
      "tpu.trace_stop"() : () -> ()
      %172 = vector.shape_cast %171 : vector<2x1x48xf32> to vector<2x48xf32>
      %c0_70 = arith.constant 0 : index
      %c0_71 = arith.constant 0 : index
      %173 = vector.load %arg40[%c0_70, %c0_71] : memref<2x48xf32, #tpu.memory_space<vmem>>, vector<2x48xf32>
      tpu.vector_store %arg40[%c0_70, %c0_71], %172 {strides = array<i32>} : memref<2x48xf32, #tpu.memory_space<vmem>>, vector<2x48xf32>,
      %c0_72 = arith.constant 0 : index
      %c0_73 = arith.constant 0 : index
      %174 = vector.load %arg19[%c0_72, %c0_73] : memref<48x32xf32, #tpu.memory_space<vmem>>, vector<48x32xf32>
      %cst_74 = arith.constant dense<0.000000e+00> : vector<2x32xf32>
      %175 = tpu.matmul %172, %174, %cst_74 {dimension_numbers = #tpu.dot_dimension_numbers<[1], [0], [0], [1], [0, 0, 1, 1], [], []>} : vector<2x48xf32>, vector<48x32xf32>, vector<2x32xf32> -> vector<2x32xf32>
      %c0_75 = arith.constant 0 : index
      %c0_76 = arith.constant 0 : index
      %176 = vector.load %arg20[%c0_75, %c0_76] : memref<32x32xf32, #tpu.memory_space<vmem>>, vector<32x32xf32>
      %cst_77 = arith.constant dense<0.000000e+00> : vector<2x32xf32>
      %177 = tpu.matmul %66, %176, %cst_77 {dimension_numbers = #tpu.dot_dimension_numbers<[1], [0], [0], [1], [0, 0, 1, 1], [], []>} : vector<2x32xf32>, vector<32x32xf32>, vector<2x32xf32> -> vector<2x32xf32>
      %178 = arith.addf %175, %177 : vector<2x32xf32>
      %c0_78 = arith.constant 0 : index
      %c0_79 = arith.constant 0 : index
      %179 = vector.load %arg21[%c0_78, %c0_79] : memref<1x32xf32, #tpu.memory_space<vmem>>, vector<1x32xf32>
      %180 = vector.broadcast %179 : vector<1x32xf32> to vector<2x32xf32>
      %181 = arith.addf %178, %180 : vector<2x32xf32>
      %c0_80 = arith.constant 0 : index
      %c0_81 = arith.constant 0 : index
      %182 = vector.load %arg22[%c0_80, %c0_81] : memref<32x128xf32, #tpu.memory_space<vmem>>, vector<32x128xf32>
      %cst_82 = arith.constant dense<0.000000e+00> : vector<2x128xf32>
      %183 = tpu.matmul %181, %182, %cst_82 {dimension_numbers = #tpu.dot_dimension_numbers<[1], [0], [0], [1], [0, 0, 1, 1], [], []>} : vector<2x32xf32>, vector<32x128xf32>, vector<2x128xf32> -> vector<2x128xf32>
      %c0_83 = arith.constant 0 : index
      %c0_84 = arith.constant 0 : index
      %184 = vector.load %arg36[%c0_83, %c0_84] : memref<2x32xf32, #tpu.memory_space<vmem>>, vector<2x32xf32>
      %c0_85 = arith.constant 0 : index
      %c0_86 = arith.constant 0 : index
      %185 = vector.load %arg23[%c0_85, %c0_86] : memref<32x128xf32, #tpu.memory_space<vmem>>, vector<32x128xf32>
      %cst_87 = arith.constant dense<0.000000e+00> : vector<2x128xf32>
      %186 = tpu.matmul %184, %185, %cst_87 {dimension_numbers = #tpu.dot_dimension_numbers<[1], [0], [0], [1], [0, 0, 1, 1], [], []>} : vector<2x32xf32>, vector<32x128xf32>, vector<2x128xf32> -> vector<2x128xf32>
      %187 = arith.addf %183, %186 : vector<2x128xf32>
      %c0_88 = arith.constant 0 : index
      %c0_89 = arith.constant 0 : index
      %188 = vector.load %arg24[%c0_88, %c0_89] : memref<1x128xf32, #tpu.memory_space<vmem>>, vector<1x128xf32>
      %189 = vector.broadcast %188 : vector<1x128xf32> to vector<2x128xf32>
      %190 = arith.addf %187, %189 : vector<2x128xf32>
      %191 = vector.extract_strided_slice %190 {offsets = [0, 0], sizes = [2, 32], strides = [1, 1]} : vector<2x128xf32> to vector<2x32xf32>
      %192 = arith.negf %191 : vector<2x32xf32>
      %193 = math.exp %192 : vector<2x32xf32>
      %cst_90 = arith.constant 1.000000e+00 : f32
      %194 = vector.broadcast %cst_90 : f32 to vector<2x32xf32>
      %195 = arith.addf %194, %193 : vector<2x32xf32>
      %196 = arith.divf %194, %195 : vector<2x32xf32>
      %197 = vector.extract_strided_slice %190 {offsets = [0, 32], sizes = [2, 32], strides = [1, 1]} : vector<2x128xf32> to vector<2x32xf32>
      %198 = arith.negf %197 : vector<2x32xf32>
      %199 = math.exp %198 : vector<2x32xf32>
      %cst_91 = arith.constant 1.000000e+00 : f32
      %200 = vector.broadcast %cst_91 : f32 to vector<2x32xf32>
      %201 = arith.addf %200, %199 : vector<2x32xf32>
      %202 = arith.divf %200, %201 : vector<2x32xf32>
      %203 = vector.extract_strided_slice %190 {offsets = [0, 64], sizes = [2, 32], strides = [1, 1]} : vector<2x128xf32> to vector<2x32xf32>
      %204 = math.tanh %203 : vector<2x32xf32>
      %205 = vector.extract_strided_slice %190 {offsets = [0, 96], sizes = [2, 32], strides = [1, 1]} : vector<2x128xf32> to vector<2x32xf32>
      %206 = arith.negf %205 : vector<2x32xf32>
      %207 = math.exp %206 : vector<2x32xf32>
      %cst_92 = arith.constant 1.000000e+00 : f32
      %208 = vector.broadcast %cst_92 : f32 to vector<2x32xf32>
      %209 = arith.addf %208, %207 : vector<2x32xf32>
      %210 = arith.divf %208, %209 : vector<2x32xf32>
      %c0_93 = arith.constant 0 : index
      %c0_94 = arith.constant 0 : index
      %211 = vector.load %arg37[%c0_93, %c0_94] : memref<2x32xf32, #tpu.memory_space<vmem>>, vector<2x32xf32>
      %212 = arith.mulf %202, %211 : vector<2x32xf32>
      %213 = arith.mulf %196, %204 : vector<2x32xf32>
      %214 = arith.addf %212, %213 : vector<2x32xf32>
      %215 = math.tanh %214 : vector<2x32xf32>
      %216 = arith.mulf %210, %215 : vector<2x32xf32>
      %c0_95 = arith.constant 0 : index
      %c0_96 = arith.constant 0 : index
      %217 = vector.load %arg36[%c0_95, %c0_96] : memref<2x32xf32, #tpu.memory_space<vmem>>, vector<2x32xf32>
      tpu.vector_store %arg36[%c0_95, %c0_96], %216 {strides = array<i32>} : memref<2x32xf32, #tpu.memory_space<vmem>>, vector<2x32xf32>,
      %c0_97 = arith.constant 0 : index
      %c0_98 = arith.constant 0 : index
      %218 = vector.load %arg37[%c0_97, %c0_98] : memref<2x32xf32, #tpu.memory_space<vmem>>, vector<2x32xf32>
      tpu.vector_store %arg37[%c0_97, %c0_98], %214 {strides = array<i32>} : memref<2x32xf32, #tpu.memory_space<vmem>>, vector<2x32xf32>,
      %219 = arith.addf %181, %216 : vector<2x32xf32>
      %c0_99 = arith.constant 0 : index
      %c0_100 = arith.constant 0 : index
      %220 = vector.load %arg25[%c0_99, %c0_100] : memref<32x128xf32, #tpu.memory_space<vmem>>, vector<32x128xf32>
      %cst_101 = arith.constant dense<0.000000e+00> : vector<2x128xf32>
      %221 = tpu.matmul %219, %220, %cst_101 {dimension_numbers = #tpu.dot_dimension_numbers<[1], [0], [0], [1], [0, 0, 1, 1], [], []>} : vector<2x32xf32>, vector<32x128xf32>, vector<2x128xf32> -> vector<2x128xf32>
      %c0_102 = arith.constant 0 : index
      %c0_103 = arith.constant 0 : index
      %222 = vector.load %arg38[%c0_102, %c0_103] : memref<2x32xf32, #tpu.memory_space<vmem>>, vector<2x32xf32>
      %c0_104 = arith.constant 0 : index
      %c0_105 = arith.constant 0 : index
      %223 = vector.load %arg26[%c0_104, %c0_105] : memref<32x128xf32, #tpu.memory_space<vmem>>, vector<32x128xf32>
      %cst_106 = arith.constant dense<0.000000e+00> : vector<2x128xf32>
      %224 = tpu.matmul %222, %223, %cst_106 {dimension_numbers = #tpu.dot_dimension_numbers<[1], [0], [0], [1], [0, 0, 1, 1], [], []>} : vector<2x32xf32>, vector<32x128xf32>, vector<2x128xf32> -> vector<2x128xf32>
      %225 = arith.addf %221, %224 : vector<2x128xf32>
      %c0_107 = arith.constant 0 : index
      %c0_108 = arith.constant 0 : index
      %226 = vector.load %arg27[%c0_107, %c0_108] : memref<1x128xf32, #tpu.memory_space<vmem>>, vector<1x128xf32>
      %227 = vector.broadcast %226 : vector<1x128xf32> to vector<2x128xf32>
      %228 = arith.addf %225, %227 : vector<2x128xf32>
      %229 = vector.extract_strided_slice %228 {offsets = [0, 0], sizes = [2, 32], strides = [1, 1]} : vector<2x128xf32> to vector<2x32xf32>
      %230 = arith.negf %229 : vector<2x32xf32>
      %231 = math.exp %230 : vector<2x32xf32>
      %cst_109 = arith.constant 1.000000e+00 : f32
      %232 = vector.broadcast %cst_109 : f32 to vector<2x32xf32>
      %233 = arith.addf %232, %231 : vector<2x32xf32>
      %234 = arith.divf %232, %233 : vector<2x32xf32>
      %235 = vector.extract_strided_slice %228 {offsets = [0, 32], sizes = [2, 32], strides = [1, 1]} : vector<2x128xf32> to vector<2x32xf32>
      %236 = arith.negf %235 : vector<2x32xf32>
      %237 = math.exp %236 : vector<2x32xf32>
      %cst_110 = arith.constant 1.000000e+00 : f32
      %238 = vector.broadcast %cst_110 : f32 to vector<2x32xf32>
      %239 = arith.addf %238, %237 : vector<2x32xf32>
      %240 = arith.divf %238, %239 : vector<2x32xf32>
      %241 = vector.extract_strided_slice %228 {offsets = [0, 64], sizes = [2, 32], strides = [1, 1]} : vector<2x128xf32> to vector<2x32xf32>
      %242 = math.tanh %241 : vector<2x32xf32>
      %243 = vector.extract_strided_slice %228 {offsets = [0, 96], sizes = [2, 32], strides = [1, 1]} : vector<2x128xf32> to vector<2x32xf32>
      %244 = arith.negf %243 : vector<2x32xf32>
      %245 = math.exp %244 : vector<2x32xf32>
      %cst_111 = arith.constant 1.000000e+00 : f32
      %246 = vector.broadcast %cst_111 : f32 to vector<2x32xf32>
      %247 = arith.addf %246, %245 : vector<2x32xf32>
      %248 = arith.divf %246, %247 : vector<2x32xf32>
      %c0_112 = arith.constant 0 : index
      %c0_113 = arith.constant 0 : index
      %249 = vector.load %arg39[%c0_112, %c0_113] : memref<2x32xf32, #tpu.memory_space<vmem>>, vector<2x32xf32>
      %250 = arith.mulf %240, %249 : vector<2x32xf32>
      %251 = arith.mulf %234, %242 : vector<2x32xf32>
      %252 = arith.addf %250, %251 : vector<2x32xf32>
      %253 = math.tanh %252 : vector<2x32xf32>
      %254 = arith.mulf %248, %253 : vector<2x32xf32>
      %c0_114 = arith.constant 0 : index
      %c0_115 = arith.constant 0 : index
      %255 = vector.load %arg38[%c0_114, %c0_115] : memref<2x32xf32, #tpu.memory_space<vmem>>, vector<2x32xf32>
      tpu.vector_store %arg38[%c0_114, %c0_115], %254 {strides = array<i32>} : memref<2x32xf32, #tpu.memory_space<vmem>>, vector<2x32xf32>,
      %c0_116 = arith.constant 0 : index
      %c0_117 = arith.constant 0 : index
      %256 = vector.load %arg39[%c0_116, %c0_117] : memref<2x32xf32, #tpu.memory_space<vmem>>, vector<2x32xf32>
      tpu.vector_store %arg39[%c0_116, %c0_117], %252 {strides = array<i32>} : memref<2x32xf32, #tpu.memory_space<vmem>>, vector<2x32xf32>,
      %257 = arith.addf %219, %254 : vector<2x32xf32>
      %c0_118 = arith.constant 0 : index
      %c0_119 = arith.constant 0 : index
      %258 = vector.load %arg28[%c0_118, %c0_119] : memref<32x32xf32, #tpu.memory_space<vmem>>, vector<32x32xf32>
      %cst_120 = arith.constant dense<0.000000e+00> : vector<2x32xf32>
      %259 = tpu.matmul %257, %258, %cst_120 {dimension_numbers = #tpu.dot_dimension_numbers<[1], [0], [0], [1], [0, 0, 1, 1], [], []>} : vector<2x32xf32>, vector<32x32xf32>, vector<2x32xf32> -> vector<2x32xf32>
      %c0_121 = arith.constant 0 : index
      %c0_122 = arith.constant 0 : index
      %260 = vector.load %arg29[%c0_121, %c0_122] : memref<32x1xf32, #tpu.memory_space<vmem>>, vector<32x1xf32>
      %cst_123 = arith.constant dense<0.000000e+00> : vector<2x1xf32>
      %261 = tpu.matmul %257, %260, %cst_123 {dimension_numbers = #tpu.dot_dimension_numbers<[1], [0], [0], [1], [0, 0, 1, 1], [], []>} : vector<2x32xf32>, vector<32x1xf32>, vector<2x1xf32> -> vector<2x1xf32>
      %c0_124 = arith.constant 0 : index
      %c0_125 = arith.constant 0 : index
      %262 = vector.load %arg30[%c0_124, %c0_125] : memref<48x1xf32, #tpu.memory_space<vmem>>, vector<48x1xf32>
      %cst_126 = arith.constant dense<0.000000e+00> : vector<2x1xf32>
      %263 = tpu.matmul %172, %262, %cst_126 {dimension_numbers = #tpu.dot_dimension_numbers<[1], [0], [0], [1], [0, 0, 1, 1], [], []>} : vector<2x48xf32>, vector<48x1xf32>, vector<2x1xf32> -> vector<2x1xf32>
      %264 = arith.addf %261, %263 : vector<2x1xf32>
      %c0_127 = arith.constant 0 : index
      %c0_128 = arith.constant 0 : index
      %265 = vector.load %arg31[%c0_127, %c0_128] : memref<1x1xf32, #tpu.memory_space<vmem>>, vector<1x1xf32>
      %266 = vector.broadcast %265 : vector<1x1xf32> to vector<2x1xf32>
      %267 = arith.addf %264, %266 : vector<2x1xf32>
      %268 = arith.negf %267 : vector<2x1xf32>
      %269 = math.exp %268 : vector<2x1xf32>
      %cst_129 = arith.constant 1.000000e+00 : f32
      %270 = vector.broadcast %cst_129 : f32 to vector<2x1xf32>
      %271 = arith.addf %270, %269 : vector<2x1xf32>
      %272 = arith.divf %270, %271 : vector<2x1xf32>
      %273 = arith.index_cast %8 : i32 to index
      %c0_130 = arith.constant 0 : index
      %c0_131 = arith.constant 0 : index
      %274 = vector.load %arg32[%273, %c0_130, %c0_131] : memref<4x2x32xf32, #tpu.memory_space<vmem>>, vector<1x2x32xf32>
      %275 = vector.shape_cast %274 : vector<1x2x32xf32> to vector<2x32xf32>
      %276 = vector.shape_cast %259 : vector<2x32xf32> to vector<1x2x32xf32>
      tpu.vector_store %arg32[%273, %c0_130, %c0_131], %276 {strides = array<i32>} : memref<4x2x32xf32, #tpu.memory_space<vmem>>, vector<1x2x32xf32>,
      %277 = arith.index_cast %8 : i32 to index
      %c0_132 = arith.constant 0 : index
      %c0_133 = arith.constant 0 : index
      %278 = vector.load %arg33[%277, %c0_132, %c0_133] : memref<4x2x8xf32, #tpu.memory_space<vmem>>, vector<1x2x8xf32>
      %279 = vector.shape_cast %278 : vector<1x2x8xf32> to vector<2x8xf32>
      %280 = vector.shape_cast %167 : vector<2x8xf32> to vector<1x2x8xf32>
      tpu.vector_store %arg33[%277, %c0_132, %c0_133], %280 {strides = array<i32>} : memref<4x2x8xf32, #tpu.memory_space<vmem>>, vector<1x2x8xf32>,
      %281 = arith.index_cast %8 : i32 to index
      %c0_134 = arith.constant 0 : index
      %c0_135 = arith.constant 0 : index
      %282 = vector.load %arg34[%281, %c0_134, %c0_135] : memref<4x2x1xf32, #tpu.memory_space<vmem>>, vector<1x2x1xf32>
      %283 = vector.shape_cast %282 : vector<1x2x1xf32> to vector<2x1xf32>
      %284 = vector.shape_cast %272 : vector<2x1xf32> to vector<1x2x1xf32>
      tpu.vector_store %arg34[%281, %c0_134, %c0_135], %284 {strides = array<i32>} : memref<4x2x1xf32, #tpu.memory_space<vmem>>, vector<1x2x1xf32>,
    }
    %c4_i32_9 = arith.constant 4 : i32
    return
  }
  func.func @transform_0(%arg0: i32) -> (i32, i32, i32) {
    %c0_i32 = arith.constant 0 : i32
    %c0_i32_0 = arith.constant 0 : i32
    %c0_i32_1 = arith.constant 0 : i32
    return %arg0, %c0_i32, %c0_i32_0 : i32, i32, i32
  }
  func.func @transform_1(%arg0: i32) -> (i32, i32, i32) {
    %c0_i32 = arith.constant 0 : i32
    %c0_i32_0 = arith.constant 0 : i32
    %c0_i32_1 = arith.constant 0 : i32
    %c0_i32_2 = arith.constant 0 : i32
    return %c0_i32, %c0_i32_0, %c0_i32_1 : i32, i32, i32
  }
  func.func @transform_2(%arg0: i32) -> (i32, i32, i32) {
    %c0_i32 = arith.constant 0 : i32
    %c0_i32_0 = arith.constant 0 : i32
    %c0_i32_1 = arith.constant 0 : i32
    %c0_i32_2 = arith.constant 0 : i32
    return %c0_i32, %c0_i32_0, %c0_i32_1 : i32, i32, i32
  }
  func.func @transform_3(%arg0: i32) -> (i32, i32) {
    %c0_i32 = arith.constant 0 : i32
    %c0_i32_0 = arith.constant 0 : i32
    %c0_i32_1 = arith.constant 0 : i32
    return %c0_i32, %c0_i32_0 : i32, i32
  }
  func.func @transform_4(%arg0: i32) -> (i32, i32) {
    %c0_i32 = arith.constant 0 : i32
    %c0_i32_0 = arith.constant 0 : i32
    %c0_i32_1 = arith.constant 0 : i32
    return %c0_i32, %c0_i32_0 : i32, i32
  }
  func.func @transform_5(%arg0: i32) -> (i32, i32) {
    %c0_i32 = arith.constant 0 : i32
    %c0_i32_0 = arith.constant 0 : i32
    %c0_i32_1 = arith.constant 0 : i32
    return %c0_i32, %c0_i32_0 : i32, i32
  }
  func.func @transform_6(%arg0: i32) -> (i32, i32) {
    %c0_i32 = arith.constant 0 : i32
    %c0_i32_0 = arith.constant 0 : i32
    %c0_i32_1 = arith.constant 0 : i32
    return %c0_i32, %c0_i32_0 : i32, i32
  }
  func.func @transform_7(%arg0: i32) -> (i32, i32) {
    %c0_i32 = arith.constant 0 : i32
    %c0_i32_0 = arith.constant 0 : i32
    %c0_i32_1 = arith.constant 0 : i32
    return %c0_i32, %c0_i32_0 : i32, i32
  }
  func.func @transform_8(%arg0: i32) -> (i32, i32) {
    %c0_i32 = arith.constant 0 : i32
    %c0_i32_0 = arith.constant 0 : i32
    %c0_i32_1 = arith.constant 0 : i32
    return %c0_i32, %c0_i32_0 : i32, i32
  }
  func.func @transform_9(%arg0: i32) -> (i32, i32) {
    %c0_i32 = arith.constant 0 : i32
    %c0_i32_0 = arith.constant 0 : i32
    %c0_i32_1 = arith.constant 0 : i32
    return %c0_i32, %c0_i32_0 : i32, i32
  }
  func.func @transform_10(%arg0: i32) -> (i32, i32) {
    %c0_i32 = arith.constant 0 : i32
    %c0_i32_0 = arith.constant 0 : i32
    %c0_i32_1 = arith.constant 0 : i32
    return %c0_i32, %c0_i32_0 : i32, i32
  }
  func.func @transform_11(%arg0: i32) -> (i32, i32) {
    %c0_i32 = arith.constant 0 : i32
    %c0_i32_0 = arith.constant 0 : i32
    %c0_i32_1 = arith.constant 0 : i32
    return %c0_i32, %c0_i32_0 : i32, i32
  }
  func.func @transform_12(%arg0: i32) -> (i32, i32) {
    %c0_i32 = arith.constant 0 : i32
    %c0_i32_0 = arith.constant 0 : i32
    %c0_i32_1 = arith.constant 0 : i32
    return %c0_i32, %c0_i32_0 : i32, i32
  }
  func.func @transform_13(%arg0: i32) -> (i32, i32) {
    %c0_i32 = arith.constant 0 : i32
    %c0_i32_0 = arith.constant 0 : i32
    %c0_i32_1 = arith.constant 0 : i32
    return %c0_i32, %c0_i32_0 : i32, i32
  }
  func.func @transform_14(%arg0: i32) -> (i32, i32) {
    %c0_i32 = arith.constant 0 : i32
    %c0_i32_0 = arith.constant 0 : i32
    %c0_i32_1 = arith.constant 0 : i32
    return %c0_i32, %c0_i32_0 : i32, i32
  }
  func.func @transform_15(%arg0: i32) -> (i32, i32) {
    %c0_i32 = arith.constant 0 : i32
    %c0_i32_0 = arith.constant 0 : i32
    %c0_i32_1 = arith.constant 0 : i32
    return %c0_i32, %c0_i32_0 : i32, i32
  }
  func.func @transform_16(%arg0: i32) -> (i32, i32, i32) {
    %c0_i32 = arith.constant 0 : i32
    %c0_i32_0 = arith.constant 0 : i32
    %c0_i32_1 = arith.constant 0 : i32
    %c0_i32_2 = arith.constant 0 : i32
    return %c0_i32, %c0_i32_0, %c0_i32_1 : i32, i32, i32
  }
  func.func @transform_17(%arg0: i32) -> (i32, i32, i32) {
    %c0_i32 = arith.constant 0 : i32
    %c0_i32_0 = arith.constant 0 : i32
    %c0_i32_1 = arith.constant 0 : i32
    %c0_i32_2 = arith.constant 0 : i32
    return %c0_i32, %c0_i32_0, %c0_i32_1 : i32, i32, i32
  }
  func.func @transform_18(%arg0: i32) -> (i32, i32) {
    %c0_i32 = arith.constant 0 : i32
    %c0_i32_0 = arith.constant 0 : i32
    %c0_i32_1 = arith.constant 0 : i32
    return %c0_i32, %c0_i32_0 : i32, i32
  }
  func.func @transform_19(%arg0: i32) -> (i32, i32) {
    %c0_i32 = arith.constant 0 : i32
    %c0_i32_0 = arith.constant 0 : i32
    %c0_i32_1 = arith.constant 0 : i32
    return %c0_i32, %c0_i32_0 : i32, i32
  }
  func.func @transform_20(%arg0: i32) -> (i32, i32) {
    %c0_i32 = arith.constant 0 : i32
    %c0_i32_0 = arith.constant 0 : i32
    %c0_i32_1 = arith.constant 0 : i32
    return %c0_i32, %c0_i32_0 : i32, i32
  }
  func.func @transform_21(%arg0: i32) -> (i32, i32) {
    %c0_i32 = arith.constant 0 : i32
    %c0_i32_0 = arith.constant 0 : i32
    %c0_i32_1 = arith.constant 0 : i32
    return %c0_i32, %c0_i32_0 : i32, i32
  }
  func.func @transform_22(%arg0: i32) -> (i32, i32) {
    %c0_i32 = arith.constant 0 : i32
    %c0_i32_0 = arith.constant 0 : i32
    %c0_i32_1 = arith.constant 0 : i32
    return %c0_i32, %c0_i32_0 : i32, i32
  }
  func.func @transform_23(%arg0: i32) -> (i32, i32) {
    %c0_i32 = arith.constant 0 : i32
    %c0_i32_0 = arith.constant 0 : i32
    %c0_i32_1 = arith.constant 0 : i32
    return %c0_i32, %c0_i32_0 : i32, i32
  }
  func.func @transform_24(%arg0: i32) -> (i32, i32) {
    %c0_i32 = arith.constant 0 : i32
    %c0_i32_0 = arith.constant 0 : i32
    %c0_i32_1 = arith.constant 0 : i32
    return %c0_i32, %c0_i32_0 : i32, i32
  }
  func.func @transform_25(%arg0: i32) -> (i32, i32) {
    %c0_i32 = arith.constant 0 : i32
    %c0_i32_0 = arith.constant 0 : i32
    %c0_i32_1 = arith.constant 0 : i32
    return %c0_i32, %c0_i32_0 : i32, i32
  }
  func.func @transform_26(%arg0: i32) -> (i32, i32) {
    %c0_i32 = arith.constant 0 : i32
    %c0_i32_0 = arith.constant 0 : i32
    %c0_i32_1 = arith.constant 0 : i32
    return %c0_i32, %c0_i32_0 : i32, i32
  }
  func.func @transform_27(%arg0: i32) -> (i32, i32) {
    %c0_i32 = arith.constant 0 : i32
    %c0_i32_0 = arith.constant 0 : i32
    %c0_i32_1 = arith.constant 0 : i32
    return %c0_i32, %c0_i32_0 : i32, i32
  }
  func.func @transform_28(%arg0: i32) -> (i32, i32) {
    %c0_i32 = arith.constant 0 : i32
    %c0_i32_0 = arith.constant 0 : i32
    %c0_i32_1 = arith.constant 0 : i32
    return %c0_i32, %c0_i32_0 : i32, i32
  }
  func.func @transform_29(%arg0: i32) -> (i32, i32) {
    %c0_i32 = arith.constant 0 : i32
    %c0_i32_0 = arith.constant 0 : i32
    %c0_i32_1 = arith.constant 0 : i32
    return %c0_i32, %c0_i32_0 : i32, i32
  }
  func.func @transform_30(%arg0: i32) -> (i32, i32) {
    %c0_i32 = arith.constant 0 : i32
    %c0_i32_0 = arith.constant 0 : i32
    %c0_i32_1 = arith.constant 0 : i32
    return %c0_i32, %c0_i32_0 : i32, i32
  }
  func.func @transform_31(%arg0: i32) -> (i32, i32, i32) {
    %c0_i32 = arith.constant 0 : i32
    %c0_i32_0 = arith.constant 0 : i32
    %c0_i32_1 = arith.constant 0 : i32
    return %arg0, %c0_i32, %c0_i32_0 : i32, i32, i32
  }
  func.func @transform_32(%arg0: i32) -> (i32, i32, i32) {
    %c0_i32 = arith.constant 0 : i32
    %c0_i32_0 = arith.constant 0 : i32
    %c0_i32_1 = arith.constant 0 : i32
    return %arg0, %c0_i32, %c0_i32_0 : i32, i32, i32
  }
  func.func @transform_33(%arg0: i32) -> (i32, i32, i32) {
    %c0_i32 = arith.constant 0 : i32
    %c0_i32_0 = arith.constant 0 : i32
    %c0_i32_1 = arith.constant 0 : i32
    return %arg0, %c0_i32, %c0_i32_0 : i32, i32, i32
  }
}

module attributes {stable_mosaic.version = 11 : i64} {
  func.func @_conv_stats_kernel(%arg0: i32, %arg1: memref<1x8x16xf32, #tpu.memory_space<vmem>>, %arg2: memref<1x16x32xbf16, #tpu.memory_space<vmem>>, %arg3: memref<1x32xf32, #tpu.memory_space<vmem>>, %arg4: memref<1x32xf32, #tpu.memory_space<vmem>>, %arg5: memref<1x8x32xf32, #tpu.memory_space<vmem>>, %arg6: memref<2x32xf32, #tpu.memory_space<vmem>>, %arg7: memref<1x32xf32, #tpu.memory_space<vmem>>, %arg8: memref<1x32xf32, #tpu.memory_space<vmem>>) attributes {dimension_semantics = [#tpu.dimension_semantics<arbitrary>], iteration_bounds = array<i64: 2>, scalar_prefetch = 0 : i64, scratch_operands = 2 : i64, tpu.core_type = #tpu.core_type<tc>, window_params = [{transform_indices = @transform_0, window_bounds = array<i64: 1, 8, 16>}, {pipeline_mode = #tpu.pipeline_mode<synchronous>, transform_indices = @transform_1, window_bounds = array<i64: 1, 16, 32>}, {pipeline_mode = #tpu.pipeline_mode<synchronous>, transform_indices = @transform_2, window_bounds = array<i64: 1, 32>}, {pipeline_mode = #tpu.pipeline_mode<synchronous>, transform_indices = @transform_3, window_bounds = array<i64: 1, 32>}, {transform_indices = @transform_4, window_bounds = array<i64: 1, 8, 32>}, {pipeline_mode = #tpu.pipeline_mode<synchronous>, transform_indices = @transform_5, window_bounds = array<i64: 2, 32>}]} {
    %c0_i32 = arith.constant 0 : i32
    %0 = arith.cmpi eq, %arg0, %c0_i32 : i32
    %1 = arith.extui %0 : i1 to i32
    %c0_i32_0 = arith.constant 0 : i32
    %2 = arith.cmpi ne, %1, %c0_i32_0 : i32
    scf.if %2 {
      %cst_22 = arith.constant 0.000000e+00 : f32
      %30 = vector.broadcast %cst_22 : f32 to vector<1x32xf32>
      %c0_23 = arith.constant 0 : index
      %c0_24 = arith.constant 0 : index
      %31 = vector.load %arg7[%c0_23, %c0_24] : memref<1x32xf32, #tpu.memory_space<vmem>>, vector<1x32xf32>
      tpu.vector_store %arg7[%c0_23, %c0_24], %30 {strides = array<i32>} : memref<1x32xf32, #tpu.memory_space<vmem>>, vector<1x32xf32>,
      %cst_25 = arith.constant 0.000000e+00 : f32
      %32 = vector.broadcast %cst_25 : f32 to vector<1x32xf32>
      %c0_26 = arith.constant 0 : index
      %c0_27 = arith.constant 0 : index
      %33 = vector.load %arg8[%c0_26, %c0_27] : memref<1x32xf32, #tpu.memory_space<vmem>>, vector<1x32xf32>
      tpu.vector_store %arg8[%c0_26, %c0_27], %32 {strides = array<i32>} : memref<1x32xf32, #tpu.memory_space<vmem>>, vector<1x32xf32>,
    } else {
    }
    %c0 = arith.constant 0 : index
    %c0_1 = arith.constant 0 : index
    %c0_2 = arith.constant 0 : index
    %3 = vector.load %arg1[%c0, %c0_1, %c0_2] : memref<1x8x16xf32, #tpu.memory_space<vmem>>, vector<1x8x16xf32>
    %4 = vector.shape_cast %3 : vector<1x8x16xf32> to vector<8x16xf32>
    %5 = arith.truncf %4 : vector<8x16xf32> to vector<8x16xbf16>
    %cst = arith.constant 0.000000e+00 : f32
    %6 = vector.broadcast %cst : f32 to vector<8x32xf32>
    %c0_3 = arith.constant 0 : index
    %c0_4 = arith.constant 0 : index
    %c0_5 = arith.constant 0 : index
    %7 = vector.load %arg2[%c0_3, %c0_4, %c0_5] : memref<1x16x32xbf16, #tpu.memory_space<vmem>>, vector<1x16x32xbf16>
    %8 = vector.shape_cast %7 : vector<1x16x32xbf16> to vector<16x32xbf16>
    %cst_6 = arith.constant dense<0.000000e+00> : vector<8x32xf32>
    %9 = tpu.matmul %5, %8, %cst_6 {dimension_numbers = #tpu.dot_dimension_numbers<[1], [0], [0], [1], [0, 0, 1, 1], [], []>} : vector<8x16xbf16>, vector<16x32xbf16>, vector<8x32xf32> -> vector<8x32xf32>
    %10 = arith.addf %6, %9 : vector<8x32xf32>
    %cst_7 = arith.constant 0.000000e+00 : f32
    %11 = vector.broadcast %cst_7 : f32 to vector<8x32xf32>
    %12 = arith.maximumf %10, %11 : vector<8x32xf32>
    %c0_8 = arith.constant 0 : index
    %c0_9 = arith.constant 0 : index
    %c0_10 = arith.constant 0 : index
    %13 = vector.load %arg5[%c0_8, %c0_9, %c0_10] : memref<1x8x32xf32, #tpu.memory_space<vmem>>, vector<1x8x32xf32>
    %14 = vector.shape_cast %13 : vector<1x8x32xf32> to vector<8x32xf32>
    %15 = vector.shape_cast %12 : vector<8x32xf32> to vector<1x8x32xf32>
    tpu.vector_store %arg5[%c0_8, %c0_9, %c0_10], %15 {strides = array<i32>} : memref<1x8x32xf32, #tpu.memory_space<vmem>>, vector<1x8x32xf32>,
    %c0_11 = arith.constant 0 : index
    %c0_12 = arith.constant 0 : index
    %16 = vector.load %arg7[%c0_11, %c0_12] : memref<1x32xf32, #tpu.memory_space<vmem>>, vector<1x32xf32>
    %cst_13 = arith.constant dense<0.000000e+00> : vector<32xf32>
    %17 = vector.multi_reduction <add>, %12, %cst_13 [0] : vector<8x32xf32> to vector<32xf32>
    %18 = vector.shape_cast %17 : vector<32xf32> to vector<1x32xf32>
    %19 = arith.addf %16, %18 : vector<1x32xf32>
    %c0_14 = arith.constant 0 : index
    %c0_15 = arith.constant 0 : index
    %20 = vector.load %arg7[%c0_14, %c0_15] : memref<1x32xf32, #tpu.memory_space<vmem>>, vector<1x32xf32>
    tpu.vector_store %arg7[%c0_14, %c0_15], %19 {strides = array<i32>} : memref<1x32xf32, #tpu.memory_space<vmem>>, vector<1x32xf32>,
    %c0_16 = arith.constant 0 : index
    %c0_17 = arith.constant 0 : index
    %21 = vector.load %arg8[%c0_16, %c0_17] : memref<1x32xf32, #tpu.memory_space<vmem>>, vector<1x32xf32>
    %22 = arith.mulf %12, %12 : vector<8x32xf32>
    %cst_18 = arith.constant dense<0.000000e+00> : vector<32xf32>
    %23 = vector.multi_reduction <add>, %22, %cst_18 [0] : vector<8x32xf32> to vector<32xf32>
    %24 = vector.shape_cast %23 : vector<32xf32> to vector<1x32xf32>
    %25 = arith.addf %21, %24 : vector<1x32xf32>
    %c0_19 = arith.constant 0 : index
    %c0_20 = arith.constant 0 : index
    %26 = vector.load %arg8[%c0_19, %c0_20] : memref<1x32xf32, #tpu.memory_space<vmem>>, vector<1x32xf32>
    tpu.vector_store %arg8[%c0_19, %c0_20], %25 {strides = array<i32>} : memref<1x32xf32, #tpu.memory_space<vmem>>, vector<1x32xf32>,
    %c1_i32 = arith.constant 1 : i32
    %27 = arith.cmpi eq, %arg0, %c1_i32 : i32
    %28 = arith.extui %27 : i1 to i32
    %c0_i32_21 = arith.constant 0 : i32
    %29 = arith.cmpi ne, %28, %c0_i32_21 : i32
    scf.if %29 {
      %c0_22 = arith.constant 0 : index
      %c0_23 = arith.constant 0 : index
      %30 = vector.load %arg7[%c0_22, %c0_23] : memref<1x32xf32, #tpu.memory_space<vmem>>, vector<1x32xf32>
      %cst_24 = arith.constant 6.250000e-02 : f32
      %31 = vector.broadcast %cst_24 : f32 to vector<1x32xf32>
      %32 = arith.mulf %30, %31 : vector<1x32xf32>
      %c0_25 = arith.constant 0 : index
      %c0_26 = arith.constant 0 : index
      %33 = vector.load %arg8[%c0_25, %c0_26] : memref<1x32xf32, #tpu.memory_space<vmem>>, vector<1x32xf32>
      %cst_27 = arith.constant 6.250000e-02 : f32
      %34 = vector.broadcast %cst_27 : f32 to vector<1x32xf32>
      %35 = arith.mulf %33, %34 : vector<1x32xf32>
      %36 = arith.mulf %32, %32 : vector<1x32xf32>
      %37 = arith.subf %35, %36 : vector<1x32xf32>
      %c0_28 = arith.constant 0 : index
      %c0_29 = arith.constant 0 : index
      %38 = vector.load %arg3[%c0_28, %c0_29] : memref<1x32xf32, #tpu.memory_space<vmem>>, vector<1x32xf32>
      %cst_30 = arith.constant 9.99999974E-6 : f32
      %39 = vector.broadcast %cst_30 : f32 to vector<1x32xf32>
      %40 = arith.addf %37, %39 : vector<1x32xf32>
      %41 = math.rsqrt %40 : vector<1x32xf32>
      %42 = arith.mulf %38, %41 : vector<1x32xf32>
      %c0_31 = arith.constant 0 : index
      %c0_32 = arith.constant 0 : index
      %43 = vector.load %arg4[%c0_31, %c0_32] : memref<1x32xf32, #tpu.memory_space<vmem>>, vector<1x32xf32>
      %44 = arith.mulf %32, %42 : vector<1x32xf32>
      %45 = arith.subf %43, %44 : vector<1x32xf32>
      %46 = tpu.concatenate %42, %45 in 0 : vector<1x32xf32>, vector<1x32xf32> -> vector<2x32xf32>
      %c0_33 = arith.constant 0 : index
      %c0_34 = arith.constant 0 : index
      %47 = vector.load %arg6[%c0_33, %c0_34] : memref<2x32xf32, #tpu.memory_space<vmem>>, vector<2x32xf32>
      tpu.vector_store %arg6[%c0_33, %c0_34], %46 {strides = array<i32>} : memref<2x32xf32, #tpu.memory_space<vmem>>, vector<2x32xf32>,
    } else {
    }
    return
  }
  func.func @transform_0(%arg0: i32) -> (i32, i32, i32) {
    %c0_i32 = arith.constant 0 : i32
    %c0_i32_0 = arith.constant 0 : i32
    %c0_i32_1 = arith.constant 0 : i32
    return %arg0, %c0_i32, %c0_i32_0 : i32, i32, i32
  }
  func.func @transform_1(%arg0: i32) -> (i32, i32, i32) {
    %c0_i32 = arith.constant 0 : i32
    %c0_i32_0 = arith.constant 0 : i32
    %c0_i32_1 = arith.constant 0 : i32
    %c0_i32_2 = arith.constant 0 : i32
    return %c0_i32, %c0_i32_0, %c0_i32_1 : i32, i32, i32
  }
  func.func @transform_2(%arg0: i32) -> (i32, i32) {
    %c0_i32 = arith.constant 0 : i32
    %c0_i32_0 = arith.constant 0 : i32
    %c0_i32_1 = arith.constant 0 : i32
    return %c0_i32, %c0_i32_0 : i32, i32
  }
  func.func @transform_3(%arg0: i32) -> (i32, i32) {
    %c0_i32 = arith.constant 0 : i32
    %c0_i32_0 = arith.constant 0 : i32
    %c0_i32_1 = arith.constant 0 : i32
    return %c0_i32, %c0_i32_0 : i32, i32
  }
  func.func @transform_4(%arg0: i32) -> (i32, i32, i32) {
    %c0_i32 = arith.constant 0 : i32
    %c0_i32_0 = arith.constant 0 : i32
    %c0_i32_1 = arith.constant 0 : i32
    return %arg0, %c0_i32, %c0_i32_0 : i32, i32, i32
  }
  func.func @transform_5(%arg0: i32) -> (i32, i32) {
    %c0_i32 = arith.constant 0 : i32
    %c0_i32_0 = arith.constant 0 : i32
    %c0_i32_1 = arith.constant 0 : i32
    return %c0_i32, %c0_i32_0 : i32, i32
  }
}

module attributes {stable_mosaic.version = 11 : i64} {
  func.func @_conv_stats_kernel(%arg0: i32, %arg1: memref<1x10x16xf32, #tpu.memory_space<vmem>>, %arg2: memref<2x16x32xbf16, #tpu.memory_space<vmem>>, %arg3: memref<1x32xf32, #tpu.memory_space<vmem>>, %arg4: memref<1x32xf32, #tpu.memory_space<vmem>>, %arg5: memref<1x8x32xf32, #tpu.memory_space<vmem>>, %arg6: memref<2x32xf32, #tpu.memory_space<vmem>>, %arg7: memref<1x32xf32, #tpu.memory_space<vmem>>, %arg8: memref<1x32xf32, #tpu.memory_space<vmem>>) attributes {dimension_semantics = [#tpu.dimension_semantics<arbitrary>], iteration_bounds = array<i64: 2>, scalar_prefetch = 0 : i64, scratch_operands = 2 : i64, tpu.core_type = #tpu.core_type<tc>, window_params = [{transform_indices = @transform_0, window_bounds = array<i64: 1, 10, 16>}, {pipeline_mode = #tpu.pipeline_mode<synchronous>, transform_indices = @transform_1, window_bounds = array<i64: 2, 16, 32>}, {pipeline_mode = #tpu.pipeline_mode<synchronous>, transform_indices = @transform_2, window_bounds = array<i64: 1, 32>}, {pipeline_mode = #tpu.pipeline_mode<synchronous>, transform_indices = @transform_3, window_bounds = array<i64: 1, 32>}, {transform_indices = @transform_4, window_bounds = array<i64: 1, 8, 32>}, {pipeline_mode = #tpu.pipeline_mode<synchronous>, transform_indices = @transform_5, window_bounds = array<i64: 2, 32>}]} {
    %c0_i32 = arith.constant 0 : i32
    %0 = arith.cmpi eq, %arg0, %c0_i32 : i32
    %1 = arith.extui %0 : i1 to i32
    %c0_i32_0 = arith.constant 0 : i32
    %2 = arith.cmpi ne, %1, %c0_i32_0 : i32
    scf.if %2 {
      %cst_25 = arith.constant 0.000000e+00 : f32
      %37 = vector.broadcast %cst_25 : f32 to vector<1x32xf32>
      %c0_26 = arith.constant 0 : index
      %c0_27 = arith.constant 0 : index
      %38 = vector.load %arg7[%c0_26, %c0_27] : memref<1x32xf32, #tpu.memory_space<vmem>>, vector<1x32xf32>
      tpu.vector_store %arg7[%c0_26, %c0_27], %37 {strides = array<i32>} : memref<1x32xf32, #tpu.memory_space<vmem>>, vector<1x32xf32>,
      %cst_28 = arith.constant 0.000000e+00 : f32
      %39 = vector.broadcast %cst_28 : f32 to vector<1x32xf32>
      %c0_29 = arith.constant 0 : index
      %c0_30 = arith.constant 0 : index
      %40 = vector.load %arg8[%c0_29, %c0_30] : memref<1x32xf32, #tpu.memory_space<vmem>>, vector<1x32xf32>
      tpu.vector_store %arg8[%c0_29, %c0_30], %39 {strides = array<i32>} : memref<1x32xf32, #tpu.memory_space<vmem>>, vector<1x32xf32>,
    } else {
    }
    %c0 = arith.constant 0 : index
    %c0_1 = arith.constant 0 : index
    %c0_2 = arith.constant 0 : index
    %3 = vector.load %arg1[%c0, %c0_1, %c0_2] : memref<1x10x16xf32, #tpu.memory_space<vmem>>, vector<1x10x16xf32>
    %4 = vector.shape_cast %3 : vector<1x10x16xf32> to vector<10x16xf32>
    %5 = arith.truncf %4 : vector<10x16xf32> to vector<10x16xbf16>
    %cst = arith.constant 0.000000e+00 : f32
    %6 = vector.broadcast %cst : f32 to vector<9x32xf32>
    %7 = vector.extract_strided_slice %5 {offsets = [0, 0], sizes = [9, 16], strides = [1, 1]} : vector<10x16xbf16> to vector<9x16xbf16>
    %c0_3 = arith.constant 0 : index
    %c0_4 = arith.constant 0 : index
    %c0_5 = arith.constant 0 : index
    %8 = vector.load %arg2[%c0_3, %c0_4, %c0_5] : memref<2x16x32xbf16, #tpu.memory_space<vmem>>, vector<1x16x32xbf16>
    %9 = vector.shape_cast %8 : vector<1x16x32xbf16> to vector<16x32xbf16>
    %cst_6 = arith.constant dense<0.000000e+00> : vector<9x32xf32>
    %10 = tpu.matmul %7, %9, %cst_6 {dimension_numbers = #tpu.dot_dimension_numbers<[1], [0], [0], [1], [0, 0, 1, 1], [], []>} : vector<9x16xbf16>, vector<16x32xbf16>, vector<9x32xf32> -> vector<9x32xf32>
    %11 = arith.addf %6, %10 : vector<9x32xf32>
    %12 = vector.extract_strided_slice %5 {offsets = [1, 0], sizes = [9, 16], strides = [1, 1]} : vector<10x16xbf16> to vector<9x16xbf16>
    %c1 = arith.constant 1 : index
    %c0_7 = arith.constant 0 : index
    %c0_8 = arith.constant 0 : index
    %13 = vector.load %arg2[%c1, %c0_7, %c0_8] : memref<2x16x32xbf16, #tpu.memory_space<vmem>>, vector<1x16x32xbf16>
    %14 = vector.shape_cast %13 : vector<1x16x32xbf16> to vector<16x32xbf16>
    %cst_9 = arith.constant dense<0.000000e+00> : vector<9x32xf32>
    %15 = tpu.matmul %12, %14, %cst_9 {dimension_numbers = #tpu.dot_dimension_numbers<[1], [0], [0], [1], [0, 0, 1, 1], [], []>} : vector<9x16xbf16>, vector<16x32xbf16>, vector<9x32xf32> -> vector<9x32xf32>
    %16 = arith.addf %11, %15 : vector<9x32xf32>
    %cst_10 = arith.constant 0.000000e+00 : f32
    %17 = vector.broadcast %cst_10 : f32 to vector<9x32xf32>
    %18 = arith.maximumf %16, %17 : vector<9x32xf32>
    %19 = vector.extract_strided_slice %18 {offsets = [0, 0], sizes = [8, 32], strides = [1, 1]} : vector<9x32xf32> to vector<8x32xf32>
    %c0_11 = arith.constant 0 : index
    %c0_12 = arith.constant 0 : index
    %c0_13 = arith.constant 0 : index
    %20 = vector.load %arg5[%c0_11, %c0_12, %c0_13] : memref<1x8x32xf32, #tpu.memory_space<vmem>>, vector<1x8x32xf32>
    %21 = vector.shape_cast %20 : vector<1x8x32xf32> to vector<8x32xf32>
    %22 = vector.shape_cast %19 : vector<8x32xf32> to vector<1x8x32xf32>
    tpu.vector_store %arg5[%c0_11, %c0_12, %c0_13], %22 {strides = array<i32>} : memref<1x8x32xf32, #tpu.memory_space<vmem>>, vector<1x8x32xf32>,
    %c0_14 = arith.constant 0 : index
    %c0_15 = arith.constant 0 : index
    %23 = vector.load %arg7[%c0_14, %c0_15] : memref<1x32xf32, #tpu.memory_space<vmem>>, vector<1x32xf32>
    %cst_16 = arith.constant dense<0.000000e+00> : vector<32xf32>
    %24 = vector.multi_reduction <add>, %18, %cst_16 [0] : vector<9x32xf32> to vector<32xf32>
    %25 = vector.shape_cast %24 : vector<32xf32> to vector<1x32xf32>
    %26 = arith.addf %23, %25 : vector<1x32xf32>
    %c0_17 = arith.constant 0 : index
    %c0_18 = arith.constant 0 : index
    %27 = vector.load %arg7[%c0_17, %c0_18] : memref<1x32xf32, #tpu.memory_space<vmem>>, vector<1x32xf32>
    tpu.vector_store %arg7[%c0_17, %c0_18], %26 {strides = array<i32>} : memref<1x32xf32, #tpu.memory_space<vmem>>, vector<1x32xf32>,
    %c0_19 = arith.constant 0 : index
    %c0_20 = arith.constant 0 : index
    %28 = vector.load %arg8[%c0_19, %c0_20] : memref<1x32xf32, #tpu.memory_space<vmem>>, vector<1x32xf32>
    %29 = arith.mulf %18, %18 : vector<9x32xf32>
    %cst_21 = arith.constant dense<0.000000e+00> : vector<32xf32>
    %30 = vector.multi_reduction <add>, %29, %cst_21 [0] : vector<9x32xf32> to vector<32xf32>
    %31 = vector.shape_cast %30 : vector<32xf32> to vector<1x32xf32>
    %32 = arith.addf %28, %31 : vector<1x32xf32>
    %c0_22 = arith.constant 0 : index
    %c0_23 = arith.constant 0 : index
    %33 = vector.load %arg8[%c0_22, %c0_23] : memref<1x32xf32, #tpu.memory_space<vmem>>, vector<1x32xf32>
    tpu.vector_store %arg8[%c0_22, %c0_23], %32 {strides = array<i32>} : memref<1x32xf32, #tpu.memory_space<vmem>>, vector<1x32xf32>,
    %c1_i32 = arith.constant 1 : i32
    %34 = arith.cmpi eq, %arg0, %c1_i32 : i32
    %35 = arith.extui %34 : i1 to i32
    %c0_i32_24 = arith.constant 0 : i32
    %36 = arith.cmpi ne, %35, %c0_i32_24 : i32
    scf.if %36 {
      %c0_25 = arith.constant 0 : index
      %c0_26 = arith.constant 0 : index
      %37 = vector.load %arg7[%c0_25, %c0_26] : memref<1x32xf32, #tpu.memory_space<vmem>>, vector<1x32xf32>
      %cst_27 = arith.constant 0.055555556 : f32
      %38 = vector.broadcast %cst_27 : f32 to vector<1x32xf32>
      %39 = arith.mulf %37, %38 : vector<1x32xf32>
      %c0_28 = arith.constant 0 : index
      %c0_29 = arith.constant 0 : index
      %40 = vector.load %arg8[%c0_28, %c0_29] : memref<1x32xf32, #tpu.memory_space<vmem>>, vector<1x32xf32>
      %cst_30 = arith.constant 0.055555556 : f32
      %41 = vector.broadcast %cst_30 : f32 to vector<1x32xf32>
      %42 = arith.mulf %40, %41 : vector<1x32xf32>
      %43 = arith.mulf %39, %39 : vector<1x32xf32>
      %44 = arith.subf %42, %43 : vector<1x32xf32>
      %c0_31 = arith.constant 0 : index
      %c0_32 = arith.constant 0 : index
      %45 = vector.load %arg3[%c0_31, %c0_32] : memref<1x32xf32, #tpu.memory_space<vmem>>, vector<1x32xf32>
      %cst_33 = arith.constant 9.99999974E-6 : f32
      %46 = vector.broadcast %cst_33 : f32 to vector<1x32xf32>
      %47 = arith.addf %44, %46 : vector<1x32xf32>
      %48 = math.rsqrt %47 : vector<1x32xf32>
      %49 = arith.mulf %45, %48 : vector<1x32xf32>
      %c0_34 = arith.constant 0 : index
      %c0_35 = arith.constant 0 : index
      %50 = vector.load %arg4[%c0_34, %c0_35] : memref<1x32xf32, #tpu.memory_space<vmem>>, vector<1x32xf32>
      %51 = arith.mulf %39, %49 : vector<1x32xf32>
      %52 = arith.subf %50, %51 : vector<1x32xf32>
      %53 = tpu.concatenate %49, %52 in 0 : vector<1x32xf32>, vector<1x32xf32> -> vector<2x32xf32>
      %c0_36 = arith.constant 0 : index
      %c0_37 = arith.constant 0 : index
      %54 = vector.load %arg6[%c0_36, %c0_37] : memref<2x32xf32, #tpu.memory_space<vmem>>, vector<2x32xf32>
      tpu.vector_store %arg6[%c0_36, %c0_37], %53 {strides = array<i32>} : memref<2x32xf32, #tpu.memory_space<vmem>>, vector<2x32xf32>,
    } else {
    }
    return
  }
  func.func @transform_0(%arg0: i32) -> (i32, i32, i32) {
    %c0_i32 = arith.constant 0 : i32
    %c0_i32_0 = arith.constant 0 : i32
    %c0_i32_1 = arith.constant 0 : i32
    return %arg0, %c0_i32, %c0_i32_0 : i32, i32, i32
  }
  func.func @transform_1(%arg0: i32) -> (i32, i32, i32) {
    %c0_i32 = arith.constant 0 : i32
    %c0_i32_0 = arith.constant 0 : i32
    %c0_i32_1 = arith.constant 0 : i32
    %c0_i32_2 = arith.constant 0 : i32
    return %c0_i32, %c0_i32_0, %c0_i32_1 : i32, i32, i32
  }
  func.func @transform_2(%arg0: i32) -> (i32, i32) {
    %c0_i32 = arith.constant 0 : i32
    %c0_i32_0 = arith.constant 0 : i32
    %c0_i32_1 = arith.constant 0 : i32
    return %c0_i32, %c0_i32_0 : i32, i32
  }
  func.func @transform_3(%arg0: i32) -> (i32, i32) {
    %c0_i32 = arith.constant 0 : i32
    %c0_i32_0 = arith.constant 0 : i32
    %c0_i32_1 = arith.constant 0 : i32
    return %c0_i32, %c0_i32_0 : i32, i32
  }
  func.func @transform_4(%arg0: i32) -> (i32, i32, i32) {
    %c0_i32 = arith.constant 0 : i32
    %c0_i32_0 = arith.constant 0 : i32
    %c0_i32_1 = arith.constant 0 : i32
    return %arg0, %c0_i32, %c0_i32_0 : i32, i32, i32
  }
  func.func @transform_5(%arg0: i32) -> (i32, i32) {
    %c0_i32 = arith.constant 0 : i32
    %c0_i32_0 = arith.constant 0 : i32
    %c0_i32_1 = arith.constant 0 : i32
    return %c0_i32, %c0_i32_0 : i32, i32
  }
}

module attributes {stable_mosaic.version = 11 : i64} {
  func.func @_conv_stats_kernel(%arg0: i32, %arg1: memref<1x10x16xf32, #tpu.memory_space<vmem>>, %arg2: memref<3x16x32xbf16, #tpu.memory_space<vmem>>, %arg3: memref<1x32xf32, #tpu.memory_space<vmem>>, %arg4: memref<1x32xf32, #tpu.memory_space<vmem>>, %arg5: memref<1x8x32xf32, #tpu.memory_space<vmem>>, %arg6: memref<2x32xf32, #tpu.memory_space<vmem>>, %arg7: memref<1x32xf32, #tpu.memory_space<vmem>>, %arg8: memref<1x32xf32, #tpu.memory_space<vmem>>) attributes {dimension_semantics = [#tpu.dimension_semantics<arbitrary>], iteration_bounds = array<i64: 2>, scalar_prefetch = 0 : i64, scratch_operands = 2 : i64, tpu.core_type = #tpu.core_type<tc>, window_params = [{transform_indices = @transform_0, window_bounds = array<i64: 1, 10, 16>}, {pipeline_mode = #tpu.pipeline_mode<synchronous>, transform_indices = @transform_1, window_bounds = array<i64: 3, 16, 32>}, {pipeline_mode = #tpu.pipeline_mode<synchronous>, transform_indices = @transform_2, window_bounds = array<i64: 1, 32>}, {pipeline_mode = #tpu.pipeline_mode<synchronous>, transform_indices = @transform_3, window_bounds = array<i64: 1, 32>}, {transform_indices = @transform_4, window_bounds = array<i64: 1, 8, 32>}, {pipeline_mode = #tpu.pipeline_mode<synchronous>, transform_indices = @transform_5, window_bounds = array<i64: 2, 32>}]} {
    %c0_i32 = arith.constant 0 : i32
    %0 = arith.cmpi eq, %arg0, %c0_i32 : i32
    %1 = arith.extui %0 : i1 to i32
    %c0_i32_0 = arith.constant 0 : i32
    %2 = arith.cmpi ne, %1, %c0_i32_0 : i32
    scf.if %2 {
      %cst_28 = arith.constant 0.000000e+00 : f32
      %41 = vector.broadcast %cst_28 : f32 to vector<1x32xf32>
      %c0_29 = arith.constant 0 : index
      %c0_30 = arith.constant 0 : index
      %42 = vector.load %arg7[%c0_29, %c0_30] : memref<1x32xf32, #tpu.memory_space<vmem>>, vector<1x32xf32>
      tpu.vector_store %arg7[%c0_29, %c0_30], %41 {strides = array<i32>} : memref<1x32xf32, #tpu.memory_space<vmem>>, vector<1x32xf32>,
      %cst_31 = arith.constant 0.000000e+00 : f32
      %43 = vector.broadcast %cst_31 : f32 to vector<1x32xf32>
      %c0_32 = arith.constant 0 : index
      %c0_33 = arith.constant 0 : index
      %44 = vector.load %arg8[%c0_32, %c0_33] : memref<1x32xf32, #tpu.memory_space<vmem>>, vector<1x32xf32>
      tpu.vector_store %arg8[%c0_32, %c0_33], %43 {strides = array<i32>} : memref<1x32xf32, #tpu.memory_space<vmem>>, vector<1x32xf32>,
    } else {
    }
    %c0 = arith.constant 0 : index
    %c0_1 = arith.constant 0 : index
    %c0_2 = arith.constant 0 : index
    %3 = vector.load %arg1[%c0, %c0_1, %c0_2] : memref<1x10x16xf32, #tpu.memory_space<vmem>>, vector<1x10x16xf32>
    %4 = vector.shape_cast %3 : vector<1x10x16xf32> to vector<10x16xf32>
    %5 = arith.truncf %4 : vector<10x16xf32> to vector<10x16xbf16>
    %cst = arith.constant 0.000000e+00 : f32
    %6 = vector.broadcast %cst : f32 to vector<8x32xf32>
    %7 = vector.extract_strided_slice %5 {offsets = [0, 0], sizes = [8, 16], strides = [1, 1]} : vector<10x16xbf16> to vector<8x16xbf16>
    %c0_3 = arith.constant 0 : index
    %c0_4 = arith.constant 0 : index
    %c0_5 = arith.constant 0 : index
    %8 = vector.load %arg2[%c0_3, %c0_4, %c0_5] : memref<3x16x32xbf16, #tpu.memory_space<vmem>>, vector<1x16x32xbf16>
    %9 = vector.shape_cast %8 : vector<1x16x32xbf16> to vector<16x32xbf16>
    %cst_6 = arith.constant dense<0.000000e+00> : vector<8x32xf32>
    %10 = tpu.matmul %7, %9, %cst_6 {dimension_numbers = #tpu.dot_dimension_numbers<[1], [0], [0], [1], [0, 0, 1, 1], [], []>} : vector<8x16xbf16>, vector<16x32xbf16>, vector<8x32xf32> -> vector<8x32xf32>
    %11 = arith.addf %6, %10 : vector<8x32xf32>
    %12 = vector.extract_strided_slice %5 {offsets = [1, 0], sizes = [8, 16], strides = [1, 1]} : vector<10x16xbf16> to vector<8x16xbf16>
    %c1 = arith.constant 1 : index
    %c0_7 = arith.constant 0 : index
    %c0_8 = arith.constant 0 : index
    %13 = vector.load %arg2[%c1, %c0_7, %c0_8] : memref<3x16x32xbf16, #tpu.memory_space<vmem>>, vector<1x16x32xbf16>
    %14 = vector.shape_cast %13 : vector<1x16x32xbf16> to vector<16x32xbf16>
    %cst_9 = arith.constant dense<0.000000e+00> : vector<8x32xf32>
    %15 = tpu.matmul %12, %14, %cst_9 {dimension_numbers = #tpu.dot_dimension_numbers<[1], [0], [0], [1], [0, 0, 1, 1], [], []>} : vector<8x16xbf16>, vector<16x32xbf16>, vector<8x32xf32> -> vector<8x32xf32>
    %16 = arith.addf %11, %15 : vector<8x32xf32>
    %17 = vector.extract_strided_slice %5 {offsets = [2, 0], sizes = [8, 16], strides = [1, 1]} : vector<10x16xbf16> to vector<8x16xbf16>
    %c2 = arith.constant 2 : index
    %c0_10 = arith.constant 0 : index
    %c0_11 = arith.constant 0 : index
    %18 = vector.load %arg2[%c2, %c0_10, %c0_11] : memref<3x16x32xbf16, #tpu.memory_space<vmem>>, vector<1x16x32xbf16>
    %19 = vector.shape_cast %18 : vector<1x16x32xbf16> to vector<16x32xbf16>
    %cst_12 = arith.constant dense<0.000000e+00> : vector<8x32xf32>
    %20 = tpu.matmul %17, %19, %cst_12 {dimension_numbers = #tpu.dot_dimension_numbers<[1], [0], [0], [1], [0, 0, 1, 1], [], []>} : vector<8x16xbf16>, vector<16x32xbf16>, vector<8x32xf32> -> vector<8x32xf32>
    %21 = arith.addf %16, %20 : vector<8x32xf32>
    %cst_13 = arith.constant 0.000000e+00 : f32
    %22 = vector.broadcast %cst_13 : f32 to vector<8x32xf32>
    %23 = arith.maximumf %21, %22 : vector<8x32xf32>
    %c0_14 = arith.constant 0 : index
    %c0_15 = arith.constant 0 : index
    %c0_16 = arith.constant 0 : index
    %24 = vector.load %arg5[%c0_14, %c0_15, %c0_16] : memref<1x8x32xf32, #tpu.memory_space<vmem>>, vector<1x8x32xf32>
    %25 = vector.shape_cast %24 : vector<1x8x32xf32> to vector<8x32xf32>
    %26 = vector.shape_cast %23 : vector<8x32xf32> to vector<1x8x32xf32>
    tpu.vector_store %arg5[%c0_14, %c0_15, %c0_16], %26 {strides = array<i32>} : memref<1x8x32xf32, #tpu.memory_space<vmem>>, vector<1x8x32xf32>,
    %c0_17 = arith.constant 0 : index
    %c0_18 = arith.constant 0 : index
    %27 = vector.load %arg7[%c0_17, %c0_18] : memref<1x32xf32, #tpu.memory_space<vmem>>, vector<1x32xf32>
    %cst_19 = arith.constant dense<0.000000e+00> : vector<32xf32>
    %28 = vector.multi_reduction <add>, %23, %cst_19 [0] : vector<8x32xf32> to vector<32xf32>
    %29 = vector.shape_cast %28 : vector<32xf32> to vector<1x32xf32>
    %30 = arith.addf %27, %29 : vector<1x32xf32>
    %c0_20 = arith.constant 0 : index
    %c0_21 = arith.constant 0 : index
    %31 = vector.load %arg7[%c0_20, %c0_21] : memref<1x32xf32, #tpu.memory_space<vmem>>, vector<1x32xf32>
    tpu.vector_store %arg7[%c0_20, %c0_21], %30 {strides = array<i32>} : memref<1x32xf32, #tpu.memory_space<vmem>>, vector<1x32xf32>,
    %c0_22 = arith.constant 0 : index
    %c0_23 = arith.constant 0 : index
    %32 = vector.load %arg8[%c0_22, %c0_23] : memref<1x32xf32, #tpu.memory_space<vmem>>, vector<1x32xf32>
    %33 = arith.mulf %23, %23 : vector<8x32xf32>
    %cst_24 = arith.constant dense<0.000000e+00> : vector<32xf32>
    %34 = vector.multi_reduction <add>, %33, %cst_24 [0] : vector<8x32xf32> to vector<32xf32>
    %35 = vector.shape_cast %34 : vector<32xf32> to vector<1x32xf32>
    %36 = arith.addf %32, %35 : vector<1x32xf32>
    %c0_25 = arith.constant 0 : index
    %c0_26 = arith.constant 0 : index
    %37 = vector.load %arg8[%c0_25, %c0_26] : memref<1x32xf32, #tpu.memory_space<vmem>>, vector<1x32xf32>
    tpu.vector_store %arg8[%c0_25, %c0_26], %36 {strides = array<i32>} : memref<1x32xf32, #tpu.memory_space<vmem>>, vector<1x32xf32>,
    %c1_i32 = arith.constant 1 : i32
    %38 = arith.cmpi eq, %arg0, %c1_i32 : i32
    %39 = arith.extui %38 : i1 to i32
    %c0_i32_27 = arith.constant 0 : i32
    %40 = arith.cmpi ne, %39, %c0_i32_27 : i32
    scf.if %40 {
      %c0_28 = arith.constant 0 : index
      %c0_29 = arith.constant 0 : index
      %41 = vector.load %arg7[%c0_28, %c0_29] : memref<1x32xf32, #tpu.memory_space<vmem>>, vector<1x32xf32>
      %cst_30 = arith.constant 6.250000e-02 : f32
      %42 = vector.broadcast %cst_30 : f32 to vector<1x32xf32>
      %43 = arith.mulf %41, %42 : vector<1x32xf32>
      %c0_31 = arith.constant 0 : index
      %c0_32 = arith.constant 0 : index
      %44 = vector.load %arg8[%c0_31, %c0_32] : memref<1x32xf32, #tpu.memory_space<vmem>>, vector<1x32xf32>
      %cst_33 = arith.constant 6.250000e-02 : f32
      %45 = vector.broadcast %cst_33 : f32 to vector<1x32xf32>
      %46 = arith.mulf %44, %45 : vector<1x32xf32>
      %47 = arith.mulf %43, %43 : vector<1x32xf32>
      %48 = arith.subf %46, %47 : vector<1x32xf32>
      %c0_34 = arith.constant 0 : index
      %c0_35 = arith.constant 0 : index
      %49 = vector.load %arg3[%c0_34, %c0_35] : memref<1x32xf32, #tpu.memory_space<vmem>>, vector<1x32xf32>
      %cst_36 = arith.constant 9.99999974E-6 : f32
      %50 = vector.broadcast %cst_36 : f32 to vector<1x32xf32>
      %51 = arith.addf %48, %50 : vector<1x32xf32>
      %52 = math.rsqrt %51 : vector<1x32xf32>
      %53 = arith.mulf %49, %52 : vector<1x32xf32>
      %c0_37 = arith.constant 0 : index
      %c0_38 = arith.constant 0 : index
      %54 = vector.load %arg4[%c0_37, %c0_38] : memref<1x32xf32, #tpu.memory_space<vmem>>, vector<1x32xf32>
      %55 = arith.mulf %43, %53 : vector<1x32xf32>
      %56 = arith.subf %54, %55 : vector<1x32xf32>
      %57 = tpu.concatenate %53, %56 in 0 : vector<1x32xf32>, vector<1x32xf32> -> vector<2x32xf32>
      %c0_39 = arith.constant 0 : index
      %c0_40 = arith.constant 0 : index
      %58 = vector.load %arg6[%c0_39, %c0_40] : memref<2x32xf32, #tpu.memory_space<vmem>>, vector<2x32xf32>
      tpu.vector_store %arg6[%c0_39, %c0_40], %57 {strides = array<i32>} : memref<2x32xf32, #tpu.memory_space<vmem>>, vector<2x32xf32>,
    } else {
    }
    return
  }
  func.func @transform_0(%arg0: i32) -> (i32, i32, i32) {
    %c0_i32 = arith.constant 0 : i32
    %c0_i32_0 = arith.constant 0 : i32
    %c0_i32_1 = arith.constant 0 : i32
    return %arg0, %c0_i32, %c0_i32_0 : i32, i32, i32
  }
  func.func @transform_1(%arg0: i32) -> (i32, i32, i32) {
    %c0_i32 = arith.constant 0 : i32
    %c0_i32_0 = arith.constant 0 : i32
    %c0_i32_1 = arith.constant 0 : i32
    %c0_i32_2 = arith.constant 0 : i32
    return %c0_i32, %c0_i32_0, %c0_i32_1 : i32, i32, i32
  }
  func.func @transform_2(%arg0: i32) -> (i32, i32) {
    %c0_i32 = arith.constant 0 : i32
    %c0_i32_0 = arith.constant 0 : i32
    %c0_i32_1 = arith.constant 0 : i32
    return %c0_i32, %c0_i32_0 : i32, i32
  }
  func.func @transform_3(%arg0: i32) -> (i32, i32) {
    %c0_i32 = arith.constant 0 : i32
    %c0_i32_0 = arith.constant 0 : i32
    %c0_i32_1 = arith.constant 0 : i32
    return %c0_i32, %c0_i32_0 : i32, i32
  }
  func.func @transform_4(%arg0: i32) -> (i32, i32, i32) {
    %c0_i32 = arith.constant 0 : i32
    %c0_i32_0 = arith.constant 0 : i32
    %c0_i32_1 = arith.constant 0 : i32
    return %arg0, %c0_i32, %c0_i32_0 : i32, i32, i32
  }
  func.func @transform_5(%arg0: i32) -> (i32, i32) {
    %c0_i32 = arith.constant 0 : i32
    %c0_i32_0 = arith.constant 0 : i32
    %c0_i32_1 = arith.constant 0 : i32
    return %c0_i32, %c0_i32_0 : i32, i32
  }
}

module attributes {stable_mosaic.version = 11 : i64} {
  func.func @_conv_stats_kernel(%arg0: i32, %arg1: memref<1x12x16xf32, #tpu.memory_space<vmem>>, %arg2: memref<4x16x32xbf16, #tpu.memory_space<vmem>>, %arg3: memref<1x32xf32, #tpu.memory_space<vmem>>, %arg4: memref<1x32xf32, #tpu.memory_space<vmem>>, %arg5: memref<1x8x32xf32, #tpu.memory_space<vmem>>, %arg6: memref<2x32xf32, #tpu.memory_space<vmem>>, %arg7: memref<1x32xf32, #tpu.memory_space<vmem>>, %arg8: memref<1x32xf32, #tpu.memory_space<vmem>>) attributes {dimension_semantics = [#tpu.dimension_semantics<arbitrary>], iteration_bounds = array<i64: 2>, scalar_prefetch = 0 : i64, scratch_operands = 2 : i64, tpu.core_type = #tpu.core_type<tc>, window_params = [{transform_indices = @transform_0, window_bounds = array<i64: 1, 12, 16>}, {pipeline_mode = #tpu.pipeline_mode<synchronous>, transform_indices = @transform_1, window_bounds = array<i64: 4, 16, 32>}, {pipeline_mode = #tpu.pipeline_mode<synchronous>, transform_indices = @transform_2, window_bounds = array<i64: 1, 32>}, {pipeline_mode = #tpu.pipeline_mode<synchronous>, transform_indices = @transform_3, window_bounds = array<i64: 1, 32>}, {transform_indices = @transform_4, window_bounds = array<i64: 1, 8, 32>}, {pipeline_mode = #tpu.pipeline_mode<synchronous>, transform_indices = @transform_5, window_bounds = array<i64: 2, 32>}]} {
    %c0_i32 = arith.constant 0 : i32
    %0 = arith.cmpi eq, %arg0, %c0_i32 : i32
    %1 = arith.extui %0 : i1 to i32
    %c0_i32_0 = arith.constant 0 : i32
    %2 = arith.cmpi ne, %1, %c0_i32_0 : i32
    scf.if %2 {
      %cst_31 = arith.constant 0.000000e+00 : f32
      %47 = vector.broadcast %cst_31 : f32 to vector<1x32xf32>
      %c0_32 = arith.constant 0 : index
      %c0_33 = arith.constant 0 : index
      %48 = vector.load %arg7[%c0_32, %c0_33] : memref<1x32xf32, #tpu.memory_space<vmem>>, vector<1x32xf32>
      tpu.vector_store %arg7[%c0_32, %c0_33], %47 {strides = array<i32>} : memref<1x32xf32, #tpu.memory_space<vmem>>, vector<1x32xf32>,
      %cst_34 = arith.constant 0.000000e+00 : f32
      %49 = vector.broadcast %cst_34 : f32 to vector<1x32xf32>
      %c0_35 = arith.constant 0 : index
      %c0_36 = arith.constant 0 : index
      %50 = vector.load %arg8[%c0_35, %c0_36] : memref<1x32xf32, #tpu.memory_space<vmem>>, vector<1x32xf32>
      tpu.vector_store %arg8[%c0_35, %c0_36], %49 {strides = array<i32>} : memref<1x32xf32, #tpu.memory_space<vmem>>, vector<1x32xf32>,
    } else {
    }
    %c0 = arith.constant 0 : index
    %c0_1 = arith.constant 0 : index
    %c0_2 = arith.constant 0 : index
    %3 = vector.load %arg1[%c0, %c0_1, %c0_2] : memref<1x12x16xf32, #tpu.memory_space<vmem>>, vector<1x12x16xf32>
    %4 = vector.shape_cast %3 : vector<1x12x16xf32> to vector<12x16xf32>
    %5 = arith.truncf %4 : vector<12x16xf32> to vector<12x16xbf16>
    %cst = arith.constant 0.000000e+00 : f32
    %6 = vector.broadcast %cst : f32 to vector<9x32xf32>
    %7 = vector.extract_strided_slice %5 {offsets = [0, 0], sizes = [9, 16], strides = [1, 1]} : vector<12x16xbf16> to vector<9x16xbf16>
    %c0_3 = arith.constant 0 : index
    %c0_4 = arith.constant 0 : index
    %c0_5 = arith.constant 0 : index
    %8 = vector.load %arg2[%c0_3, %c0_4, %c0_5] : memref<4x16x32xbf16, #tpu.memory_space<vmem>>, vector<1x16x32xbf16>
    %9 = vector.shape_cast %8 : vector<1x16x32xbf16> to vector<16x32xbf16>
    %cst_6 = arith.constant dense<0.000000e+00> : vector<9x32xf32>
    %10 = tpu.matmul %7, %9, %cst_6 {dimension_numbers = #tpu.dot_dimension_numbers<[1], [0], [0], [1], [0, 0, 1, 1], [], []>} : vector<9x16xbf16>, vector<16x32xbf16>, vector<9x32xf32> -> vector<9x32xf32>
    %11 = arith.addf %6, %10 : vector<9x32xf32>
    %12 = vector.extract_strided_slice %5 {offsets = [1, 0], sizes = [9, 16], strides = [1, 1]} : vector<12x16xbf16> to vector<9x16xbf16>
    %c1 = arith.constant 1 : index
    %c0_7 = arith.constant 0 : index
    %c0_8 = arith.constant 0 : index
    %13 = vector.load %arg2[%c1, %c0_7, %c0_8] : memref<4x16x32xbf16, #tpu.memory_space<vmem>>, vector<1x16x32xbf16>
    %14 = vector.shape_cast %13 : vector<1x16x32xbf16> to vector<16x32xbf16>
    %cst_9 = arith.constant dense<0.000000e+00> : vector<9x32xf32>
    %15 = tpu.matmul %12, %14, %cst_9 {dimension_numbers = #tpu.dot_dimension_numbers<[1], [0], [0], [1], [0, 0, 1, 1], [], []>} : vector<9x16xbf16>, vector<16x32xbf16>, vector<9x32xf32> -> vector<9x32xf32>
    %16 = arith.addf %11, %15 : vector<9x32xf32>
    %17 = vector.extract_strided_slice %5 {offsets = [2, 0], sizes = [9, 16], strides = [1, 1]} : vector<12x16xbf16> to vector<9x16xbf16>
    %c2 = arith.constant 2 : index
    %c0_10 = arith.constant 0 : index
    %c0_11 = arith.constant 0 : index
    %18 = vector.load %arg2[%c2, %c0_10, %c0_11] : memref<4x16x32xbf16, #tpu.memory_space<vmem>>, vector<1x16x32xbf16>
    %19 = vector.shape_cast %18 : vector<1x16x32xbf16> to vector<16x32xbf16>
    %cst_12 = arith.constant dense<0.000000e+00> : vector<9x32xf32>
    %20 = tpu.matmul %17, %19, %cst_12 {dimension_numbers = #tpu.dot_dimension_numbers<[1], [0], [0], [1], [0, 0, 1, 1], [], []>} : vector<9x16xbf16>, vector<16x32xbf16>, vector<9x32xf32> -> vector<9x32xf32>
    %21 = arith.addf %16, %20 : vector<9x32xf32>
    %22 = vector.extract_strided_slice %5 {offsets = [3, 0], sizes = [9, 16], strides = [1, 1]} : vector<12x16xbf16> to vector<9x16xbf16>
    %c3 = arith.constant 3 : index
    %c0_13 = arith.constant 0 : index
    %c0_14 = arith.constant 0 : index
    %23 = vector.load %arg2[%c3, %c0_13, %c0_14] : memref<4x16x32xbf16, #tpu.memory_space<vmem>>, vector<1x16x32xbf16>
    %24 = vector.shape_cast %23 : vector<1x16x32xbf16> to vector<16x32xbf16>
    %cst_15 = arith.constant dense<0.000000e+00> : vector<9x32xf32>
    %25 = tpu.matmul %22, %24, %cst_15 {dimension_numbers = #tpu.dot_dimension_numbers<[1], [0], [0], [1], [0, 0, 1, 1], [], []>} : vector<9x16xbf16>, vector<16x32xbf16>, vector<9x32xf32> -> vector<9x32xf32>
    %26 = arith.addf %21, %25 : vector<9x32xf32>
    %cst_16 = arith.constant 0.000000e+00 : f32
    %27 = vector.broadcast %cst_16 : f32 to vector<9x32xf32>
    %28 = arith.maximumf %26, %27 : vector<9x32xf32>
    %29 = vector.extract_strided_slice %28 {offsets = [0, 0], sizes = [8, 32], strides = [1, 1]} : vector<9x32xf32> to vector<8x32xf32>
    %c0_17 = arith.constant 0 : index
    %c0_18 = arith.constant 0 : index
    %c0_19 = arith.constant 0 : index
    %30 = vector.load %arg5[%c0_17, %c0_18, %c0_19] : memref<1x8x32xf32, #tpu.memory_space<vmem>>, vector<1x8x32xf32>
    %31 = vector.shape_cast %30 : vector<1x8x32xf32> to vector<8x32xf32>
    %32 = vector.shape_cast %29 : vector<8x32xf32> to vector<1x8x32xf32>
    tpu.vector_store %arg5[%c0_17, %c0_18, %c0_19], %32 {strides = array<i32>} : memref<1x8x32xf32, #tpu.memory_space<vmem>>, vector<1x8x32xf32>,
    %c0_20 = arith.constant 0 : index
    %c0_21 = arith.constant 0 : index
    %33 = vector.load %arg7[%c0_20, %c0_21] : memref<1x32xf32, #tpu.memory_space<vmem>>, vector<1x32xf32>
    %cst_22 = arith.constant dense<0.000000e+00> : vector<32xf32>
    %34 = vector.multi_reduction <add>, %28, %cst_22 [0] : vector<9x32xf32> to vector<32xf32>
    %35 = vector.shape_cast %34 : vector<32xf32> to vector<1x32xf32>
    %36 = arith.addf %33, %35 : vector<1x32xf32>
    %c0_23 = arith.constant 0 : index
    %c0_24 = arith.constant 0 : index
    %37 = vector.load %arg7[%c0_23, %c0_24] : memref<1x32xf32, #tpu.memory_space<vmem>>, vector<1x32xf32>
    tpu.vector_store %arg7[%c0_23, %c0_24], %36 {strides = array<i32>} : memref<1x32xf32, #tpu.memory_space<vmem>>, vector<1x32xf32>,
    %c0_25 = arith.constant 0 : index
    %c0_26 = arith.constant 0 : index
    %38 = vector.load %arg8[%c0_25, %c0_26] : memref<1x32xf32, #tpu.memory_space<vmem>>, vector<1x32xf32>
    %39 = arith.mulf %28, %28 : vector<9x32xf32>
    %cst_27 = arith.constant dense<0.000000e+00> : vector<32xf32>
    %40 = vector.multi_reduction <add>, %39, %cst_27 [0] : vector<9x32xf32> to vector<32xf32>
    %41 = vector.shape_cast %40 : vector<32xf32> to vector<1x32xf32>
    %42 = arith.addf %38, %41 : vector<1x32xf32>
    %c0_28 = arith.constant 0 : index
    %c0_29 = arith.constant 0 : index
    %43 = vector.load %arg8[%c0_28, %c0_29] : memref<1x32xf32, #tpu.memory_space<vmem>>, vector<1x32xf32>
    tpu.vector_store %arg8[%c0_28, %c0_29], %42 {strides = array<i32>} : memref<1x32xf32, #tpu.memory_space<vmem>>, vector<1x32xf32>,
    %c1_i32 = arith.constant 1 : i32
    %44 = arith.cmpi eq, %arg0, %c1_i32 : i32
    %45 = arith.extui %44 : i1 to i32
    %c0_i32_30 = arith.constant 0 : i32
    %46 = arith.cmpi ne, %45, %c0_i32_30 : i32
    scf.if %46 {
      %c0_31 = arith.constant 0 : index
      %c0_32 = arith.constant 0 : index
      %47 = vector.load %arg7[%c0_31, %c0_32] : memref<1x32xf32, #tpu.memory_space<vmem>>, vector<1x32xf32>
      %cst_33 = arith.constant 0.055555556 : f32
      %48 = vector.broadcast %cst_33 : f32 to vector<1x32xf32>
      %49 = arith.mulf %47, %48 : vector<1x32xf32>
      %c0_34 = arith.constant 0 : index
      %c0_35 = arith.constant 0 : index
      %50 = vector.load %arg8[%c0_34, %c0_35] : memref<1x32xf32, #tpu.memory_space<vmem>>, vector<1x32xf32>
      %cst_36 = arith.constant 0.055555556 : f32
      %51 = vector.broadcast %cst_36 : f32 to vector<1x32xf32>
      %52 = arith.mulf %50, %51 : vector<1x32xf32>
      %53 = arith.mulf %49, %49 : vector<1x32xf32>
      %54 = arith.subf %52, %53 : vector<1x32xf32>
      %c0_37 = arith.constant 0 : index
      %c0_38 = arith.constant 0 : index
      %55 = vector.load %arg3[%c0_37, %c0_38] : memref<1x32xf32, #tpu.memory_space<vmem>>, vector<1x32xf32>
      %cst_39 = arith.constant 9.99999974E-6 : f32
      %56 = vector.broadcast %cst_39 : f32 to vector<1x32xf32>
      %57 = arith.addf %54, %56 : vector<1x32xf32>
      %58 = math.rsqrt %57 : vector<1x32xf32>
      %59 = arith.mulf %55, %58 : vector<1x32xf32>
      %c0_40 = arith.constant 0 : index
      %c0_41 = arith.constant 0 : index
      %60 = vector.load %arg4[%c0_40, %c0_41] : memref<1x32xf32, #tpu.memory_space<vmem>>, vector<1x32xf32>
      %61 = arith.mulf %49, %59 : vector<1x32xf32>
      %62 = arith.subf %60, %61 : vector<1x32xf32>
      %63 = tpu.concatenate %59, %62 in 0 : vector<1x32xf32>, vector<1x32xf32> -> vector<2x32xf32>
      %c0_42 = arith.constant 0 : index
      %c0_43 = arith.constant 0 : index
      %64 = vector.load %arg6[%c0_42, %c0_43] : memref<2x32xf32, #tpu.memory_space<vmem>>, vector<2x32xf32>
      tpu.vector_store %arg6[%c0_42, %c0_43], %63 {strides = array<i32>} : memref<2x32xf32, #tpu.memory_space<vmem>>, vector<2x32xf32>,
    } else {
    }
    return
  }
  func.func @transform_0(%arg0: i32) -> (i32, i32, i32) {
    %c0_i32 = arith.constant 0 : i32
    %c0_i32_0 = arith.constant 0 : i32
    %c0_i32_1 = arith.constant 0 : i32
    return %arg0, %c0_i32, %c0_i32_0 : i32, i32, i32
  }
  func.func @transform_1(%arg0: i32) -> (i32, i32, i32) {
    %c0_i32 = arith.constant 0 : i32
    %c0_i32_0 = arith.constant 0 : i32
    %c0_i32_1 = arith.constant 0 : i32
    %c0_i32_2 = arith.constant 0 : i32
    return %c0_i32, %c0_i32_0, %c0_i32_1 : i32, i32, i32
  }
  func.func @transform_2(%arg0: i32) -> (i32, i32) {
    %c0_i32 = arith.constant 0 : i32
    %c0_i32_0 = arith.constant 0 : i32
    %c0_i32_1 = arith.constant 0 : i32
    return %c0_i32, %c0_i32_0 : i32, i32
  }
  func.func @transform_3(%arg0: i32) -> (i32, i32) {
    %c0_i32 = arith.constant 0 : i32
    %c0_i32_0 = arith.constant 0 : i32
    %c0_i32_1 = arith.constant 0 : i32
    return %c0_i32, %c0_i32_0 : i32, i32
  }
  func.func @transform_4(%arg0: i32) -> (i32, i32, i32) {
    %c0_i32 = arith.constant 0 : i32
    %c0_i32_0 = arith.constant 0 : i32
    %c0_i32_1 = arith.constant 0 : i32
    return %arg0, %c0_i32, %c0_i32_0 : i32, i32, i32
  }
  func.func @transform_5(%arg0: i32) -> (i32, i32) {
    %c0_i32 = arith.constant 0 : i32
    %c0_i32_0 = arith.constant 0 : i32
    %c0_i32_1 = arith.constant 0 : i32
    return %c0_i32, %c0_i32_0 : i32, i32
  }
}

module attributes {stable_mosaic.version = 11 : i64} {
  func.func @_conv_stats_kernel(%arg0: i32, %arg1: memref<1x10x32xf32, #tpu.memory_space<vmem>>, %arg2: memref<3x32x16xbf16, #tpu.memory_space<vmem>>, %arg3: memref<1x16xf32, #tpu.memory_space<vmem>>, %arg4: memref<1x16xf32, #tpu.memory_space<vmem>>, %arg5: memref<1x8x16xf32, #tpu.memory_space<vmem>>, %arg6: memref<2x16xf32, #tpu.memory_space<vmem>>, %arg7: memref<1x16xf32, #tpu.memory_space<vmem>>, %arg8: memref<1x16xf32, #tpu.memory_space<vmem>>) attributes {dimension_semantics = [#tpu.dimension_semantics<arbitrary>], iteration_bounds = array<i64: 2>, scalar_prefetch = 0 : i64, scratch_operands = 2 : i64, tpu.core_type = #tpu.core_type<tc>, window_params = [{transform_indices = @transform_0, window_bounds = array<i64: 1, 10, 32>}, {pipeline_mode = #tpu.pipeline_mode<synchronous>, transform_indices = @transform_1, window_bounds = array<i64: 3, 32, 16>}, {pipeline_mode = #tpu.pipeline_mode<synchronous>, transform_indices = @transform_2, window_bounds = array<i64: 1, 16>}, {pipeline_mode = #tpu.pipeline_mode<synchronous>, transform_indices = @transform_3, window_bounds = array<i64: 1, 16>}, {transform_indices = @transform_4, window_bounds = array<i64: 1, 8, 16>}, {pipeline_mode = #tpu.pipeline_mode<synchronous>, transform_indices = @transform_5, window_bounds = array<i64: 2, 16>}]} {
    %c0_i32 = arith.constant 0 : i32
    %0 = arith.cmpi eq, %arg0, %c0_i32 : i32
    %1 = arith.extui %0 : i1 to i32
    %c0_i32_0 = arith.constant 0 : i32
    %2 = arith.cmpi ne, %1, %c0_i32_0 : i32
    scf.if %2 {
      %cst_27 = arith.constant 0.000000e+00 : f32
      %39 = vector.broadcast %cst_27 : f32 to vector<1x16xf32>
      %c0_28 = arith.constant 0 : index
      %c0_29 = arith.constant 0 : index
      %40 = vector.load %arg7[%c0_28, %c0_29] : memref<1x16xf32, #tpu.memory_space<vmem>>, vector<1x16xf32>
      tpu.vector_store %arg7[%c0_28, %c0_29], %39 {strides = array<i32>} : memref<1x16xf32, #tpu.memory_space<vmem>>, vector<1x16xf32>,
      %cst_30 = arith.constant 0.000000e+00 : f32
      %41 = vector.broadcast %cst_30 : f32 to vector<1x16xf32>
      %c0_31 = arith.constant 0 : index
      %c0_32 = arith.constant 0 : index
      %42 = vector.load %arg8[%c0_31, %c0_32] : memref<1x16xf32, #tpu.memory_space<vmem>>, vector<1x16xf32>
      tpu.vector_store %arg8[%c0_31, %c0_32], %41 {strides = array<i32>} : memref<1x16xf32, #tpu.memory_space<vmem>>, vector<1x16xf32>,
    } else {
    }
    %c0 = arith.constant 0 : index
    %c0_1 = arith.constant 0 : index
    %c0_2 = arith.constant 0 : index
    %3 = vector.load %arg1[%c0, %c0_1, %c0_2] : memref<1x10x32xf32, #tpu.memory_space<vmem>>, vector<1x10x32xf32>
    %4 = vector.shape_cast %3 : vector<1x10x32xf32> to vector<10x32xf32>
    %5 = arith.truncf %4 : vector<10x32xf32> to vector<10x32xbf16>
    %cst = arith.constant 0.000000e+00 : f32
    %6 = vector.broadcast %cst : f32 to vector<8x16xf32>
    %7 = vector.extract_strided_slice %5 {offsets = [0, 0], sizes = [8, 32], strides = [1, 1]} : vector<10x32xbf16> to vector<8x32xbf16>
    %c0_3 = arith.constant 0 : index
    %c0_4 = arith.constant 0 : index
    %c0_5 = arith.constant 0 : index
    %8 = vector.load %arg2[%c0_3, %c0_4, %c0_5] : memref<3x32x16xbf16, #tpu.memory_space<vmem>>, vector<1x32x16xbf16>
    %9 = vector.shape_cast %8 : vector<1x32x16xbf16> to vector<32x16xbf16>
    %cst_6 = arith.constant dense<0.000000e+00> : vector<8x16xf32>
    %10 = tpu.matmul %7, %9, %cst_6 {dimension_numbers = #tpu.dot_dimension_numbers<[1], [0], [0], [1], [0, 0, 1, 1], [], []>} : vector<8x32xbf16>, vector<32x16xbf16>, vector<8x16xf32> -> vector<8x16xf32>
    %11 = arith.addf %6, %10 : vector<8x16xf32>
    %12 = vector.extract_strided_slice %5 {offsets = [1, 0], sizes = [8, 32], strides = [1, 1]} : vector<10x32xbf16> to vector<8x32xbf16>
    %c1 = arith.constant 1 : index
    %c0_7 = arith.constant 0 : index
    %c0_8 = arith.constant 0 : index
    %13 = vector.load %arg2[%c1, %c0_7, %c0_8] : memref<3x32x16xbf16, #tpu.memory_space<vmem>>, vector<1x32x16xbf16>
    %14 = vector.shape_cast %13 : vector<1x32x16xbf16> to vector<32x16xbf16>
    %cst_9 = arith.constant dense<0.000000e+00> : vector<8x16xf32>
    %15 = tpu.matmul %12, %14, %cst_9 {dimension_numbers = #tpu.dot_dimension_numbers<[1], [0], [0], [1], [0, 0, 1, 1], [], []>} : vector<8x32xbf16>, vector<32x16xbf16>, vector<8x16xf32> -> vector<8x16xf32>
    %16 = arith.addf %11, %15 : vector<8x16xf32>
    %17 = vector.extract_strided_slice %5 {offsets = [2, 0], sizes = [8, 32], strides = [1, 1]} : vector<10x32xbf16> to vector<8x32xbf16>
    %c2 = arith.constant 2 : index
    %c0_10 = arith.constant 0 : index
    %c0_11 = arith.constant 0 : index
    %18 = vector.load %arg2[%c2, %c0_10, %c0_11] : memref<3x32x16xbf16, #tpu.memory_space<vmem>>, vector<1x32x16xbf16>
    %19 = vector.shape_cast %18 : vector<1x32x16xbf16> to vector<32x16xbf16>
    %cst_12 = arith.constant dense<0.000000e+00> : vector<8x16xf32>
    %20 = tpu.matmul %17, %19, %cst_12 {dimension_numbers = #tpu.dot_dimension_numbers<[1], [0], [0], [1], [0, 0, 1, 1], [], []>} : vector<8x32xbf16>, vector<32x16xbf16>, vector<8x16xf32> -> vector<8x16xf32>
    %21 = arith.addf %16, %20 : vector<8x16xf32>
    %c0_13 = arith.constant 0 : index
    %c0_14 = arith.constant 0 : index
    %c0_15 = arith.constant 0 : index
    %22 = vector.load %arg5[%c0_13, %c0_14, %c0_15] : memref<1x8x16xf32, #tpu.memory_space<vmem>>, vector<1x8x16xf32>
    %23 = vector.shape_cast %22 : vector<1x8x16xf32> to vector<8x16xf32>
    %24 = vector.shape_cast %21 : vector<8x16xf32> to vector<1x8x16xf32>
    tpu.vector_store %arg5[%c0_13, %c0_14, %c0_15], %24 {strides = array<i32>} : memref<1x8x16xf32, #tpu.memory_space<vmem>>, vector<1x8x16xf32>,
    %c0_16 = arith.constant 0 : index
    %c0_17 = arith.constant 0 : index
    %25 = vector.load %arg7[%c0_16, %c0_17] : memref<1x16xf32, #tpu.memory_space<vmem>>, vector<1x16xf32>
    %cst_18 = arith.constant dense<0.000000e+00> : vector<16xf32>
    %26 = vector.multi_reduction <add>, %21, %cst_18 [0] : vector<8x16xf32> to vector<16xf32>
    %27 = vector.shape_cast %26 : vector<16xf32> to vector<1x16xf32>
    %28 = arith.addf %25, %27 : vector<1x16xf32>
    %c0_19 = arith.constant 0 : index
    %c0_20 = arith.constant 0 : index
    %29 = vector.load %arg7[%c0_19, %c0_20] : memref<1x16xf32, #tpu.memory_space<vmem>>, vector<1x16xf32>
    tpu.vector_store %arg7[%c0_19, %c0_20], %28 {strides = array<i32>} : memref<1x16xf32, #tpu.memory_space<vmem>>, vector<1x16xf32>,
    %c0_21 = arith.constant 0 : index
    %c0_22 = arith.constant 0 : index
    %30 = vector.load %arg8[%c0_21, %c0_22] : memref<1x16xf32, #tpu.memory_space<vmem>>, vector<1x16xf32>
    %31 = arith.mulf %21, %21 : vector<8x16xf32>
    %cst_23 = arith.constant dense<0.000000e+00> : vector<16xf32>
    %32 = vector.multi_reduction <add>, %31, %cst_23 [0] : vector<8x16xf32> to vector<16xf32>
    %33 = vector.shape_cast %32 : vector<16xf32> to vector<1x16xf32>
    %34 = arith.addf %30, %33 : vector<1x16xf32>
    %c0_24 = arith.constant 0 : index
    %c0_25 = arith.constant 0 : index
    %35 = vector.load %arg8[%c0_24, %c0_25] : memref<1x16xf32, #tpu.memory_space<vmem>>, vector<1x16xf32>
    tpu.vector_store %arg8[%c0_24, %c0_25], %34 {strides = array<i32>} : memref<1x16xf32, #tpu.memory_space<vmem>>, vector<1x16xf32>,
    %c1_i32 = arith.constant 1 : i32
    %36 = arith.cmpi eq, %arg0, %c1_i32 : i32
    %37 = arith.extui %36 : i1 to i32
    %c0_i32_26 = arith.constant 0 : i32
    %38 = arith.cmpi ne, %37, %c0_i32_26 : i32
    scf.if %38 {
      %c0_27 = arith.constant 0 : index
      %c0_28 = arith.constant 0 : index
      %39 = vector.load %arg7[%c0_27, %c0_28] : memref<1x16xf32, #tpu.memory_space<vmem>>, vector<1x16xf32>
      %cst_29 = arith.constant 6.250000e-02 : f32
      %40 = vector.broadcast %cst_29 : f32 to vector<1x16xf32>
      %41 = arith.mulf %39, %40 : vector<1x16xf32>
      %c0_30 = arith.constant 0 : index
      %c0_31 = arith.constant 0 : index
      %42 = vector.load %arg8[%c0_30, %c0_31] : memref<1x16xf32, #tpu.memory_space<vmem>>, vector<1x16xf32>
      %cst_32 = arith.constant 6.250000e-02 : f32
      %43 = vector.broadcast %cst_32 : f32 to vector<1x16xf32>
      %44 = arith.mulf %42, %43 : vector<1x16xf32>
      %45 = arith.mulf %41, %41 : vector<1x16xf32>
      %46 = arith.subf %44, %45 : vector<1x16xf32>
      %c0_33 = arith.constant 0 : index
      %c0_34 = arith.constant 0 : index
      %47 = vector.load %arg3[%c0_33, %c0_34] : memref<1x16xf32, #tpu.memory_space<vmem>>, vector<1x16xf32>
      %cst_35 = arith.constant 9.99999974E-6 : f32
      %48 = vector.broadcast %cst_35 : f32 to vector<1x16xf32>
      %49 = arith.addf %46, %48 : vector<1x16xf32>
      %50 = math.rsqrt %49 : vector<1x16xf32>
      %51 = arith.mulf %47, %50 : vector<1x16xf32>
      %c0_36 = arith.constant 0 : index
      %c0_37 = arith.constant 0 : index
      %52 = vector.load %arg4[%c0_36, %c0_37] : memref<1x16xf32, #tpu.memory_space<vmem>>, vector<1x16xf32>
      %53 = arith.mulf %41, %51 : vector<1x16xf32>
      %54 = arith.subf %52, %53 : vector<1x16xf32>
      %55 = tpu.concatenate %51, %54 in 0 : vector<1x16xf32>, vector<1x16xf32> -> vector<2x16xf32>
      %c0_38 = arith.constant 0 : index
      %c0_39 = arith.constant 0 : index
      %56 = vector.load %arg6[%c0_38, %c0_39] : memref<2x16xf32, #tpu.memory_space<vmem>>, vector<2x16xf32>
      tpu.vector_store %arg6[%c0_38, %c0_39], %55 {strides = array<i32>} : memref<2x16xf32, #tpu.memory_space<vmem>>, vector<2x16xf32>,
    } else {
    }
    return
  }
  func.func @transform_0(%arg0: i32) -> (i32, i32, i32) {
    %c0_i32 = arith.constant 0 : i32
    %c0_i32_0 = arith.constant 0 : i32
    %c0_i32_1 = arith.constant 0 : i32
    return %arg0, %c0_i32, %c0_i32_0 : i32, i32, i32
  }
  func.func @transform_1(%arg0: i32) -> (i32, i32, i32) {
    %c0_i32 = arith.constant 0 : i32
    %c0_i32_0 = arith.constant 0 : i32
    %c0_i32_1 = arith.constant 0 : i32
    %c0_i32_2 = arith.constant 0 : i32
    return %c0_i32, %c0_i32_0, %c0_i32_1 : i32, i32, i32
  }
  func.func @transform_2(%arg0: i32) -> (i32, i32) {
    %c0_i32 = arith.constant 0 : i32
    %c0_i32_0 = arith.constant 0 : i32
    %c0_i32_1 = arith.constant 0 : i32
    return %c0_i32, %c0_i32_0 : i32, i32
  }
  func.func @transform_3(%arg0: i32) -> (i32, i32) {
    %c0_i32 = arith.constant 0 : i32
    %c0_i32_0 = arith.constant 0 : i32
    %c0_i32_1 = arith.constant 0 : i32
    return %c0_i32, %c0_i32_0 : i32, i32
  }
  func.func @transform_4(%arg0: i32) -> (i32, i32, i32) {
    %c0_i32 = arith.constant 0 : i32
    %c0_i32_0 = arith.constant 0 : i32
    %c0_i32_1 = arith.constant 0 : i32
    return %arg0, %c0_i32, %c0_i32_0 : i32, i32, i32
  }
  func.func @transform_5(%arg0: i32) -> (i32, i32) {
    %c0_i32 = arith.constant 0 : i32
    %c0_i32_0 = arith.constant 0 : i32
    %c0_i32_1 = arith.constant 0 : i32
    return %c0_i32, %c0_i32_0 : i32, i32
  }
}

module attributes {stable_mosaic.version = 11 : i64} {
  func.func @_bn_apply_rows_kernel(%arg0: i32, %arg1: memref<16x16xf32, #tpu.memory_space<vmem>>, %arg2: memref<2x16xf32, #tpu.memory_space<vmem>>, %arg3: memref<16x16xf32, #tpu.memory_space<vmem>>) attributes {dimension_semantics = [#tpu.dimension_semantics<parallel>], iteration_bounds = array<i64: 1>, scalar_prefetch = 0 : i64, scratch_operands = 0 : i64, tpu.core_type = #tpu.core_type<tc>, window_params = [{transform_indices = @transform_0, window_bounds = array<i64: 16, 16>}, {pipeline_mode = #tpu.pipeline_mode<synchronous>, transform_indices = @transform_1, window_bounds = array<i64: 2, 16>}, {transform_indices = @transform_2, window_bounds = array<i64: 16, 16>}]} {
    %c0 = arith.constant 0 : index
    %c0_0 = arith.constant 0 : index
    %0 = vector.load %arg1[%c0, %c0_0] : memref<16x16xf32, #tpu.memory_space<vmem>>, vector<16x16xf32>
    %c0_1 = arith.constant 0 : index
    %c0_2 = arith.constant 0 : index
    %1 = vector.load %arg2[%c0_1, %c0_2] : memref<2x16xf32, #tpu.memory_space<vmem>>, vector<1x16xf32>
    %2 = vector.broadcast %1 : vector<1x16xf32> to vector<16x16xf32>
    %3 = arith.mulf %0, %2 : vector<16x16xf32>
    %c1 = arith.constant 1 : index
    %c0_3 = arith.constant 0 : index
    %4 = vector.load %arg2[%c1, %c0_3] : memref<2x16xf32, #tpu.memory_space<vmem>>, vector<1x16xf32>
    %5 = vector.broadcast %4 : vector<1x16xf32> to vector<16x16xf32>
    %6 = arith.addf %3, %5 : vector<16x16xf32>
    %c0_4 = arith.constant 0 : index
    %c0_5 = arith.constant 0 : index
    %7 = vector.load %arg3[%c0_4, %c0_5] : memref<16x16xf32, #tpu.memory_space<vmem>>, vector<16x16xf32>
    tpu.vector_store %arg3[%c0_4, %c0_5], %6 {strides = array<i32>} : memref<16x16xf32, #tpu.memory_space<vmem>>, vector<16x16xf32>,
    return
  }
  func.func @transform_0(%arg0: i32) -> (i32, i32) {
    %c0_i32 = arith.constant 0 : i32
    %c0_i32_0 = arith.constant 0 : i32
    return %arg0, %c0_i32 : i32, i32
  }
  func.func @transform_1(%arg0: i32) -> (i32, i32) {
    %c0_i32 = arith.constant 0 : i32
    %c0_i32_0 = arith.constant 0 : i32
    %c0_i32_1 = arith.constant 0 : i32
    return %c0_i32, %c0_i32_0 : i32, i32
  }
  func.func @transform_2(%arg0: i32) -> (i32, i32) {
    %c0_i32 = arith.constant 0 : i32
    %c0_i32_0 = arith.constant 0 : i32
    return %arg0, %c0_i32 : i32, i32
  }
}

module attributes {stable_mosaic.version = 11 : i64} {
  func.func @_highway_pre_rows_kernel(%arg0: i32, %arg1: memref<16x16xf32, #tpu.memory_space<vmem>>, %arg2: memref<16x32xbf16, #tpu.memory_space<vmem>>, %arg3: memref<2x32x64xbf16, #tpu.memory_space<vmem>>, %arg4: memref<2x1x64xf32, #tpu.memory_space<vmem>>, %arg5: memref<16x32xf32, #tpu.memory_space<vmem>>) attributes {dimension_semantics = [#tpu.dimension_semantics<parallel>], iteration_bounds = array<i64: 1>, scalar_prefetch = 0 : i64, scratch_operands = 0 : i64, tpu.core_type = #tpu.core_type<tc>, window_params = [{transform_indices = @transform_0, window_bounds = array<i64: 16, 16>}, {pipeline_mode = #tpu.pipeline_mode<synchronous>, transform_indices = @transform_1, window_bounds = array<i64: 16, 32>}, {pipeline_mode = #tpu.pipeline_mode<synchronous>, transform_indices = @transform_2, window_bounds = array<i64: 2, 32, 64>}, {pipeline_mode = #tpu.pipeline_mode<synchronous>, transform_indices = @transform_3, window_bounds = array<i64: 2, 1, 64>}, {transform_indices = @transform_4, window_bounds = array<i64: 16, 32>}]} {
    %c0 = arith.constant 0 : index
    %c0_0 = arith.constant 0 : index
    %0 = vector.load %arg1[%c0, %c0_0] : memref<16x16xf32, #tpu.memory_space<vmem>>, vector<16x16xf32>
    %1 = arith.truncf %0 : vector<16x16xf32> to vector<16x16xbf16>
    %c0_1 = arith.constant 0 : index
    %c0_2 = arith.constant 0 : index
    %2 = vector.load %arg2[%c0_1, %c0_2] : memref<16x32xbf16, #tpu.memory_space<vmem>>, vector<16x32xbf16>
    %cst = arith.constant dense<0.000000e+00> : vector<16x32xf32>
    %3 = tpu.matmul %1, %2, %cst {dimension_numbers = #tpu.dot_dimension_numbers<[1], [0], [0], [1], [0, 0, 1, 1], [], []>} : vector<16x16xbf16>, vector<16x32xbf16>, vector<16x32xf32> -> vector<16x32xf32>
    %4 = arith.truncf %3 : vector<16x32xf32> to vector<16x32xbf16>
    %c0_3 = arith.constant 0 : index
    %c0_4 = arith.constant 0 : index
    %c0_5 = arith.constant 0 : index
    %5 = vector.load %arg3[%c0_3, %c0_4, %c0_5] : memref<2x32x64xbf16, #tpu.memory_space<vmem>>, vector<1x32x64xbf16>
    %6 = vector.shape_cast %5 : vector<1x32x64xbf16> to vector<32x64xbf16>
    %cst_6 = arith.constant dense<0.000000e+00> : vector<16x64xf32>
    %7 = tpu.matmul %4, %6, %cst_6 {dimension_numbers = #tpu.dot_dimension_numbers<[1], [0], [0], [1], [0, 0, 1, 1], [], []>} : vector<16x32xbf16>, vector<32x64xbf16>, vector<16x64xf32> -> vector<16x64xf32>
    %c0_7 = arith.constant 0 : index
    %c0_8 = arith.constant 0 : index
    %c0_9 = arith.constant 0 : index
    %8 = vector.load %arg4[%c0_7, %c0_8, %c0_9] : memref<2x1x64xf32, #tpu.memory_space<vmem>>, vector<1x1x64xf32>
    %9 = vector.shape_cast %8 : vector<1x1x64xf32> to vector<1x64xf32>
    %10 = vector.broadcast %9 : vector<1x64xf32> to vector<16x64xf32>
    %11 = arith.addf %7, %10 : vector<16x64xf32>
    %12 = vector.extract_strided_slice %11 {offsets = [0, 32], sizes = [16, 32], strides = [1, 1]} : vector<16x64xf32> to vector<16x32xf32>
    %13 = arith.negf %12 : vector<16x32xf32>
    %14 = math.exp %13 : vector<16x32xf32>
    %cst_10 = arith.constant 1.000000e+00 : f32
    %15 = vector.broadcast %cst_10 : f32 to vector<16x32xf32>
    %16 = arith.addf %15, %14 : vector<16x32xf32>
    %17 = arith.divf %15, %16 : vector<16x32xf32>
    %18 = vector.extract_strided_slice %11 {offsets = [0, 0], sizes = [16, 32], strides = [1, 1]} : vector<16x64xf32> to vector<16x32xf32>
    %cst_11 = arith.constant 0.000000e+00 : f32
    %19 = vector.broadcast %cst_11 : f32 to vector<16x32xf32>
    %20 = arith.maximumf %18, %19 : vector<16x32xf32>
    %21 = arith.mulf %17, %20 : vector<16x32xf32>
    %cst_12 = arith.constant 1.000000e+00 : f32
    %22 = vector.broadcast %cst_12 : f32 to vector<16x32xf32>
    %23 = arith.subf %22, %17 : vector<16x32xf32>
    %24 = arith.mulf %23, %3 : vector<16x32xf32>
    %25 = arith.addf %21, %24 : vector<16x32xf32>
    %26 = arith.truncf %25 : vector<16x32xf32> to vector<16x32xbf16>
    %c1 = arith.constant 1 : index
    %c0_13 = arith.constant 0 : index
    %c0_14 = arith.constant 0 : index
    %27 = vector.load %arg3[%c1, %c0_13, %c0_14] : memref<2x32x64xbf16, #tpu.memory_space<vmem>>, vector<1x32x64xbf16>
    %28 = vector.shape_cast %27 : vector<1x32x64xbf16> to vector<32x64xbf16>
    %cst_15 = arith.constant dense<0.000000e+00> : vector<16x64xf32>
    %29 = tpu.matmul %26, %28, %cst_15 {dimension_numbers = #tpu.dot_dimension_numbers<[1], [0], [0], [1], [0, 0, 1, 1], [], []>} : vector<16x32xbf16>, vector<32x64xbf16>, vector<16x64xf32> -> vector<16x64xf32>
    %c1_16 = arith.constant 1 : index
    %c0_17 = arith.constant 0 : index
    %c0_18 = arith.constant 0 : index
    %30 = vector.load %arg4[%c1_16, %c0_17, %c0_18] : memref<2x1x64xf32, #tpu.memory_space<vmem>>, vector<1x1x64xf32>
    %31 = vector.shape_cast %30 : vector<1x1x64xf32> to vector<1x64xf32>
    %32 = vector.broadcast %31 : vector<1x64xf32> to vector<16x64xf32>
    %33 = arith.addf %29, %32 : vector<16x64xf32>
    %34 = vector.extract_strided_slice %33 {offsets = [0, 32], sizes = [16, 32], strides = [1, 1]} : vector<16x64xf32> to vector<16x32xf32>
    %35 = arith.negf %34 : vector<16x32xf32>
    %36 = math.exp %35 : vector<16x32xf32>
    %cst_19 = arith.constant 1.000000e+00 : f32
    %37 = vector.broadcast %cst_19 : f32 to vector<16x32xf32>
    %38 = arith.addf %37, %36 : vector<16x32xf32>
    %39 = arith.divf %37, %38 : vector<16x32xf32>
    %40 = vector.extract_strided_slice %33 {offsets = [0, 0], sizes = [16, 32], strides = [1, 1]} : vector<16x64xf32> to vector<16x32xf32>
    %cst_20 = arith.constant 0.000000e+00 : f32
    %41 = vector.broadcast %cst_20 : f32 to vector<16x32xf32>
    %42 = arith.maximumf %40, %41 : vector<16x32xf32>
    %43 = arith.mulf %39, %42 : vector<16x32xf32>
    %cst_21 = arith.constant 1.000000e+00 : f32
    %44 = vector.broadcast %cst_21 : f32 to vector<16x32xf32>
    %45 = arith.subf %44, %39 : vector<16x32xf32>
    %46 = arith.mulf %45, %25 : vector<16x32xf32>
    %47 = arith.addf %43, %46 : vector<16x32xf32>
    %c0_22 = arith.constant 0 : index
    %c0_23 = arith.constant 0 : index
    %48 = vector.load %arg5[%c0_22, %c0_23] : memref<16x32xf32, #tpu.memory_space<vmem>>, vector<16x32xf32>
    tpu.vector_store %arg5[%c0_22, %c0_23], %47 {strides = array<i32>} : memref<16x32xf32, #tpu.memory_space<vmem>>, vector<16x32xf32>,
    return
  }
  func.func @transform_0(%arg0: i32) -> (i32, i32) {
    %c0_i32 = arith.constant 0 : i32
    %c0_i32_0 = arith.constant 0 : i32
    return %arg0, %c0_i32 : i32, i32
  }
  func.func @transform_1(%arg0: i32) -> (i32, i32) {
    %c0_i32 = arith.constant 0 : i32
    %c0_i32_0 = arith.constant 0 : i32
    %c0_i32_1 = arith.constant 0 : i32
    return %c0_i32, %c0_i32_0 : i32, i32
  }
  func.func @transform_2(%arg0: i32) -> (i32, i32, i32) {
    %c0_i32 = arith.constant 0 : i32
    %c0_i32_0 = arith.constant 0 : i32
    %c0_i32_1 = arith.constant 0 : i32
    %c0_i32_2 = arith.constant 0 : i32
    return %c0_i32, %c0_i32_0, %c0_i32_1 : i32, i32, i32
  }
  func.func @transform_3(%arg0: i32) -> (i32, i32, i32) {
    %c0_i32 = arith.constant 0 : i32
    %c0_i32_0 = arith.constant 0 : i32
    %c0_i32_1 = arith.constant 0 : i32
    %c0_i32_2 = arith.constant 0 : i32
    return %c0_i32, %c0_i32_0, %c0_i32_1 : i32, i32, i32
  }
  func.func @transform_4(%arg0: i32) -> (i32, i32) {
    %c0_i32 = arith.constant 0 : i32
    %c0_i32_0 = arith.constant 0 : i32
    return %arg0, %c0_i32 : i32, i32
  }
}

module attributes {stable_mosaic.version = 11 : i64} {
  func.func @_matmul_rows_kernel(%arg0: i32, %arg1: memref<16x32xf32, #tpu.memory_space<vmem>>, %arg2: memref<32x16xbf16, #tpu.memory_space<vmem>>, %arg3: memref<16x16xf32, #tpu.memory_space<vmem>>) attributes {dimension_semantics = [#tpu.dimension_semantics<parallel>], iteration_bounds = array<i64: 1>, scalar_prefetch = 0 : i64, scratch_operands = 0 : i64, tpu.core_type = #tpu.core_type<tc>, window_params = [{transform_indices = @transform_0, window_bounds = array<i64: 16, 32>}, {pipeline_mode = #tpu.pipeline_mode<synchronous>, transform_indices = @transform_1, window_bounds = array<i64: 32, 16>}, {transform_indices = @transform_2, window_bounds = array<i64: 16, 16>}]} {
    %c0 = arith.constant 0 : index
    %c0_0 = arith.constant 0 : index
    %0 = vector.load %arg1[%c0, %c0_0] : memref<16x32xf32, #tpu.memory_space<vmem>>, vector<16x32xf32>
    %1 = arith.truncf %0 : vector<16x32xf32> to vector<16x32xbf16>
    %c0_1 = arith.constant 0 : index
    %c0_2 = arith.constant 0 : index
    %2 = vector.load %arg2[%c0_1, %c0_2] : memref<32x16xbf16, #tpu.memory_space<vmem>>, vector<32x16xbf16>
    %cst = arith.constant dense<0.000000e+00> : vector<16x16xf32>
    %3 = tpu.matmul %1, %2, %cst {dimension_numbers = #tpu.dot_dimension_numbers<[1], [0], [0], [1], [0, 0, 1, 1], [], []>} : vector<16x32xbf16>, vector<32x16xbf16>, vector<16x16xf32> -> vector<16x16xf32>
    %c0_3 = arith.constant 0 : index
    %c0_4 = arith.constant 0 : index
    %4 = vector.load %arg3[%c0_3, %c0_4] : memref<16x16xf32, #tpu.memory_space<vmem>>, vector<16x16xf32>
    tpu.vector_store %arg3[%c0_3, %c0_4], %3 {strides = array<i32>} : memref<16x16xf32, #tpu.memory_space<vmem>>, vector<16x16xf32>,
    return
  }
  func.func @transform_0(%arg0: i32) -> (i32, i32) {
    %c0_i32 = arith.constant 0 : i32
    %c0_i32_0 = arith.constant 0 : i32
    return %arg0, %c0_i32 : i32, i32
  }
  func.func @transform_1(%arg0: i32) -> (i32, i32) {
    %c0_i32 = arith.constant 0 : i32
    %c0_i32_0 = arith.constant 0 : i32
    %c0_i32_1 = arith.constant 0 : i32
    return %c0_i32, %c0_i32_0 : i32, i32
  }
  func.func @transform_2(%arg0: i32) -> (i32, i32) {
    %c0_i32 = arith.constant 0 : i32
    %c0_i32_0 = arith.constant 0 : i32
    return %arg0, %c0_i32 : i32, i32
  }
}

</mosaic_0001>

<bundles_post_ra>
// kernel: tacotron_forward.38
= control target key start
LH: loop header
LB: loop body
LE: loop exit
PB: predicated region body
PF: predicated region fallthrough
CT: control target
= control target key end

     0   :  { %vm27_vm0 = vcmask 261120   ;;  %s69_s0 = inlined_call_operand.vmem [shape: f32[16,32], index: 0, kind: input, shape index: {}]   ;;  %s70_s1 = inlined_call_operand.vmem [shape: f32[2,32], index: 1, kind: input, shape index: {}]   ;;  %s71_s2 = inlined_call_operand.vmem [shape: f32[16,32], index: 2, kind: output, shape index: {}]  }
   0x1   :  { %v11_v0 = vld [vmem:[%s69_s0] sm:$0xff]  ;;  %v12_v4 = vld [vmem:[%s69_s0 + $0x8] sm:$0xff] }
   0x2   :  { %v34_v1 = vld [vmem:[%s70_s1] ss:$0 sm:$0xff]  ;;  %v35_v2 = vld [vmem:[%s70_s1 + $0x1] ss:$0 sm:$0xff] }
   0x3   :  { %v18_v3 = vmul.f32 %v34_v1, %v11_v0  ;;  %v19_v5 = vmul.f32 %v34_v1, %v12_v4 }
   0x5   :  { %v25_v6 = vadd.f32 %v35_v2, %v18_v3  ;;  %v26_v7 = vadd.f32 %v35_v2, %v19_v5 }
   0x7   :  { %28 = vst.msk [vmem:[%s71_s2] sm:$0xff] %vm27_vm0, %v25_v6  ;;  %29 = vst.msk [vmem:[%s71_s2 + $0x8] sm:$0xff] %vm27_vm0, %v26_v7 }

// kernel: tacotron_forward.34
= control target key start
LH: loop header
LB: loop body
LE: loop exit
PB: predicated region body
PF: predicated region fallthrough
CT: control target
= control target key end

     0   :  { %v206_v0 = vmov 0.0   ;;  %vm207_vm0 = vmmov 0   ;;  %vm47_vm1 = vcmask 261120   ;;  %s272_s1 = inlined_call_operand.vmem [shape: bf16[32,32], index: 1, kind: input, shape index: {}]   ;;  %s273_s0 = inlined_call_operand.vmem [shape: f32[16,32], index: 0, kind: input, shape index: {}]   ;;  %s274_s3 = inlined_call_operand.vmem [shape: bf16[32,32], index: 3, kind: input, shape index: {}]   ;;  %s275_s2 = inlined_call_operand.vmem [shape: f32[1,32], index: 2, kind: input, shape index: {}]   ;;  %s276_s4 = inlined_call_operand.vmem [shape: f32[1,32], index: 4, kind: input, shape index: {}]   ;;  %s277_s5 = inlined_call_operand.vmem [shape: f32[16,32], index: 5, kind: output, shape index: {}]  }
   0x1   :  { %184 = vmatprep.subr.bf16.mxu0 %v206_v0  ;;  %v202_v1 = vld [vmem:[%s272_s1] sm:$0xff]   ;;  %188 = vmatprep.mubr.msk.bf16.mxu0 %vm207_vm0, %v206_v0  ;;  %v203_v2 = vld [vmem:[%s272_s1 + $0x8] sm:$0xff]  }
   0x2   :  { %192 = vmatprep.subr.bf16.mxu1 %v206_v0  ;;  %196 = vmatprep.mubr.msk.bf16.mxu1 %vm207_vm0, %v206_v0  ;;  %v21_v3 = vld [vmem:[%s273_s0] sm:$0xff]  ;;  %v22_v4 = vld [vmem:[%s273_s0 + $0x8] sm:$0xff] }
   0x3   :  { %185 = vmatpush3.bf16.msra.mxu0 %v202_v1  ;;  %v23_v5 = vpack.c.bf16 %v22_v4, %v21_v3  ;;  %v204_v6 = vld [vmem:[%s274_s3] sm:$0xff]   ;;  %v205_v7 = vld [vmem:[%s274_s3 + $0x8] sm:$0xff]  }
   0x4   :  { %186 = vmatprep.subr.bf16.mxu0 %v206_v0  ;;  %193 = vmatpush3.bf16.msra.mxu1 %v204_v6  ;;  %v170_v8 = vld [vmem:[%s275_s2] ss:$0 sm:$0xff] }
   0x5   :  { %194 = vmatprep.subr.bf16.mxu1 %v206_v0  ;;  %v174_v18 = vld [vmem:[%s276_s4] ss:$0 sm:$0xff] }
   0x7   :  { %187 = vmatpush3.bf16.msra.mxu0 %v203_v2 }
   0x8   :  { %195 = vmatpush3.bf16.msra.mxu1 %v205_v7 }
   0xa   :  { %189 = vmatmul.mubr.msk.bf16.vlgmr.msra.gmra.mrb[0].mxu0 %vm47_vm1, %v23_v5 }
  0xdd   :  { %v85_v9 = vpop.f32.mrb[0].mxu0 }
  0xde   :  { %v86_v10 = vadd.f32 %v170_v8, %v85_v9  ;;  %v190_v11 = vpop.f32.mrb[1].mxu0 }
  0xdf   :  { %v88_v12 = vpop.f32.mrb[2].mxu0 }
  0xe0   :  { %v89_v13 = vadd.f32 %v170_v8, %v88_v12  ;;  %v191_v14 = vpop.f32.mrb[3].mxu0  ;;  %v92_v15 = vmax.f32 %v86_v10, 0.0 }
  0xe2   :  { %v93_v16 = vmax.f32 %v89_v13, 0.0 }
  0xe4   :  { %v94_v17 = vpack.c.bf16 %v93_v16, %v92_v15 }
  0xe6   :  { %197 = vmatmul.mubr.msk.bf16.vlgmr.msra.gmra.mrb[0].mxu1 %vm47_vm1, %v94_v17 }
 0x1b9   :  { %v155_v19 = vpop.f32.mrb[0].mxu1 }
 0x1ba   :  { %v156_v20 = vadd.f32 %v174_v18, %v155_v19  ;;  %v198_v21 = vpop.f32.mrb[1].mxu1 }
 0x1bb   :  { %v158_v22 = vpop.f32.mrb[2].mxu1 }
 0x1bc   :  { %v162_v23 = vmax.f32 %v156_v20, 0.0  ;;  %v159_v24 = vadd.f32 %v174_v18, %v158_v22  ;;  %v199_v25 = vpop.f32.mrb[3].mxu1 }
 0x1be   :  { %164 = vst.msk [vmem:[%s277_s5] sm:$0xff] %vm47_vm1, %v162_v23  ;;  %v163_v26 = vmax.f32 %v159_v24, 0.0 }
 0x1c0   :  { %165 = vst.msk [vmem:[%s277_s5 + $0x8] sm:$0xff] %vm47_vm1, %v163_v26 }

// kernel: tacotron_forward.37
= control target key start
LH: loop header
LB: loop body
LE: loop exit
PB: predicated region body
PF: predicated region fallthrough
CT: control target
= control target key end

     0   :  { %s581_s18 = smov 0   ;;  %s637_s0 = inlined_call_operand.vmem [shape: f32[2,10,32], index: 0, kind: input, shape index: {}]   ;;  %s638_s1 = inlined_call_operand.vmem [shape: bf16[2,32,32], index: 1, kind: input, shape index: {}]   ;;  %s639_s2 = inlined_call_operand.vmem [shape: f32[1,32], index: 2, kind: input, shape index: {}]   ;;  %s640_s3 = inlined_call_operand.vmem [shape: f32[1,32], index: 3, kind: input, shape index: {}]   ;;  %s641_s4 = inlined_call_operand.vmem [shape: f32[2,8,32], index: 4, kind: output, shape index: {0}]   ;;  %s642_s5 = inlined_call_operand.vmem [shape: f32[2,32], index: 5, kind: output, shape index: {1}]  }
   0x1 LB: > { %s587_s19 = sadd.s32 4294967295, %s546_s18   ;;  %p480_p0 = scmp.ge.s32.totalorder %s546_s18, 1  ;;  %s546_s18 = sphi %s581_s18, %s16_s18  }
   0x2   : > { %p185_p1 = scmp.lt.s32.totalorder %s546_s18, 3 }
   0x4   : > { %p186_p2 = pnand %p480_p0, %p185_p1 }
   0x5   : > { %p212_p3 = scmp.lt.s32.totalorder (!%p186_p2), %s587_s19, 1  ;;  %p484_p4 = scmp.ne.s32.totalorder (!%p186_p2), %s587_s19, 0 }
   0x6   : > { %189 = sbr.rel (%p186_p2) target bundleno = 304 (0x130), region = 36 }
   0xd   : > { %s213_s20 = scalar_select %p212_p3, %s587_s19, 1 }
   0xe   : > { %225 = sbr.rel (%p484_p4) target bundleno = 21 (0x15), region = 40  ;;  %vm226_vm0 = vcmask (!%p484_p4), 253952   ;;  %v548_v0 = vmov (!%p484_p4), 0.0  }
   0xf   : > { %s498_s21 = sshll.u32 %s213_s20, 4  ;;  %s483_s22 = sshll.u32 %s213_s20, 3  ;;  %227 = vst.msk [vmem:[#allocation2] sm:$0x1] (!%p484_p4), %vm226_vm0, %v548_v0  ;;  %228 = vst.msk [vmem:[#allocation3] sm:$0x1] (!%p484_p4), %vm226_vm0, %v548_v0 }
  0x10   : > { %s216_s25 = scalar_lea.vmem %s637_s0, %s498_s21  ;;  %s599_s28 = scalar_lea.vmem %s641_s4, %s483_s22 }
  0x15 PF: > { %v534_v1 = vld [vmem:[%s638_s1 + $0x10] sm:$0xff]   ;;  %v549_v2 = vmov 0.0   ;;  %v535_v3 = vld [vmem:[%s638_s1] sm:$0xff]   ;;  %v536_v4 = vld [vmem:[%s638_s1 + $0x18] sm:$0xff]   ;;  %vm550_vm1 = vmmov 0   ;;  %vm260_vm2 = vcmask 261120  }
  0x16   : > { %505 = vmatprep.subr.bf16.mxu1 %v549_v2  ;;  %513 = vmatprep.subr.bf16.mxu0 %v549_v2  ;;  %v537_v5 = vld [vmem:[%s638_s1 + $0x8] sm:$0xff]   ;;  %v229_v6 = vld [vmem:[%s216_s25] sm:$0xff]  ;;  %vm365_vm3 = vcmask 253952   ;;  %p495_p5 = scmp.ne.s32.totalorder %s587_s19, 1 }
  0x17   : > { %506 = vmatpush3.bf16.msra.mxu1 %v534_v1  ;;  %509 = vmatprep.mubr.msk.bf16.mxu1 %vm550_vm1, %v549_v2  ;;  %v230_v7 = vld [vmem:[%s216_s25 + $0x8] sm:$0x3]  ;;  %v363_v42 = vld [vmem:[#allocation2] sm:$0x1]  ;;  %v376_v45 = vld [vmem:[#allocation3] sm:$0x1]  ;;  %v408_v56 = vlaneseq (!%p495_p5) }
  0x18   : > { %514 = vmatpush3.bf16.msra.mxu0 %v535_v3  ;;  %507 = vmatprep.subr.bf16.mxu1 %v549_v2  ;;  %v231_v8 = vpack.c.bf16 %v230_v7, %v229_v6  ;;  %v400_v57 = vld [vmem:[%s639_s2] sm:$0x1] (!%p495_p5)  ;;  %vm413_vm4 = vcmask (!%p495_p5), 1040384   ;;  %vm415_vm5 = vcmask (!%p495_p5), 254976  }
  0x19   : > { %515 = vmatprep.subr.bf16.mxu0 %v549_v2  ;;  %517 = vmatprep.mubr.msk.bf16.mxu0 %vm550_vm1, %v549_v2  ;;  %v409_v58 = vshrl.u32 (!%p495_p5), %v408_v56, 7  ;;  %v404_v61 = vld [vmem:[%s640_s3] sm:$0x1] (!%p495_p5) }
  0x1a   : > { %v242_v9 = vshrl.u32 %v231_v8, 16  ;;  %v244_v10 = vshll.u32 %v231_v8, 16 }
  0x1b   : > { %508 = vmatpush3.bf16.msra.mxu1 %v536_v4  ;;  %v410_v63 = vsub.s32 (!%p495_p5), 0, %v409_v58 }
  0x1c   : > { %516 = vmatpush3.bf16.msra.mxu0 %v537_v5  ;;  %v246_v11 = vrot.slane %v244_v10, 1 }
  0x1e   : > { %v247_v12 = vor.u32 %v246_v11, %v242_v9 }
  0x1f   : > { %518 = vmatmul.mubr.msk.bf16.vlgmr.msra.gmra.mrb[0].mxu0 %vm260_vm2, %v231_v8 }
  0x20   : > { %510 = vmatmul.mubr.msk.bf16.vlgmr.msra.gmra.mrb[0].mxu1 %vm260_vm2, %v247_v12 }
  0xf2   : > { %v353_v13 = vpop.f32.mrb[0].mxu0 }
  0xf3   : > { %v519_v14 = vpop.f32.mrb[1].mxu0  ;;  %v298_v16 = vpop.f32.mrb[0].mxu1 }
  0xf4   : > { %v356_v15 = vpop.f32.mrb[2].mxu0  ;;  %v354_v18 = vadd.f32 %v353_v13, %v298_v16  ;;  %v511_v19 = vpop.f32.mrb[1].mxu1 }
  0xf5   : > { %v520_v17 = vpop.f32.mrb[3].mxu0  ;;  %v301_v20 = vpop.f32.mrb[2].mxu1 }
  0xf6   : > { %v360_v21 = vmax.f32 %v354_v18, 0.0  ;;  %v357_v22 = vadd.f32 %v356_v15, %v301_v20  ;;  %v512_v23 = vpop.f32.mrb[3].mxu1 }
  0xf8   : > { %362 = vst.msk [vmem:[%s599_s28] sm:$0xff] %vm260_vm2, %v360_v21  ;;  %v377_v24 = vmul.f32 %v360_v21, %v360_v21  ;;  %v361_v25 = vmax.f32 %v357_v22, 0.0  ;;  %v364_v26 = vsel %vm260_vm2, %v360_v21, 0.0 }
  0xfa   : > { %v366_v27 = vsel %vm365_vm3, %v361_v25, 0.0  ;;  %v378_v28 = vmul.f32 %v361_v25, %v361_v25  ;;  %v379_v30 = vsel %vm260_vm2, %v377_v24, 0.0 }
  0xfb   : > { %v367_v29 = vadd.f32 %v366_v27, %v364_v26 }
  0xfc   : > { %v380_v31 = vsel %vm365_vm3, %v378_v28, 0.0 }
  0xfd   : > { %v368_v32 = vrot.slane %v367_v29, 4  ;;  %v381_v33 = vadd.f32 %v380_v31, %v379_v30 }
  0xff   : > { %v369_v34 = vadd.f32 %v368_v32, %v367_v29  ;;  %v382_v35 = vrot.slane %v381_v33, 4 }
 0x101   : > { %v370_v36 = vrot.slane %v369_v34, 2  ;;  %v383_v37 = vadd.f32 %v382_v35, %v381_v33 }
 0x103   : > { %v371_v38 = vadd.f32 %v370_v36, %v369_v34  ;;  %v384_v39 = vrot.slane %v383_v37, 2 }
 0x105   : > { %v372_v40 = vrot.slane %v371_v38, 1  ;;  %v385_v41 = vadd.f32 %v384_v39, %v383_v37 }
 0x107   : > { %v373_v43 = vadd.f32 %v372_v40, %v371_v38  ;;  %v386_v44 = vrot.slane %v385_v41, 1  ;;  %393 = sbr.rel (%p495_p5) target bundleno = 304 (0x130), region = 44 }
 0x109   : > { %v374_v46 = vadd.f32 %v373_v43, %v363_v42  ;;  %v387_v47 = vadd.f32 %v386_v44, %v385_v41 }
 0x10b   : > { %375 = vst.msk [vmem:[#allocation2] sm:$0x1] %vm365_vm3, %v374_v46  ;;  %v388_v48 = vadd.f32 %v387_v47, %v376_v45 }
 0x10d   : > { %389 = vst.msk [vmem:[#allocation3] sm:$0x1] %vm365_vm3, %v388_v48 }
 0x112   : > { %v394_v49 = vld [vmem:[#allocation2] sm:$0x1] }
 0x113   : > { %v395_v51 = vmul.f32 0.055555556, %v394_v49 }
 0x114   : > { %v396_v50 = vld [vmem:[#allocation3] sm:$0x1] }
 0x115   : > { %v397_v52 = vmul.f32 0.055555556, %v396_v50  ;;  %v398_v53 = vmul.f32 %v395_v51, %v395_v51 }
 0x117   : > { %v399_v54 = vsub.f32 %v397_v52, %v398_v53 }
 0x119   : > { %v401_v55 = vadd.f32 1e-05, %v399_v54 }
 0x11b   : > { %538 = vrsqrt.f32 %v401_v55 }
 0x125   : > { %v539_v59 = vpop.eup %538 }
 0x126   : > { %v403_v60 = vmul.f32 %v539_v59, %v400_v57 }
 0x128   : > { %v405_v62 = vmul.f32 %v403_v60, %v395_v51 }
 0x12a   : > { %v406_v0 = vsub.f32 %v404_v61, %v405_v62 }
 0x12c   : > { %v411_v1 = vrot.slane %v406_v0, %v410_v63 }
 0x12e   : > { %v414_v2 = vsel %vm413_vm4, %v403_v60, %v411_v1 }
 0x12f   : > { %416 = vst.msk [vmem:[%s642_s5] sm:$0x3] %vm415_vm5, %v414_v2 }
 0x130 PF: > { %s16_s18 = sadd.s32 1, %s546_s18  }
 0x131   : > { %p13_p6 = scmp.ge.s32.totalorder %s16_s18, 4  }
 0x133   :  { %15 = sbr.rel (!%p13_p6) target bundleno = 1 (0x1), region = 83 }

// kernel: tacotron_forward.39
= control target key start
LH: loop header
LB: loop body
LE: loop exit
PB: predicated region body
PF: predicated region fallthrough
CT: control target
= control target key end

     0   :  { %s659_s18 = smov 0   ;;  %s721_s0 = inlined_call_operand.vmem [shape: f32[2,10,32], index: 0, kind: input, shape index: {}]   ;;  %s722_s1 = inlined_call_operand.vmem [shape: bf16[3,32,32], index: 1, kind: input, shape index: {}]   ;;  %s723_s2 = inlined_call_operand.vmem [shape: f32[1,32], index: 2, kind: input, shape index: {}]   ;;  %s724_s3 = inlined_call_operand.vmem [shape: f32[1,32], index: 3, kind: input, shape index: {}]   ;;  %s725_s4 = inlined_call_operand.vmem [shape: f32[2,8,32], index: 4, kind: output, shape index: {0}]   ;;  %s726_s5 = inlined_call_operand.vmem [shape: f32[2,32], index: 5, kind: output, shape index: {1}]  }
   0x1 LB: > { %s665_s19 = sadd.s32 4294967295, %s624_s18   ;;  %p535_p0 = scmp.ge.s32.totalorder %s624_s18, 1  ;;  %s624_s18 = sphi %s659_s18, %s16_s18  }
   0x2   : > { %p185_p1 = scmp.lt.s32.totalorder %s624_s18, 3 }
   0x4   : > { %p186_p2 = pnand %p535_p0, %p185_p1 }
   0x5   : > { %p212_p3 = scmp.lt.s32.totalorder (!%p186_p2), %s665_s19, 1  ;;  %p539_p4 = scmp.ne.s32.totalorder (!%p186_p2), %s665_s19, 0 }
   0x6   : > { %189 = sbr.rel (%p186_p2) target bundleno = 310 (0x136), region = 36 }
   0xd   : > { %s213_s20 = scalar_select %p212_p3, %s665_s19, 1 }
   0xe   : > { %225 = sbr.rel (%p539_p4) target bundleno = 21 (0x15), region = 40  ;;  %vm226_vm0 = vcmask (!%p539_p4), 253952   ;;  %v626_v0 = vmov (!%p539_p4), 0.0  }
   0xf   : > { %s560_s21 = sshll.u32 %s213_s20, 4  ;;  %s538_s22 = sshll.u32 %s213_s20, 3  ;;  %227 = vst.msk [vmem:[#allocation2] sm:$0x1] (!%p539_p4), %vm226_vm0, %v626_v0  ;;  %228 = vst.msk [vmem:[#allocation3] sm:$0x1] (!%p539_p4), %vm226_vm0, %v626_v0 }
  0x10   : > { %s216_s25 = scalar_lea.vmem %s721_s0, %s560_s21  ;;  %s677_s28 = scalar_lea.vmem %s725_s4, %s538_s22 }
  0x15 PF: > { %v610_v1 = vld [vmem:[%s722_s1] sm:$0xff]   ;;  %v627_v2 = vmov 0.0   ;;  %v611_v3 = vld [vmem:[%s722_s1 + $0x8] sm:$0xff]   ;;  %vm628_vm1 = vmmov 0   ;;  %v613_v7 = vld [vmem:[%s722_s1 + $0x10] sm:$0xff]   ;;  %vm260_vm2 = vcmask 261120  }
  0x16   : > { %578 = vmatprep.subr.bf16.mxu0 %v627_v2  ;;  %570 = vmatprep.subr.bf16.mxu1 %v627_v2  ;;  %v229_v4 = vld [vmem:[%s216_s25] sm:$0xff]  ;;  %v230_v5 = vld [vmem:[%s216_s25 + $0x8] sm:$0x3]  ;;  %v614_v9 = vld [vmem:[%s722_s1 + $0x18] sm:$0xff]   ;;  %vm432_vm3 = vcmask 253952   ;;  %p557_p5 = scmp.ne.s32.totalorder %s665_s19, 1 }
  0x17   : > { %579 = vmatpush3.bf16.msra.mxu0 %v610_v1  ;;  %582 = vmatprep.mubr.msk.bf16.mxu0 %vm628_vm1, %v627_v2  ;;  %v231_v6 = vpack.c.bf16 %v230_v5, %v229_v4  ;;  %v612_v8 = vld [vmem:[%s722_s1 + $0x20] sm:$0xff]   ;;  %v615_v13 = vld [vmem:[%s722_s1 + $0x28] sm:$0xff]   ;;  %v463_v52 = vlaneseq (!%p557_p5)  ;;  %vm468_vm4 = vcmask (!%p557_p5), 1040384   ;;  %vm470_vm5 = vcmask (!%p557_p5), 254976  }
  0x18   : > { %580 = vmatprep.subr.bf16.mxu0 %v627_v2  ;;  %574 = vmatprep.mubr.msk.bf16.mxu1 %vm628_vm1, %v627_v2  ;;  %v423_v38 = vld [vmem:[#allocation2] sm:$0x1]  ;;  %v434_v41 = vld [vmem:[#allocation3] sm:$0x1] }
  0x19   : > { %571 = vmatpush3.bf16.msra.mxu1 %v613_v7  ;;  %v242_v10 = vshrl.u32 %v231_v6, 16  ;;  %v244_v11 = vshll.u32 %v231_v6, 16  ;;  %v364_v15 = vrot.slane %v231_v6, 1  ;;  %v455_v53 = vld [vmem:[%s723_s2] sm:$0x1] (!%p557_p5)  ;;  %v464_v54 = vshrl.u32 (!%p557_p5), %v463_v52, 7 }
  0x1a   : > { %572 = vmatprep.subr.bf16.mxu1 %v627_v2  ;;  %v459_v57 = vld [vmem:[%s724_s3] sm:$0x1] (!%p557_p5) }
  0x1b   : > { %581 = vmatpush3.bf16.msra.mxu0 %v611_v3  ;;  %v246_v12 = vrot.slane %v244_v11, 1  ;;  %v465_v59 = vsub.s32 (!%p557_p5), 0, %v464_v54 }
  0x1c   : > { %586 = vmatprep.subr.bf16.mxu0 %v627_v2 }
  0x1d   : > { %573 = vmatpush3.bf16.msra.mxu1 %v614_v9  ;;  %v247_v14 = vor.u32 %v246_v12, %v242_v10 }
  0x1e   : > { %583 = vmatmul.mubr.msk.bf16.vlgmr.msra.gmra.mrb[0].mxu0 %vm260_vm2, %v231_v6 }
  0x1f   : > { %587 = vmatpush3.bf16.msra.mxu0 %v612_v8  ;;  %590 = vmatprep.mubr.msk.bf16.mxu0 %vm628_vm1, %v627_v2 }
  0x20   : > { %588 = vmatprep.subr.bf16.mxu0 %v627_v2  ;;  %575 = vmatmul.mubr.msk.bf16.vlgmr.msra.gmra.mrb[0].mxu1 %vm260_vm2, %v247_v14 }
  0x23   : > { %589 = vmatpush3.bf16.msra.mxu0 %v615_v13 }
  0x2a   : > { %591 = vmatmul.mubr.msk.bf16.vlgmr.msra.gmra.mrb[0].mxu0 %vm260_vm2, %v364_v15 }
  0xf3   : > { %v298_v16 = vpop.f32.mrb[0].mxu1 }
  0xf4   : > { %v576_v17 = vpop.f32.mrb[1].mxu1 }
  0xf5   : > { %v301_v18 = vpop.f32.mrb[2].mxu1 }
  0xf6   : > { %v577_v19 = vpop.f32.mrb[3].mxu1 }
  0xfd   : > { %v414_v20 = vpop.f32.mrb[0].mxu0 }
  0xfe   : > { %v594_v21 = vadd.f32 %v414_v20, %v298_v16  ;;  %v592_v22 = vpop.f32.mrb[1].mxu0 }
  0xff   : > { %v417_v23 = vpop.f32.mrb[2].mxu0 }
 0x100   : > { %v421_v24 = vmax.f32 %v594_v21, 0.0  ;;  %v593_v25 = vpop.f32.mrb[3].mxu0 }
 0x102   : > { %422 = vst.msk [vmem:[%s677_s28] sm:$0xff] %vm260_vm2, %v421_v24  ;;  %v424_v26 = vsel %vm260_vm2, %v421_v24, 0.0  ;;  %v435_v27 = vmul.f32 %v421_v24, %v421_v24 }
 0x103   : > { %v425_v28 = vrot.slane %v424_v26, 4 }
 0x104   : > { %v436_v29 = vsel %vm260_vm2, %v435_v27, 0.0 }
 0x105   : > { %v426_v30 = vadd.f32 %v425_v28, %v424_v26  ;;  %v437_v31 = vrot.slane %v436_v29, 4 }
 0x107   : > { %v427_v32 = vrot.slane %v426_v30, 2  ;;  %v438_v33 = vadd.f32 %v437_v31, %v436_v29 }
 0x109   : > { %v428_v34 = vadd.f32 %v427_v32, %v426_v30  ;;  %v439_v35 = vrot.slane %v438_v33, 2 }
 0x10b   : > { %v429_v36 = vrot.slane %v428_v34, 1  ;;  %v440_v37 = vadd.f32 %v439_v35, %v438_v33 }
 0x10d   : > { %v430_v39 = vadd.f32 %v429_v36, %v428_v34  ;;  %v441_v40 = vrot.slane %v440_v37, 1  ;;  %448 = sbr.rel (%p557_p5) target bundleno = 310 (0x136), region = 44 }
 0x10f   : > { %v431_v42 = vadd.f32 %v430_v39, %v423_v38  ;;  %v442_v43 = vadd.f32 %v441_v40, %v440_v37 }
 0x111   : > { %433 = vst.msk [vmem:[#allocation2] sm:$0x1] %vm432_vm3, %v431_v42  ;;  %v443_v44 = vadd.f32 %v442_v43, %v434_v41 }
 0x113   : > { %444 = vst.msk [vmem:[#allocation3] sm:$0x1] %vm432_vm3, %v443_v44 }
 0x118   : > { %v449_v45 = vld [vmem:[#allocation2] sm:$0x1] }
 0x119   : > { %v450_v47 = vmul.f32 0.0625, %v449_v45 }
 0x11a   : > { %v451_v46 = vld [vmem:[#allocation3] sm:$0x1] }
 0x11b   : > { %v452_v48 = vmul.f32 0.0625, %v451_v46  ;;  %v453_v49 = vmul.f32 %v450_v47, %v450_v47 }
 0x11d   : > { %v454_v50 = vsub.f32 %v452_v48, %v453_v49 }
 0x11f   : > { %v456_v51 = vadd.f32 1e-05, %v454_v50 }
 0x121   : > { %616 = vrsqrt.f32 %v456_v51 }
 0x12b   : > { %v617_v55 = vpop.eup %616 }
 0x12c   : > { %v458_v56 = vmul.f32 %v617_v55, %v455_v53 }
 0x12e   : > { %v460_v58 = vmul.f32 %v458_v56, %v450_v47 }
 0x130   : > { %v461_v60 = vsub.f32 %v459_v57, %v460_v58 }
 0x132   : > { %v466_v61 = vrot.slane %v461_v60, %v465_v59 }
 0x134   : > { %v469_v62 = vsel %vm468_vm4, %v458_v56, %v466_v61 }
 0x135   : > { %471 = vst.msk [vmem:[%s726_s5] sm:$0x3] %vm470_vm5, %v469_v62 }
 0x136 PF: > { %s16_s18 = sadd.s32 1, %s624_s18  }
 0x137   : > { %p13_p6 = scmp.ge.s32.totalorder %s16_s18, 4  }
 0x139   :  { %15 = sbr.rel (!%p13_p6) target bundleno = 1 (0x1), region = 84 }

// kernel: tacotron_forward.35
= control target key start
LH: loop header
LB: loop body
LE: loop exit
PB: predicated region body
PF: predicated region fallthrough
CT: control target
= control target key end

     0   :  { %s479_s18 = smov 0   ;;  %s517_s0 = inlined_call_operand.vmem [shape: f32[2,8,32], index: 0, kind: input, shape index: {}]   ;;  %s518_s1 = inlined_call_operand.vmem [shape: bf16[1,32,32], index: 1, kind: input, shape index: {}]   ;;  %s519_s2 = inlined_call_operand.vmem [shape: f32[1,32], index: 2, kind: input, shape index: {}]   ;;  %s520_s3 = inlined_call_operand.vmem [shape: f32[1,32], index: 3, kind: input, shape index: {}]   ;;  %s521_s4 = inlined_call_operand.vmem [shape: f32[2,8,32], index: 4, kind: output, shape index: {0}]   ;;  %s522_s5 = inlined_call_operand.vmem [shape: f32[2,32], index: 5, kind: output, shape index: {1}]  }
   0x1 LB: > { %s485_s19 = sadd.s32 4294967295, %s444_s18   ;;  %p402_p0 = scmp.ge.s32.totalorder %s444_s18, 1  ;;  %s444_s18 = sphi %s479_s18, %s16_s18  }
   0x2   : > { %p184_p1 = scmp.lt.s32.totalorder %s444_s18, 3 }
   0x4   : > { %p185_p2 = pnand %p402_p0, %p184_p1 }
   0x5   : > { %p210_p3 = scmp.lt.s32.totalorder (!%p185_p2), %s485_s19, 1  ;;  %p405_p4 = scmp.ne.s32.totalorder (!%p185_p2), %s485_s19, 0 }
   0x6   : > { %188 = sbr.rel (%p185_p2) target bundleno = 296 (0x128), region = 36 }
   0xd   : > { %s211_s20 = scalar_select %p210_p3, %s485_s19, 1 }
   0xe   : > { %222 = sbr.rel (%p405_p4) target bundleno = 21 (0x15), region = 40  ;;  %vm223_vm0 = vcmask (!%p405_p4), 253952   ;;  %v446_v0 = vmov (!%p405_p4), 0.0  }
   0xf   : > { %s403_s21 = sshll.u32 %s211_s20, 3  ;;  %224 = vst.msk [vmem:[#allocation2] sm:$0x1] (!%p405_p4), %vm223_vm0, %v446_v0  ;;  %225 = vst.msk [vmem:[#allocation3] sm:$0x1] (!%p405_p4), %vm223_vm0, %v446_v0 }
  0x10   : > { %s213_s24 = scalar_lea.vmem %s517_s0, %s403_s21  ;;  %s217_s27 = scalar_lea.vmem %s521_s4, %s403_s21 }
  0x15 PF: > { %v434_v1 = vld [vmem:[%s518_s1] sm:$0xff]   ;;  %v447_v2 = vmov 0.0   ;;  %v435_v3 = vld [vmem:[%s518_s1 + $0x8] sm:$0xff]   ;;  %vm448_vm1 = vmmov 0   ;;  %vm244_vm2 = vcmask 261120   ;;  %vm299_vm3 = vcmask 253952  }
  0x16   : > { %415 = vmatprep.subr.bf16.mxu0 %v447_v2  ;;  %419 = vmatprep.mubr.msk.bf16.mxu0 %vm448_vm1, %v447_v2  ;;  %v226_v4 = vld [vmem:[%s213_s24] sm:$0xff]  ;;  %p409_p5 = scmp.ne.s32.totalorder %s485_s19, 1 }
  0x17   : > { %416 = vmatpush3.bf16.msra.mxu0 %v434_v1  ;;  %v227_v5 = vpack.c.bf16 %v226_v4, %v226_v4  ;;  %v290_v23 = vld [vmem:[#allocation2] sm:$0x1]  ;;  %v301_v26 = vld [vmem:[#allocation3] sm:$0x1]  ;;  %v330_v37 = vlaneseq (!%p409_p5)  ;;  %vm335_vm4 = vcmask (!%p409_p5), 1040384   ;;  %vm337_vm5 = vcmask (!%p409_p5), 254976  }
  0x18   : > { %417 = vmatprep.subr.bf16.mxu0 %v447_v2  ;;  %v322_v38 = vld [vmem:[%s519_s2] sm:$0x1] (!%p409_p5) }
  0x19   : > { %v331_v39 = vshrl.u32 (!%p409_p5), %v330_v37, 7  ;;  %v326_v42 = vld [vmem:[%s520_s3] sm:$0x1] (!%p409_p5) }
  0x1b   : > { %418 = vmatpush3.bf16.msra.mxu0 %v435_v3  ;;  %v332_v44 = vsub.s32 (!%p409_p5), 0, %v331_v39 }
  0x1e   : > { %420 = vmatmul.mubr.msk.bf16.vlgmr.msra.gmra.mrb[0].mxu0 %vm244_vm2, %v227_v5 }
  0xf1   : > { %v282_v6 = vpop.f32.mrb[0].mxu0 }
  0xf2   : > { %v288_v7 = vmax.f32 %v282_v6, 0.0  ;;  %v421_v8 = vpop.f32.mrb[1].mxu0 }
  0xf3   : > { %v285_v9 = vpop.f32.mrb[2].mxu0 }
  0xf4   : > { %289 = vst.msk [vmem:[%s217_s27] sm:$0xff] %vm244_vm2, %v288_v7  ;;  %v291_v10 = vsel %vm244_vm2, %v288_v7, 0.0  ;;  %v302_v11 = vmul.f32 %v288_v7, %v288_v7  ;;  %v422_v12 = vpop.f32.mrb[3].mxu0 }
  0xf5   : > { %v292_v13 = vrot.slane %v291_v10, 4 }
  0xf6   : > { %v303_v14 = vsel %vm244_vm2, %v302_v11, 0.0 }
  0xf7   : > { %v293_v15 = vadd.f32 %v292_v13, %v291_v10  ;;  %v304_v16 = vrot.slane %v303_v14, 4 }
  0xf9   : > { %v294_v17 = vrot.slane %v293_v15, 2  ;;  %v305_v18 = vadd.f32 %v304_v16, %v303_v14 }
  0xfb   : > { %v295_v19 = vadd.f32 %v294_v17, %v293_v15  ;;  %v306_v20 = vrot.slane %v305_v18, 2 }
  0xfd   : > { %v296_v21 = vrot.slane %v295_v19, 1  ;;  %v307_v22 = vadd.f32 %v306_v20, %v305_v18 }
  0xff   : > { %v297_v24 = vadd.f32 %v296_v21, %v295_v19  ;;  %v308_v25 = vrot.slane %v307_v22, 1  ;;  %315 = sbr.rel (%p409_p5) target bundleno = 296 (0x128), region = 44 }
 0x101   : > { %v298_v27 = vadd.f32 %v297_v24, %v290_v23  ;;  %v309_v28 = vadd.f32 %v308_v25, %v307_v22 }
 0x103   : > { %300 = vst.msk [vmem:[#allocation2] sm:$0x1] %vm299_vm3, %v298_v27  ;;  %v310_v29 = vadd.f32 %v309_v28, %v301_v26 }
 0x105   : > { %311 = vst.msk [vmem:[#allocation3] sm:$0x1] %vm299_vm3, %v310_v29 }
 0x10a   : > { %v316_v30 = vld [vmem:[#allocation2] sm:$0x1] }
 0x10b   : > { %v317_v32 = vmul.f32 0.0625, %v316_v30 }
 0x10c   : > { %v318_v31 = vld [vmem:[#allocation3] sm:$0x1] }
 0x10d   : > { %v319_v33 = vmul.f32 0.0625, %v318_v31  ;;  %v320_v34 = vmul.f32 %v317_v32, %v317_v32 }
 0x10f   : > { %v321_v35 = vsub.f32 %v319_v33, %v320_v34 }
 0x111   : > { %v323_v36 = vadd.f32 1e-05, %v321_v35 }
 0x113   : > { %436 = vrsqrt.f32 %v323_v36 }
 0x11d   : > { %v437_v40 = vpop.eup %436 }
 0x11e   : > { %v325_v41 = vmul.f32 %v437_v40, %v322_v38 }
 0x120   : > { %v327_v43 = vmul.f32 %v325_v41, %v317_v32 }
 0x122   : > { %v328_v45 = vsub.f32 %v326_v42, %v327_v43 }
 0x124   : > { %v333_v46 = vrot.slane %v328_v45, %v332_v44 }
 0x126   : > { %v336_v47 = vsel %vm335_vm4, %v325_v41, %v333_v46 }
 0x127   : > { %338 = vst.msk [vmem:[%s522_s5] sm:$0x3] %vm337_vm5, %v336_v47 }
 0x128 PF: > { %s16_s18 = sadd.s32 1, %s444_s18  }
 0x129   : > { %p13_p6 = scmp.ge.s32.totalorder %s16_s18, 4  }
 0x12b   :  { %15 = sbr.rel (!%p13_p6) target bundleno = 1 (0x1), region = 82 }

// kernel: tacotron_forward.41
= control target key start
LH: loop header
LB: loop body
LE: loop exit
PB: predicated region body
PF: predicated region fallthrough
CT: control target
= control target key end

     0   :  { %s760_s18 = smov 0   ;;  %s834_s0 = inlined_call_operand.vmem [shape: f32[2,12,32], index: 0, kind: input, shape index: {}]   ;;  %s835_s1 = inlined_call_operand.vmem [shape: bf16[4,32,32], index: 1, kind: input, shape index: {}]   ;;  %s836_s2 = inlined_call_operand.vmem [shape: f32[1,32], index: 2, kind: input, shape index: {}]   ;;  %s837_s3 = inlined_call_operand.vmem [shape: f32[1,32], index: 3, kind: input, shape index: {}]   ;;  %s838_s4 = inlined_call_operand.vmem [shape: f32[2,8,32], index: 4, kind: output, shape index: {0}]   ;;  %s839_s5 = inlined_call_operand.vmem [shape: f32[2,32], index: 5, kind: output, shape index: {1}]  }
   0x1 LB: > { %s766_s19 = sadd.s32 4294967295, %s725_s18   ;;  %p611_p0 = scmp.ge.s32.totalorder %s725_s18, 1  ;;  %s725_s18 = sphi %s760_s18, %s16_s18  }
   0x2   : > { %p185_p1 = scmp.lt.s32.totalorder %s725_s18, 3 }
   0x4   : > { %p186_p2 = pnand %p611_p0, %p185_p1 }
   0x5   : > { %p212_p3 = scmp.lt.s32.totalorder (!%p186_p2), %s766_s19, 1  ;;  %p615_p4 = scmp.ne.s32.totalorder (!%p186_p2), %s766_s19, 0 }
   0x6   : > { %189 = sbr.rel (%p186_p2) target bundleno = 317 (0x13d), region = 36 }
   0xd   : > { %s213_s20 = scalar_select %p212_p3, %s766_s19, 1 }
   0xe   : > { %225 = sbr.rel (%p615_p4) target bundleno = 21 (0x15), region = 40  ;;  %vm226_vm0 = vcmask (!%p615_p4), 253952   ;;  %v727_v0 = vmov (!%p615_p4), 0.0  }
   0xf   : > { %s643_s21 = sshll.u32 %s213_s20, 4  ;;  %s614_s22 = sshll.u32 %s213_s20, 3  ;;  %227 = vst.msk [vmem:[#allocation2] sm:$0x1] (!%p615_p4), %vm226_vm0, %v727_v0  ;;  %228 = vst.msk [vmem:[#allocation3] sm:$0x1] (!%p615_p4), %vm226_vm0, %v727_v0 }
  0x10   : > { %s216_s25 = scalar_lea.vmem %s834_s0, %s643_s21  ;;  %s778_s28 = scalar_lea.vmem %s838_s4, %s614_s22 }
  0x15 PF: > { %v709_v1 = vld [vmem:[%s835_s1 + $0x10] sm:$0xff]   ;;  %v728_v2 = vmov 0.0   ;;  %v710_v3 = vld [vmem:[%s835_s1 + $0x20] sm:$0xff]   ;;  %v711_v4 = vld [vmem:[%s835_s1 + $0x18] sm:$0xff]   ;;  %vm729_vm1 = vmmov 0   ;;  %vm260_vm2 = vcmask 261120  }
  0x16   : > { %656 = vmatprep.subr.bf16.mxu1 %v728_v2  ;;  %672 = vmatprep.subr.bf16.mxu0 %v728_v2  ;;  %v712_v5 = vld [vmem:[%s835_s1 + $0x28] sm:$0xff]   ;;  %v229_v6 = vld [vmem:[%s216_s25] sm:$0xff]  ;;  %v714_v12 = vld [vmem:[%s835_s1 + $0x30] sm:$0xff]   ;;  %vm496_vm3 = vcmask 253952   ;;  %p640_p5 = scmp.ne.s32.totalorder %s766_s19, 1 }
  0x17   : > { %657 = vmatpush3.bf16.msra.mxu1 %v709_v1  ;;  %660 = vmatprep.mubr.msk.bf16.mxu1 %vm729_vm1, %v728_v2  ;;  %v230_v7 = vld [vmem:[%s216_s25 + $0x8] sm:$0xf]  ;;  %v713_v14 = vld [vmem:[%s835_s1] sm:$0xff]   ;;  %v716_v16 = vld [vmem:[%s835_s1 + $0x38] sm:$0xff]   ;;  %v539_v0 = vlaneseq (!%p640_p5)  ;;  %vm544_vm4 = vcmask (!%p640_p5), 1040384   ;;  %vm546_vm5 = vcmask (!%p640_p5), 254976  }
  0x18   : > { %673 = vmatpush3.bf16.msra.mxu0 %v710_v3  ;;  %658 = vmatprep.subr.bf16.mxu1 %v728_v2  ;;  %v231_v8 = vpack.c.bf16 %v230_v7, %v229_v6  ;;  %v715_v19 = vld [vmem:[%s835_s1 + $0x8] sm:$0xff]   ;;  %v494_v50 = vld [vmem:[#allocation2] sm:$0x1]  ;;  %v507_v53 = vld [vmem:[#allocation3] sm:$0x1] }
  0x19   : > { %674 = vmatprep.subr.bf16.mxu0 %v728_v2  ;;  %676 = vmatprep.mubr.msk.bf16.mxu0 %vm729_vm1, %v728_v2  ;;  %v531_v1 = vld [vmem:[%s836_s2] sm:$0x1] (!%p640_p5) }
  0x1a   : > { %v242_v9 = vshrl.u32 %v231_v8, 16  ;;  %v244_v10 = vshll.u32 %v231_v8, 16  ;;  %v366_v11 = vrot.slane %v231_v8, 1 }
  0x1b   : > { %659 = vmatpush3.bf16.msra.mxu1 %v711_v4 }
  0x1c   : > { %675 = vmatpush3.bf16.msra.mxu0 %v712_v5  ;;  %664 = vmatprep.subr.bf16.mxu1 %v728_v2  ;;  %v246_v13 = vrot.slane %v244_v10, 1  ;;  %v430_v17 = vrot.slane %v242_v9, 1  ;;  %v431_v18 = vrot.slane %v244_v10, 2  ;;  %v535_v5 = vld [vmem:[%s837_s3] sm:$0x1] (!%p640_p5) }
  0x1d   : > { %680 = vmatprep.subr.bf16.mxu0 %v728_v2 }
  0x1e   : > { %v247_v15 = vor.u32 %v246_v13, %v242_v9  ;;  %v432_v20 = vor.u32 %v431_v18, %v430_v17 }
  0x1f   : > { %677 = vmatmul.mubr.msk.bf16.vlgmr.msra.gmra.mrb[0].mxu0 %vm260_vm2, %v366_v11 }
  0x20   : > { %681 = vmatpush3.bf16.msra.mxu0 %v714_v12  ;;  %684 = vmatprep.mubr.msk.bf16.mxu0 %vm729_vm1, %v728_v2 }
  0x21   : > { %682 = vmatprep.subr.bf16.mxu0 %v728_v2  ;;  %661 = vmatmul.mubr.msk.bf16.vlgmr.msra.gmra.mrb[0].mxu1 %vm260_vm2, %v247_v15 }
  0x22   : > { %665 = vmatpush3.bf16.msra.mxu1 %v713_v14  ;;  %668 = vmatprep.mubr.msk.bf16.mxu1 %vm729_vm1, %v728_v2 }
  0x23   : > { %666 = vmatprep.subr.bf16.mxu1 %v728_v2  ;;  %v540_v2 = vshrl.u32 (!%p640_p5), %v539_v0, 7 }
  0x24   : > { %683 = vmatpush3.bf16.msra.mxu0 %v716_v16 }
  0x25   : > { %v541_v7 = vsub.s32 (!%p640_p5), 0, %v540_v2 }
  0x26   : > { %667 = vmatpush3.bf16.msra.mxu1 %v715_v19 }
  0x2b   : > { %685 = vmatmul.mubr.msk.bf16.vlgmr.msra.gmra.mrb[0].mxu0 %vm260_vm2, %v432_v20 }
  0x2d   : > { %669 = vmatmul.mubr.msk.bf16.vlgmr.msra.gmra.mrb[0].mxu1 %vm260_vm2, %v231_v8 }
  0xfe   : > { %v482_v21 = vpop.f32.mrb[0].mxu0 }
  0xff   : > { %v686_v22 = vpop.f32.mrb[1].mxu0 }
 0x100   : > { %v485_v23 = vpop.f32.mrb[2].mxu0  ;;  %v353_v24 = vpop.f32.mrb[0].mxu1 }
 0x101   : > { %v687_v25 = vpop.f32.mrb[3].mxu0  ;;  %v688_v26 = vadd.f32 %v482_v21, %v353_v24  ;;  %v670_v27 = vpop.f32.mrb[1].mxu1 }
 0x102   : > { %v356_v28 = vpop.f32.mrb[2].mxu1 }
 0x103   : > { %v491_v29 = vmax.f32 %v688_v26, 0.0  ;;  %v689_v30 = vadd.f32 %v485_v23, %v356_v28  ;;  %v671_v31 = vpop.f32.mrb[3].mxu1 }
 0x105   : > { %493 = vst.msk [vmem:[%s778_s28] sm:$0xff] %vm260_vm2, %v491_v29  ;;  %v508_v32 = vmul.f32 %v491_v29, %v491_v29  ;;  %v492_v33 = vmax.f32 %v689_v30, 0.0  ;;  %v495_v34 = vsel %vm260_vm2, %v491_v29, 0.0 }
 0x107   : > { %v497_v35 = vsel %vm496_vm3, %v492_v33, 0.0  ;;  %v509_v36 = vmul.f32 %v492_v33, %v492_v33  ;;  %v510_v38 = vsel %vm260_vm2, %v508_v32, 0.0 }
 0x108   : > { %v498_v37 = vadd.f32 %v497_v35, %v495_v34 }
 0x109   : > { %v511_v39 = vsel %vm496_vm3, %v509_v36, 0.0 }
 0x10a   : > { %v499_v40 = vrot.slane %v498_v37, 4  ;;  %v512_v41 = vadd.f32 %v511_v39, %v510_v38 }
 0x10c   : > { %v500_v42 = vadd.f32 %v499_v40, %v498_v37  ;;  %v513_v43 = vrot.slane %v512_v41, 4 }
 0x10e   : > { %v501_v44 = vrot.slane %v500_v42, 2  ;;  %v514_v45 = vadd.f32 %v513_v43, %v512_v41 }
 0x110   : > { %v502_v46 = vadd.f32 %v501_v44, %v500_v42  ;;  %v515_v47 = vrot.slane %v514_v45, 2 }
 0x112   : > { %v503_v48 = vrot.slane %v502_v46, 1  ;;  %v516_v49 = vadd.f32 %v515_v47, %v514_v45 }
 0x114   : > { %v504_v51 = vadd.f32 %v503_v48, %v502_v46  ;;  %v517_v52 = vrot.slane %v516_v49, 1  ;;  %524 = sbr.rel (%p640_p5) target bundleno = 317 (0x13d), region = 44 }
 0x116   : > { %v505_v54 = vadd.f32 %v504_v51, %v494_v50  ;;  %v518_v55 = vadd.f32 %v517_v52, %v516_v49 }
 0x118   : > { %506 = vst.msk [vmem:[#allocation2] sm:$0x1] %vm496_vm3, %v505_v54  ;;  %v519_v56 = vadd.f32 %v518_v55, %v507_v53 }
 0x11a   : > { %520 = vst.msk [vmem:[#allocation3] sm:$0x1] %vm496_vm3, %v519_v56 }
 0x11f   : > { %v525_v57 = vld [vmem:[#allocation2] sm:$0x1] }
 0x120   : > { %v526_v59 = vmul.f32 0.055555556, %v525_v57 }
 0x121   : > { %v527_v58 = vld [vmem:[#allocation3] sm:$0x1] }
 0x122   : > { %v528_v60 = vmul.f32 0.055555556, %v527_v58  ;;  %v529_v61 = vmul.f32 %v526_v59, %v526_v59 }
 0x124   : > { %v530_v62 = vsub.f32 %v528_v60, %v529_v61 }
 0x126   : > { %v532_v63 = vadd.f32 1e-05, %v530_v62 }
 0x128   : > { %717 = vrsqrt.f32 %v532_v63 }
 0x132   : > { %v718_v3 = vpop.eup %717 }
 0x133   : > { %v534_v4 = vmul.f32 %v718_v3, %v531_v1 }
 0x135   : > { %v536_v6 = vmul.f32 %v534_v4, %v526_v59 }
 0x137   : > { %v537_v8 = vsub.f32 %v535_v5, %v536_v6 }
 0x139   : > { %v542_v9 = vrot.slane %v537_v8, %v541_v7 }
 0x13b   : > { %v545_v10 = vsel %vm544_vm4, %v534_v4, %v542_v9 }
 0x13c   : > { %547 = vst.msk [vmem:[%s839_s5] sm:$0x3] %vm546_vm5, %v545_v10 }
 0x13d PF: > { %s16_s18 = sadd.s32 1, %s725_s18  }
 0x13e   : > { %p13_p6 = scmp.ge.s32.totalorder %s16_s18, 4  }
 0x140   :  { %15 = sbr.rel (!%p13_p6) target bundleno = 1 (0x1), region = 85 }

// kernel: tacotron_forward.45
= control target key start
LH: loop header
LB: loop body
LE: loop exit
PB: predicated region body
PF: predicated region fallthrough
CT: control target
= control target key end

     0   :  { %s658_s18 = smov 0   ;;  %s720_s0 = inlined_call_operand.vmem [shape: f32[2,10,32], index: 0, kind: input, shape index: {}]   ;;  %s721_s1 = inlined_call_operand.vmem [shape: bf16[3,32,32], index: 1, kind: input, shape index: {}]   ;;  %s722_s2 = inlined_call_operand.vmem [shape: f32[1,32], index: 2, kind: input, shape index: {}]   ;;  %s723_s3 = inlined_call_operand.vmem [shape: f32[1,32], index: 3, kind: input, shape index: {}]   ;;  %s724_s4 = inlined_call_operand.vmem [shape: f32[2,8,32], index: 4, kind: output, shape index: {0}]   ;;  %s725_s5 = inlined_call_operand.vmem [shape: f32[2,32], index: 5, kind: output, shape index: {1}]  }
   0x1 LB: > { %s664_s19 = sadd.s32 4294967295, %s623_s18   ;;  %p534_p0 = scmp.ge.s32.totalorder %s623_s18, 1  ;;  %s623_s18 = sphi %s658_s18, %s16_s18  }
   0x2   : > { %p185_p1 = scmp.lt.s32.totalorder %s623_s18, 3 }
   0x4   : > { %p186_p2 = pnand %p534_p0, %p185_p1 }
   0x5   : > { %p212_p3 = scmp.lt.s32.totalorder (!%p186_p2), %s664_s19, 1  ;;  %p538_p4 = scmp.ne.s32.totalorder (!%p186_p2), %s664_s19, 0 }
   0x6   : > { %189 = sbr.rel (%p186_p2) target bundleno = 308 (0x134), region = 36 }
   0xd   : > { %s213_s20 = scalar_select %p212_p3, %s664_s19, 1 }
   0xe   : > { %225 = sbr.rel (%p538_p4) target bundleno = 21 (0x15), region = 40  ;;  %vm226_vm0 = vcmask (!%p538_p4), 253952   ;;  %v625_v0 = vmov (!%p538_p4), 0.0  }
   0xf   : > { %s559_s21 = sshll.u32 %s213_s20, 4  ;;  %s537_s22 = sshll.u32 %s213_s20, 3  ;;  %227 = vst.msk [vmem:[#allocation2] sm:$0x1] (!%p538_p4), %vm226_vm0, %v625_v0  ;;  %228 = vst.msk [vmem:[#allocation3] sm:$0x1] (!%p538_p4), %vm226_vm0, %v625_v0 }
  0x10   : > { %s216_s25 = scalar_lea.vmem %s720_s0, %s559_s21  ;;  %s676_s28 = scalar_lea.vmem %s724_s4, %s537_s22 }
  0x15 PF: > { %v609_v1 = vld [vmem:[%s721_s1] sm:$0xff]   ;;  %v626_v2 = vmov 0.0   ;;  %v610_v3 = vld [vmem:[%s721_s1 + $0x8] sm:$0xff]   ;;  %vm627_vm1 = vmmov 0   ;;  %v612_v7 = vld [vmem:[%s721_s1 + $0x10] sm:$0xff]   ;;  %vm260_vm2 = vcmask 261120  }
  0x16   : > { %577 = vmatprep.subr.bf16.mxu0 %v626_v2  ;;  %569 = vmatprep.subr.bf16.mxu1 %v626_v2  ;;  %v229_v4 = vld [vmem:[%s216_s25] sm:$0xff]  ;;  %v230_v5 = vld [vmem:[%s216_s25 + $0x8] sm:$0x3]  ;;  %v613_v9 = vld [vmem:[%s721_s1 + $0x18] sm:$0xff]   ;;  %vm431_vm3 = vcmask 253952   ;;  %p556_p5 = scmp.ne.s32.totalorder %s664_s19, 1 }
  0x17   : > { %578 = vmatpush3.bf16.msra.mxu0 %v609_v1  ;;  %581 = vmatprep.mubr.msk.bf16.mxu0 %vm627_vm1, %v626_v2  ;;  %v231_v6 = vpack.c.bf16 %v230_v5, %v229_v4  ;;  %v611_v8 = vld [vmem:[%s721_s1 + $0x20] sm:$0xff]   ;;  %v614_v13 = vld [vmem:[%s721_s1 + $0x28] sm:$0xff]   ;;  %v462_v51 = vlaneseq (!%p556_p5)  ;;  %vm467_vm4 = vcmask (!%p556_p5), 1040384   ;;  %vm469_vm5 = vcmask (!%p556_p5), 254976  }
  0x18   : > { %579 = vmatprep.subr.bf16.mxu0 %v626_v2  ;;  %573 = vmatprep.mubr.msk.bf16.mxu1 %vm627_vm1, %v626_v2  ;;  %v422_v37 = vld [vmem:[#allocation2] sm:$0x1]  ;;  %v433_v40 = vld [vmem:[#allocation3] sm:$0x1] }
  0x19   : > { %570 = vmatpush3.bf16.msra.mxu1 %v612_v7  ;;  %v242_v10 = vshrl.u32 %v231_v6, 16  ;;  %v244_v11 = vshll.u32 %v231_v6, 16  ;;  %v364_v15 = vrot.slane %v231_v6, 1  ;;  %v454_v52 = vld [vmem:[%s722_s2] sm:$0x1] (!%p556_p5)  ;;  %v463_v53 = vshrl.u32 (!%p556_p5), %v462_v51, 7 }
  0x1a   : > { %571 = vmatprep.subr.bf16.mxu1 %v626_v2  ;;  %v458_v56 = vld [vmem:[%s723_s3] sm:$0x1] (!%p556_p5) }
  0x1b   : > { %580 = vmatpush3.bf16.msra.mxu0 %v610_v3  ;;  %v246_v12 = vrot.slane %v244_v11, 1  ;;  %v464_v58 = vsub.s32 (!%p556_p5), 0, %v463_v53 }
  0x1c   : > { %585 = vmatprep.subr.bf16.mxu0 %v626_v2 }
  0x1d   : > { %572 = vmatpush3.bf16.msra.mxu1 %v613_v9  ;;  %v247_v14 = vor.u32 %v246_v12, %v242_v10 }
  0x1e   : > { %582 = vmatmul.mubr.msk.bf16.vlgmr.msra.gmra.mrb[0].mxu0 %vm260_vm2, %v231_v6 }
  0x1f   : > { %586 = vmatpush3.bf16.msra.mxu0 %v611_v8  ;;  %589 = vmatprep.mubr.msk.bf16.mxu0 %vm627_vm1, %v626_v2 }
  0x20   : > { %587 = vmatprep.subr.bf16.mxu0 %v626_v2  ;;  %574 = vmatmul.mubr.msk.bf16.vlgmr.msra.gmra.mrb[0].mxu1 %vm260_vm2, %v247_v14 }
  0x23   : > { %588 = vmatpush3.bf16.msra.mxu0 %v614_v13 }
  0x2a   : > { %590 = vmatmul.mubr.msk.bf16.vlgmr.msra.gmra.mrb[0].mxu0 %vm260_vm2, %v364_v15 }
  0xf3   : > { %v298_v16 = vpop.f32.mrb[0].mxu1 }
  0xf4   : > { %v575_v17 = vpop.f32.mrb[1].mxu1 }
  0xf5   : > { %v301_v18 = vpop.f32.mrb[2].mxu1 }
  0xf6   : > { %v576_v19 = vpop.f32.mrb[3].mxu1 }
  0xfd   : > { %v414_v20 = vpop.f32.mrb[0].mxu0 }
  0xfe   : > { %v593_v21 = vadd.f32 %v414_v20, %v298_v16  ;;  %v591_v22 = vpop.f32.mrb[1].mxu0 }
  0xff   : > { %v417_v23 = vpop.f32.mrb[2].mxu0 }
 0x100   : > { %421 = vst.msk [vmem:[%s676_s28] sm:$0xff] %vm260_vm2, %v593_v21  ;;  %v423_v24 = vsel %vm260_vm2, %v593_v21, 0.0  ;;  %v434_v25 = vmul.f32 %v593_v21, %v593_v21  ;;  %v592_v26 = vpop.f32.mrb[3].mxu0 }
 0x101   : > { %v424_v27 = vrot.slane %v423_v24, 4 }
 0x102   : > { %v435_v28 = vsel %vm260_vm2, %v434_v25, 0.0 }
 0x103   : > { %v425_v29 = vadd.f32 %v424_v27, %v423_v24  ;;  %v436_v30 = vrot.slane %v435_v28, 4 }
 0x105   : > { %v426_v31 = vrot.slane %v425_v29, 2  ;;  %v437_v32 = vadd.f32 %v436_v30, %v435_v28 }
 0x107   : > { %v427_v33 = vadd.f32 %v426_v31, %v425_v29  ;;  %v438_v34 = vrot.slane %v437_v32, 2 }
 0x109   : > { %v428_v35 = vrot.slane %v427_v33, 1  ;;  %v439_v36 = vadd.f32 %v438_v34, %v437_v32 }
 0x10b   : > { %v429_v38 = vadd.f32 %v428_v35, %v427_v33  ;;  %v440_v39 = vrot.slane %v439_v36, 1  ;;  %447 = sbr.rel (%p556_p5) target bundleno = 308 (0x134), region = 44 }
 0x10d   : > { %v430_v41 = vadd.f32 %v429_v38, %v422_v37  ;;  %v441_v42 = vadd.f32 %v440_v39, %v439_v36 }
 0x10f   : > { %432 = vst.msk [vmem:[#allocation2] sm:$0x1] %vm431_vm3, %v430_v41  ;;  %v442_v43 = vadd.f32 %v441_v42, %v433_v40 }
 0x111   : > { %443 = vst.msk [vmem:[#allocation3] sm:$0x1] %vm431_vm3, %v442_v43 }
 0x116   : > { %v448_v44 = vld [vmem:[#allocation2] sm:$0x1] }
 0x117   : > { %v449_v46 = vmul.f32 0.0625, %v448_v44 }
 0x118   : > { %v450_v45 = vld [vmem:[#allocation3] sm:$0x1] }
 0x119   : > { %v451_v47 = vmul.f32 0.0625, %v450_v45  ;;  %v452_v48 = vmul.f32 %v449_v46, %v449_v46 }
 0x11b   : > { %v453_v49 = vsub.f32 %v451_v47, %v452_v48 }
 0x11d   : > { %v455_v50 = vadd.f32 1e-05, %v453_v49 }
 0x11f   : > { %615 = vrsqrt.f32 %v455_v50 }
 0x129   : > { %v616_v54 = vpop.eup %615 }
 0x12a   : > { %v457_v55 = vmul.f32 %v616_v54, %v454_v52 }
 0x12c   : > { %v459_v57 = vmul.f32 %v457_v55, %v449_v46 }
 0x12e   : > { %v460_v59 = vsub.f32 %v458_v56, %v459_v57 }
 0x130   : > { %v465_v60 = vrot.slane %v460_v59, %v464_v58 }
 0x132   : > { %v468_v61 = vsel %vm467_vm4, %v457_v55, %v465_v60 }
 0x133   : > { %470 = vst.msk [vmem:[%s725_s5] sm:$0x3] %vm469_vm5, %v468_v61 }
 0x134 PF: > { %s16_s18 = sadd.s32 1, %s623_s18  }
 0x135   : > { %p13_p6 = scmp.ge.s32.totalorder %s16_s18, 4  }
 0x137   :  { %15 = sbr.rel (!%p13_p6) target bundleno = 1 (0x1), region = 84 }

// kernel: tacotron_forward.43
= control target key start
LH: loop header
LB: loop body
LE: loop exit
PB: predicated region body
PF: predicated region fallthrough
CT: control target
= control target key end

     0   :  { %s908_s18 = smov 0   ;;  %s1049_s0 = inlined_call_operand.vmem [shape: f32[2,10,128], index: 0, kind: input, shape index: {}]   ;;  %s1050_s1 = inlined_call_operand.vmem [shape: bf16[3,128,32], index: 1, kind: input, shape index: {}]   ;;  %s1051_s2 = inlined_call_operand.vmem [shape: f32[1,32], index: 2, kind: input, shape index: {}]   ;;  %s1052_s3 = inlined_call_operand.vmem [shape: f32[1,32], index: 3, kind: input, shape index: {}]   ;;  %s1053_s4 = inlined_call_operand.vmem [shape: f32[2,8,32], index: 4, kind: output, shape index: {0}]   ;;  %s1054_s5 = inlined_call_operand.vmem [shape: f32[2,32], index: 5, kind: output, shape index: {1}]  }
   0x1 LB: > { %s914_s19 = sadd.s32 4294967295, %s873_s18   ;;  %p673_p0 = scmp.ge.s32.totalorder %s873_s18, 1  ;;  %s873_s18 = sphi %s908_s18, %s16_s18  }
   0x2   : > { %p185_p1 = scmp.lt.s32.totalorder %s873_s18, 3 }
   0x4   : > { %p186_p2 = pnand %p673_p0, %p185_p1 }
   0x5   : > { %p212_p3 = scmp.lt.s32.totalorder (!%p186_p2), %s914_s19, 1  ;;  %p677_p4 = scmp.ne.s32.totalorder (!%p186_p2), %s914_s19, 0 }
   0x6   : > { %189 = sbr.rel (%p186_p2) target bundleno = 354 (0x162), region = 36 }
   0xd   : > { %s213_s20 = scalar_select %p212_p3, %s914_s19, 1 }
   0xe   : > { %225 = sbr.rel (%p677_p4) target bundleno = 21 (0x15), region = 40  ;;  %vm226_vm0 = vcmask (!%p677_p4), 253952   ;;  %v875_v0 = vmov (!%p677_p4), 0.0  }
   0xf   : > { %s737_s21 = sshll.u32 %s213_s20, 4  ;;  %s676_s22 = sshll.u32 %s213_s20, 3  ;;  %227 = vst.msk [vmem:[#allocation2] sm:$0x1] (!%p677_p4), %vm226_vm0, %v875_v0  ;;  %228 = vst.msk [vmem:[#allocation3] sm:$0x1] (!%p677_p4), %vm226_vm0, %v875_v0 }
  0x10   : > { %s923_s25 = scalar_lea.vmem %s1049_s0, %s737_s21  ;;  %s928_s28 = scalar_lea.vmem %s1053_s4, %s676_s22 }
  0x15 PF: > { %v841_v1 = vld [vmem:[%s1050_s1] sm:$0xff]   ;;  %v876_v2 = vmov 0.0   ;;  %v842_v3 = vld [vmem:[%s1050_s1 + $0x8] sm:$0xff]   ;;  %vm877_vm1 = vmmov 0   ;;  %v843_v4 = vld [vmem:[%s1050_s1 + $0x10] sm:$0xff]   ;;  %vm559_vm2 = vcmask 261120  }
  0x16   : > { %785 = vmatprep.subr.bf16.mxu0 %v876_v2  ;;  %765 = vmatprep.subr.bf16.mxu1 %v876_v2  ;;  %v849_v5 = vld [vmem:[%s1050_s1 + $0x40] sm:$0xff]   ;;  %v844_v6 = vld [vmem:[%s1050_s1 + $0x18] sm:$0xff]   ;;  %v851_v7 = vld [vmem:[%s1050_s1 + $0x48] sm:$0xff]   ;;  %vm570_vm3 = vcmask 253952   ;;  %p734_p5 = scmp.ne.s32.totalorder %s914_s19, 1 }
  0x17   : > { %786 = vmatpush3.bf16.msra.mxu0 %v841_v1  ;;  %801 = vmatprep.mubr.msk.bf16.mxu0 %vm877_vm1, %v876_v2  ;;  %v845_v8 = vld [vmem:[%s1050_s1 + $0x20] sm:$0xff]   ;;  %v853_v9 = vld [vmem:[%s1050_s1 + $0x50] sm:$0xff]   ;;  %v846_v10 = vld [vmem:[%s1050_s1 + $0x28] sm:$0xff]   ;;  %vm606_vm4 = vcmask (!%p734_p5), 1040384   ;;  %vm608_vm5 = vcmask (!%p734_p5), 254976  }
  0x18   : > { %787 = vmatprep.subr.bf16.mxu0 %v876_v2  ;;  %781 = vmatprep.mubr.msk.bf16.mxu1 %vm877_vm1, %v876_v2  ;;  %v855_v11 = vld [vmem:[%s1050_s1 + $0x58] sm:$0xff]   ;;  %v847_v12 = vld [vmem:[%s1050_s1 + $0x30] sm:$0xff]   ;;  %v857_v13 = vld [vmem:[%s1050_s1 + $0x60] sm:$0xff]  }
  0x19   : > { %766 = vmatpush3.bf16.msra.mxu1 %v849_v5  ;;  %v229_v14 = vld [vmem:[%s923_s25] sm:$0xff]  ;;  %v230_v15 = vld [vmem:[%s923_s25 + $0x8] sm:$0x3]  ;;  %v848_v16 = vld [vmem:[%s1050_s1 + $0x38] sm:$0xff]  }
  0x1a   : > { %767 = vmatprep.subr.bf16.mxu1 %v876_v2  ;;  %v859_v17 = vld [vmem:[%s1050_s1 + $0x68] sm:$0xff]   ;;  %v231_v18 = vpack.c.bf16 %v230_v15, %v229_v14  ;;  %v850_v20 = vld [vmem:[%s1050_s1 + $0x80] sm:$0xff]   ;;  %v861_v21 = vld [vmem:[%s1050_s1 + $0x70] sm:$0xff]  }
  0x1b   : > { %788 = vmatpush3.bf16.msra.mxu0 %v842_v3  ;;  %v852_v24 = vld [vmem:[%s1050_s1 + $0x88] sm:$0xff]   ;;  %v863_v25 = vld [vmem:[%s1050_s1 + $0x78] sm:$0xff]   ;;  %v854_v27 = vld [vmem:[%s1050_s1 + $0x90] sm:$0xff]  }
  0x1c   : > { %789 = vmatprep.subr.bf16.mxu0 %v876_v2  ;;  %v268_v19 = vshll.u32 %v231_v18, 16  ;;  %v266_v22 = vshrl.u32 %v231_v18, 16  ;;  %v856_v28 = vld [vmem:[%s1050_s1 + $0x98] sm:$0xff]   ;;  %v858_v29 = vld [vmem:[%s1050_s1 + $0xa0] sm:$0xff]   ;;  %v860_v30 = vld [vmem:[%s1050_s1 + $0xa8] sm:$0xff]   ;;  %v467_v33 = vrot.slane %v231_v18, 1 }
  0x1d   : > { %768 = vmatpush3.bf16.msra.mxu1 %v851_v7  ;;  %v862_v31 = vld [vmem:[%s1050_s1 + $0xb0] sm:$0xff]   ;;  %v864_v32 = vld [vmem:[%s1050_s1 + $0xb8] sm:$0xff]   ;;  %v561_v56 = vld [vmem:[#allocation2] sm:$0x1] }
  0x1e   : > { %769 = vmatprep.subr.bf16.mxu1 %v876_v2  ;;  %v270_v23 = vrot.slane %v268_v19, 1  ;;  %v572_v59 = vld [vmem:[#allocation3] sm:$0x1]  ;;  %v593_v7 = vld [vmem:[%s1051_s2] sm:$0x1] (!%p734_p5) }
  0x1f   : > { %790 = vmatpush3.bf16.msra.mxu0 %v843_v4 }
  0x20   : > { %791 = vmatprep.subr.bf16.mxu0 %v876_v2  ;;  %v271_v26 = vor.u32 %v270_v23, %v266_v22 }
  0x21   : > { %770 = vmatpush3.bf16.msra.mxu1 %v853_v9 }
  0x22   : > { %771 = vmatprep.subr.bf16.mxu1 %v876_v2 }
  0x23   : > { %792 = vmatpush3.bf16.msra.mxu0 %v844_v6  ;;  %v601_v6 = vlaneseq (!%p734_p5) }
  0x24   : > { %793 = vmatprep.subr.bf16.mxu0 %v876_v2 }
  0x25   : > { %772 = vmatpush3.bf16.msra.mxu1 %v855_v11  ;;  %v597_v11 = vld [vmem:[%s1052_s3] sm:$0x1] (!%p734_p5) }
  0x26   : > { %773 = vmatprep.subr.bf16.mxu1 %v876_v2 }
  0x27   : > { %794 = vmatpush3.bf16.msra.mxu0 %v845_v8  ;;  %v602_v8 = vshrl.u32 (!%p734_p5), %v601_v6, 7 }
  0x28   : > { %795 = vmatprep.subr.bf16.mxu0 %v876_v2 }
  0x29   : > { %774 = vmatpush3.bf16.msra.mxu1 %v857_v13  ;;  %v603_v13 = vsub.s32 (!%p734_p5), 0, %v602_v8 }
  0x2a   : > { %775 = vmatprep.subr.bf16.mxu1 %v876_v2 }
  0x2b   : > { %796 = vmatpush3.bf16.msra.mxu0 %v846_v10 }
  0x2c   : > { %797 = vmatprep.subr.bf16.mxu0 %v876_v2 }
  0x2d   : > { %776 = vmatpush3.bf16.msra.mxu1 %v859_v17 }
  0x2e   : > { %777 = vmatprep.subr.bf16.mxu1 %v876_v2 }
  0x2f   : > { %798 = vmatpush3.bf16.msra.mxu0 %v847_v12 }
  0x30   : > { %799 = vmatprep.subr.bf16.mxu0 %v876_v2 }
  0x31   : > { %778 = vmatpush3.bf16.msra.mxu1 %v861_v21 }
  0x32   : > { %779 = vmatprep.subr.bf16.mxu1 %v876_v2 }
  0x33   : > { %800 = vmatpush3.bf16.msra.mxu0 %v848_v16 }
  0x34   : > { %805 = vmatprep.subr.bf16.mxu0 %v876_v2 }
  0x35   : > { %780 = vmatpush3.bf16.msra.mxu1 %v863_v25 }
  0x36   : > { %802 = vmatmul.mubr.bf16.vlgmr.msra.gmra.mrb[0].mxu0 %v231_v18 }
  0x37   : > { %806 = vmatpush3.bf16.msra.mxu0 %v850_v20  ;;  %821 = vmatprep.mubr.msk.bf16.mxu0 %vm877_vm1, %v876_v2 }
  0x38   : > { %807 = vmatprep.subr.bf16.mxu0 %v876_v2  ;;  %782 = vmatmul.mubr.bf16.vlgmr.msra.gmra.mrb[0].mxu1 %v271_v26 }
  0x3b   : > { %808 = vmatpush3.bf16.msra.mxu0 %v852_v24 }
  0x3c   : > { %809 = vmatprep.subr.bf16.mxu0 %v876_v2 }
  0x3f   : > { %810 = vmatpush3.bf16.msra.mxu0 %v854_v27 }
  0x40   : > { %811 = vmatprep.subr.bf16.mxu0 %v876_v2 }
  0x43   : > { %812 = vmatpush3.bf16.msra.mxu0 %v856_v28 }
  0x44   : > { %813 = vmatprep.subr.bf16.mxu0 %v876_v2 }
  0x47   : > { %814 = vmatpush3.bf16.msra.mxu0 %v858_v29 }
  0x48   : > { %815 = vmatprep.subr.bf16.mxu0 %v876_v2 }
  0x4b   : > { %816 = vmatpush3.bf16.msra.mxu0 %v860_v30 }
  0x4c   : > { %817 = vmatprep.subr.bf16.mxu0 %v876_v2 }
  0x4f   : > { %818 = vmatpush3.bf16.msra.mxu0 %v862_v31 }
  0x50   : > { %819 = vmatprep.subr.bf16.mxu0 %v876_v2 }
  0x53   : > { %820 = vmatpush3.bf16.msra.mxu0 %v864_v32 }
  0x56   : > { %822 = vmatmul.mubr.bf16.vlgmr.msra.gmra.mrb[0].mxu0 %v467_v33 }
 0x10b   : > { %v355_v34 = vpop.f32.mrb[0].mxu1 }
 0x10c   : > { %v783_v35 = vpop.f32.mrb[1].mxu1 }
 0x10d   : > { %v358_v36 = vpop.f32.mrb[2].mxu1 }
 0x10e   : > { %v784_v37 = vpop.f32.mrb[3].mxu1 }
 0x129   : > { %v551_v38 = vpop.f32.mrb[0].mxu0 }
 0x12a   : > { %v825_v39 = vadd.f32 %v551_v38, %v355_v34  ;;  %v823_v40 = vpop.f32.mrb[1].mxu0 }
 0x12b   : > { %v554_v41 = vpop.f32.mrb[2].mxu0 }
 0x12c   : > { %v558_v42 = vmax.f32 %v825_v39, 0.0  ;;  %v824_v43 = vpop.f32.mrb[3].mxu0 }
 0x12e   : > { %560 = vst.msk [vmem:[%s928_s28] sm:$0xff] %vm559_vm2, %v558_v42  ;;  %v562_v44 = vsel %vm559_vm2, %v558_v42, 0.0  ;;  %v573_v45 = vmul.f32 %v558_v42, %v558_v42 }
 0x12f   : > { %v563_v46 = vrot.slane %v562_v44, 4 }
 0x130   : > { %v574_v47 = vsel %vm559_vm2, %v573_v45, 0.0 }
 0x131   : > { %v564_v48 = vadd.f32 %v563_v46, %v562_v44  ;;  %v575_v49 = vrot.slane %v574_v47, 4 }
 0x133   : > { %v565_v50 = vrot.slane %v564_v48, 2  ;;  %v576_v51 = vadd.f32 %v575_v49, %v574_v47 }
 0x135   : > { %v566_v52 = vadd.f32 %v565_v50, %v564_v48  ;;  %v577_v53 = vrot.slane %v576_v51, 2 }
 0x137   : > { %v567_v54 = vrot.slane %v566_v52, 1  ;;  %v578_v55 = vadd.f32 %v577_v53, %v576_v51 }
 0x139   : > { %v568_v57 = vadd.f32 %v567_v54, %v566_v52  ;;  %v579_v58 = vrot.slane %v578_v55, 1  ;;  %586 = sbr.rel (%p734_p5) target bundleno = 354 (0x162), region = 44 }
 0x13b   : > { %v569_v60 = vadd.f32 %v568_v57, %v561_v56  ;;  %v580_v61 = vadd.f32 %v579_v58, %v578_v55 }
 0x13d   : > { %571 = vst.msk [vmem:[#allocation2] sm:$0x1] %vm570_vm3, %v569_v60  ;;  %v581_v62 = vadd.f32 %v580_v61, %v572_v59 }
 0x13f   : > { %582 = vst.msk [vmem:[#allocation3] sm:$0x1] %vm570_vm3, %v581_v62 }
 0x144   : > { %v587_v63 = vld [vmem:[#allocation2] sm:$0x1] }
 0x145   : > { %v588_v1 = vmul.f32 0.0625, %v587_v63 }
 0x146   : > { %v589_v0 = vld [vmem:[#allocation3] sm:$0x1] }
 0x147   : > { %v590_v2 = vmul.f32 0.0625, %v589_v0  ;;  %v591_v3 = vmul.f32 %v588_v1, %v588_v1 }
 0x149   : > { %v592_v4 = vsub.f32 %v590_v2, %v591_v3 }
 0x14b   : > { %v594_v5 = vadd.f32 1e-05, %v592_v4 }
 0x14d   : > { %865 = vrsqrt.f32 %v594_v5 }
 0x157   : > { %v866_v9 = vpop.eup %865 }
 0x158   : > { %v596_v10 = vmul.f32 %v866_v9, %v593_v7 }
 0x15a   : > { %v598_v12 = vmul.f32 %v596_v10, %v588_v1 }
 0x15c   : > { %v599_v14 = vsub.f32 %v597_v11, %v598_v12 }
 0x15e   : > { %v604_v15 = vrot.slane %v599_v14, %v603_v13 }
 0x160   : > { %v607_v16 = vsel %vm606_vm4, %v596_v10, %v604_v15 }
 0x161   : > { %609 = vst.msk [vmem:[%s1054_s5] sm:$0x3] %vm608_vm5, %v607_v16 }
 0x162 PF: > { %s16_s18 = sadd.s32 1, %s873_s18  }
 0x163   : > { %p13_p6 = scmp.ge.s32.totalorder %s16_s18, 4  }
 0x165   :  { %15 = sbr.rel (!%p13_p6) target bundleno = 1 (0x1), region = 84 }

// kernel: tacotron_forward.48
= control target key start
LH: loop header
LB: loop body
LE: loop exit
PB: predicated region body
PF: predicated region fallthrough
CT: control target
= control target key end

     0   :  { %v112_v0 = vmov 0.0   ;;  %vm113_vm0 = vmmov 0   ;;  %vm41_vm1 = vcmask 261120   ;;  %vm86_vm2 = vcmask 785408   ;;  %s155_s1 = inlined_call_operand.vmem [shape: bf16[32,96], index: 1, kind: input, shape index: {}]   ;;  %s156_s0 = inlined_call_operand.vmem [shape: f32[16,32], index: 0, kind: input, shape index: {}]   ;;  %s157_s2 = inlined_call_operand.vmem [shape: f32[1,96], index: 2, kind: input, shape index: {}]   ;;  %s158_s3 = inlined_call_operand.vmem [shape: f32[16,96], index: 3, kind: output, shape index: {}]  }
   0x1   :  { %100 = vmatprep.subr.bf16.mxu0 %v112_v0  ;;  %v110_v1 = vld [vmem:[%s155_s1] sm:$0xff]   ;;  %104 = vmatprep.mubr.msk.bf16.mxu0 %vm113_vm0, %v112_v0  ;;  %v111_v2 = vld [vmem:[%s155_s1 + $0x8] sm:$0xff]  }
   0x2   :  { %101 = vmatpush3.bf16.msra.mxu0 %v110_v1  ;;  %v15_v3 = vld [vmem:[%s156_s0] sm:$0xff]  ;;  %v16_v4 = vld [vmem:[%s156_s0 + $0x8] sm:$0xff] }
   0x3   :  { %102 = vmatprep.subr.bf16.mxu0 %v112_v0  ;;  %v17_v5 = vpack.c.bf16 %v16_v4, %v15_v3  ;;  %v93_v6 = vld [vmem:[%s157_s2] ss:$0 sm:$0xff] }
   0x6   :  { %103 = vmatpush3.bf16.msra.mxu0 %v111_v2 }
   0x9   :  { %105 = vmatmul.mubr.msk.bf16.vlgmr.msra.gmra.mrb[0].mxu0 %vm41_vm1, %v17_v5 }
  0xdc   :  { %v79_v7 = vpop.f32.mrb[0].mxu0 }
  0xdd   :  { %v80_v8 = vadd.f32 %v93_v6, %v79_v7  ;;  %v106_v9 = vpop.f32.mrb[1].mxu0 }
  0xde   :  { %v82_v10 = vpop.f32.mrb[2].mxu0 }
  0xdf   :  { %87 = vst.msk [vmem:[%s158_s3] sm:$0xff] %vm86_vm2, %v80_v8  ;;  %v83_v11 = vadd.f32 %v93_v6, %v82_v10  ;;  %v107_v12 = vpop.f32.mrb[3].mxu0 }
  0xe1   :  { %88 = vst.msk [vmem:[%s158_s3 + $0x8] sm:$0xff] %vm86_vm2, %v83_v11 }

// kernel: tacotron_forward.47
= control target key start
LH: loop header
LB: loop body
LE: loop exit
PB: predicated region body
PF: predicated region fallthrough
CT: control target
= control target key end

     0   :  { %v304_v0 = vmov 0.0   ;;  %vm305_vm0 = vmmov 0   ;;  %s306_s20 = smov 32   ;;  %vm41_vm1 = vcmask 261120   ;;  %s371_s1 = inlined_call_operand.vmem [shape: bf16[2,32,64], index: 1, kind: input, shape index: {}]   ;;  %s372_s0 = inlined_call_operand.vmem [shape: f32[16,32], index: 0, kind: input, shape index: {}]   ;;  %s373_s2 = inlined_call_operand.vmem [shape: f32[2,1,64], index: 2, kind: input, shape index: {}]   ;;  %s374_s3 = inlined_call_operand.vmem [shape: f32[16,32], index: 3, kind: output, shape index: {}]  }
   0x1   :  { %264 = vmatprep.subr.bf16.mxu0 %v304_v0  ;;  %v284_v1 = vld [vmem:[%s371_s1] sm:$0xff]   ;;  %268 = vmatprep.mubr.msk.bf16.mxu0 %vm305_vm0, %v304_v0  ;;  %v285_v2 = vld [vmem:[%s371_s1 + $0x8] sm:$0xff]   ;;  %v286_v11 = vld [vmem:[%s371_s1 + $0x10] sm:$0xff]  }
   0x2   :  { %272 = vmatprep.subr.bf16.mxu1 %v304_v0  ;;  %276 = vmatprep.mubr.msk.bf16.mxu1 %vm305_vm0, %v304_v0  ;;  %v15_v3 = vld [vmem:[%s372_s0] sm:$0xff]  ;;  %v16_v4 = vld [vmem:[%s372_s0 + $0x8] sm:$0xff]  ;;  %v287_v15 = vld [vmem:[%s371_s1 + $0x18] sm:$0xff]   ;;  %s307_s1 = smov 96  }
   0x3   :  { %265 = vmatpush3.bf16.msra.mxu0 %v284_v1  ;;  %114 = vrot.lane.b32.xlu1 %v15_v3, %s306_s20  ;;  %v17_v5 = vpack.c.bf16 %v16_v4, %v15_v3  ;;  %v241_v6 = vld [vmem:[%s373_s2] ss:$0 sm:$0xff]  ;;  %v252_v39 = vld [vmem:[%s373_s2 + $0x1] ss:$0 sm:$0xff] }
   0x4   :  { %266 = vmatprep.subr.bf16.mxu0 %v304_v0  ;;  %273 = vmatpush3.bf16.msra.mxu1 %v286_v11 }
   0x5   :  { %274 = vmatprep.subr.bf16.mxu1 %v304_v0 }
   0x7   :  { %267 = vmatpush3.bf16.msra.mxu0 %v285_v2  ;;  %116 = vrot.lane.b32.xlu1 %v16_v4, %s306_s20 }
   0x8   :  { %275 = vmatpush3.bf16.msra.mxu1 %v287_v15 }
   0xa   :  { %269 = vmatmul.mubr.msk.bf16.vlgmr.msra.gmra.mrb[0].mxu0 %vm41_vm1, %v17_v5 }
  0x75   :  { %v115_v23 = vpop.permute.xlu1 %114 }
  0x79   :  { %v117_v29 = vpop.permute.xlu1 %116 }
  0xdd   :  { %v79_v7 = vpop.f32.mrb[0].mxu0 }
  0xde   :  { %v80_v8 = vadd.f32 %v241_v6, %v79_v7  ;;  %v270_v9 = vpop.f32.mrb[1].mxu0 }
  0xdf   :  { %v82_v10 = vpop.f32.mrb[2].mxu0 }
  0xe0   :  { %v83_v12 = vadd.f32 %v241_v6, %v82_v10  ;;  %v271_v13 = vpop.f32.mrb[3].mxu0  ;;  %v98_v14 = vmax.f32 %v80_v8, 0.0  ;;  %v245_v17 = vmul.f32 -1.442695, %v80_v8 }
  0xe2   :  { %102 = vrot.lane.b32.xlu0 %v98_v14, %s306_s20  ;;  %v99_v16 = vmax.f32 %v83_v12, 0.0  ;;  %v246_v18 = vmul.f32 -1.442695, %v83_v12  ;;  %288 = vpow2.f32 %v245_v17 }
  0xe4   :  { %290 = vpow2.f32 %v246_v18 }
  0xe6   :  { %104 = vrot.lane.b32.xlu0 %v99_v16, %s306_s20 }
  0xec   :  { %v289_v19 = vpop.eup %288 }
  0xed   :  { %v92_v21 = vadd.f32 1.0, %v289_v19 }
  0xee   :  { %v291_v20 = vpop.eup %290 }
  0xef   :  { %v93_v22 = vadd.f32 1.0, %v291_v20  ;;  %292 = vrcp.f32 %v92_v21 }
  0xf1   :  { %294 = vrcp.f32 %v93_v22 }
  0xf9   :  { %v293_v24 = vpop.eup %292 }
  0xfa   :  { %v110_v27 = vsub.f32 1.0, %v293_v24 }
  0xfb   :  { %v295_v25 = vpop.eup %294 }
  0xfc   :  { %v111_v28 = vsub.f32 1.0, %v295_v25  ;;  %v120_v32 = vmul.f32 %v115_v23, %v110_v27 }
  0xfe   :  { %v121_v33 = vmul.f32 %v117_v29, %v111_v28 }
 0x154   :  { %v103_v26 = vpop.permute.xlu0 %102 }
 0x155   :  { %v108_v30 = vmul.f32 %v293_v24, %v103_v26 }
 0x157   :  { %v122_v35 = vadd.f32 %v120_v32, %v108_v30 }
 0x158   :  { %v105_v31 = vpop.permute.xlu0 %104 }
 0x159   :  { %v109_v34 = vmul.f32 %v295_v25, %v105_v31 }
 0x15b   :  { %v123_v36 = vadd.f32 %v121_v33, %v109_v34 }
 0x15d   :  { %v124_v37 = vpack.c.bf16 %v123_v36, %v122_v35 }
 0x15f   :  { %139 = vrot.lane.b32.xlu0 %v124_v37, %s307_s1 }
 0x1d1   :  { %v140_v38 = vpop.permute.xlu0 %139 }
 0x1d2   :  { %277 = vmatmul.mubr.msk.bf16.vlgmr.msra.gmra.mrb[0].mxu1 %vm41_vm1, %v140_v38 }
 0x2a5   :  { %v190_v40 = vpop.f32.mrb[0].mxu1 }
 0x2a6   :  { %v191_v41 = vadd.f32 %v252_v39, %v190_v40  ;;  %v278_v42 = vpop.f32.mrb[1].mxu1 }
 0x2a7   :  { %v193_v43 = vpop.f32.mrb[2].mxu1 }
 0x2a8   :  { %v209_v44 = vmax.f32 %v191_v41, 0.0  ;;  %v194_v45 = vadd.f32 %v252_v39, %v193_v43  ;;  %v279_v46 = vpop.f32.mrb[3].mxu1  ;;  %v256_v48 = vmul.f32 -1.442695, %v191_v41 }
 0x2aa   :  { %v210_v47 = vmax.f32 %v194_v45, 0.0  ;;  %213 = vrot.lane.b32.xlu1 %v209_v44, %s306_s20  ;;  %v257_v49 = vmul.f32 -1.442695, %v194_v45  ;;  %296 = vpow2.f32 %v256_v48 }
 0x2ac   :  { %215 = vrot.lane.b32.xlu0 %v210_v47, %s306_s20  ;;  %298 = vpow2.f32 %v257_v49 }
 0x2b4   :  { %v297_v50 = vpop.eup %296 }
 0x2b5   :  { %v203_v52 = vadd.f32 1.0, %v297_v50 }
 0x2b6   :  { %v299_v51 = vpop.eup %298 }
 0x2b7   :  { %v204_v53 = vadd.f32 1.0, %v299_v51  ;;  %300 = vrcp.f32 %v203_v52 }
 0x2b9   :  { %302 = vrcp.f32 %v204_v53 }
 0x2c1   :  { %v301_v54 = vpop.eup %300 }
 0x2c2   :  { %v221_v56 = vsub.f32 1.0, %v301_v54 }
 0x2c3   :  { %v303_v55 = vpop.eup %302 }
 0x2c4   :  { %v222_v57 = vsub.f32 1.0, %v303_v55  ;;  %v223_v60 = vmul.f32 %v221_v56, %v122_v35 }
 0x2c6   :  { %v224_v0 = vmul.f32 %v222_v57, %v123_v36 }
 0x31c   :  { %v214_v58 = vpop.permute.xlu1 %213 }
 0x31d   :  { %v219_v59 = vmul.f32 %v301_v54, %v214_v58 }
 0x31e   :  { %v216_v61 = vpop.permute.xlu0 %215 }
 0x31f   :  { %v225_v62 = vadd.f32 %v223_v60, %v219_v59  ;;  %v220_v63 = vmul.f32 %v303_v55, %v216_v61 }
 0x321   :  { %v226_v1 = vadd.f32 %v224_v0, %v220_v63  ;;  %229 = vrot.lane.b32.xlu1 %v225_v62, %s307_s1 }
 0x323   :  { %231 = vrot.lane.b32.xlu0 %v226_v1, %s307_s1 }
 0x393   :  { %v230_v2 = vpop.permute.xlu1 %229 }
 0x394   :  { %235 = vst.msk [vmem:[%s374_s3] sm:$0xff] %vm41_vm1, %v230_v2 }
 0x395   :  { %v232_v3 = vpop.permute.xlu0 %231 }
 0x396   :  { %236 = vst.msk [vmem:[%s374_s3 + $0x8] sm:$0xff] %vm41_vm1, %v232_v3 }

// kernel: tacotron_forward.50
= control target key start
LH: loop header
LB: loop body
LE: loop exit
PB: predicated region body
PF: predicated region fallthrough
CT: control target
= control target key end

     0   :  { %v114_v0 = vmov 0.0   ;;  %vm115_vm0 = vmmov 0   ;;  %vm39_vm1 = vcmask 392192   ;;  %vm84_vm2 = vcmask 261120   ;;  %s152_s1 = inlined_call_operand.vmem [shape: bf16[48,32], index: 1, kind: input, shape index: {}]   ;;  %s153_s0 = inlined_call_operand.vmem [shape: f32[16,48], index: 0, kind: input, shape index: {}]   ;;  %s154_s2 = inlined_call_operand.vmem [shape: f32[16,32], index: 2, kind: output, shape index: {}]  }
   0x1   :  { %99 = vmatprep.subr.bf16.mxu0 %v114_v0  ;;  %v111_v1 = vld [vmem:[%s152_s1] sm:$0xff]   ;;  %105 = vmatprep.mubr.msk.bf16.mxu0 %vm115_vm0, %v114_v0  ;;  %v112_v2 = vld [vmem:[%s152_s1 + $0x8] sm:$0xff]   ;;  %v113_v3 = vld [vmem:[%s152_s1 + $0x10] sm:$0xff]  }
   0x2   :  { %100 = vmatpush3.bf16.msra.mxu0 %v111_v1  ;;  %v12_v4 = vld [vmem:[%s153_s0] sm:$0xff]  ;;  %v13_v5 = vld [vmem:[%s153_s0 + $0x8] sm:$0xff] }
   0x3   :  { %101 = vmatprep.subr.bf16.mxu0 %v114_v0  ;;  %v14_v6 = vpack.c.bf16 %v13_v5, %v12_v4 }
   0x6   :  { %102 = vmatpush3.bf16.msra.mxu0 %v112_v2 }
   0x7   :  { %103 = vmatprep.subr.bf16.mxu0 %v114_v0 }
   0xa   :  { %104 = vmatpush3.bf16.msra.mxu0 %v113_v3 }
   0xd   :  { %106 = vmatmul.mubr.msk.bf16.vlgmr.msra.gmra.mrb[0].mxu0 %vm39_vm1, %v14_v6 }
  0xe0   :  { %v77_v7 = vpop.f32.mrb[0].mxu0 }
  0xe1   :  { %85 = vst.msk [vmem:[%s154_s2] sm:$0xff] %vm84_vm2, %v77_v7  ;;  %v107_v8 = vpop.f32.mrb[1].mxu0 }
  0xe2   :  { %v80_v9 = vpop.f32.mrb[2].mxu0 }
  0xe3   :  { %86 = vst.msk [vmem:[%s154_s2 + $0x8] sm:$0xff] %vm84_vm2, %v80_v9  ;;  %v108_v10 = vpop.f32.mrb[3].mxu0 }

// kernel: tacotron_forward.49
= control target key start
LH: loop header
LB: loop body
LE: loop exit
PB: predicated region body
PF: predicated region fallthrough
CT: control target
= control target key end

     0   :  { %s1502_s12 = smov 0   ;;  %s1504_s13 = smov 0   ;;  %s1661_s0 = inlined_call_operand.vmem [shape: f32[2,8,2,48], index: 0, kind: input, shape index: {}]   ;;  %s1662_s1 = inlined_call_operand.vmem [shape: f32[2,16,48], index: 1, kind: input, shape index: {}]   ;;  %s1663_s2 = inlined_call_operand.vmem [shape: f32[2,1,48], index: 2, kind: input, shape index: {}]   ;;  %s1664_s3 = inlined_call_operand.vmem [shape: f32[2,8,2,16], index: 3, kind: output, shape index: {}]  }
   0x1   :  { %s1506_s14 = smov 0  }
   0x2 LB: > { %s25_s15 = sadd.s32 1, %s1469_s13  ;;  %p1225_p0 = scmp.ge.s32.totalorder %s1473_s14, 1  ;;  %s1473_s14 = sphi %s1506_s14, %s13_s14   ;;  %s1469_s13 = sphi %s1504_s13, %s1666_s13   ;;  %s1465_s12 = sphi %s1502_s12, %s1665_s12  }
   0x3   : > { %p27_p1 = scmp.ge.s32.totalorder %s25_s15, 2  ;;  %p176_p2 = scmp.lt.s32.totalorder %s1473_s14, 3 }
   0x5   : > { %s1668_s15 = smov (%p27_p1, %s25_s15), 0  ;;  %p177_p3 = pnand %p1225_p0, %p176_p2 }
   0x6   : > { %p217_p4 = scmp.lt.s32.totalorder (!%p177_p3), %s1465_s12, 1  ;;  %vm248_vm0 = vcmask (!%p177_p3), 123904   ;;  %v1475_v0 = vmov (!%p177_p3), 0.0|0.0   ;;  %vm1476_vm1 = vmmov (!%p177_p3), 0   ;;  %v1477_v1 = vmov (!%p177_p3), 0.0   ;;  %s1478_s23 = smov (!%p177_p3), 96  }
   0x7   : > { %180 = sbr.rel (%p177_p3) target bundleno = 5572 (0x15c4), region = 32  ;;  %1348 = vmatprep.subr.bf16.mxu0 (!%p177_p3), %v1475_v0  ;;  %1296 = vmatprep.mubr.msk.f32.mxu0 (!%p177_p3), %vm1476_vm1, %v1477_v1  ;;  %249 = vst.msk [vmem:[#allocation2] sm:$0x3] (!%p177_p3), %vm248_vm0, %v1477_v1  ;;  %vm261_vm2 = vcmask (!%p177_p3), 130048   ;;  %s1479_s27 = smov (!%p177_p3), 32  }
   0x8   : > { %1351 = vmatprep.subr.bf16.mxu1 (!%p177_p3), %v1475_v0  ;;  %1303 = vmatprep.mubr.msk.f32.mxu1 (!%p177_p3), %vm1476_vm1, %v1477_v1  ;;  %s1480_s28 = smov (!%p177_p3), 112   ;;  %s1481_s29 = smov (!%p177_p3), 16  }
   0xe   : > { %s1670_s12 = smov (!%p217_p4, %s1465_s12), 1  ;;  %v253_v5 = vld [vmem:[#allocation2] sm:$0x3] }
   0xf   : > { %s1528_s16 = sshll.u32 %s1670_s12, 4  ;;  %s233_s22 = scalar_lea.vmem %s1663_s2, %s1670_s12 }
  0x10   : > { %s230_s19 = scalar_lea.vmem %s1662_s1, %s1528_s16  ;;  %v1548_v6 = vld [vmem:[%s233_s22] ss:$0 sm:$0xff]  ;;  %s1556_s26 = scalar_lea.vmem %s1661_s0, %s1528_s16 }
  0x11   : > { %v250_v2 = vld [vmem:[%s230_s19] sm:$0xff]  ;;  %v251_v3 = vld [vmem:[%s230_s19 + $0x8] sm:$0xff]  ;;  %s1566_s5 = scalar_lea.vmem %s1664_s3, %s1528_s16 }
  0x12   : > { %v1534_v4 = vpack.c.bf16 %v251_v3, %v250_v2  ;;  %v254_v10 = vld [vmem:[%s1556_s26] sm:$0x3]  ;;  %v1235_v31 = vld [vmem:[%s1556_s26 + $0x2] sm:$0x3]  ;;  %v1239_v51 = vld [vmem:[%s1556_s26 + $0x4] sm:$0x3] }
  0x14   : > { %1350 = vmatpush3.bf16.msra.mxu0 %v1534_v4  ;;  %1353 = vmatpush3.bf16.msra.mxu1 %v1534_v4 }
  0x15   : > { %1354 = vmatprep.subr.bf16.mxu0 %v1475_v0  ;;  %1357 = vmatprep.subr.bf16.mxu1 %v1475_v0 }
  0x17   : > { %1297 = vmatmul.mubr.msk.f32.vlgmr.msra.gmra.mrb[0].mxu0 %vm261_vm2, %v253_v5 }
  0x18   : > { %1356 = vmatpush3.bf16.msra.mxu0 %v1534_v4  ;;  %1310 = vmatprep.mubr.msk.f32.mxu0 %vm1476_vm1, %v1477_v1 }
  0x19   : > { %1360 = vmatprep.subr.bf16.mxu0 %v1475_v0 }
  0xea   : > { %v331_v7 = vpop.f32.mrb[0].mxu0 }
  0xeb   : > { %v332_v8 = vadd.f32 %v1548_v6, %v331_v7  ;;  %v1298_v9 = vpop.f32.mrb[1].mxu0 }
  0xed   : > { %343 = vrot.lane.b32.xlu0 %v332_v8, %s1478_s23  ;;  %v335_v11 = vadd.f32 %v332_v8, %v254_v10 }
  0xef   : > { %v1234_v12 = vmul.f32 -1.442695, %v335_v11  ;;  %v1243_v11 = vld [vmem:[%s1556_s26 + $0x6] sm:$0x3] }
  0xf1   : > { %1403 = vpow2.f32 %v1234_v12 }
  0xfb   : > { %v1404_v13 = vpop.eup %1403 }
  0xfc   : > { %v339_v14 = vadd.f32 1.0, %v1404_v13 }
  0xfe   : > { %1405 = vrcp.f32 %v339_v14 }
 0x108   : > { %v1406_v15 = vpop.eup %1405 }
 0x109   : > { %v353_v22 = vsub.f32 1.0, %v1406_v15 }
 0x15f   : > { %v344_v16 = vpop.permute.xlu0 %343 }
 0x160   : > { %v346_v17 = vmul.f32 %v1406_v15, %v344_v16 }
 0x162   : > { %348 = vrot.lane.b32.xlu0 %v346_v17, %s1479_s27 }
 0x1d4   : > { %v349_v18 = vpop.permute.xlu0 %348 }
 0x1d5   : > { %v351_v19 = vadd.f32 %v349_v18, %v254_v10 }
 0x1d7   : > { %1407 = vtanh.f32 %v351_v19 }
 0x1e1   : > { %v1408_v20 = vpop.eup %1407 }
 0x1e2   : > { %355 = vrot.lane.b32.xlu1 %v1408_v20, %s1480_s28 }
 0x1e6   : > { %359 = vrot.lane.b32.xlu1 %v253_v5, %s1481_s29 }
 0x254   : > { %v356_v21 = vpop.permute.xlu1 %355 }
 0x255   : > { %v358_v24 = vmul.f32 %v356_v21, %v353_v22 }
 0x258   : > { %v360_v23 = vpop.permute.xlu1 %359 }
 0x259   : > { %v362_v25 = vmul.f32 %v1406_v15, %v360_v23 }
 0x25b   : > { %v363_v26 = vadd.f32 %v362_v25, %v358_v24 }
 0x25d   : > { %365 = vrot.lane.b32.xlu0 %v363_v26, %s1480_s28 }
 0x2cf   : > { %v366_v27 = vpop.permute.xlu0 %365 }
 0x2d0   : > { %369 = vst.msk [vmem:[%s1566_s5] sm:$0x3] %vm248_vm0, %v366_v27  ;;  %1304 = vmatmul.mubr.msk.f32.vlgmr.msra.gmra.mrb[0].mxu1 %vm261_vm2, %v366_v27 }
 0x2d1   : > { %1359 = vmatpush3.bf16.msra.mxu1 %v1534_v4  ;;  %1317 = vmatprep.mubr.msk.f32.mxu1 %vm1476_vm1, %v1477_v1 }
 0x2d2   : > { %1363 = vmatprep.subr.bf16.mxu1 %v1475_v0 }
 0x3a3   : > { %v440_v28 = vpop.f32.mrb[0].mxu1 }
 0x3a4   : > { %v441_v29 = vadd.f32 %v1548_v6, %v440_v28  ;;  %v1305_v30 = vpop.f32.mrb[1].mxu1 }
 0x3a5   : > { %v1247_v30 = vld [vmem:[%s1556_s26 + $0x8] sm:$0x3] }
 0x3a6   : > { %452 = vrot.lane.b32.xlu1 %v441_v29, %s1478_s23  ;;  %v444_v32 = vadd.f32 %v1235_v31, %v441_v29 }
 0x3a8   : > { %v1237_v33 = vmul.f32 -1.442695, %v444_v32 }
 0x3aa   : > { %1409 = vpow2.f32 %v1237_v33 }
 0x3b4   : > { %v1410_v34 = vpop.eup %1409 }
 0x3b5   : > { %v448_v35 = vadd.f32 1.0, %v1410_v34 }
 0x3b7   : > { %1411 = vrcp.f32 %v448_v35 }
 0x3c1   : > { %v1412_v36 = vpop.eup %1411 }
 0x3c2   : > { %v462_v42 = vsub.f32 1.0, %v1412_v36  ;;  %v468_v44 = vmul.f32 %v1412_v36, %v363_v26 }
 0x418   : > { %v453_v37 = vpop.permute.xlu1 %452 }
 0x419   : > { %v455_v38 = vmul.f32 %v1412_v36, %v453_v37 }
 0x41b   : > { %457 = vrot.lane.b32.xlu0 %v455_v38, %s1479_s27 }
 0x48d   : > { %v458_v39 = vpop.permute.xlu0 %457 }
 0x48e   : > { %v460_v40 = vadd.f32 %v1235_v31, %v458_v39 }
 0x490   : > { %1413 = vtanh.f32 %v460_v40 }
 0x49a   : > { %v1414_v41 = vpop.eup %1413 }
 0x49b   : > { %464 = vrot.lane.b32.xlu1 %v1414_v41, %s1480_s28 }
 0x50d   : > { %v465_v43 = vpop.permute.xlu1 %464 }
 0x50e   : > { %v467_v45 = vmul.f32 %v465_v43, %v462_v42 }
 0x510   : > { %v469_v46 = vadd.f32 %v468_v44, %v467_v45 }
 0x512   : > { %471 = vrot.lane.b32.xlu0 %v469_v46, %s1480_s28 }
 0x584   : > { %v472_v47 = vpop.permute.xlu0 %471 }
 0x585   : > { %1238 = vst.msk [vmem:[%s1566_s5 + $0x2] sm:$0x3] %vm248_vm0, %v472_v47  ;;  %1311 = vmatmul.mubr.msk.f32.vlgmr.msra.gmra.mrb[2].mxu0 %vm261_vm2, %v472_v47 }
 0x586   : > { %1362 = vmatpush3.bf16.msra.mxu0 %v1534_v4  ;;  %1324 = vmatprep.mubr.msk.f32.mxu0 %vm1476_vm1, %v1477_v1 }
 0x587   : > { %1366 = vmatprep.subr.bf16.mxu0 %v1475_v0 }
 0x658   : > { %v546_v48 = vpop.f32.mrb[2].mxu0 }
 0x659   : > { %v547_v49 = vadd.f32 %v1548_v6, %v546_v48  ;;  %v1312_v50 = vpop.f32.mrb[3].mxu0 }
 0x65a   : > { %v1251_v50 = vld [vmem:[%s1556_s26 + $0xa] sm:$0x3] }
 0x65b   : > { %558 = vrot.lane.b32.xlu1 %v547_v49, %s1478_s23  ;;  %v550_v52 = vadd.f32 %v1239_v51, %v547_v49 }
 0x65d   : > { %v1241_v53 = vmul.f32 -1.442695, %v550_v52 }
 0x65f   : > { %1415 = vpow2.f32 %v1241_v53 }
 0x669   : > { %v1416_v54 = vpop.eup %1415 }
 0x66a   : > { %v554_v55 = vadd.f32 1.0, %v1416_v54 }
 0x66c   : > { %1417 = vrcp.f32 %v554_v55 }
 0x676   : > { %v1418_v56 = vpop.eup %1417 }
 0x677   : > { %v568_v62 = vsub.f32 1.0, %v1418_v56  ;;  %v574_v2 = vmul.f32 %v1418_v56, %v469_v46 }
 0x6cd   : > { %v559_v57 = vpop.permute.xlu1 %558 }
 0x6ce   : > { %v561_v58 = vmul.f32 %v1418_v56, %v559_v57 }
 0x6d0   : > { %563 = vrot.lane.b32.xlu0 %v561_v58, %s1479_s27 }
 0x742   : > { %v564_v59 = vpop.permute.xlu0 %563 }
 0x743   : > { %v566_v60 = vadd.f32 %v1239_v51, %v564_v59 }
 0x745   : > { %1419 = vtanh.f32 %v566_v60 }
 0x74f   : > { %v1420_v61 = vpop.eup %1419 }
 0x750   : > { %570 = vrot.lane.b32.xlu1 %v1420_v61, %s1480_s28 }
 0x7c2   : > { %v571_v63 = vpop.permute.xlu1 %570 }
 0x7c3   : > { %v573_v3 = vmul.f32 %v571_v63, %v568_v62 }
 0x7c5   : > { %v575_v5 = vadd.f32 %v574_v2, %v573_v3 }
 0x7c7   : > { %577 = vrot.lane.b32.xlu0 %v575_v5, %s1480_s28 }
 0x839   : > { %v578_v7 = vpop.permute.xlu0 %577 }
 0x83a   : > { %1242 = vst.msk [vmem:[%s1566_s5 + $0x4] sm:$0x3] %vm248_vm0, %v578_v7  ;;  %1318 = vmatmul.mubr.msk.f32.vlgmr.msra.gmra.mrb[2].mxu1 %vm261_vm2, %v578_v7 }
 0x83b   : > { %1365 = vmatpush3.bf16.msra.mxu1 %v1534_v4  ;;  %1331 = vmatprep.mubr.msk.f32.mxu1 %vm1476_vm1, %v1477_v1 }
 0x83c   : > { %1369 = vmatprep.subr.bf16.mxu1 %v1475_v0 }
 0x90d   : > { %v652_v8 = vpop.f32.mrb[2].mxu1 }
 0x90e   : > { %v653_v9 = vadd.f32 %v1548_v6, %v652_v8  ;;  %v1319_v10 = vpop.f32.mrb[3].mxu1  ;;  %v1255_v8 = vld [vmem:[%s1556_s26 + $0xc] sm:$0x3] }
 0x910   : > { %664 = vrot.lane.b32.xlu1 %v653_v9, %s1478_s23  ;;  %v656_v12 = vadd.f32 %v1243_v11, %v653_v9 }
 0x912   : > { %v1245_v13 = vmul.f32 -1.442695, %v656_v12 }
 0x914   : > { %1421 = vpow2.f32 %v1245_v13 }
 0x91e   : > { %v1422_v14 = vpop.eup %1421 }
 0x91f   : > { %v660_v15 = vadd.f32 1.0, %v1422_v14 }
 0x921   : > { %1423 = vrcp.f32 %v660_v15 }
 0x92b   : > { %v1424_v16 = vpop.eup %1423 }
 0x92c   : > { %v674_v21 = vsub.f32 1.0, %v1424_v16  ;;  %v680_v23 = vmul.f32 %v1424_v16, %v575_v5 }
 0x982   : > { %v665_v17 = vpop.permute.xlu1 %664 }
 0x983   : > { %v667_v18 = vmul.f32 %v1424_v16, %v665_v17 }
 0x985   : > { %669 = vrot.lane.b32.xlu0 %v667_v18, %s1479_s27 }
 0x9f7   : > { %v670_v0 = vpop.permute.xlu0 %669 }
 0x9f8   : > { %v672_v19 = vadd.f32 %v1243_v11, %v670_v0 }
 0x9fa   : > { %1425 = vtanh.f32 %v672_v19 }
 0xa04   : > { %v1426_v20 = vpop.eup %1425 }
 0xa05   : > { %676 = vrot.lane.b32.xlu1 %v1426_v20, %s1480_s28 }
 0xa77   : > { %v677_v22 = vpop.permute.xlu1 %676 }
 0xa78   : > { %v679_v24 = vmul.f32 %v677_v22, %v674_v21 }
 0xa7a   : > { %v681_v25 = vadd.f32 %v680_v23, %v679_v24 }
 0xa7c   : > { %683 = vrot.lane.b32.xlu0 %v681_v25, %s1480_s28 }
 0xaee   : > { %v684_v26 = vpop.permute.xlu0 %683 }
 0xaef   : > { %1246 = vst.msk [vmem:[%s1566_s5 + $0x6] sm:$0x3] %vm248_vm0, %v684_v26  ;;  %1325 = vmatmul.mubr.msk.f32.vlgmr.msra.gmra.mrb[4].mxu0 %vm261_vm2, %v684_v26 }
 0xaf0   : > { %1368 = vmatpush3.bf16.msra.mxu0 %v1534_v4  ;;  %1338 = vmatprep.mubr.msk.f32.mxu0 %vm1476_vm1, %v1477_v1 }
 0xbc2   : > { %v758_v27 = vpop.f32.mrb[4].mxu0 }
 0xbc3   : > { %v759_v28 = vadd.f32 %v1548_v6, %v758_v27  ;;  %v1326_v29 = vpop.f32.mrb[5].mxu0  ;;  %v1259_v27 = vld [vmem:[%s1556_s26 + $0xe] sm:$0x3] }
 0xbc5   : > { %770 = vrot.lane.b32.xlu1 %v759_v28, %s1478_s23  ;;  %v762_v31 = vadd.f32 %v1247_v30, %v759_v28 }
 0xbc7   : > { %v1249_v32 = vmul.f32 -1.442695, %v762_v31 }
 0xbc9   : > { %1427 = vpow2.f32 %v1249_v32 }
 0xbd3   : > { %v1428_v33 = vpop.eup %1427 }
 0xbd4   : > { %v766_v34 = vadd.f32 1.0, %v1428_v33 }
 0xbd6   : > { %1429 = vrcp.f32 %v766_v34 }
 0xbe0   : > { %v1430_v35 = vpop.eup %1429 }
 0xbe1   : > { %v780_v41 = vsub.f32 1.0, %v1430_v35  ;;  %v786_v43 = vmul.f32 %v1430_v35, %v681_v25 }
 0xc37   : > { %v771_v36 = vpop.permute.xlu1 %770 }
 0xc38   : > { %v773_v37 = vmul.f32 %v1430_v35, %v771_v36 }
 0xc3a   : > { %775 = vrot.lane.b32.xlu0 %v773_v37, %s1479_s27 }
 0xcac   : > { %v776_v38 = vpop.permute.xlu0 %775 }
 0xcad   : > { %v778_v39 = vadd.f32 %v1247_v30, %v776_v38 }
 0xcaf   : > { %1431 = vtanh.f32 %v778_v39 }
 0xcb9   : > { %v1432_v40 = vpop.eup %1431 }
 0xcba   : > { %782 = vrot.lane.b32.xlu1 %v1432_v40, %s1480_s28 }
 0xd2c   : > { %v783_v42 = vpop.permute.xlu1 %782 }
 0xd2d   : > { %v785_v44 = vmul.f32 %v783_v42, %v780_v41 }
 0xd2f   : > { %v787_v45 = vadd.f32 %v786_v43, %v785_v44 }
 0xd31   : > { %789 = vrot.lane.b32.xlu0 %v787_v45, %s1480_s28 }
 0xda3   : > { %v790_v46 = vpop.permute.xlu0 %789 }
 0xda4   : > { %1250 = vst.msk [vmem:[%s1566_s5 + $0x8] sm:$0x3] %vm248_vm0, %v790_v46  ;;  %1332 = vmatmul.mubr.msk.f32.vlgmr.msra.gmra.mrb[4].mxu1 %vm261_vm2, %v790_v46 }
 0xda5   : > { %1371 = vmatpush3.bf16.msra.mxu1 %v1534_v4  ;;  %1345 = vmatprep.mubr.msk.f32.mxu1 %vm1476_vm1, %v1477_v1 }
 0xe77   : > { %v864_v47 = vpop.f32.mrb[4].mxu1 }
 0xe78   : > { %v865_v48 = vadd.f32 %v1548_v6, %v864_v47  ;;  %v1333_v49 = vpop.f32.mrb[5].mxu1 }
 0xe7a   : > { %876 = vrot.lane.b32.xlu1 %v865_v48, %s1478_s23  ;;  %v868_v51 = vadd.f32 %v1251_v50, %v865_v48 }
 0xe7c   : > { %v1253_v52 = vmul.f32 -1.442695, %v868_v51 }
 0xe7e   : > { %1433 = vpow2.f32 %v1253_v52 }
 0xe88   : > { %v1434_v53 = vpop.eup %1433 }
 0xe89   : > { %v872_v54 = vadd.f32 1.0, %v1434_v53 }
 0xe8b   : > { %1435 = vrcp.f32 %v872_v54 }
 0xe95   : > { %v1436_v55 = vpop.eup %1435 }
 0xe96   : > { %v886_v59 = vsub.f32 1.0, %v1436_v55  ;;  %v892_v61 = vmul.f32 %v1436_v55, %v787_v45 }
 0xeec   : > { %v877_v56 = vpop.permute.xlu1 %876 }
 0xeed   : > { %v879_v4 = vmul.f32 %v1436_v55, %v877_v56 }
 0xeef   : > { %881 = vrot.lane.b32.xlu0 %v879_v4, %s1479_s27 }
 0xf61   : > { %v882_v1 = vpop.permute.xlu0 %881 }
 0xf62   : > { %v884_v57 = vadd.f32 %v1251_v50, %v882_v1 }
 0xf64   : > { %1437 = vtanh.f32 %v884_v57 }
 0xf6e   : > { %v1438_v58 = vpop.eup %1437 }
 0xf6f   : > { %888 = vrot.lane.b32.xlu1 %v1438_v58, %s1480_s28 }
 0xfe1   : > { %v889_v60 = vpop.permute.xlu1 %888 }
 0xfe2   : > { %v891_v62 = vmul.f32 %v889_v60, %v886_v59 }
 0xfe4   : > { %v893_v63 = vadd.f32 %v892_v61, %v891_v62 }
 0xfe6   : > { %895 = vrot.lane.b32.xlu0 %v893_v63, %s1480_s28 }
0x1058   : > { %v896_v2 = vpop.permute.xlu0 %895 }
0x1059   : > { %1254 = vst.msk [vmem:[%s1566_s5 + $0xa] sm:$0x3] %vm248_vm0, %v896_v2  ;;  %1339 = vmatmul.mubr.msk.f32.vlgmr.msra.gmra.mrb[6].mxu0 %vm261_vm2, %v896_v2 }
0x112c   : > { %v970_v3 = vpop.f32.mrb[6].mxu0 }
0x112d   : > { %v971_v5 = vadd.f32 %v1548_v6, %v970_v3  ;;  %v1340_v7 = vpop.f32.mrb[7].mxu0 }
0x112f   : > { %982 = vrot.lane.b32.xlu1 %v971_v5, %s1478_s23  ;;  %v974_v9 = vadd.f32 %v1255_v8, %v971_v5 }
0x1131   : > { %v1257_v10 = vmul.f32 -1.442695, %v974_v9 }
0x1133   : > { %1439 = vpow2.f32 %v1257_v10 }
0x113d   : > { %v1440_v11 = vpop.eup %1439 }
0x113e   : > { %v978_v12 = vadd.f32 1.0, %v1440_v11 }
0x1140   : > { %1441 = vrcp.f32 %v978_v12 }
0x114a   : > { %v1442_v13 = vpop.eup %1441 }
0x114b   : > { %v992_v0 = vsub.f32 1.0, %v1442_v13  ;;  %v998_v20 = vmul.f32 %v1442_v13, %v893_v63 }
0x11a1   : > { %v983_v14 = vpop.permute.xlu1 %982 }
0x11a2   : > { %v985_v15 = vmul.f32 %v1442_v13, %v983_v14 }
0x11a4   : > { %987 = vrot.lane.b32.xlu0 %v985_v15, %s1479_s27 }
0x1216   : > { %v988_v16 = vpop.permute.xlu0 %987 }
0x1217   : > { %v990_v17 = vadd.f32 %v1255_v8, %v988_v16 }
0x1219   : > { %1443 = vtanh.f32 %v990_v17 }
0x1223   : > { %v1444_v18 = vpop.eup %1443 }
0x1224   : > { %994 = vrot.lane.b32.xlu1 %v1444_v18, %s1480_s28 }
0x1296   : > { %v995_v19 = vpop.permute.xlu1 %994 }
0x1297   : > { %v997_v21 = vmul.f32 %v995_v19, %v992_v0 }
0x1299   : > { %v999_v22 = vadd.f32 %v998_v20, %v997_v21 }
0x129b   : > { %1001 = vrot.lane.b32.xlu0 %v999_v22, %s1480_s28 }
0x130d   : > { %v1002_v23 = vpop.permute.xlu0 %1001 }
0x130e   : > { %1258 = vst.msk [vmem:[%s1566_s5 + $0xc] sm:$0x3] %vm248_vm0, %v1002_v23  ;;  %1346 = vmatmul.mubr.msk.f32.vlgmr.msra.gmra.mrb[6].mxu1 %vm261_vm2, %v1002_v23 }
0x13e1   : > { %v1076_v24 = vpop.f32.mrb[6].mxu1 }
0x13e2   : > { %v1077_v25 = vadd.f32 %v1548_v6, %v1076_v24  ;;  %v1347_v26 = vpop.f32.mrb[7].mxu1 }
0x13e4   : > { %1088 = vrot.lane.b32.xlu1 %v1077_v25, %s1478_s23  ;;  %v1080_v28 = vadd.f32 %v1259_v27, %v1077_v25 }
0x13e6   : > { %v1261_v29 = vmul.f32 -1.442695, %v1080_v28 }
0x13e8   : > { %1445 = vpow2.f32 %v1261_v29 }
0x13f2   : > { %v1446_v30 = vpop.eup %1445 }
0x13f3   : > { %v1084_v31 = vadd.f32 1.0, %v1446_v30 }
0x13f5   : > { %1447 = vrcp.f32 %v1084_v31 }
0x13ff   : > { %v1448_v32 = vpop.eup %1447 }
0x1400   : > { %v1098_v37 = vsub.f32 1.0, %v1448_v32  ;;  %v1104_v39 = vmul.f32 %v1448_v32, %v999_v22 }
0x1456   : > { %v1089_v33 = vpop.permute.xlu1 %1088 }
0x1457   : > { %v1091_v34 = vmul.f32 %v1448_v32, %v1089_v33 }
0x1459   : > { %1093 = vrot.lane.b32.xlu0 %v1091_v34, %s1479_s27 }
0x14cb   : > { %v1094_v35 = vpop.permute.xlu0 %1093 }
0x14cc   : > { %v1096_v36 = vadd.f32 %v1259_v27, %v1094_v35 }
0x14ce   : > { %1449 = vtanh.f32 %v1096_v36 }
0x14d8   : > { %v1450_v6 = vpop.eup %1449 }
0x14d9   : > { %1100 = vrot.lane.b32.xlu1 %v1450_v6, %s1480_s28 }
0x154b   : > { %v1101_v38 = vpop.permute.xlu1 %1100 }
0x154c   : > { %v1103_v40 = vmul.f32 %v1101_v38, %v1098_v37 }
0x154e   : > { %v1105_v41 = vadd.f32 %v1104_v39, %v1103_v40 }
0x1550   : > { %1107 = vrot.lane.b32.xlu0 %v1105_v41, %s1480_s28 }
0x15c2   : > { %v1108_v42 = vpop.permute.xlu0 %1107 }
0x15c3   : > { %1262 = vst.msk [vmem:[%s1566_s5 + $0xe] sm:$0x3] %vm248_vm0, %v1108_v42  ;;  %1112 = vst.msk [vmem:[#allocation2] sm:$0x3] %vm248_vm0, %v1108_v42 }
0x15c4 PF: > { %s13_s14 = sadd.s32 1, %s1473_s14   ;;  %s1665_s12 = smov %s1469_s13 }
0x15c5   : > { %p10_p5 = scmp.ge.s32.totalorder %s13_s14, 4   ;;  %s1666_s13 = smov %s1668_s15 }
0x15c7   :  { %12 = sbr.rel (!%p10_p5) target bundleno = 2 (0x2), region = 86 }

// kernel: tacotron_forward.52
= control target key start
LH: loop header
LB: loop body
LE: loop exit
PB: predicated region body
PF: predicated region fallthrough
CT: control target
= control target key end

     0   :  { %s467_s18 = smov 0   ;;  %s502_s0 = inlined_call_operand.vmem [shape: f32[2,8,16], index: 0, kind: input, shape index: {}]   ;;  %s503_s1 = inlined_call_operand.vmem [shape: bf16[1,16,32], index: 1, kind: input, shape index: {}]   ;;  %s504_s2 = inlined_call_operand.vmem [shape: f32[1,32], index: 2, kind: input, shape index: {}]   ;;  %s505_s3 = inlined_call_operand.vmem [shape: f32[1,32], index: 3, kind: input, shape index: {}]   ;;  %s506_s4 = inlined_call_operand.vmem [shape: f32[2,8,32], index: 4, kind: output, shape index: {0}]   ;;  %s507_s5 = inlined_call_operand.vmem [shape: f32[2,32], index: 5, kind: output, shape index: {1}]  }
   0x1 LB: > { %s473_s19 = sadd.s32 4294967295, %s432_s18   ;;  %p395_p0 = scmp.ge.s32.totalorder %s432_s18, 1  ;;  %s432_s18 = sphi %s467_s18, %s16_s18  }
   0x2   : > { %p184_p1 = scmp.lt.s32.totalorder %s432_s18, 3 }
   0x4   : > { %p185_p2 = pnand %p395_p0, %p184_p1 }
   0x5   : > { %p210_p3 = scmp.lt.s32.totalorder (!%p185_p2), %s473_s19, 1  ;;  %p398_p4 = scmp.ne.s32.totalorder (!%p185_p2), %s473_s19, 0 }
   0x6   : > { %188 = sbr.rel (%p185_p2) target bundleno = 292 (0x124), region = 36 }
   0xd   : > { %s211_s20 = scalar_select %p210_p3, %s473_s19, 1 }
   0xe   : > { %222 = sbr.rel (%p398_p4) target bundleno = 21 (0x15), region = 40  ;;  %vm223_vm0 = vcmask (!%p398_p4), 253952   ;;  %v434_v0 = vmov (!%p398_p4), 0.0  }
   0xf   : > { %s396_s21 = sshll.u32 %s211_s20, 3  ;;  %224 = vst.msk [vmem:[#allocation2] sm:$0x1] (!%p398_p4), %vm223_vm0, %v434_v0  ;;  %225 = vst.msk [vmem:[#allocation3] sm:$0x1] (!%p398_p4), %vm223_vm0, %v434_v0 }
  0x10   : > { %s213_s24 = scalar_lea.vmem %s502_s0, %s396_s21  ;;  %s217_s27 = scalar_lea.vmem %s506_s4, %s396_s21 }
  0x15 PF: > { %v423_v1 = vld [vmem:[%s503_s1] sm:$0xff]   ;;  %v435_v2 = vmov 0.0   ;;  %vm436_vm1 = vmmov 0   ;;  %vm236_vm2 = vcmask 130048   ;;  %vm281_vm3 = vcmask 261120   ;;  %p401_p5 = scmp.ne.s32.totalorder %s473_s19, 1 }
  0x16   : > { %406 = vmatprep.subr.bf16.mxu0 %v435_v2  ;;  %v226_v3 = vld [vmem:[%s213_s24] sm:$0xff]  ;;  %408 = vmatprep.mubr.msk.bf16.mxu0 %vm436_vm1, %v435_v2  ;;  %vm292_vm4 = vcmask 253952   ;;  %v323_v36 = vlaneseq (!%p401_p5)  ;;  %vm328_vm5 = vcmask (!%p401_p5), 1040384   ;;  %vm330_vm6 = vcmask (!%p401_p5), 254976  }
  0x17   : > { %407 = vmatpush3.bf16.msra.mxu0 %v423_v1  ;;  %v227_v4 = vpack.c.bf16 %v226_v3, %v226_v3  ;;  %v283_v22 = vld [vmem:[#allocation2] sm:$0x1]  ;;  %v294_v25 = vld [vmem:[#allocation3] sm:$0x1] }
  0x18   : > { %v315_v37 = vld [vmem:[%s504_s2] sm:$0x1] (!%p401_p5)  ;;  %v324_v38 = vshrl.u32 (!%p401_p5), %v323_v36, 7 }
  0x19   : > { %v319_v41 = vld [vmem:[%s505_s3] sm:$0x1] (!%p401_p5) }
  0x1a   : > { %409 = vmatmul.mubr.msk.bf16.vlgmr.msra.gmra.mrb[0].mxu0 %vm236_vm2, %v227_v4  ;;  %v325_v43 = vsub.s32 (!%p401_p5), 0, %v324_v38 }
  0xed   : > { %v274_v5 = vpop.f32.mrb[0].mxu0 }
  0xee   : > { %v280_v6 = vmax.f32 %v274_v5, 0.0  ;;  %v410_v7 = vpop.f32.mrb[1].mxu0 }
  0xef   : > { %v277_v8 = vpop.f32.mrb[2].mxu0 }
  0xf0   : > { %282 = vst.msk [vmem:[%s217_s27] sm:$0xff] %vm281_vm3, %v280_v6  ;;  %v284_v9 = vsel %vm281_vm3, %v280_v6, 0.0  ;;  %v295_v10 = vmul.f32 %v280_v6, %v280_v6  ;;  %v411_v11 = vpop.f32.mrb[3].mxu0 }
  0xf1   : > { %v285_v12 = vrot.slane %v284_v9, 4 }
  0xf2   : > { %v296_v13 = vsel %vm281_vm3, %v295_v10, 0.0 }
  0xf3   : > { %v286_v14 = vadd.f32 %v285_v12, %v284_v9  ;;  %v297_v15 = vrot.slane %v296_v13, 4 }
  0xf5   : > { %v287_v16 = vrot.slane %v286_v14, 2  ;;  %v298_v17 = vadd.f32 %v297_v15, %v296_v13 }
  0xf7   : > { %v288_v18 = vadd.f32 %v287_v16, %v286_v14  ;;  %v299_v19 = vrot.slane %v298_v17, 2 }
  0xf9   : > { %v289_v20 = vrot.slane %v288_v18, 1  ;;  %v300_v21 = vadd.f32 %v299_v19, %v298_v17 }
  0xfb   : > { %v290_v23 = vadd.f32 %v289_v20, %v288_v18  ;;  %v301_v24 = vrot.slane %v300_v21, 1  ;;  %308 = sbr.rel (%p401_p5) target bundleno = 292 (0x124), region = 44 }
  0xfd   : > { %v291_v26 = vadd.f32 %v290_v23, %v283_v22  ;;  %v302_v27 = vadd.f32 %v301_v24, %v300_v21 }
  0xff   : > { %293 = vst.msk [vmem:[#allocation2] sm:$0x1] %vm292_vm4, %v291_v26  ;;  %v303_v28 = vadd.f32 %v302_v27, %v294_v25 }
 0x101   : > { %304 = vst.msk [vmem:[#allocation3] sm:$0x1] %vm292_vm4, %v303_v28 }
 0x106   : > { %v309_v29 = vld [vmem:[#allocation2] sm:$0x1] }
 0x107   : > { %v310_v31 = vmul.f32 0.0625, %v309_v29 }
 0x108   : > { %v311_v30 = vld [vmem:[#allocation3] sm:$0x1] }
 0x109   : > { %v312_v32 = vmul.f32 0.0625, %v311_v30  ;;  %v313_v33 = vmul.f32 %v310_v31, %v310_v31 }
 0x10b   : > { %v314_v34 = vsub.f32 %v312_v32, %v313_v33 }
 0x10d   : > { %v316_v35 = vadd.f32 1e-05, %v314_v34 }
 0x10f   : > { %424 = vrsqrt.f32 %v316_v35 }
 0x119   : > { %v425_v39 = vpop.eup %424 }
 0x11a   : > { %v318_v40 = vmul.f32 %v425_v39, %v315_v37 }
 0x11c   : > { %v320_v42 = vmul.f32 %v318_v40, %v310_v31 }
 0x11e   : > { %v321_v44 = vsub.f32 %v319_v41, %v320_v42 }
 0x120   : > { %v326_v45 = vrot.slane %v321_v44, %v325_v43 }
 0x122   : > { %v329_v46 = vsel %vm328_vm5, %v318_v40, %v326_v45 }
 0x123   : > { %331 = vst.msk [vmem:[%s507_s5] sm:$0x3] %vm330_vm6, %v329_v46 }
 0x124 PF: > { %s16_s18 = sadd.s32 1, %s432_s18  }
 0x125   : > { %p13_p6 = scmp.ge.s32.totalorder %s16_s18, 4  }
 0x127   :  { %15 = sbr.rel (!%p13_p6) target bundleno = 1 (0x1), region = 82 }

// kernel: tacotron_forward.54
= control target key start
LH: loop header
LB: loop body
LE: loop exit
PB: predicated region body
PF: predicated region fallthrough
CT: control target
= control target key end

     0   :  { %s554_s18 = smov 0   ;;  %s599_s0 = inlined_call_operand.vmem [shape: f32[2,10,16], index: 0, kind: input, shape index: {}]   ;;  %s600_s1 = inlined_call_operand.vmem [shape: bf16[2,16,32], index: 1, kind: input, shape index: {}]   ;;  %s601_s2 = inlined_call_operand.vmem [shape: f32[1,32], index: 2, kind: input, shape index: {}]   ;;  %s602_s3 = inlined_call_operand.vmem [shape: f32[1,32], index: 3, kind: input, shape index: {}]   ;;  %s603_s4 = inlined_call_operand.vmem [shape: f32[2,8,32], index: 4, kind: output, shape index: {0}]   ;;  %s604_s5 = inlined_call_operand.vmem [shape: f32[2,32], index: 5, kind: output, shape index: {1}]  }
   0x1 LB: > { %s560_s19 = sadd.s32 4294967295, %s519_s18   ;;  %p465_p0 = scmp.ge.s32.totalorder %s519_s18, 1  ;;  %s519_s18 = sphi %s554_s18, %s16_s18  }
   0x2   : > { %p185_p1 = scmp.lt.s32.totalorder %s519_s18, 3 }
   0x4   : > { %p186_p2 = pnand %p465_p0, %p185_p1 }
   0x5   : > { %p212_p3 = scmp.lt.s32.totalorder (!%p186_p2), %s560_s19, 1  ;;  %p469_p4 = scmp.ne.s32.totalorder (!%p186_p2), %s560_s19, 0 }
   0x6   : > { %189 = sbr.rel (%p186_p2) target bundleno = 303 (0x12f), region = 36 }
   0xd   : > { %s213_s20 = scalar_select %p212_p3, %s560_s19, 1 }
   0xe   : > { %225 = sbr.rel (%p469_p4) target bundleno = 21 (0x15), region = 40  ;;  %vm226_vm0 = vcmask (!%p469_p4), 253952   ;;  %v521_v0 = vmov (!%p469_p4), 0.0  }
   0xf   : > { %s479_s21 = sshll.u32 %s213_s20, 4  ;;  %s468_s22 = sshll.u32 %s213_s20, 3  ;;  %227 = vst.msk [vmem:[#allocation2] sm:$0x1] (!%p469_p4), %vm226_vm0, %v521_v0  ;;  %228 = vst.msk [vmem:[#allocation3] sm:$0x1] (!%p469_p4), %vm226_vm0, %v521_v0 }
  0x10   : > { %s216_s25 = scalar_lea.vmem %s599_s0, %s479_s21  ;;  %s572_s28 = scalar_lea.vmem %s603_s4, %s468_s22 }
  0x15 PF: > { %v509_v1 = vld [vmem:[%s600_s1] sm:$0xff]   ;;  %v522_v2 = vmov 0.0   ;;  %v510_v3 = vld [vmem:[%s600_s1 + $0x8] sm:$0xff]   ;;  %vm523_vm1 = vmmov 0   ;;  %vm250_vm2 = vcmask 130048   ;;  %vm346_vm3 = vcmask 261120  }
  0x16   : > { %490 = vmatprep.subr.bf16.mxu0 %v522_v2  ;;  %484 = vmatprep.subr.bf16.mxu1 %v522_v2  ;;  %v229_v4 = vld [vmem:[%s216_s25] sm:$0xff]  ;;  %v230_v5 = vld [vmem:[%s216_s25 + $0x8] sm:$0x3]  ;;  %vm350_vm4 = vcmask 253952   ;;  %p476_p5 = scmp.ne.s32.totalorder %s560_s19, 1 }
  0x17   : > { %491 = vmatpush3.bf16.msra.mxu0 %v509_v1  ;;  %492 = vmatprep.mubr.msk.bf16.mxu0 %vm523_vm1, %v522_v2  ;;  %v231_v6 = vpack.c.bf16 %v230_v5, %v229_v4  ;;  %v348_v40 = vld [vmem:[#allocation2] sm:$0x1]  ;;  %v361_v43 = vld [vmem:[#allocation3] sm:$0x1]  ;;  %v393_v54 = vlaneseq (!%p476_p5)  ;;  %vm398_vm5 = vcmask (!%p476_p5), 1040384   ;;  %vm400_vm6 = vcmask (!%p476_p5), 254976  }
  0x18   : > { %485 = vmatpush3.bf16.msra.mxu1 %v510_v3  ;;  %486 = vmatprep.mubr.msk.bf16.mxu1 %vm523_vm1, %v522_v2  ;;  %v385_v55 = vld [vmem:[%s601_s2] sm:$0x1] (!%p476_p5) }
  0x19   : > { %v238_v7 = vshrl.u32 %v231_v6, 16  ;;  %v240_v8 = vshll.u32 %v231_v6, 16  ;;  %v394_v56 = vshrl.u32 (!%p476_p5), %v393_v54, 7  ;;  %v389_v59 = vld [vmem:[%s602_s3] sm:$0x1] (!%p476_p5) }
  0x1a   : > { %493 = vmatmul.mubr.msk.bf16.vlgmr.msra.gmra.mrb[0].mxu0 %vm250_vm2, %v231_v6 }
  0x1b   : > { %v242_v9 = vrot.slane %v240_v8, 1  ;;  %v395_v61 = vsub.s32 (!%p476_p5), 0, %v394_v56 }
  0x1d   : > { %v243_v10 = vor.u32 %v242_v9, %v238_v7 }
  0x1f   : > { %487 = vmatmul.mubr.msk.bf16.vlgmr.msra.gmra.mrb[0].mxu1 %vm250_vm2, %v243_v10 }
  0xed   : > { %v337_v11 = vpop.f32.mrb[0].mxu0 }
  0xee   : > { %v494_v12 = vpop.f32.mrb[1].mxu0 }
  0xef   : > { %v340_v13 = vpop.f32.mrb[2].mxu0 }
  0xf0   : > { %v495_v14 = vpop.f32.mrb[3].mxu0 }
  0xf2   : > { %v288_v15 = vpop.f32.mrb[0].mxu1 }
  0xf3   : > { %v338_v16 = vadd.f32 %v337_v11, %v288_v15  ;;  %v488_v17 = vpop.f32.mrb[1].mxu1 }
  0xf4   : > { %v291_v18 = vpop.f32.mrb[2].mxu1 }
  0xf5   : > { %v344_v19 = vmax.f32 %v338_v16, 0.0  ;;  %v341_v20 = vadd.f32 %v340_v13, %v291_v18  ;;  %v489_v21 = vpop.f32.mrb[3].mxu1 }
  0xf7   : > { %347 = vst.msk [vmem:[%s572_s28] sm:$0xff] %vm346_vm3, %v344_v19  ;;  %v362_v22 = vmul.f32 %v344_v19, %v344_v19  ;;  %v345_v23 = vmax.f32 %v341_v20, 0.0  ;;  %v349_v24 = vsel %vm346_vm3, %v344_v19, 0.0 }
  0xf9   : > { %v351_v25 = vsel %vm350_vm4, %v345_v23, 0.0  ;;  %v363_v26 = vmul.f32 %v345_v23, %v345_v23  ;;  %v364_v28 = vsel %vm346_vm3, %v362_v22, 0.0 }
  0xfa   : > { %v352_v27 = vadd.f32 %v351_v25, %v349_v24 }
  0xfb   : > { %v365_v29 = vsel %vm350_vm4, %v363_v26, 0.0 }
  0xfc   : > { %v353_v30 = vrot.slane %v352_v27, 4  ;;  %v366_v31 = vadd.f32 %v365_v29, %v364_v28 }
  0xfe   : > { %v354_v32 = vadd.f32 %v353_v30, %v352_v27  ;;  %v367_v33 = vrot.slane %v366_v31, 4 }
 0x100   : > { %v355_v34 = vrot.slane %v354_v32, 2  ;;  %v368_v35 = vadd.f32 %v367_v33, %v366_v31 }
 0x102   : > { %v356_v36 = vadd.f32 %v355_v34, %v354_v32  ;;  %v369_v37 = vrot.slane %v368_v35, 2 }
 0x104   : > { %v357_v38 = vrot.slane %v356_v36, 1  ;;  %v370_v39 = vadd.f32 %v369_v37, %v368_v35 }
 0x106   : > { %v358_v41 = vadd.f32 %v357_v38, %v356_v36  ;;  %v371_v42 = vrot.slane %v370_v39, 1  ;;  %378 = sbr.rel (%p476_p5) target bundleno = 303 (0x12f), region = 44 }
 0x108   : > { %v359_v44 = vadd.f32 %v358_v41, %v348_v40  ;;  %v372_v45 = vadd.f32 %v371_v42, %v370_v39 }
 0x10a   : > { %360 = vst.msk [vmem:[#allocation2] sm:$0x1] %vm350_vm4, %v359_v44  ;;  %v373_v46 = vadd.f32 %v372_v45, %v361_v43 }
 0x10c   : > { %374 = vst.msk [vmem:[#allocation3] sm:$0x1] %vm350_vm4, %v373_v46 }
 0x111   : > { %v379_v47 = vld [vmem:[#allocation2] sm:$0x1] }
 0x112   : > { %v380_v49 = vmul.f32 0.055555556, %v379_v47 }
 0x113   : > { %v381_v48 = vld [vmem:[#allocation3] sm:$0x1] }
 0x114   : > { %v382_v50 = vmul.f32 0.055555556, %v381_v48  ;;  %v383_v51 = vmul.f32 %v380_v49, %v380_v49 }
 0x116   : > { %v384_v52 = vsub.f32 %v382_v50, %v383_v51 }
 0x118   : > { %v386_v53 = vadd.f32 1e-05, %v384_v52 }
 0x11a   : > { %511 = vrsqrt.f32 %v386_v53 }
 0x124   : > { %v512_v57 = vpop.eup %511 }
 0x125   : > { %v388_v58 = vmul.f32 %v512_v57, %v385_v55 }
 0x127   : > { %v390_v60 = vmul.f32 %v388_v58, %v380_v49 }
 0x129   : > { %v391_v62 = vsub.f32 %v389_v59, %v390_v60 }
 0x12b   : > { %v396_v63 = vrot.slane %v391_v62, %v395_v61 }
 0x12d   : > { %v399_v0 = vsel %vm398_vm5, %v388_v58, %v396_v63 }
 0x12e   : > { %401 = vst.msk [vmem:[%s604_s5] sm:$0x3] %vm400_vm6, %v399_v0 }
 0x12f PF: > { %s16_s18 = sadd.s32 1, %s519_s18  }
 0x130   : > { %p13_p6 = scmp.ge.s32.totalorder %s16_s18, 4  }
 0x132   :  { %15 = sbr.rel (!%p13_p6) target bundleno = 1 (0x1), region = 83 }

// kernel: tacotron_forward.56
= control target key start
LH: loop header
LB: loop body
LE: loop exit
PB: predicated region body
PF: predicated region fallthrough
CT: control target
= control target key end

     0   :  { %s617_s18 = smov 0   ;;  %s664_s0 = inlined_call_operand.vmem [shape: f32[2,10,16], index: 0, kind: input, shape index: {}]   ;;  %s665_s1 = inlined_call_operand.vmem [shape: bf16[3,16,32], index: 1, kind: input, shape index: {}]   ;;  %s666_s2 = inlined_call_operand.vmem [shape: f32[1,32], index: 2, kind: input, shape index: {}]   ;;  %s667_s3 = inlined_call_operand.vmem [shape: f32[1,32], index: 3, kind: input, shape index: {}]   ;;  %s668_s4 = inlined_call_operand.vmem [shape: f32[2,8,32], index: 4, kind: output, shape index: {0}]   ;;  %s669_s5 = inlined_call_operand.vmem [shape: f32[2,32], index: 5, kind: output, shape index: {1}]  }
   0x1 LB: > { %s623_s19 = sadd.s32 4294967295, %s582_s18   ;;  %p512_p0 = scmp.ge.s32.totalorder %s582_s18, 1  ;;  %s582_s18 = sphi %s617_s18, %s16_s18  }
   0x2   : > { %p185_p1 = scmp.lt.s32.totalorder %s582_s18, 3 }
   0x4   : > { %p186_p2 = pnand %p512_p0, %p185_p1 }
   0x5   : > { %p212_p3 = scmp.lt.s32.totalorder (!%p186_p2), %s623_s19, 1  ;;  %p516_p4 = scmp.ne.s32.totalorder (!%p186_p2), %s623_s19, 0 }
   0x6   : > { %189 = sbr.rel (%p186_p2) target bundleno = 306 (0x132), region = 36 }
   0xd   : > { %s213_s20 = scalar_select %p212_p3, %s623_s19, 1 }
   0xe   : > { %225 = sbr.rel (%p516_p4) target bundleno = 21 (0x15), region = 40  ;;  %vm226_vm0 = vcmask (!%p516_p4), 253952   ;;  %v584_v0 = vmov (!%p516_p4), 0.0  }
   0xf   : > { %s530_s21 = sshll.u32 %s213_s20, 4  ;;  %s515_s22 = sshll.u32 %s213_s20, 3  ;;  %227 = vst.msk [vmem:[#allocation2] sm:$0x1] (!%p516_p4), %vm226_vm0, %v584_v0  ;;  %228 = vst.msk [vmem:[#allocation3] sm:$0x1] (!%p516_p4), %vm226_vm0, %v584_v0 }
  0x10   : > { %s216_s25 = scalar_lea.vmem %s664_s0, %s530_s21  ;;  %s635_s28 = scalar_lea.vmem %s668_s4, %s515_s22 }
  0x15 PF: > { %v571_v1 = vld [vmem:[%s665_s1] sm:$0xff]   ;;  %v585_v2 = vmov 0.0   ;;  %v230_v4 = vld [vmem:[%s216_s25 + $0x8] sm:$0x3]  ;;  %vm250_vm1 = vcmask 130048   ;;  %v572_v5 = vld [vmem:[%s665_s1 + $0x10] sm:$0xff]  }
  0x16   : > { %543 = vmatprep.subr.bf16.mxu0 %v585_v2  ;;  %v229_v3 = vld [vmem:[%s216_s25] sm:$0xff]  ;;  %537 = vmatprep.subr.bf16.mxu1 %v585_v2  ;;  %vm586_vm2 = vmmov 0   ;;  %v573_v7 = vld [vmem:[%s665_s1 + $0x8] sm:$0xff]   ;;  %vm398_vm3 = vcmask 261120   ;;  %vm409_vm4 = vcmask 253952   ;;  %p527_p5 = scmp.ne.s32.totalorder %s623_s19, 1 }
  0x17   : > { %544 = vmatpush3.bf16.msra.mxu0 %v571_v1  ;;  %545 = vmatprep.mubr.msk.bf16.mxu0 %vm586_vm2, %v585_v2  ;;  %v231_v6 = vpack.c.bf16 %v230_v4, %v229_v3  ;;  %v400_v35 = vld [vmem:[#allocation2] sm:$0x1]  ;;  %v411_v38 = vld [vmem:[#allocation3] sm:$0x1]  ;;  %v440_v49 = vlaneseq (!%p527_p5)  ;;  %vm445_vm5 = vcmask (!%p527_p5), 1040384   ;;  %vm447_vm6 = vcmask (!%p527_p5), 254976  }
  0x18   : > { %549 = vmatprep.subr.bf16.mxu0 %v585_v2  ;;  %539 = vmatprep.mubr.msk.bf16.mxu1 %vm586_vm2, %v585_v2  ;;  %v432_v50 = vld [vmem:[%s666_s2] sm:$0x1] (!%p527_p5) }
  0x19   : > { %v238_v8 = vshrl.u32 %v231_v6, 16  ;;  %v240_v9 = vshll.u32 %v231_v6, 16  ;;  %538 = vmatpush3.bf16.msra.mxu1 %v573_v7  ;;  %v346_v12 = vrot.slane %v231_v6, 1  ;;  %v441_v51 = vshrl.u32 (!%p527_p5), %v440_v49, 7  ;;  %v436_v54 = vld [vmem:[%s667_s3] sm:$0x1] (!%p527_p5) }
  0x1a   : > { %546 = vmatmul.mubr.msk.bf16.vlgmr.msra.gmra.mrb[0].mxu0 %vm250_vm1, %v231_v6 }
  0x1b   : > { %550 = vmatpush3.bf16.msra.mxu0 %v572_v5  ;;  %v242_v10 = vrot.slane %v240_v9, 1  ;;  %551 = vmatprep.mubr.msk.bf16.mxu0 %vm586_vm2, %v585_v2  ;;  %v442_v56 = vsub.s32 (!%p527_p5), 0, %v441_v51 }
  0x1d   : > { %v243_v11 = vor.u32 %v242_v10, %v238_v8 }
  0x1f   : > { %540 = vmatmul.mubr.msk.bf16.vlgmr.msra.gmra.mrb[0].mxu1 %vm250_vm1, %v243_v11 }
  0x26   : > { %552 = vmatmul.mubr.msk.bf16.vlgmr.msra.gmra.mrb[0].mxu0 %vm250_vm1, %v346_v12 }
  0xf2   : > { %v288_v13 = vpop.f32.mrb[0].mxu1 }
  0xf3   : > { %v541_v14 = vpop.f32.mrb[1].mxu1 }
  0xf4   : > { %v291_v15 = vpop.f32.mrb[2].mxu1 }
  0xf5   : > { %v542_v16 = vpop.f32.mrb[3].mxu1 }
  0xf9   : > { %v390_v17 = vpop.f32.mrb[0].mxu0 }
  0xfa   : > { %v555_v18 = vadd.f32 %v390_v17, %v288_v13  ;;  %v553_v19 = vpop.f32.mrb[1].mxu0 }
  0xfb   : > { %v393_v20 = vpop.f32.mrb[2].mxu0 }
  0xfc   : > { %v397_v21 = vmax.f32 %v555_v18, 0.0  ;;  %v554_v22 = vpop.f32.mrb[3].mxu0 }
  0xfe   : > { %399 = vst.msk [vmem:[%s635_s28] sm:$0xff] %vm398_vm3, %v397_v21  ;;  %v401_v23 = vsel %vm398_vm3, %v397_v21, 0.0  ;;  %v412_v24 = vmul.f32 %v397_v21, %v397_v21 }
  0xff   : > { %v402_v25 = vrot.slane %v401_v23, 4 }
 0x100   : > { %v413_v26 = vsel %vm398_vm3, %v412_v24, 0.0 }
 0x101   : > { %v403_v27 = vadd.f32 %v402_v25, %v401_v23  ;;  %v414_v28 = vrot.slane %v413_v26, 4 }
 0x103   : > { %v404_v29 = vrot.slane %v403_v27, 2  ;;  %v415_v30 = vadd.f32 %v414_v28, %v413_v26 }
 0x105   : > { %v405_v31 = vadd.f32 %v404_v29, %v403_v27  ;;  %v416_v32 = vrot.slane %v415_v30, 2 }
 0x107   : > { %v406_v33 = vrot.slane %v405_v31, 1  ;;  %v417_v34 = vadd.f32 %v416_v32, %v415_v30 }
 0x109   : > { %v407_v36 = vadd.f32 %v406_v33, %v405_v31  ;;  %v418_v37 = vrot.slane %v417_v34, 1  ;;  %425 = sbr.rel (%p527_p5) target bundleno = 306 (0x132), region = 44 }
 0x10b   : > { %v408_v39 = vadd.f32 %v407_v36, %v400_v35  ;;  %v419_v40 = vadd.f32 %v418_v37, %v417_v34 }
 0x10d   : > { %410 = vst.msk [vmem:[#allocation2] sm:$0x1] %vm409_vm4, %v408_v39  ;;  %v420_v41 = vadd.f32 %v419_v40, %v411_v38 }
 0x10f   : > { %421 = vst.msk [vmem:[#allocation3] sm:$0x1] %vm409_vm4, %v420_v41 }
 0x114   : > { %v426_v42 = vld [vmem:[#allocation2] sm:$0x1] }
 0x115   : > { %v427_v44 = vmul.f32 0.0625, %v426_v42 }
 0x116   : > { %v428_v43 = vld [vmem:[#allocation3] sm:$0x1] }
 0x117   : > { %v429_v45 = vmul.f32 0.0625, %v428_v43  ;;  %v430_v46 = vmul.f32 %v427_v44, %v427_v44 }
 0x119   : > { %v431_v47 = vsub.f32 %v429_v45, %v430_v46 }
 0x11b   : > { %v433_v48 = vadd.f32 1e-05, %v431_v47 }
 0x11d   : > { %574 = vrsqrt.f32 %v433_v48 }
 0x127   : > { %v575_v52 = vpop.eup %574 }
 0x128   : > { %v435_v53 = vmul.f32 %v575_v52, %v432_v50 }
 0x12a   : > { %v437_v55 = vmul.f32 %v435_v53, %v427_v44 }
 0x12c   : > { %v438_v57 = vsub.f32 %v436_v54, %v437_v55 }
 0x12e   : > { %v443_v58 = vrot.slane %v438_v57, %v442_v56 }
 0x130   : > { %v446_v59 = vsel %vm445_vm5, %v435_v53, %v443_v58 }
 0x131   : > { %448 = vst.msk [vmem:[%s669_s5] sm:$0x3] %vm447_vm6, %v446_v59 }
 0x132 PF: > { %s16_s18 = sadd.s32 1, %s582_s18  }
 0x133   : > { %p13_p6 = scmp.ge.s32.totalorder %s16_s18, 4  }
 0x135   :  { %15 = sbr.rel (!%p13_p6) target bundleno = 1 (0x1), region = 84 }

// kernel: tacotron_forward.58
= control target key start
LH: loop header
LB: loop body
LE: loop exit
PB: predicated region body
PF: predicated region fallthrough
CT: control target
= control target key end

     0   :  { %s703_s18 = smov 0   ;;  %s762_s0 = inlined_call_operand.vmem [shape: f32[2,12,16], index: 0, kind: input, shape index: {}]   ;;  %s763_s1 = inlined_call_operand.vmem [shape: bf16[4,16,32], index: 1, kind: input, shape index: {}]   ;;  %s764_s2 = inlined_call_operand.vmem [shape: f32[1,32], index: 2, kind: input, shape index: {}]   ;;  %s765_s3 = inlined_call_operand.vmem [shape: f32[1,32], index: 3, kind: input, shape index: {}]   ;;  %s766_s4 = inlined_call_operand.vmem [shape: f32[2,8,32], index: 4, kind: output, shape index: {0}]   ;;  %s767_s5 = inlined_call_operand.vmem [shape: f32[2,32], index: 5, kind: output, shape index: {1}]  }
   0x1 LB: > { %s709_s19 = sadd.s32 4294967295, %s668_s18   ;;  %p580_p0 = scmp.ge.s32.totalorder %s668_s18, 1  ;;  %s668_s18 = sphi %s703_s18, %s16_s18  }
   0x2   : > { %p185_p1 = scmp.lt.s32.totalorder %s668_s18, 3 }
   0x4   : > { %p186_p2 = pnand %p580_p0, %p185_p1 }
   0x5   : > { %p212_p3 = scmp.lt.s32.totalorder (!%p186_p2), %s709_s19, 1  ;;  %p584_p4 = scmp.ne.s32.totalorder (!%p186_p2), %s709_s19, 0 }
   0x6   : > { %189 = sbr.rel (%p186_p2) target bundleno = 315 (0x13b), region = 36 }
   0xd   : > { %s213_s20 = scalar_select %p212_p3, %s709_s19, 1 }
   0xe   : > { %225 = sbr.rel (%p584_p4) target bundleno = 21 (0x15), region = 40  ;;  %vm226_vm0 = vcmask (!%p584_p4), 253952   ;;  %v670_v0 = vmov (!%p584_p4), 0.0  }
   0xf   : > { %s602_s21 = sshll.u32 %s213_s20, 4  ;;  %s583_s22 = sshll.u32 %s213_s20, 3  ;;  %227 = vst.msk [vmem:[#allocation2] sm:$0x1] (!%p584_p4), %vm226_vm0, %v670_v0  ;;  %228 = vst.msk [vmem:[#allocation3] sm:$0x1] (!%p584_p4), %vm226_vm0, %v670_v0 }
  0x10   : > { %s216_s25 = scalar_lea.vmem %s762_s0, %s602_s21  ;;  %s721_s28 = scalar_lea.vmem %s766_s4, %s583_s22 }
  0x15 PF: > { %v656_v1 = vld [vmem:[%s763_s1 + $0x10] sm:$0xff]   ;;  %v671_v2 = vmov 0.0   ;;  %v657_v3 = vld [vmem:[%s763_s1 + $0x8] sm:$0xff]   ;;  %vm672_vm1 = vmmov 0   ;;  %v229_v4 = vld [vmem:[%s216_s25] sm:$0xff]  ;;  %vm250_vm2 = vcmask 130048  }
  0x16   : > { %623 = vmatprep.subr.bf16.mxu0 %v671_v2  ;;  %611 = vmatprep.subr.bf16.mxu1 %v671_v2  ;;  %v230_v5 = vld [vmem:[%s216_s25 + $0x8] sm:$0xf]  ;;  %v659_v7 = vld [vmem:[%s763_s1 + $0x18] sm:$0xff]   ;;  %v658_v12 = vld [vmem:[%s763_s1] sm:$0xff]   ;;  %vm461_vm3 = vcmask 261120   ;;  %vm465_vm4 = vcmask 253952  }
  0x17   : > { %624 = vmatpush3.bf16.msra.mxu0 %v656_v1  ;;  %625 = vmatprep.mubr.msk.bf16.mxu0 %vm672_vm1, %v671_v2  ;;  %v231_v6 = vpack.c.bf16 %v230_v5, %v229_v4  ;;  %v463_v46 = vld [vmem:[#allocation2] sm:$0x1]  ;;  %v476_v49 = vld [vmem:[#allocation3] sm:$0x1]  ;;  %p599_p5 = scmp.ne.s32.totalorder %s709_s19, 1 }
  0x18   : > { %612 = vmatpush3.bf16.msra.mxu1 %v657_v3  ;;  %613 = vmatprep.mubr.msk.bf16.mxu1 %vm672_vm1, %v671_v2  ;;  %v508_v60 = vlaneseq (!%p599_p5)  ;;  %v500_v61 = vld [vmem:[%s764_s2] sm:$0x1] (!%p599_p5)  ;;  %vm513_vm5 = vcmask (!%p599_p5), 1040384   ;;  %vm515_vm6 = vcmask (!%p599_p5), 254976  }
  0x19   : > { %617 = vmatprep.subr.bf16.mxu1 %v671_v2  ;;  %629 = vmatprep.subr.bf16.mxu0 %v671_v2  ;;  %v348_v8 = vrot.slane %v231_v6, 1  ;;  %v238_v9 = vshrl.u32 %v231_v6, 16  ;;  %v240_v10 = vshll.u32 %v231_v6, 16  ;;  %v504_v1 = vld [vmem:[%s765_s3] sm:$0x1] (!%p599_p5) }
  0x1a   : > { %v509_v62 = vshrl.u32 (!%p599_p5), %v508_v60, 7 }
  0x1b   : > { %626 = vmatmul.mubr.msk.bf16.vlgmr.msra.gmra.mrb[0].mxu0 %vm250_vm2, %v348_v8  ;;  %v242_v11 = vrot.slane %v240_v10, 1  ;;  %v404_v14 = vrot.slane %v238_v9, 1  ;;  %v405_v15 = vrot.slane %v240_v10, 2 }
  0x1c   : > { %630 = vmatpush3.bf16.msra.mxu0 %v659_v7  ;;  %631 = vmatprep.mubr.msk.bf16.mxu0 %vm672_vm1, %v671_v2  ;;  %v510_v3 = vsub.s32 (!%p599_p5), 0, %v509_v62 }
  0x1d   : > { %v243_v13 = vor.u32 %v242_v11, %v238_v9  ;;  %v406_v16 = vor.u32 %v405_v15, %v404_v14 }
  0x1f   : > { %614 = vmatmul.mubr.msk.bf16.vlgmr.msra.gmra.mrb[0].mxu1 %vm250_vm2, %v243_v13 }
  0x20   : > { %618 = vmatpush3.bf16.msra.mxu1 %v658_v12  ;;  %619 = vmatprep.mubr.msk.bf16.mxu1 %vm672_vm1, %v671_v2 }
  0x27   : > { %632 = vmatmul.mubr.msk.bf16.vlgmr.msra.gmra.mrb[0].mxu0 %vm250_vm2, %v406_v16 }
  0x2b   : > { %620 = vmatmul.mubr.msk.bf16.vlgmr.msra.gmra.mrb[0].mxu1 %vm250_vm2, %v231_v6 }
  0xfa   : > { %v450_v17 = vpop.f32.mrb[0].mxu0 }
  0xfb   : > { %v633_v18 = vpop.f32.mrb[1].mxu0 }
  0xfc   : > { %v453_v19 = vpop.f32.mrb[2].mxu0 }
  0xfd   : > { %v634_v20 = vpop.f32.mrb[3].mxu0 }
  0xfe   : > { %v337_v21 = vpop.f32.mrb[0].mxu1 }
  0xff   : > { %v635_v22 = vadd.f32 %v450_v17, %v337_v21  ;;  %v621_v23 = vpop.f32.mrb[1].mxu1 }
 0x100   : > { %v340_v24 = vpop.f32.mrb[2].mxu1 }
 0x101   : > { %v459_v25 = vmax.f32 %v635_v22, 0.0  ;;  %v636_v26 = vadd.f32 %v453_v19, %v340_v24  ;;  %v622_v27 = vpop.f32.mrb[3].mxu1 }
 0x103   : > { %462 = vst.msk [vmem:[%s721_s28] sm:$0xff] %vm461_vm3, %v459_v25  ;;  %v477_v28 = vmul.f32 %v459_v25, %v459_v25  ;;  %v460_v29 = vmax.f32 %v636_v26, 0.0  ;;  %v464_v30 = vsel %vm461_vm3, %v459_v25, 0.0 }
 0x105   : > { %v466_v31 = vsel %vm465_vm4, %v460_v29, 0.0  ;;  %v478_v32 = vmul.f32 %v460_v29, %v460_v29  ;;  %v479_v34 = vsel %vm461_vm3, %v477_v28, 0.0 }
 0x106   : > { %v467_v33 = vadd.f32 %v466_v31, %v464_v30 }
 0x107   : > { %v480_v35 = vsel %vm465_vm4, %v478_v32, 0.0 }
 0x108   : > { %v468_v36 = vrot.slane %v467_v33, 4  ;;  %v481_v37 = vadd.f32 %v480_v35, %v479_v34 }
 0x10a   : > { %v469_v38 = vadd.f32 %v468_v36, %v467_v33  ;;  %v482_v39 = vrot.slane %v481_v37, 4 }
 0x10c   : > { %v470_v40 = vrot.slane %v469_v38, 2  ;;  %v483_v41 = vadd.f32 %v482_v39, %v481_v37 }
 0x10e   : > { %v471_v42 = vadd.f32 %v470_v40, %v469_v38  ;;  %v484_v43 = vrot.slane %v483_v41, 2 }
 0x110   : > { %v472_v44 = vrot.slane %v471_v42, 1  ;;  %v485_v45 = vadd.f32 %v484_v43, %v483_v41 }
 0x112   : > { %v473_v47 = vadd.f32 %v472_v44, %v471_v42  ;;  %v486_v48 = vrot.slane %v485_v45, 1  ;;  %493 = sbr.rel (%p599_p5) target bundleno = 315 (0x13b), region = 44 }
 0x114   : > { %v474_v50 = vadd.f32 %v473_v47, %v463_v46  ;;  %v487_v51 = vadd.f32 %v486_v48, %v485_v45 }
 0x116   : > { %475 = vst.msk [vmem:[#allocation2] sm:$0x1] %vm465_vm4, %v474_v50  ;;  %v488_v52 = vadd.f32 %v487_v51, %v476_v49 }
 0x118   : > { %489 = vst.msk [vmem:[#allocation3] sm:$0x1] %vm465_vm4, %v488_v52 }
 0x11d   : > { %v494_v53 = vld [vmem:[#allocation2] sm:$0x1] }
 0x11e   : > { %v495_v55 = vmul.f32 0.055555556, %v494_v53 }
 0x11f   : > { %v496_v54 = vld [vmem:[#allocation3] sm:$0x1] }
 0x120   : > { %v497_v56 = vmul.f32 0.055555556, %v496_v54  ;;  %v498_v57 = vmul.f32 %v495_v55, %v495_v55 }
 0x122   : > { %v499_v58 = vsub.f32 %v497_v56, %v498_v57 }
 0x124   : > { %v501_v59 = vadd.f32 1e-05, %v499_v58 }
 0x126   : > { %660 = vrsqrt.f32 %v501_v59 }
 0x130   : > { %v661_v63 = vpop.eup %660 }
 0x131   : > { %v503_v0 = vmul.f32 %v661_v63, %v500_v61 }
 0x133   : > { %v505_v2 = vmul.f32 %v503_v0, %v495_v55 }
 0x135   : > { %v506_v4 = vsub.f32 %v504_v1, %v505_v2 }
 0x137   : > { %v511_v5 = vrot.slane %v506_v4, %v510_v3 }
 0x139   : > { %v514_v6 = vsel %vm513_vm5, %v503_v0, %v511_v5 }
 0x13a   : > { %516 = vst.msk [vmem:[%s767_s5] sm:$0x3] %vm515_vm6, %v514_v6 }
 0x13b PF: > { %s16_s18 = sadd.s32 1, %s668_s18  }
 0x13c   : > { %p13_p6 = scmp.ge.s32.totalorder %s16_s18, 4  }
 0x13e   :  { %15 = sbr.rel (!%p13_p6) target bundleno = 1 (0x1), region = 85 }

// kernel: tacotron_forward.51
= control target key start
LH: loop header
LB: loop body
LE: loop exit
PB: predicated region body
PF: predicated region fallthrough
CT: control target
= control target key end

     0   :  { %vm3582_vm0 = vcmask 254976   ;;  %vm3575_vm1 = vcmask 386048   ;;  %vm3576_vm2 = vcmask 58368   ;;  %s2910_s6 = smov 1   ;;  %v2911_v0 = vmov 0.0   ;;  %s2912_s10 = smov 2   ;;  %s3564_s0 = inlined_call_operand.smem [shape: u32[34], index: -1, kind: input, shape index: {}] }
   0x1   :  { %s2963_s5 = sld [smem:[%s3564_s0]]   ;;  %142 = vst.msk [vmem:[#allocation2] sm:$0x3] %vm3582_vm0, %v2911_v0  ;;  %143 = vst.msk [vmem:[#allocation3] sm:$0x3] %vm3582_vm0, %v2911_v0  ;;  %s2913_s14 = smov 3  }
   0x2   :  { %s2317_s9 = sld [smem:[%s3564_s0 + %s2910_s6]]   ;;  %144 = vst.msk [vmem:[#allocation4] sm:$0x3] %vm3582_vm0, %v2911_v0  ;;  %145 = vst.msk [vmem:[#allocation5] sm:$0x3] %vm3582_vm0, %v2911_v0  ;;  %s2914_s18 = smov 4  }
   0x3   :  { %146 = vst.msk [vmem:[#allocation6] sm:$0x3] %vm3582_vm0, %v2911_v0  ;;  %s2318_s13 = sld [smem:[%s3564_s0 + %s2912_s10]]   ;;  %s2915_s22 = smov 5  }
   0x4   :  { %148 = vst.msk [vmem:[#allocation7] sm:$0x3] %vm3575_vm1, %v2911_v0  ;;  %s2319_s17 = sld [smem:[%s3564_s0 + %s2913_s14]]   ;;  %s2916_s26 = smov 6  }
   0x5   :  { %150 = vst.msk [vmem:[#allocation8] sm:$0x3] %vm3576_vm2, %v2911_v0  ;;  %s2984_s21 = sld [smem:[%s3564_s0 + %s2914_s18]]   ;;  %s2917_s30 = smov 7  }
   0x6   :  { %s2989_s25 = sld [smem:[%s3564_s0 + %s2915_s22]]   ;;  %s2918_s4 = smov 8  }
   0x7   :  { %s2994_s29 = sld [smem:[%s3564_s0 + %s2916_s26]]   ;;  %s2919_s10 = smov 9  }
   0x8   :  { %s2999_s3 = sld [smem:[%s3564_s0 + %s2917_s30]]   ;;  %v3001_v1 = vld [vmem:[%s2317_s9] sm:$0xff]  ;;  %v3003_v2 = vld [vmem:[%s2317_s9 + $0x8] sm:$0xff]  ;;  %s2920_s9 = smov 10  }
   0x9   :  { %s3008_s8 = sld [smem:[%s3564_s0 + %s2918_s4]]   ;;  %v3010_v3 = vld [vmem:[%s2318_s13] sm:$0xff]  ;;  %v3012_v4 = vld [vmem:[%s2318_s13 + $0x8] sm:$0xff]  ;;  %s2921_s19 = smov 11  }
   0xa   :  { %s3017_s14 = sld [smem:[%s3564_s0 + %s2919_s10]]   ;;  %v3019_v5 = vld [vmem:[%s2319_s17] sm:$0x3]  ;;  %s2922_s23 = smov 12  }
   0xb   :  { %s3024_s18 = sld [smem:[%s3564_s0 + %s2920_s9]]   ;;  %s2923_s17 = smov 13  }
   0xc   :  { %s3029_s13 = sld [smem:[%s3564_s0 + %s2921_s19]]   ;;  %s2924_s2 = smov 14  }
   0xd   :  { %s3034_s27 = sld [smem:[%s3564_s0 + %s2922_s23]]   ;;  %s2925_s10 = smov 15  }
   0xe   :  { %s3039_s1 = sld [smem:[%s3564_s0 + %s2923_s17]]   ;;  %s2926_s15 = smov 16  }
   0xf   :  { %s3044_s7 = sld [smem:[%s3564_s0 + %s2924_s2]]   ;;  %s2927_s22 = smov 17  }
  0x10   :  { %s3049_s9 = sld [smem:[%s3564_s0 + %s2925_s10]]   ;;  %s2928_s17 = smov 18  }
  0x11   :  { %s3054_s20 = sld [smem:[%s3564_s0 + %s2926_s15]]   ;;  %s2929_s4 = smov 19  }
  0x12   :  { %s3059_s26 = sld [smem:[%s3564_s0 + %s2927_s22]]   ;;  %s2930_s12 = smov 20  }
  0x13   :  { %s3064_s2 = sld [smem:[%s3564_s0 + %s2928_s17]]   ;;  %s2931_s22 = smov 21  }
  0x14   :  { %s3069_s11 = sld [smem:[%s3564_s0 + %s2929_s4]]   ;;  %s2932_s17 = smov 22  }
  0x15   :  { %s3074_s19 = sld [smem:[%s3564_s0 + %s2930_s12]]   ;;  %s2933_s4 = smov 23  }
  0x16   :  { %s2934_s12 = smov 24   ;;  %s2941_s6 = smov 31  }
  0x17   :  { %s2942_s15 = smov 32   ;;  %s2943_s23 = smov 33  }
  0x18   :  { %3584 = sst [smem:[#allocation10_spill]] %s3059_s26 }
  0x19   :  { %3585 = sst [smem:[#allocation11_spill]] %s3064_s2 }
  0x1a   :  { %3586 = sst [smem:[#allocation12_spill]] %s3069_s11 }
  0x1b   :  { %3587 = sst [smem:[#allocation13_spill]] %s3074_s19 }
  0x1c   :  { %s3079_s26 = sld [smem:[%s3564_s0 + %s2931_s22]]   ;;  %s2935_s22 = smov 25  }
  0x1d   :  { %s3084_s2 = sld [smem:[%s3564_s0 + %s2932_s17]]   ;;  %s2936_s17 = smov 26  }
  0x1e   :  { %s3089_s11 = sld [smem:[%s3564_s0 + %s2933_s4]]   ;;  %s2937_s4 = smov 27  }
  0x1f   :  { %s3094_s19 = sld [smem:[%s3564_s0 + %s2934_s12]]   ;;  %s2938_s12 = smov 28  }
  0x22   :  { %3588 = sst [smem:[#allocation14_spill]] %s3079_s26 }
  0x23   :  { %3589 = sst [smem:[#allocation15_spill]] %s3084_s2 }
  0x24   :  { %3590 = sst [smem:[#allocation16_spill]] %s3089_s11 }
  0x25   :  { %3591 = sst [smem:[#allocation17_spill]] %s3094_s19 }
  0x26   :  { %s3099_s26 = sld [smem:[%s3564_s0 + %s2935_s22]]   ;;  %s2939_s22 = smov 29  }
  0x27   :  { %s3104_s2 = sld [smem:[%s3564_s0 + %s2936_s17]]   ;;  %s2940_s17 = smov 30  }
  0x28   :  { %s3109_s11 = sld [smem:[%s3564_s0 + %s2937_s4]]  }
  0x29   :  { %s3114_s19 = sld [smem:[%s3564_s0 + %s2938_s12]]  }
  0x2c   :  { %3592 = sst [smem:[#allocation18_spill]] %s3099_s26 }
  0x2d   :  { %3593 = sst [smem:[#allocation19_spill]] %s3104_s2 }
  0x2e   :  { %3594 = sst [smem:[#allocation20_spill]] %s3109_s11 }
  0x2f   :  { %3595 = sst [smem:[#allocation21_spill]] %s3114_s19 }
  0x30   :  { %s3119_s26 = sld [smem:[%s3564_s0 + %s2939_s22]]  }
  0x31   :  { %s2346_s2 = sld [smem:[%s3564_s0 + %s2940_s17]]   ;;  %s3139_s17 = smov 0  }
  0x32   :  { %s3127_s11 = sld [smem:[%s3564_s0 + %s2941_s6]]  }
  0x33   :  { %s3132_s19 = sld [smem:[%s3564_s0 + %s2942_s15]]  }
  0x36   :  { %3596 = sst [smem:[#allocation22_spill]] %s3119_s26 }
  0x37   :  { %s3137_s26 = sld [smem:[%s3564_s0 + %s2943_s23]]   ;;  %v73_v6 = vstv %s2346_s2 }
  0x38   :  { %74 = vst [vmem:[#allocation9] sm:$0x1] %v73_v6 }
  0x39 LB: > { %v165_v7 = vld [vmem:[%s2984_s21] sm:$0xff]  ;;  %v166_v8 = vld [vmem:[%s2984_s21 + $0x8] sm:$0xff]  ;;  %v2944_v9 = vmov 0.0|0.0   ;;  %vm3579_vm3 = vmmov 0   ;;  %v2946_v11 = vmov 0.0   ;;  %v251_v14 = vld [vmem:[%s2994_s29 + $0x10] sm:$0xff]  ;;  %s2908_s17 = sphi %s3139_s17, %s161_s17  }
  0x3a   : > { %2693 = vmatprep.subr.bf16.mxu0 %v2944_v9  ;;  %v2694_v10 = vpack.c.bf16 %v166_v8, %v165_v7  ;;  %2487 = vmatprep.mubr.msk.f32.mxu0 %vm3579_vm3, %v2946_v11  ;;  %v249_v12 = vld [vmem:[%s2994_s29] sm:$0xff]  ;;  %v250_v13 = vld [vmem:[%s2994_s29 + $0x8] sm:$0xff]  ;;  %s3153_s0 = sshll.u32 %s2908_s17, 1  ;;  %v252_v16 = vld [vmem:[%s2994_s29 + $0x18] sm:$0xff]  ;;  %vm3577_vm4 = vcmask 130048   ;;  %vm264_vm5 = vcmask 523264   ;;  %v722_v8 = vlaneseq }
  0x3b   : > { %2696 = vmatprep.subr.bf16.mxu1 %v2944_v9  ;;  %v2697_v15 = vpack.c.bf16 %v250_v13, %v249_v12  ;;  %2506 = vmatprep.mubr.msk.f32.mxu1 %vm3579_vm3, %v2946_v11  ;;  %s163_s2 = scalar_lea.vmem %s2963_s5, %s3153_s0  ;;  %v2700_v18 = vpack.c.bf16 %v252_v16, %v251_v14  ;;  %v253_v19 = vld [vmem:[%s2994_s29 + $0x20] sm:$0xff]  ;;  %v254_v20 = vld [vmem:[%s2994_s29 + $0x28] sm:$0xff]  ;;  %v255_v22 = vld [vmem:[%s2994_s29 + $0x30] sm:$0xff]  ;;  %vm3574_vm6 = vcmask 392192   ;;  %vm3581_vm7 = vcmask 261120   ;;  %s2947_s28 = smov 15  }
  0x3c   : > { %2695 = vmatpush3.bf16.msra.mxu0 %v2694_v10  ;;  %v164_v17 = vld [vmem:[%s163_s2] sm:$0x3]  ;;  %v2703_v21 = vpack.c.bf16 %v254_v20, %v253_v19  ;;  %v256_v23 = vld [vmem:[%s2994_s29 + $0x38] sm:$0xff]  ;;  %v348_v26 = vld [vmem:[%s3017_s14 + $0x8] sm:$0xff]  ;;  %vm3578_vm8 = vcmask 121856   ;;  %vm720_vm9 = vcmask 187392   ;;  %s2287_s23 = scalar_lea.vmem %s3132_s19, %s3153_s0 }
  0x3d   : > { %2698 = vmatpush3.bf16.msra.mxu1 %v2697_v15  ;;  %2708 = vmatprep.subr.bf16.mxu0 %v2944_v9  ;;  %v2706_v24 = vpack.c.bf16 %v256_v23, %v255_v22  ;;  %v347_v25 = vld [vmem:[%s3017_s14] sm:$0xff]  ;;  %v349_v27 = vld [vmem:[%s3017_s14 + $0x10] sm:$0xff]  ;;  %v350_v29 = vld [vmem:[%s3017_s14 + $0x18] sm:$0xff]  ;;  %v3215_v10 = vshrl.u32 %v722_v8, 7  ;;  %s2948_s30 = smov 64   ;;  %s2949_s6 = smov 32  }
  0x3e   : > { %2699 = vmatprep.subr.bf16.mxu1 %v2944_v9  ;;  %v2709_v28 = vpack.c.bf16 %v348_v26, %v347_v25  ;;  %v2712_v30 = vpack.c.bf16 %v350_v29, %v349_v27  ;;  %v351_v31 = vld [vmem:[%s3017_s14 + $0x20] sm:$0xff]  ;;  %v352_v32 = vld [vmem:[%s3017_s14 + $0x28] sm:$0xff]  ;;  %v343_v42 = vld [vmem:[%s3008_s8 + $0x10] sm:$0xff]  ;;  %s2950_s4 = smov 96   ;;  %vm976_vm10 = vcmask 7168   ;;  %vm979_vm11 = vcmask 15360  }
  0x3f   : > { %2488 = vmatmul.mubr.msk.f32.vlgmr.msra.gmra.mrb[0].mxu0 %vm3577_vm4, %v164_v17  ;;  %v2715_v33 = vpack.c.bf16 %v352_v32, %v351_v31  ;;  %v2351_v34 = vld [vmem:[%s2989_s25] ss:$0 sm:$0xff]  ;;  %v342_v36 = vld [vmem:[%s3008_s8 + $0x8] sm:$0xff]  ;;  %v344_v43 = vld [vmem:[%s3008_s8 + $0x18] sm:$0xff]  ;;  %v3218_v14 = vsub.s32 0, %v3215_v10  ;;  %v3222_v19 = vsub.s32 1, %v3215_v10 }
  0x40   : > { %2525 = vmatprep.mubr.msk.f32.mxu0 %vm3579_vm3, %v2946_v11  ;;  %2710 = vmatpush3.bf16.msra.mxu0 %v2709_v28  ;;  %v341_v35 = vld [vmem:[%s3008_s8] sm:$0xff]  ;;  %v2724_v44 = vpack.c.bf16 %v344_v43, %v343_v42  ;;  %v353_v45 = vld [vmem:[%s3017_s14 + $0x30] sm:$0xff]  ;;  %v354_v46 = vld [vmem:[%s3017_s14 + $0x38] sm:$0xff]  ;;  %vm982_vm12 = vcmask 23552   ;;  %vm985_vm13 = vcmask 31744   ;;  %vm988_vm14 = vcmask 39936  }
  0x41   : > { %2701 = vmatpush3.bf16.msra.mxu1 %v2700_v18  ;;  %2711 = vmatprep.subr.bf16.mxu0 %v2944_v9  ;;  %v2721_v40 = vpack.c.bf16 %v342_v36, %v341_v35  ;;  %v2718_v47 = vpack.c.bf16 %v354_v46, %v353_v45  ;;  %v345_v48 = vld [vmem:[%s3008_s8 + $0x20] sm:$0xff]  ;;  %v346_v49 = vld [vmem:[%s3008_s8 + $0x28] sm:$0xff]  ;;  %v512_v60 = vld [vmem:[%s3024_s18 + $0x10] sm:$0xff]  ;;  %vm991_vm15 = vcmask 48128   ;;  %vm1003_vm1 = vcmask 80896   ;;  %s2951_s10 = smov 16  }
  0x42   : > { %2702 = vmatprep.subr.bf16.mxu1 %v2944_v9  ;;  %v2727_v50 = vpack.c.bf16 %v346_v49, %v345_v48  ;;  %v340_v51 = vld [vmem:[#allocation7] sm:$0x3]  ;;  %v2353_v52 = vld [vmem:[%s2999_s3] ss:$0 sm:$0xff]  ;;  %v513_v61 = vld [vmem:[%s3024_s18 + $0x18] sm:$0xff]  ;;  %vm1006_vm2 = vcmask 89088  }
  0x43   : > { %v510_v53 = vld [vmem:[%s3024_s18] sm:$0xff]  ;;  %v511_v54 = vld [vmem:[%s3024_s18 + $0x8] sm:$0xff]  ;;  %v2733_v62 = vpack.c.bf16 %v513_v61, %v512_v60  ;;  %vm1009_vm4 = vcmask 97280   ;;  %vm2952_vm0 = vmmov 1   ;;  %s3606_s15 = sld [smem:[#allocation10_spill]]  ;;  %s3610_s12 = sld [smem:[#allocation12_spill]] }
  0x44   : > { %2713 = vmatpush3.bf16.msra.mxu0 %v2712_v30  ;;  %v2730_v58 = vpack.c.bf16 %v511_v54, %v510_v53  ;;  %v339_v63 = vld [vmem:[#allocation2] sm:$0x3]  ;;  %v3211_v7 = vld [vmem:[#allocation8] sm:$0x3]  ;;  %s3611_s16 = sld [smem:[#allocation11_spill]]  ;;  %s3614_s22 = sld [smem:[#allocation15_spill]] }
  0x45   : > { %2704 = vmatpush3.bf16.msra.mxu1 %v2703_v21  ;;  %2714 = vmatprep.subr.bf16.mxu0 %v2944_v9  ;;  %v2358_v21 = vld [vmem:[%s3034_s27] ss:$0 sm:$0xff]  ;;  %s3616_s24 = sld [smem:[#allocation14_spill]]  ;;  %s3620_s2 = sld [smem:[#allocation13_spill]] }
  0x46   : > { %2705 = vmatprep.subr.bf16.mxu1 %v2944_v9  ;;  %715 = vrot.lane.b32.xlu1 %v3211_v7, %s2947_s28  ;;  %v2357_v26 = vld [vmem:[%s3029_s13] ss:$0 sm:$0xff]  ;;  %s3621_s28 = sld [smem:[#allocation16_spill]]  ;;  %s161_s17 = sadd.s32 1, %s2908_s17  }
  0x47   : > { %p158_p0 = scmp.ge.s32.totalorder %s161_s17, 4  }
  0x48   : > { %2716 = vmatpush3.bf16.msra.mxu0 %v2715_v33 }
  0x49   : > { %2707 = vmatpush3.bf16.msra.mxu1 %v2706_v24  ;;  %2717 = vmatprep.subr.bf16.mxu0 %v2944_v9 }
  0x4a   : > { %2720 = vmatprep.subr.bf16.mxu1 %v2944_v9 }
  0x4c   : > { %2719 = vmatpush3.bf16.msra.mxu0 %v2718_v47 }
  0x4d   : > { %2729 = vmatprep.subr.bf16.mxu0 %v2944_v9 }
  0xb8   : > { %v716_v12 = vpop.permute.xlu1 %715 }
  0xb9   : > { %v719_v15 = vsel %vm3578_vm8, 0.0, %v716_v12  ;;  %vm1012_vm8 = vcmask 105472  }
  0xba   : > { %v721_v18 = vsel %vm720_vm9, %v719_v15, 0.0  ;;  %vm997_vm9 = vcmask 64512   ;;  %v630_v15 = vld [vmem:[%s3039_s1] sm:$0xff] }
  0xbb   : > { %v3225_v20 = vrot.slane %v721_v18, %v3218_v14  ;;  %v3230_v22 = vrot.slane %v721_v18, %v3222_v19 }
  0xbd   : > { %858 = vbcast.lane.b32.xlu1 %v3225_v20, 272 }
  0xc1   : > { %862 = vbcast.lane.b32.xlu1 %v3230_v22, 272 }
  0xc5   : > { %874 = vbcast.lane.b32.xlu1 %v3225_v20, 274 }
  0xc9   : > { %882 = vbcast.lane.b32.xlu1 %v3225_v20, 275 }
  0xcd   : > { %890 = vbcast.lane.b32.xlu1 %v3225_v20, 276 }
  0xd1   : > { %898 = vbcast.lane.b32.xlu1 %v3225_v20, 277 }
  0xd5   : > { %906 = vbcast.lane.b32.xlu1 %v3225_v20, 278 }
  0xd9   : > { %914 = vbcast.lane.b32.xlu1 %v3225_v20, 279 }
  0xdd   : > { %922 = vbcast.lane.b32.xlu1 %v3225_v20, 280 }
  0xe1   : > { %930 = vbcast.lane.b32.xlu1 %v3225_v20, 281 }
  0xe5   : > { %938 = vbcast.lane.b32.xlu1 %v3225_v20, 282 }
  0xe9   : > { %946 = vbcast.lane.b32.xlu1 %v3225_v20, 283 }
  0xed   : > { %954 = vbcast.lane.b32.xlu1 %v3225_v20, 284 }
  0xf1   : > { %962 = vbcast.lane.b32.xlu1 %v3225_v20, 285 }
  0xf5   : > { %970 = vbcast.lane.b32.xlu1 %v3225_v20, 286 }
 0x112   : > { %v244_v37 = vpop.f32.mrb[0].mxu0 }
 0x113   : > { %v245_v38 = vadd.f32 %v2351_v34, %v244_v37  ;;  %v2489_v39 = vpop.f32.mrb[1].mxu0 }
 0x115   : > { %v248_v41 = vmax.f32 %v245_v38, 0.0 }
 0x117   : > { %2507 = vmatmul.mubr.msk.f32.vlgmr.msra.gmra.mrb[0].mxu1 %vm264_vm5, %v248_v41 }
 0x118   : > { %2722 = vmatpush3.bf16.msra.mxu1 %v2721_v40  ;;  %2540 = vmatprep.mubr.msk.f32.mxu1 %vm3579_vm3, %v2946_v11 }
 0x119   : > { %2723 = vmatprep.subr.bf16.mxu1 %v2944_v9 }
 0x11c   : > { %2725 = vmatpush3.bf16.msra.mxu1 %v2724_v44 }
 0x11d   : > { %2726 = vmatprep.subr.bf16.mxu1 %v2944_v9 }
 0x120   : > { %2728 = vmatpush3.bf16.msra.mxu1 %v2727_v50 }
 0x123   : > { %2541 = vmatmul.mubr.msk.f32.vlgmr.msra.gmra.mrb[2].mxu1 %vm3574_vm6, %v340_v51  ;;  %vm1000_vm6 = vcmask 72704  }
 0x12f   : > { %v3292_v46 = vpop.permute.xlu1 %858 }
 0x133   : > { %v863_v48 = vpop.permute.xlu1 %862 }
 0x1ea   : > { %v334_v55 = vpop.f32.mrb[0].mxu1 }
 0x1eb   : > { %v335_v56 = vadd.f32 %v2353_v52, %v334_v55  ;;  %v2508_v57 = vpop.f32.mrb[1].mxu1  ;;  %v875_v52 = vpop.permute.xlu1 %874 }
 0x1ed   : > { %v338_v59 = vmax.f32 %v335_v56, 0.0 }
 0x1ef   : > { %2526 = vmatmul.mubr.msk.f32.vlgmr.msra.gmra.mrb[2].mxu0 %vm264_vm5, %v338_v59  ;;  %v883_v56 = vpop.permute.xlu1 %882  ;;  %vm3583_vm5 = vcmask 56320  }
 0x1f0   : > { %2731 = vmatpush3.bf16.msra.mxu0 %v2730_v58  ;;  %2551 = vmatprep.mubr.msk.f32.mxu0 %vm3579_vm3, %v2946_v11 }
 0x1f1   : > { %2732 = vmatprep.subr.bf16.mxu0 %v2944_v9 }
 0x1f3   : > { %v891_v60 = vpop.permute.xlu1 %890 }
 0x1f4   : > { %2734 = vmatpush3.bf16.msra.mxu0 %v2733_v62 }
 0x1f5   : > { %2735 = vmatprep.subr.bf16.mxu0 %v2944_v9 }
 0x1f6   : > { %v498_v0 = vpop.f32.mrb[2].mxu1 }
 0x1f7   : > { %2552 = vmatmul.mubr.msk.f32.vlgmr.msra.gmra.mrb[4].mxu0 %vm3581_vm7, %v339_v63  ;;  %v2542_v6 = vpop.f32.mrb[3].mxu1  ;;  %vm1069_vm7 = vcmask 1046528  }
 0x1f8   : > { %2562 = vmatprep.mubr.msk.f32.mxu0 %vm3579_vm3, %v2946_v11  ;;  %vm1015_vm3 = vcmask 113664  }
 0x2c2   : > { %v424_v13 = vpop.f32.mrb[2].mxu0 }
 0x2c3   : > { %v499_v16 = vadd.f32 %v498_v0, %v424_v13  ;;  %v2527_v17 = vpop.f32.mrb[3].mxu0  ;;  %v899_v0 = vpop.permute.xlu1 %898 }
 0x2c4   : > { %v632_v17 = vld [vmem:[%s3039_s1 + $0x10] sm:$0xff] }
 0x2c5   : > { %v509_v27 = vadd.f32 %v2357_v26, %v499_v16  ;;  %v631_v16 = vld [vmem:[%s3039_s1 + $0x8] sm:$0xff] }
 0x2c6   : > { %v2736_v18 = vpack.c.bf16 %v631_v16, %v630_v15 }
 0x2c8   : > { %2737 = vmatpush3.bf16.msra.mxu0 %v2736_v18 }
 0x2c9   : > { %2738 = vmatprep.subr.bf16.mxu0 %v2944_v9 }
 0x2ca   : > { %v591_v23 = vpop.f32.mrb[4].mxu0 }
 0x2cb   : > { %v592_v24 = vadd.f32 %v2358_v21, %v591_v23  ;;  %v2553_v25 = vpop.f32.mrb[5].mxu0  ;;  %v633_v21 = vld [vmem:[%s3039_s1 + $0x18] sm:$0xff]  ;;  %v907_v23 = vpop.permute.xlu1 %906 }
 0x2cc   : > { %v2739_v25 = vpack.c.bf16 %v633_v21, %v632_v17 }
 0x2cd   : > { %603 = vrot.lane.b32.xlu0 %v592_v24, %s2948_s30  ;;  %v595_v28 = vadd.f32 %v592_v24, %v509_v27 }
 0x2ce   : > { %2740 = vmatpush3.bf16.msra.mxu0 %v2739_v25 }
 0x2cf   : > { %v2360_v29 = vmul.f32 -1.442695, %v595_v28  ;;  %2576 = vmatprep.subr.mxu0 %v2946_v11  ;;  %v915_v28 = vpop.permute.xlu1 %914 }
 0x2d1   : > { %2866 = vpow2.f32 %v2360_v29 }
 0x2db   : > { %v2867_v30 = vpop.eup %2866 }
 0x2dc   : > { %v599_v31 = vadd.f32 1.0, %v2867_v30 }
 0x2de   : > { %2868 = vrcp.f32 %v599_v31 }
 0x2e8   : > { %v3248_v32 = vpop.eup %2868 }
 0x33f   : > { %v604_v33 = vpop.permute.xlu0 %603 }
 0x340   : > { %v606_v34 = vmul.f32 %v3248_v32, %v604_v33  ;;  %v923_v33 = vpop.permute.xlu1 %922 }
 0x342   : > { %608 = vrot.lane.b32.xlu0 %v606_v34, %s2948_s30 }
 0x344   : > { %v931_v34 = vpop.permute.xlu1 %930 }
 0x346   : > { %866 = vbcast.lane.b32.xlu0 %v3225_v20, 273 }
 0x34a   : > { %619 = vrot.lane.b32.xlu0 %v339_v63, %s2949_s6 }
 0x34e   : > { %870 = vbcast.lane.b32.xlu0 %v3230_v22, 273 }
 0x352   : > { %878 = vbcast.lane.b32.xlu0 %v3230_v22, 274 }
 0x356   : > { %886 = vbcast.lane.b32.xlu0 %v3230_v22, 275 }
 0x35a   : > { %894 = vbcast.lane.b32.xlu0 %v3230_v22, 276 }
 0x35e   : > { %902 = vbcast.lane.b32.xlu0 %v3230_v22, 277 }
 0x362   : > { %910 = vbcast.lane.b32.xlu0 %v3230_v22, 278 }
 0x366   : > { %918 = vbcast.lane.b32.xlu0 %v3230_v22, 279 }
 0x36a   : > { %926 = vbcast.lane.b32.xlu0 %v3230_v22, 280 }
 0x36e   : > { %934 = vbcast.lane.b32.xlu0 %v3230_v22, 281 }
 0x372   : > { %942 = vbcast.lane.b32.xlu0 %v3230_v22, 282 }
 0x376   : > { %950 = vbcast.lane.b32.xlu0 %v3230_v22, 283 }
 0x37a   : > { %958 = vbcast.lane.b32.xlu0 %v3230_v22, 284 }
 0x37e   : > { %966 = vbcast.lane.b32.xlu0 %v3230_v22, 285 }
 0x382   : > { %974 = vbcast.lane.b32.xlu0 %v3230_v22, 286 }
 0x386   : > { %738 = vbcast.lane.b32.xlu0 %v3225_v20, 257 }
 0x38a   : > { %742 = vbcast.lane.b32.xlu0 %v3230_v22, 257 }
 0x38e   : > { %750 = vbcast.lane.b32.xlu0 %v3230_v22, 258 }
 0x392   : > { %758 = vbcast.lane.b32.xlu0 %v3230_v22, 259 }
 0x396   : > { %766 = vbcast.lane.b32.xlu0 %v3230_v22, 260 }
 0x39a   : > { %774 = vbcast.lane.b32.xlu0 %v3230_v22, 261 }
 0x39e   : > { %786 = vbcast.lane.b32.xlu0 %v3225_v20, 263 }
 0x3a2   : > { %794 = vbcast.lane.b32.xlu0 %v3225_v20, 264 }
 0x3a6   : > { %802 = vbcast.lane.b32.xlu0 %v3225_v20, 265 }
 0x3aa   : > { %810 = vbcast.lane.b32.xlu0 %v3225_v20, 266 }
 0x3ae   : > { %818 = vbcast.lane.b32.xlu0 %v3225_v20, 267 }
 0x3b2   : > { %826 = vbcast.lane.b32.xlu0 %v3225_v20, 268 }
 0x3b4   : > { %v609_v35 = vpop.permute.xlu0 %608 }
 0x3b5   : > { %v611_v36 = vadd.f32 %v609_v35, %v509_v27  ;;  %v939_v35 = vpop.permute.xlu1 %938 }
 0x3b6   : > { %834 = vbcast.lane.b32.xlu0 %v3225_v20, 269 }
 0x3b7   : > { %2870 = vtanh.f32 %v611_v36 }
 0x3b8   : > { %v3281_v37 = vpop.permute.xlu0 %866 }
 0x3b9   : > { %v1020_v36 = vsel %vm976_vm10, %v3292_v46, %v3281_v37 }
 0x3bc   : > { %v3283_v38 = vpop.permute.xlu0 %619 }
 0x3c0   : > { %v871_v39 = vpop.permute.xlu0 %870 }
 0x3c1   : > { %v2871_v40 = vpop.eup %2870  ;;  %v1021_v49 = vsel %vm976_vm10, %v863_v48, %v871_v39  ;;  %v947_v39 = vpop.permute.xlu1 %946  ;;  %v1058_v48 = vld [vmem:[%s3049_s9] sm:$0xff] }
 0x3c2   : > { %615 = vrot.lane.b32.xlu1 %v2871_v40, %s2950_s4  ;;  %v1022_v40 = vsel %vm979_vm11, %v1020_v36, %v875_v52  ;;  %v1060_v52 = vld [vmem:[%s3049_s9 + $0x10] sm:$0xff] }
 0x3c4   : > { %v879_v41 = vpop.permute.xlu0 %878 }
 0x3c5   : > { %v1023_v51 = vsel %vm979_vm11, %v1021_v49, %v879_v41  ;;  %v955_v41 = vpop.permute.xlu1 %954  ;;  %v1059_v49 = vld [vmem:[%s3049_s9 + $0x8] sm:$0xff] }
 0x3c6   : > { %727 = vbcast.lane.b32.xlu1 %v3225_v20, 256  ;;  %v2741_v46 = vpack.c.bf16 %v1059_v49, %v1058_v48 }
 0x3c8   : > { %v887_v42 = vpop.permute.xlu0 %886  ;;  %2742 = vmatprep.subr.bf16.mxu1 %v2741_v46 }
 0x3c9   : > { %v1025_v53 = vsel %vm982_vm12, %v1023_v51, %v887_v42  ;;  %v613_v51 = vsub.f32 1.0, %v3248_v32  ;;  %2744 = vmatpush3.bf16.msra.mxu1 %v2741_v46 }
 0x3ca   : > { %734 = vbcast.lane.b32.xlu1 %v3230_v22, 256 }
 0x3cc   : > { %v895_v43 = vpop.permute.xlu0 %894 }
 0x3cd   : > { %v1027_v55 = vsel %vm985_vm13, %v1025_v53, %v895_v43  ;;  %v1061_v53 = vld [vmem:[%s3049_s9 + $0x18] sm:$0x7f] }
 0x3ce   : > { %746 = vbcast.lane.b32.xlu1 %v3225_v20, 258 }
 0x3d0   : > { %v903_v44 = vpop.permute.xlu0 %902 }
 0x3d1   : > { %v1029_v57 = vsel %vm988_vm14, %v1027_v55, %v903_v44  ;;  %v963_v44 = vpop.permute.xlu1 %962  ;;  %v2745_v55 = vpack.c.bf16 %v1061_v53, %v1060_v52 }
 0x3d2   : > { %754 = vbcast.lane.b32.xlu1 %v3225_v20, 259 }
 0x3d4   : > { %v911_v45 = vpop.permute.xlu0 %910 }
 0x3d5   : > { %v1031_v59 = vsel %vm991_vm15, %v1029_v57, %v911_v45  ;;  %v971_v37 = vpop.permute.xlu1 %970 }
 0x3d6   : > { %762 = vbcast.lane.b32.xlu1 %v3225_v20, 260 }
 0x3d8   : > { %v919_v47 = vpop.permute.xlu0 %918 }
 0x3d9   : > { %v1033_v61 = vsel %vm3583_vm5, %v1031_v59, %v919_v47 }
 0x3da   : > { %770 = vbcast.lane.b32.xlu1 %v3225_v20, 261 }
 0x3dc   : > { %v927_v50 = vpop.permute.xlu0 %926 }
 0x3dd   : > { %v1035_v63 = vsel %vm997_vm9, %v1033_v61, %v927_v50 }
 0x3de   : > { %778 = vbcast.lane.b32.xlu1 %v3225_v20, 262 }
 0x3e0   : > { %v935_v54 = vpop.permute.xlu0 %934 }
 0x3e1   : > { %v1037_v6 = vsel %vm1000_vm6, %v1035_v63, %v935_v54 }
 0x3e2   : > { %782 = vbcast.lane.b32.xlu1 %v3230_v22, 262 }
 0x3e4   : > { %v943_v58 = vpop.permute.xlu0 %942 }
 0x3e5   : > { %v1039_v13 = vsel %vm1003_vm1, %v1037_v6, %v943_v58 }
 0x3e6   : > { %790 = vbcast.lane.b32.xlu1 %v3230_v22, 263 }
 0x3e8   : > { %v951_v62 = vpop.permute.xlu0 %950 }
 0x3e9   : > { %v1041_v24 = vsel %vm1006_vm2, %v1039_v13, %v951_v62 }
 0x3ea   : > { %798 = vbcast.lane.b32.xlu1 %v3230_v22, 264 }
 0x3ec   : > { %v959_v12 = vpop.permute.xlu0 %958 }
 0x3ed   : > { %v1043_v27 = vsel %vm1009_vm4, %v1041_v24, %v959_v12 }
 0x3ee   : > { %806 = vbcast.lane.b32.xlu1 %v3230_v22, 265 }
 0x3f0   : > { %v967_v26 = vpop.permute.xlu0 %966 }
 0x3f1   : > { %v1045_v29 = vsel %vm1012_vm8, %v1043_v27, %v967_v26 }
 0x3f2   : > { %814 = vbcast.lane.b32.xlu1 %v3230_v22, 266 }
 0x3f4   : > { %v975_v30 = vpop.permute.xlu0 %974 }
 0x3f5   : > { %v1047_v31 = vsel %vm1015_vm3, %v1045_v29, %v975_v30 }
 0x3f6   : > { %822 = vbcast.lane.b32.xlu1 %v3230_v22, 267 }
 0x3f8   : > { %v739_v12 = vpop.permute.xlu0 %738 }
 0x3fa   : > { %830 = vbcast.lane.b32.xlu1 %v3230_v22, 268 }
 0x3fc   : > { %v743_v15 = vpop.permute.xlu0 %742 }
 0x3fe   : > { %838 = vbcast.lane.b32.xlu1 %v3230_v22, 269 }
 0x400   : > { %v751_v17 = vpop.permute.xlu0 %750 }
 0x402   : > { %846 = vbcast.lane.b32.xlu1 %v3230_v22, 270 }
 0x404   : > { %v759_v21 = vpop.permute.xlu0 %758 }
 0x406   : > { %854 = vbcast.lane.b32.xlu1 %v3230_v22, 271  ;;  %v1024_v22 = vsel %vm982_vm12, %v1022_v40, %v883_v56  ;;  %v622_v56 = vmul.f32 %v3248_v32, %v3283_v38 }
 0x407   : > { %v1026_v42 = vsel %vm985_vm13, %v1024_v22, %v891_v60 }
 0x408   : > { %v1028_v43 = vsel %vm988_vm14, %v1026_v42, %v899_v0  ;;  %v767_v24 = vpop.permute.xlu0 %766 }
 0x409   : > { %v1030_v45 = vsel %vm991_vm15, %v1028_v43, %v907_v23 }
 0x40a   : > { %1052 = vrot.lane.b32.xlu1 %v1047_v31, %s2951_s10  ;;  %v1032_v47 = vsel %vm3583_vm5, %v1030_v45, %v915_v28  ;;  %vm2746_vm5 = vmpackc.low %vm1069_vm7, %vm2952_vm0  ;;  %vm3597_vm0 = vcmask 56320   ;;  %vm3598_vm7 = vcmask 254976  }
 0x40b   : > { %v1034_v50 = vsel %vm997_vm9, %v1032_v47, %v923_v33  ;;  %2747 = vmatprep.subr.msk.bf16.mxu1 %vm2746_vm5, %v2745_v55 }
 0x40c   : > { %v1036_v57 = vsel %vm1000_vm6, %v1034_v50, %v931_v34  ;;  %2750 = vmatpush3.bf16.msk.msra.mxu1 %vm2746_vm5, %v2745_v55  ;;  %v775_v26 = vpop.permute.xlu0 %774 }
 0x40d   : > { %v1038_v60 = vsel %vm1003_vm1, %v1036_v57, %v939_v35  ;;  %2581 = vmatprep.subr.mxu1 %v2946_v11 }
 0x40e   : > { %v1040_v61 = vsel %vm1006_vm2, %v1038_v60, %v947_v39 }
 0x40f   : > { %v1042_v32 = vsel %vm1009_vm4, %v1040_v61, %v955_v41 }
 0x410   : > { %v1044_v38 = vsel %vm1012_vm8, %v1042_v32, %v963_v44 }
 0x411   : > { %v1046_v62 = vsel %vm1015_vm3, %v1044_v38, %v971_v37 }
 0x434   : > { %v616_v54 = vpop.permute.xlu1 %615 }
 0x435   : > { %v618_v58 = vmul.f32 %v616_v54, %v613_v51 }
 0x437   : > { %v623_v59 = vadd.f32 %v622_v56, %v618_v58 }
 0x438   : > { %v728_v63 = vpop.permute.xlu1 %727 }
 0x439   : > { %625 = vrot.lane.b32.xlu0 %v623_v59, %s2950_s4  ;;  %v977_v39 = vsel %vm976_vm10, %v728_v63, %v739_v12 }
 0x43c   : > { %v735_v0 = vpop.permute.xlu1 %734 }
 0x43d   : > { %842 = vbcast.lane.b32.xlu0 %v3225_v20, 270  ;;  %v978_v47 = vsel %vm976_vm10, %v735_v0, %v743_v15  ;;  %vm3599_vm10 = vcmask 261120  }
 0x43e   : > { %v981_v37 = vsel %vm979_vm11, %v978_v47, %v751_v17 }
 0x43f   : > { %v984_v51 = vsel %vm982_vm12, %v981_v37, %v759_v21 }
 0x440   : > { %v747_v6 = vpop.permute.xlu1 %746  ;;  %v987_v54 = vsel %vm985_vm13, %v984_v51, %v767_v24  ;;  %v2367_v51 = vld [vmem:[%s3606_s15] ss:$0 sm:$0xff]  ;;  %s3625_s15 = sld [smem:[#allocation17_spill]] }
 0x441   : > { %850 = vbcast.lane.b32.xlu0 %v3225_v20, 271  ;;  %v787_v20 = vpop.permute.xlu0 %786  ;;  %v980_v40 = vsel %vm979_vm11, %v977_v39, %v747_v6  ;;  %vm3600_vm11 = vmmov 0   ;;  %v990_v57 = vsel %vm988_vm14, %v987_v54, %v775_v26 }
 0x444   : > { %v755_v13 = vpop.permute.xlu1 %754 }
 0x445   : > { %1050 = vrot.lane.b32.xlu0 %v1046_v62, %s2951_s10  ;;  %v795_v29 = vpop.permute.xlu0 %794  ;;  %v983_v22 = vsel %vm982_vm12, %v980_v40, %v755_v13  ;;  %vm3601_vm12 = vmmov %vm3597_vm0  ;;  %s3624_s10 = sld [smem:[#allocation18_spill]] }
 0x448   : > { %v763_v16 = vpop.permute.xlu1 %762 }
 0x449   : > { %v803_v31 = vpop.permute.xlu0 %802  ;;  %v986_v41 = vsel %vm985_vm13, %v983_v22, %v763_v16  ;;  %vm1062_vm13 = vcmask 252928  }
 0x44c   : > { %v771_v18 = vpop.permute.xlu1 %770 }
 0x44d   : > { %v811_v34 = vpop.permute.xlu0 %810  ;;  %v989_v43 = vsel %vm988_vm14, %v986_v41, %v771_v18  ;;  %vm3604_vm14 = vcmask 130048  }
 0x450   : > { %v779_v23 = vpop.permute.xlu1 %778 }
 0x451   : > { %v819_v36 = vpop.permute.xlu0 %818  ;;  %v992_v44 = vsel %vm991_vm15, %v989_v43, %v779_v23 }
 0x452   : > { %v995_v48 = vsel %vm3597_vm0, %v992_v44, %v787_v20  ;;  %v2953_v20 = vmov 1966171168  }
 0x453   : > { %v998_v46 = vsel %vm997_vm9, %v995_v48, %v795_v29 }
 0x454   : > { %v783_v25 = vpop.permute.xlu1 %782  ;;  %v1001_v52 = vsel %vm1000_vm6, %v998_v46, %v803_v31 }
 0x455   : > { %v827_v45 = vpop.permute.xlu0 %826  ;;  %v1004_v56 = vsel %vm1003_vm1, %v1001_v52, %v811_v34  ;;  %v993_v58 = vsel %vm991_vm15, %v990_v57, %v783_v25  ;;  %vm3609_vm15 = vcmask 58368  }
 0x456   : > { %v1007_v59 = vsel %vm1006_vm2, %v1004_v56, %v819_v36  ;;  %vm3612_vm5 = vmmov %vm3609_vm15 }
 0x457   : > { %v1010_v63 = vsel %vm1009_vm4, %v1007_v59, %v827_v45  ;;  %v2366_v45 = vld [vmem:[%s3054_s20] ss:$0 sm:$0xff]  ;;  %v1222_v59 = vrot.slane %v3019_v5, %v3222_v19  ;;  %vm3613_vm0 = vmmov %vm3612_vm5 }
 0x458   : > { %v791_v27 = vpop.permute.xlu1 %790 }
 0x459   : > { %v835_v50 = vpop.permute.xlu0 %834  ;;  %v996_v61 = vsel %vm3601_vm12, %v993_v58, %v791_v27  ;;  %vm3619_vm12 = vcmask 392192  }
 0x45a   : > { %v1013_v15 = vsel %vm1012_vm8, %v1010_v63, %v835_v50 }
 0x45c   : > { %v799_v28 = vpop.permute.xlu1 %798 }
 0x45d   : > { %v999_v38 = vsel %vm997_vm9, %v996_v61, %v799_v28  ;;  %v1150_v28 = vunpack.c.l.s4 %v2953_v20  ;;  %v2954_v61 = vmov 0  }
 0x45e   : > { %2865 = vset.pattern.permute.xlu1 %v2954_v61  ;;  %2864 = vset.pattern.permute.xlu0 %v2954_v61 }
 0x45f   : > { %v1151_v29 = vunpack.c.0.s8 %v1150_v28 }
 0x460   : > { %v807_v30 = vpop.permute.xlu1 %806 }
 0x461   : > { %v1002_v62 = vsel %vm1000_vm6, %v999_v38, %v807_v30  ;;  %vm3602_vm6 = vcmask 121856   ;;  %v2361_v30 = vld [vmem:[%s3044_s7] ss:$0 sm:$0xff]  ;;  %v1154_v31 = vsub.s32 %v1151_v29, %v3215_v10 }
 0x464   : > { %v815_v33 = vpop.permute.xlu1 %814 }
 0x465   : > { %v1005_v0 = vsel %vm1003_vm1, %v1002_v62, %v815_v33  ;;  %vm3603_vm1 = vmmov %vm3602_vm6 }
 0x468   : > { %v823_v35 = vpop.permute.xlu1 %822 }
 0x469   : > { %v1008_v12 = vsel %vm1006_vm2, %v1005_v0, %v823_v35  ;;  %vm3605_vm2 = vmmov %vm3604_vm14 }
 0x46c   : > { %v831_v42 = vpop.permute.xlu1 %830 }
 0x46d   : > { %v1011_v13 = vsel %vm1009_vm4, %v1008_v12, %v831_v42  ;;  %v1239_v12 = vand.u32 127, %v722_v8 }
 0x470   : > { %v839_v49 = vpop.permute.xlu1 %838 }
 0x471   : > { %v1014_v16 = vsel %vm1012_vm8, %v1011_v13, %v839_v49  ;;  %v1242_v13 = vsub.s32 %v1239_v12, %v3215_v10  ;;  %vm1248_vm8 = vcmask 1041409  }
 0x474   : > { %v847_v53 = vpop.permute.xlu1 %846 }
 0x475   : > { %v1017_v21 = vsel %vm1015_vm3, %v1014_v16, %v847_v53 }
 0x478   : > { %v855_v32 = vpop.permute.xlu1 %854 }
 0x479   : > { %v1019_v25 = vsel %vm3603_vm1, %v1017_v21, %v855_v32 }
 0x47c   : > { %v1053_v17 = vpop.permute.xlu1 %1052 }
 0x47d   : > { %v1057_v27 = vsel %vm3605_vm2, %v1019_v25, %v1053_v17 }
 0x4ab   : > { %v3367_v55 = vpop.permute.xlu0 %625 }
 0x4ac   : > { %629 = vst.msk [vmem:[#allocation2] sm:$0x3] %vm3598_vm7, %v3367_v55  ;;  %2563 = vmatmul.mubr.msk.f32.vlgmr.msra.gmra.mrb[6].mxu0 %vm3599_vm10, %v3367_v55  ;;  %vm3615_vm7 = vmmov %vm3613_vm0 }
 0x4ad   : > { %2577 = vmatpush3.msra.mxu0 %v3001_v1  ;;  %2578 = vmatprep.mubr.msk.f32.mxu0 %vm3600_vm11, %v2946_v11 }
 0x4ae   : > { %2751 = vmatprep.subr.bf16.mxu0 %v2944_v9 }
 0x4af   : > { %v843_v60 = vpop.permute.xlu0 %842 }
 0x4b0   : > { %v1016_v18 = vsel %vm1015_vm3, %v1013_v15, %v843_v60  ;;  %vm3607_vm3 = vmmov %vm3599_vm10  ;;  %v1215_v60 = vrot.slane %v3019_v5, %v3218_v14  ;;  %vm3618_vm10 = vcmask 386048  }
 0x4b1   : > { %vm3608_vm4 = vmmov %vm3607_vm3 }
 0x4b2   : > { %vm3627_vm1 = vmmov %vm3607_vm3 }
 0x4b3   : > { %v851_v6 = vpop.permute.xlu0 %850  ;;  %vm3629_vm2 = vmmov %vm3627_vm1 }
 0x4b4   : > { %v1018_v23 = vsel %vm3602_vm6, %v1016_v18, %v851_v6  ;;  %vm3623_vm6 = vmmov %vm3607_vm3 }
 0x4b7   : > { %v1051_v24 = vpop.permute.xlu0 %1050 }
 0x4b8   : > { %v1056_v26 = vsel %vm3604_vm14, %v1018_v23, %v1051_v24  ;;  %vm3628_vm14 = vcmask 254976  }
 0x4b9   : > { %2573 = vmatprep.mubr.msk.f32.mxu1 %vm1062_vm13, %v1056_v26 }
 0x4ba   : > { %2574 = vmatmul.mubr.msk.f32.vlgmr.msra.gmra.mrb[4].mxu1 %vm1062_vm13, %v1057_v27  ;;  %vm3622_vm13 = vmmov %vm3607_vm3 }
 0x4bb   : > { %2582 = vmatpush3.msra.mxu1 %v3003_v2  ;;  %2583 = vmatprep.mubr.msk.f32.mxu1 %vm3600_vm11, %v2946_v11 }
 0x4bc   : > { %2757 = vmatprep.subr.bf16.mxu1 %v2944_v9 }
 0x57f   : > { %v709_v33 = vpop.f32.mrb[6].mxu0 }
 0x580   : > { %v710_v34 = vadd.f32 %v2361_v30, %v709_v33  ;;  %v2564_v35 = vpop.f32.mrb[7].mxu0 }
 0x582   : > { %v1155_v36 = vrot.slane %v710_v34, %v1154_v31 }
 0x584   : > { %v1156_v39 = vcombine.high %v1155_v36, %v1155_v36  ;;  %v1163_v40 = vrot.slane %v1155_v36, %v1154_v31 }
 0x586   : > { %v1170_v22 = vrot.slane %v1156_v39, %v1154_v31  ;;  %v1174_v42 = vrot.slane %v1163_v40, %v3218_v14 }
 0x588   : > { %v1178_v41 = vrot.slane %v1170_v22, %v3218_v14  ;;  %v1181_v47 = vadd.f32 %v1174_v42, %v3010_v3 }
 0x58a   : > { %v1182_v43 = vadd.f32 %v1178_v41, %v3012_v4 }
 0x58d   : > { %v2575_v44 = vpop.f32.mrb[4].mxu1 }
 0x58e   : > { %v1184_v48 = vadd.f32 %v2575_v44, %v1182_v43  ;;  %v1139_v49 = vpop.f32.mrb[5].mxu1  ;;  %v1484_v44 = vld [vmem:[%s3610_s12] sm:$0xff] }
 0x58f   : > { %v1183_v37 = vadd.f32 %v1181_v47, %v1139_v49  ;;  %v1478_v47 = vld [vmem:[%s3611_s16] sm:$0xff] }
 0x590   : > { %v1193_v46 = vadd.f32 %v2366_v45, %v1184_v48  ;;  %v1479_v48 = vld [vmem:[%s3611_s16 + $0x8] sm:$0xff] }
 0x591   : > { %v1192_v50 = vadd.f32 %v2366_v45, %v1183_v37  ;;  %v1485_v45 = vld [vmem:[%s3610_s12 + $0x8] sm:$0xff] }
 0x592   : > { %2872 = vtanh.f32 %v1193_v46  ;;  %v2752_v46 = vpack.c.bf16 %v1485_v45, %v1484_v44 }
 0x593   : > { %2874 = vtanh.f32 %v1192_v50 }
 0x59c   : > { %v2873_v52 = vpop.eup %2872 }
 0x59d   : > { %v2875_v53 = vpop.eup %2874  ;;  %v1204_v54 = vmul.f32 %v2873_v52, %v2367_v51  ;;  %v1487_v52 = vld [vmem:[%s3610_s12 + $0x18] sm:$0xff] }
 0x59e   : > { %v1203_v56 = vmul.f32 %v2875_v53, %v2367_v51  ;;  %v1486_v51 = vld [vmem:[%s3610_s12 + $0x10] sm:$0xff] }
 0x59f   : > { %v1208_v57 = vsel %vm3607_vm3, %v1204_v54, 0.0  ;;  %v1480_v53 = vld [vmem:[%s3611_s16 + $0x10] sm:$0xff]  ;;  %v1481_v54 = vld [vmem:[%s3611_s16 + $0x18] sm:$0xff] }
 0x5a0   : > { %1209 = vadd.xlane.f32.xlu1 %v1208_v57  ;;  %v1205_v58 = vsel %vm3608_vm4, %v1203_v56, 0.0  ;;  %vm3634_vm4 = vmmov %vm3628_vm14 }
 0x5a1   : > { %1206 = vadd.xlane.f32.xlu0 %v1205_v58  ;;  %v2755_v58 = vpack.c.bf16 %v1487_v52, %v1486_v51  ;;  %v1846_v51 = vld [vmem:[%s3624_s10] sm:$0xff]  ;;  %v1847_v52 = vld [vmem:[%s3624_s10 + $0x8] sm:$0xff] }
 0x5b1   : > { %1224 = vbcast.lane.b32.xlu1 %v1222_v59, 256  ;;  %v2761_v59 = vpack.c.bf16 %v1481_v54, %v1480_v53  ;;  %v2779_v53 = vpack.c.bf16 %v1847_v52, %v1846_v51  ;;  %v1842_v54 = vld [vmem:[%s3625_s15 + $0x8] sm:$0xff] }
 0x5b7   : > { %1217 = vbcast.lane.b32.xlu0 %v1215_v60, 256  ;;  %v1483_v60 = vld [vmem:[%s3611_s16 + $0x28] sm:$0xff] }
 0x62d   : > { %v1210_v32 = vpop.xlane.xlu1 %1209 }
 0x62e   : > { %v1207_v38 = vpop.xlane.xlu0 %1206 }
 0x631   : > { %v1225_v62 = vpop.permute.xlu1 %1224 }
 0x632   : > { %v1229_v63 = vmul.f32 %v1225_v62, %v1210_v32  ;;  %v1218_v0 = vpop.permute.xlu0 %1217  ;;  %v1643_v32 = vld [vmem:[%s3614_s22] sm:$0xff] }
 0x633   : > { %v1228_v6 = vmul.f32 %v1218_v0, %v1207_v38  ;;  %v1644_v38 = vld [vmem:[%s3614_s22 + $0x8] sm:$0xff] }
 0x634   : > { %1236 = vperm.xlu1 %2865, %v1229_v63   ;;  %v2767_v62 = vpack.c.bf16 %v1644_v38, %v1643_v32  ;;  %v1639_v0 = vld [vmem:[%s3616_s24 + $0x8] sm:$0xff]  ;;  %v1845_v38 = vld [vmem:[#allocation5] sm:$0x3] }
 0x635   : > { %1233 = vperm.xlu0 %2864, %v1228_v6  }
 0x6b3   : > { %v1237_v15 = vpop.permute.xlu1 %1236 }
 0x6b4   : > { %v1247_v16 = vrot.slane %v1237_v15, %v1242_v13  ;;  %v1234_v17 = vpop.permute.xlu0 %1233 }
 0x6b5   : > { %v1243_v18 = vrot.slane %v1234_v17, %v1242_v13 }
 0x6b7   : > { %v1249_v21 = vsel %vm1248_vm8, %v1247_v16, %v1243_v18 }
 0x6b8   : > { %v1252_v23 = vsel %vm3609_vm15, %v1249_v21, -inf  ;;  %vm3636_vm15 = vmmov %vm3627_vm1 }
 0x6b9   : > { %1253 = vmax.xlane.f32.xlu1 %v1252_v23  ;;  %v1645_v23 = vld [vmem:[%s3614_s22 + $0x10] sm:$0xff] }
 0x746   : > { %v1254_v24 = vpop.xlane.xlu1 %1253 }
 0x747   : > { %v1259_v25 = vrot.slane %v1254_v24, %v3218_v14  ;;  %v1263_v26 = vrot.slane %v1254_v24, %v3222_v19  ;;  %v1646_v24 = vld [vmem:[%s3614_s22 + $0x18] sm:$0xff] }
 0x749   : > { %v1266_v27 = vsub.f32 %v1228_v6, %v1259_v25  ;;  %v1267_v20 = vsub.f32 %v1229_v63, %v1263_v26  ;;  %v1638_v63 = vld [vmem:[%s3616_s24] sm:$0xff]  ;;  %v2770_v25 = vpack.c.bf16 %v1646_v24, %v1645_v23  ;;  %v1640_v26 = vld [vmem:[%s3616_s24 + $0x10] sm:$0xff] }
 0x74a   : > { %v2773_v16 = vpack.c.bf16 %v1639_v0, %v1638_v63  ;;  %v2011_v0 = vld [vmem:[#allocation6] sm:$0x3] }
 0x74b   : > { %v1268_v8 = vmul.f32 1.442695, %v1266_v27  ;;  %v1270_v10 = vmul.f32 1.442695, %v1267_v20  ;;  %v1641_v27 = vld [vmem:[%s3616_s24 + $0x18] sm:$0xff] }
 0x74c   : > { %v2776_v20 = vpack.c.bf16 %v1641_v27, %v1640_v26 }
 0x74d   : > { %2876 = vpow2.f32 %v1268_v8  ;;  %v1642_v8 = vld [vmem:[#allocation3] sm:$0x3] }
 0x74e   : > { %2878 = vpow2.f32 %v1270_v10 }
 0x757   : > { %v2877_v28 = vpop.eup %2876 }
 0x758   : > { %1275 = vperm.xlu0 %2864, %v2877_v28   ;;  %v2879_v29 = vpop.eup %2878 }
 0x75c   : > { %1278 = vperm.xlu0 %2864, %v2879_v29  }
 0x7d7   : > { %v1276_v30 = vpop.permute.xlu0 %1275 }
 0x7d8   : > { %v1283_v33 = vrot.slane %v1276_v30, %v1242_v13 }
 0x7db   : > { %v1279_v31 = vpop.permute.xlu0 %1278 }
 0x7dc   : > { %v1287_v34 = vrot.slane %v1279_v31, %v1242_v13 }
 0x7de   : > { %v1288_v35 = vsel %vm1248_vm8, %v1287_v34, %v1283_v33 }
 0x7df   : > { %v1290_v36 = vsel %vm3612_vm5, %v1288_v35, 0.0  ;;  %vm3637_vm5 = vmmov %vm3634_vm4 }
 0x7e0   : > { %1291 = vadd.xlane.f32.xlu0 %v1290_v36  ;;  %v2375_v36 = vld [vmem:[%s3621_s28] ss:$0 sm:$0xff]  ;;  %s3632_s28 = sld [smem:[#allocation20_spill]] }
 0x86d   : > { %v1292_v39 = vpop.xlane.xlu0 %1291 }
 0x86e   : > { %2880 = vrcp.f32 %v1292_v39 }
 0x878   : > { %v2881_v40 = vpop.eup %2880 }
 0x879   : > { %v1302_v22 = vrot.slane %v2881_v40, %v3222_v19  ;;  %v1298_v41 = vrot.slane %v2881_v40, %v3218_v14  ;;  %v2758_v14 = vpack.c.bf16 %v1479_v48, %v1478_v47 }
 0x87b   : > { %v1306_v42 = vmul.f32 %v2879_v29, %v1302_v22  ;;  %v1305_v43 = vmul.f32 %v2877_v28, %v1298_v41  ;;  %v2372_v28 = vld [vmem:[%s3620_s2] ss:$0 sm:$0xff]  ;;  %s3630_s2 = sld [smem:[#allocation19_spill]] }
 0x87d   : > { %1313 = vperm.xlu1 %2865, %v1306_v42   ;;  %1310 = vperm.xlu0 %2864, %v1305_v43   ;;  %v1808_v42 = vld [vmem:[#allocation4] sm:$0x3] }
 0x8fc   : > { %v1314_v49 = vpop.permute.xlu1 %1313  ;;  %v1311_v37 = vpop.permute.xlu0 %1310 }
 0x8fd   : > { %v1322_v50 = vrot.slane %v1314_v49, %v1242_v13  ;;  %v1318_v19 = vrot.slane %v1311_v37, %v1242_v13 }
 0x8ff   : > { %v1323_v56 = vsel %vm1248_vm8, %v1322_v50, %v1318_v19  ;;  %2579 = vmatmul.mubr.msk.f32.vlgmr.msra.gmra.mrb[8].mxu0 %vm997_vm9, %v1318_v19  ;;  %2584 = vmatmul.mubr.msk.f32.vlgmr.msra.gmra.mrb[6].mxu1 %vm997_vm9, %v1322_v50  ;;  %vm3617_vm9 = vmmov %vm3607_vm3 }
 0x900   : > { %v1325_v57 = vadd.f32 %v1323_v56, %v3211_v7  ;;  %2288 = vst.msk [vmem:[%s2287_s23] sm:$0x3] %vm3613_vm0, %v1323_v56  ;;  %2753 = vmatpush3.bf16.msra.mxu0 %v2752_v46  ;;  %2594 = vmatprep.mubr.msk.f32.mxu0 %vm3600_vm11, %v2946_v11  ;;  %v1482_v7 = vld [vmem:[%s3611_s16 + $0x20] sm:$0xff]  ;;  %v1848_v56 = vld [vmem:[%s3624_s10 + $0x10] sm:$0xff]  ;;  %s3626_s23 = sld [smem:[#allocation22_spill]]  ;;  %vm3631_vm3 = vmmov %vm3619_vm12 }
 0x901   : > { %2754 = vmatprep.subr.bf16.mxu0 %v2944_v9  ;;  %2759 = vmatpush3.bf16.msra.mxu1 %v2758_v14  ;;  %v2764_v61 = vpack.c.bf16 %v1483_v60, %v1482_v7  ;;  %v1841_v14 = vld [vmem:[%s3625_s15] sm:$0xff]  ;;  %v1844_v7 = vld [vmem:[%s3625_s15 + $0x18] sm:$0xff]  ;;  %vm3638_vm0 = vmmov %vm3627_vm1 }
 0x902   : > { %1326 = vst.msk [vmem:[#allocation8] sm:$0x3] %vm3615_vm7, %v1325_v57  ;;  %2760 = vmatprep.subr.bf16.mxu1 %v2944_v9  ;;  %2609 = vmatprep.mubr.msk.f32.mxu1 %vm3600_vm11, %v2946_v11  ;;  %v1849_v57 = vld [vmem:[%s3624_s10 + $0x18] sm:$0xff]  ;;  %vm3639_vm7 = vmmov %vm3634_vm4 }
 0x903   : > { %v2782_v60 = vpack.c.bf16 %v1849_v57, %v1848_v56 }
 0x904   : > { %2756 = vmatpush3.bf16.msra.mxu0 %v2755_v58  ;;  %v2785_v58 = vpack.c.bf16 %v1842_v54, %v1841_v14 }
 0x905   : > { %2762 = vmatpush3.bf16.msra.mxu1 %v2761_v59  ;;  %2766 = vmatprep.subr.bf16.mxu0 %v2944_v9  ;;  %v1843_v59 = vld [vmem:[%s3625_s15 + $0x10] sm:$0xff] }
 0x906   : > { %2763 = vmatprep.subr.bf16.mxu1 %v2944_v9  ;;  %v2129_v23 = vld [vmem:[%s3626_s23 + $0x20] sm:$0xff]  ;;  %v2130_v24 = vld [vmem:[%s3626_s23 + $0x28] sm:$0xff] }
 0x907   : > { %2595 = vmatmul.mubr.msk.f32.vlgmr.msra.gmra.mrb[10].mxu0 %vm3617_vm9, %v3367_v55 }
 0x908   : > { %2620 = vmatprep.mubr.msk.f32.mxu0 %vm3600_vm11, %v2946_v11  ;;  %2768 = vmatpush3.bf16.msra.mxu0 %v2767_v62 }
 0x909   : > { %2765 = vmatpush3.bf16.msra.mxu1 %v2764_v61  ;;  %2769 = vmatprep.subr.bf16.mxu0 %v2944_v9  ;;  %v2788_v61 = vpack.c.bf16 %v1844_v7, %v1843_v59 }
 0x90a   : > { %2772 = vmatprep.subr.bf16.mxu1 %v2944_v9 }
 0x90c   : > { %2771 = vmatpush3.bf16.msra.mxu0 %v2770_v25  ;;  %v2803_v25 = vpack.c.bf16 %v2130_v24, %v2129_v23 }
 0x90d   : > { %2778 = vmatprep.subr.bf16.mxu0 %v2944_v9 }
 0x90f   : > { %2621 = vmatmul.mubr.msk.f32.vlgmr.msra.gmra.mrb[12].mxu0 %vm3622_vm13, %v1642_v8  ;;  %v2379_v8 = vld [vmem:[%s3630_s2] ss:$0 sm:$0xff]  ;;  %s3633_s2 = sld [smem:[#allocation21_spill]] }
 0x910   : > { %2642 = vmatprep.mubr.msk.f32.mxu0 %vm3600_vm11, %v2946_v11  ;;  %2780 = vmatpush3.bf16.msra.mxu0 %v2779_v53 }
 0x911   : > { %2781 = vmatprep.subr.bf16.mxu0 %v2944_v9 }
 0x914   : > { %2783 = vmatpush3.bf16.msra.mxu0 %v2782_v60 }
 0x915   : > { %2790 = vmatprep.subr.bf16.mxu0 %v2944_v9  ;;  %v2121_v14 = vld [vmem:[%s3633_s2] sm:$0xff]  ;;  %v2122_v53 = vld [vmem:[%s3633_s2 + $0x8] sm:$0xff] }
 0x916   : > { %v2806_v56 = vpack.c.bf16 %v2122_v53, %v2121_v14 }
 0x917   : > { %2643 = vmatmul.mubr.msk.f32.vlgmr.msra.gmra.mrb[14].mxu0 %vm3627_vm1, %v1845_v38  ;;  %v2384_v38 = vld [vmem:[#allocation9] ss:$0 sm:$0xff] }
 0x918   : > { %2664 = vmatprep.mubr.msk.f32.mxu0 %vm3600_vm11, %v2946_v11 }
 0x9d2   : > { %v1395_v55 = vpop.f32.mrb[8].mxu0  ;;  %v1467_v6 = vpop.f32.mrb[6].mxu1 }
 0x9d3   : > { %v1473_v12 = vrot.slane %v1467_v6, 7  ;;  %v2580_v13 = vpop.f32.mrb[9].mxu0  ;;  %v2585_v15 = vpop.f32.mrb[7].mxu1  ;;  %v2126_v6 = vld [vmem:[%s3626_s23 + $0x8] sm:$0xff] }
 0x9d5   : > { %v3461_v17 = vsel %vm1248_vm8, %v1473_v12, %v1395_v55  ;;  %v2125_v55 = vld [vmem:[%s3626_s23] sm:$0xff]  ;;  %vm3635_vm8 = vmmov %vm3634_vm4 }
 0x9d6   : > { %1477 = vst.msk [vmem:[#allocation7] sm:$0x3] %vm3618_vm10, %v3461_v17  ;;  %2610 = vmatmul.mubr.msk.f32.vlgmr.msra.gmra.mrb[8].mxu1 %vm3619_vm12, %v3461_v17  ;;  %v2797_v13 = vpack.c.bf16 %v2126_v6, %v2125_v55 }
 0x9d7   : > { %2774 = vmatpush3.bf16.msra.mxu1 %v2773_v16  ;;  %2631 = vmatprep.mubr.msk.f32.mxu1 %vm3600_vm11, %v2946_v11  ;;  %v2127_v16 = vld [vmem:[%s3626_s23 + $0x10] sm:$0xff] }
 0x9d8   : > { %2775 = vmatprep.subr.bf16.mxu1 %v2944_v9 }
 0x9da   : > { %v1554_v18 = vpop.f32.mrb[10].mxu0 }
 0x9db   : > { %v2596_v21 = vpop.f32.mrb[11].mxu0  ;;  %2777 = vmatpush3.bf16.msra.mxu1 %v2776_v20 }
 0x9dc   : > { %2784 = vmatprep.subr.bf16.mxu1 %v2944_v9 }
 0x9e2   : > { %v1716_v33 = vpop.f32.mrb[12].mxu0 }
 0x9e3   : > { %v2622_v34 = vpop.f32.mrb[13].mxu0 }
 0x9ea   : > { %v1919_v26 = vpop.f32.mrb[14].mxu0 }
 0x9eb   : > { %v2644_v27 = vpop.f32.mrb[15].mxu0 }
 0xaa9   : > { %v1626_v10 = vpop.f32.mrb[8].mxu1 }
 0xaaa   : > { %v1627_v29 = vadd.f32 %v1626_v10, %v1554_v18  ;;  %v2611_v30 = vpop.f32.mrb[9].mxu1  ;;  %v2128_v18 = vld [vmem:[%s3626_s23 + $0x18] sm:$0xff] }
 0xaab   : > { %v2800_v21 = vpack.c.bf16 %v2128_v18, %v2127_v16 }
 0xaac   : > { %v3480_v31 = vadd.f32 %v2372_v28, %v1627_v29 }
 0xaae   : > { %2632 = vmatmul.mubr.msk.f32.vlgmr.msra.gmra.mrb[10].mxu1 %vm3623_vm6, %v3480_v31 }
 0xaaf   : > { %2653 = vmatprep.mubr.msk.f32.mxu1 %vm3600_vm11, %v2946_v11  ;;  %2786 = vmatpush3.bf16.msra.mxu1 %v2785_v58  ;;  %v2124_v58 = vld [vmem:[%s3633_s2 + $0x18] sm:$0xff] }
 0xab0   : > { %2787 = vmatprep.subr.bf16.mxu1 %v2944_v9 }
 0xab3   : > { %2789 = vmatpush3.bf16.msra.mxu1 %v2788_v61 }
 0xab4   : > { %2796 = vmatprep.subr.bf16.mxu1 %v2944_v9 }
 0xb81   : > { %v1789_v35 = vpop.f32.mrb[10].mxu1 }
 0xb82   : > { %v1790_v39 = vadd.f32 %v1789_v35, %v1716_v33  ;;  %v2633_v40 = vpop.f32.mrb[11].mxu1 }
 0xb84   : > { %v1800_v22 = vadd.f32 %v2375_v36, %v1790_v39 }
 0xb86   : > { %2882 = vtanh.f32 %v1800_v22  ;;  %v2376_v43 = vmul.f32 -1.442695, %v1800_v22 }
 0xb88   : > { %2884 = vpow2.f32 %v2376_v43 }
 0xb90   : > { %v2883_v41 = vpop.eup %2882 }
 0xb91   : > { %1815 = vrot.lane.b32.xlu1 %v2883_v41, %s2948_s30 }
 0xb92   : > { %v2885_v44 = vpop.eup %2884 }
 0xb93   : > { %v1804_v45 = vadd.f32 1.0, %v2885_v44  ;;  %v2044_v44 = vld [vmem:[%s3632_s28] sm:$0xff] }
 0xb95   : > { %1810 = vrot.lane.b32.xlu1 %v1808_v42, %s2949_s6  ;;  %2886 = vrcp.f32 %v1804_v45  ;;  %v2045_v45 = vld [vmem:[%s3632_s28 + $0x8] sm:$0xff] }
 0xb9f   : > { %v2887_v47 = vpop.eup %2886 }
 0xc03   : > { %v1816_v48 = vpop.permute.xlu1 %1815 }
 0xc04   : > { %v1818_v49 = vmul.f32 %v2887_v47, %v1816_v48  ;;  %v2791_v48 = vpack.c.bf16 %v2045_v45, %v2044_v44 }
 0xc06   : > { %1820 = vrot.lane.b32.xlu1 %v1818_v49, %s2949_s6  ;;  %v2047_v49 = vld [vmem:[%s3632_s28 + $0x18] sm:$0xff]  ;;  %2792 = vmatpush3.bf16.msra.mxu0 %v2791_v48 }
 0xc07   : > { %v1811_v37 = vpop.permute.xlu1 %1810  ;;  %2793 = vmatprep.subr.bf16.mxu0 %v2944_v9 }
 0xc08   : > { %v1813_v46 = vmul.f32 %v2887_v47, %v1811_v37 }
 0xc78   : > { %v1821_v50 = vpop.permute.xlu1 %1820 }
 0xc79   : > { %v3490_v19 = vadd.f32 %v1821_v50, %v1813_v46 }
 0xc7b   : > { %2888 = vtanh.f32 %v3490_v19 }
 0xc85   : > { %v2889_v32 = vpop.eup %2888 }
 0xc86   : > { %1826 = vrot.lane.b32.xlu0 %v2889_v32, %s2948_s30 }
 0xcf8   : > { %v1827_v62 = vpop.permute.xlu0 %1826 }
 0xcf9   : > { %v1829_v63 = vmul.f32 %v2887_v47, %v1827_v62  ;;  %v2046_v47 = vld [vmem:[%s3632_s28 + $0x10] sm:$0xff] }
 0xcfa   : > { %v2794_v37 = vpack.c.bf16 %v2047_v49, %v2046_v47 }
 0xcfb   : > { %1831 = vrot.lane.b32.xlu1 %v1829_v63, %s2949_s6 }
 0xcfc   : > { %2795 = vmatpush3.bf16.msra.mxu0 %v2794_v37 }
 0xcfd   : > { %2805 = vmatprep.subr.bf16.mxu0 %v2944_v9 }
 0xcff   : > { %2013 = vrot.lane.b32.xlu1 %v2011_v0, %s2949_s6 }
 0xd6d   : > { %v1832_v12 = vpop.permute.xlu1 %1831 }
 0xd6e   : > { %1834 = vst.msk [vmem:[#allocation3] sm:$0x3] %vm3628_vm14, %v1832_v12  ;;  %v3515_v15 = vadd.f32 %v1832_v12, %v3480_v31 }
 0xd70   : > { %2654 = vmatmul.mubr.msk.f32.vlgmr.msra.gmra.mrb[12].mxu1 %vm3629_vm2, %v3515_v15 }
 0xd71   : > { %2798 = vmatpush3.bf16.msra.mxu1 %v2797_v13  ;;  %2679 = vmatprep.mubr.msk.f32.mxu1 %vm3600_vm11, %v2946_v11  ;;  %v2014_v22 = vpop.permute.xlu1 %2013 }
 0xd72   : > { %2799 = vmatprep.subr.bf16.mxu1 %v2944_v9 }
 0xd75   : > { %2801 = vmatpush3.bf16.msra.mxu1 %v2800_v21 }
 0xd76   : > { %2802 = vmatprep.subr.bf16.mxu1 %v2944_v9 }
 0xd79   : > { %2804 = vmatpush3.bf16.msra.mxu1 %v2803_v25 }
 0xd7c   : > { %2680 = vmatmul.mubr.msk.f32.vlgmr.msra.gmra.mrb[14].mxu1 %vm3631_vm3, %v3461_v17 }
 0xe43   : > { %v1992_v20 = vpop.f32.mrb[12].mxu1 }
 0xe44   : > { %v1993_v10 = vadd.f32 %v1992_v20, %v1919_v26  ;;  %v2655_v28 = vpop.f32.mrb[13].mxu1 }
 0xe46   : > { %v2003_v29 = vadd.f32 %v2379_v8, %v1993_v10 }
 0xe48   : > { %2890 = vtanh.f32 %v2003_v29  ;;  %v2380_v34 = vmul.f32 -1.442695, %v2003_v29 }
 0xe4a   : > { %2892 = vpow2.f32 %v2380_v34 }
 0xe4f   : > { %v2197_v30 = vpop.f32.mrb[14].mxu1 }
 0xe50   : > { %v2681_v31 = vpop.f32.mrb[15].mxu1 }
 0xe52   : > { %v2891_v33 = vpop.eup %2890 }
 0xe53   : > { %2018 = vrot.lane.b32.xlu0 %v2891_v33, %s2948_s30 }
 0xe54   : > { %v2893_v35 = vpop.eup %2892 }
 0xe55   : > { %v2007_v17 = vadd.f32 1.0, %v2893_v35 }
 0xe57   : > { %2894 = vrcp.f32 %v2007_v17 }
 0xe61   : > { %v2895_v36 = vpop.eup %2894 }
 0xe62   : > { %v2016_v41 = vmul.f32 %v2895_v36, %v2014_v22 }
 0xec5   : > { %v2019_v39 = vpop.permute.xlu0 %2018 }
 0xec6   : > { %v2021_v40 = vmul.f32 %v2895_v36, %v2019_v39 }
 0xec8   : > { %2023 = vrot.lane.b32.xlu0 %v2021_v40, %s2949_s6 }
 0xf3a   : > { %v2024_v42 = vpop.permute.xlu0 %2023 }
 0xf3b   : > { %v2026_v43 = vadd.f32 %v2024_v42, %v2016_v41 }
 0xf3d   : > { %2896 = vtanh.f32 %v2026_v43 }
 0xf47   : > { %v2897_v46 = vpop.eup %2896 }
 0xf48   : > { %2029 = vrot.lane.b32.xlu1 %v2897_v46, %s2948_s30  ;;  %s2285_s30 = scalar_lea.vmem %s3127_s11, %s3153_s0 }
 0xf4c   : > { %1836 = vrot.lane.b32.xlu1 %v3490_v19, %s2950_s4  ;;  %v2123_v19 = vld [vmem:[%s3633_s2 + $0x10] sm:$0xff] }
 0xf4d   : > { %v2809_v7 = vpack.c.bf16 %v2124_v58, %v2123_v19 }
 0xfba   : > { %v2030_v50 = vpop.permute.xlu1 %2029 }
 0xfbb   : > { %v2032_v51 = vmul.f32 %v2895_v36, %v2030_v50 }
 0xfbd   : > { %2034 = vrot.lane.b32.xlu0 %v2032_v51, %s2949_s6  ;;  %s2289_s6 = scalar_lea.vmem %s3137_s26, %s3153_s0 }
 0xfbe   : > { %v1837_v52 = vpop.permute.xlu1 %1836 }
 0xfbf   : > { %1839 = vst.msk [vmem:[#allocation4] sm:$0x3] %vm3634_vm4, %v1837_v52 }
 0xfc1   : > { %2039 = vrot.lane.b32.xlu0 %v2026_v43, %s2950_s4 }
0x102f   : > { %v2035_v54 = vpop.permute.xlu0 %2034 }
0x1030   : > { %2037 = vst.msk [vmem:[#allocation5] sm:$0x3] %vm3635_vm8, %v2035_v54  ;;  %v2043_v57 = vadd.f32 %v2035_v54, %v3515_v15 }
0x1032   : > { %2665 = vmatmul.mubr.msk.f32.vlgmr.msra.gmra.mrb[16].mxu0 %vm3636_vm15, %v2043_v57 }
0x1033   : > { %2807 = vmatpush3.bf16.msra.mxu0 %v2806_v56  ;;  %v2040_v59 = vpop.permute.xlu0 %2039  ;;  %2690 = vmatprep.mubr.msk.f32.mxu0 %vm3600_vm11, %v2946_v11  ;;  %vm2290_vm11 = vcmask 1024  }
0x1034   : > { %2042 = vst.msk [vmem:[#allocation6] sm:$0x3] %vm3637_vm5, %v2040_v59  ;;  %2808 = vmatprep.subr.bf16.mxu0 %v2944_v9 }
0x1037   : > { %2810 = vmatpush3.bf16.msra.mxu0 %v2809_v7 }
0x103a   : > { %2691 = vmatmul.mubr.msk.f32.vlgmr.msra.gmra.mrb[18].mxu0 %vm3638_vm0, %v2043_v57 }
0x1105   : > { %v2117_v60 = vpop.f32.mrb[16].mxu0 }
0x1106   : > { %2286 = vst.msk [vmem:[%s2285_s30] sm:$0x3] %vm3639_vm7, %v2117_v60  ;;  %v2666_v61 = vpop.f32.mrb[17].mxu0 }
0x110d   : > { %v2267_v32 = vpop.f32.mrb[18].mxu0 }
0x110e   : > { %v2268_v62 = vadd.f32 %v2267_v32, %v2197_v30  ;;  %v2692_v63 = vpop.f32.mrb[19].mxu0 }
0x1110   : > { %v2278_v0 = vadd.f32 %v2384_v38, %v2268_v62 }
0x1112   : > { %v2385_v11 = vmul.f32 -1.442695, %v2278_v0 }
0x1114   : > { %2898 = vpow2.f32 %v2385_v11 }
0x111e   : > { %v2899_v55 = vpop.eup %2898 }
0x111f   : > { %v2282_v6 = vadd.f32 1.0, %v2899_v55 }
0x1121   : > { %2900 = vrcp.f32 %v2282_v6 }
0x1126   :  { %160 = sbr.rel (!%p158_p0) target bundleno = 57 (0x39), region = 208 }
0x112b   : > { %v2901_v9 = vpop.eup %2900 }
0x112c   : > { %2291 = vst.msk [vmem:[%s2289_s6] sm:$0x3] %vm2290_vm11, %v2901_v9 }

// kernel: tacotron_forward.62
= control target key start
LH: loop header
LB: loop body
LE: loop exit
PB: predicated region body
PF: predicated region fallthrough
CT: control target
= control target key end

     0   :  { %s659_s18 = smov 0   ;;  %s718_s0 = inlined_call_operand.vmem [shape: f32[2,10,32], index: 0, kind: input, shape index: {}]   ;;  %s719_s1 = inlined_call_operand.vmem [shape: bf16[3,32,16], index: 1, kind: input, shape index: {}]   ;;  %s720_s2 = inlined_call_operand.vmem [shape: f32[1,16], index: 2, kind: input, shape index: {}]   ;;  %s721_s3 = inlined_call_operand.vmem [shape: f32[1,16], index: 3, kind: input, shape index: {}]   ;;  %s722_s4 = inlined_call_operand.vmem [shape: f32[2,8,16], index: 4, kind: output, shape index: {0}]   ;;  %s723_s5 = inlined_call_operand.vmem [shape: f32[2,16], index: 5, kind: output, shape index: {1}]  }
   0x1 LB: > { %s665_s19 = sadd.s32 4294967295, %s624_s18   ;;  %p535_p0 = scmp.ge.s32.totalorder %s624_s18, 1  ;;  %s624_s18 = sphi %s659_s18, %s16_s18  }
   0x2   : > { %p185_p1 = scmp.lt.s32.totalorder %s624_s18, 3 }
   0x4   : > { %p186_p2 = pnand %p535_p0, %p185_p1 }
   0x5   : > { %p212_p3 = scmp.lt.s32.totalorder (!%p186_p2), %s665_s19, 1  ;;  %p539_p4 = scmp.ne.s32.totalorder (!%p186_p2), %s665_s19, 0 }
   0x6   : > { %189 = sbr.rel (%p186_p2) target bundleno = 308 (0x134), region = 36 }
   0xd   : > { %s213_s20 = scalar_select %p212_p3, %s665_s19, 1 }
   0xe   : > { %225 = sbr.rel (%p539_p4) target bundleno = 21 (0x15), region = 40  ;;  %vm226_vm0 = vcmask (!%p539_p4), 122880   ;;  %v626_v0 = vmov (!%p539_p4), 0.0  }
   0xf   : > { %s560_s21 = sshll.u32 %s213_s20, 4  ;;  %s538_s22 = sshll.u32 %s213_s20, 3  ;;  %227 = vst.msk [vmem:[#allocation2] sm:$0x1] (!%p539_p4), %vm226_vm0, %v626_v0  ;;  %228 = vst.msk [vmem:[#allocation3] sm:$0x1] (!%p539_p4), %vm226_vm0, %v626_v0 }
  0x10   : > { %s216_s25 = scalar_lea.vmem %s718_s0, %s560_s21  ;;  %s677_s28 = scalar_lea.vmem %s722_s4, %s538_s22 }
  0x15 PF: > { %v610_v1 = vld [vmem:[%s719_s1] sm:$0xff]   ;;  %v627_v2 = vmov 0.0   ;;  %v611_v3 = vld [vmem:[%s719_s1 + $0x8] sm:$0xff]   ;;  %vm628_vm1 = vmmov 0   ;;  %v613_v7 = vld [vmem:[%s719_s1 + $0x10] sm:$0xff]   ;;  %vm260_vm2 = vcmask 261120  }
  0x16   : > { %578 = vmatprep.subr.bf16.mxu0 %v627_v2  ;;  %570 = vmatprep.subr.bf16.mxu1 %v627_v2  ;;  %v229_v4 = vld [vmem:[%s216_s25] sm:$0xff]  ;;  %v230_v5 = vld [vmem:[%s216_s25 + $0x8] sm:$0x3]  ;;  %v614_v9 = vld [vmem:[%s719_s1 + $0x18] sm:$0xff]   ;;  %vm421_vm3 = vcmask 130048   ;;  %vm432_vm4 = vcmask 122880  }
  0x17   : > { %579 = vmatpush3.bf16.msra.mxu0 %v610_v1  ;;  %582 = vmatprep.mubr.msk.bf16.mxu0 %vm628_vm1, %v627_v2  ;;  %v231_v6 = vpack.c.bf16 %v230_v5, %v229_v4  ;;  %v612_v8 = vld [vmem:[%s719_s1 + $0x20] sm:$0xff]   ;;  %v615_v13 = vld [vmem:[%s719_s1 + $0x28] sm:$0xff]   ;;  %p557_p5 = scmp.ne.s32.totalorder %s665_s19, 1 }
  0x18   : > { %580 = vmatprep.subr.bf16.mxu0 %v627_v2  ;;  %574 = vmatprep.mubr.msk.bf16.mxu1 %vm628_vm1, %v627_v2  ;;  %v423_v37 = vld [vmem:[#allocation2] sm:$0x1]  ;;  %v434_v40 = vld [vmem:[#allocation3] sm:$0x1]  ;;  %v463_v51 = vlaneseq (!%p557_p5)  ;;  %vm468_vm5 = vcmask (!%p557_p5), 1040384   ;;  %vm470_vm6 = vcmask (!%p557_p5), 123904  }
  0x19   : > { %571 = vmatpush3.bf16.msra.mxu1 %v613_v7  ;;  %v242_v10 = vshrl.u32 %v231_v6, 16  ;;  %v244_v11 = vshll.u32 %v231_v6, 16  ;;  %v364_v15 = vrot.slane %v231_v6, 1  ;;  %v455_v52 = vld [vmem:[%s720_s2] sm:$0x1] (!%p557_p5) }
  0x1a   : > { %572 = vmatprep.subr.bf16.mxu1 %v627_v2  ;;  %v464_v53 = vshrl.u32 (!%p557_p5), %v463_v51, 7  ;;  %v459_v56 = vld [vmem:[%s721_s3] sm:$0x1] (!%p557_p5) }
  0x1b   : > { %581 = vmatpush3.bf16.msra.mxu0 %v611_v3  ;;  %v246_v12 = vrot.slane %v244_v11, 1 }
  0x1c   : > { %586 = vmatprep.subr.bf16.mxu0 %v627_v2  ;;  %v465_v58 = vsub.s32 (!%p557_p5), 0, %v464_v53 }
  0x1d   : > { %573 = vmatpush3.bf16.msra.mxu1 %v614_v9  ;;  %v247_v14 = vor.u32 %v246_v12, %v242_v10 }
  0x1e   : > { %583 = vmatmul.mubr.msk.bf16.vlgmr.msra.gmra.mrb[0].mxu0 %vm260_vm2, %v231_v6 }
  0x1f   : > { %587 = vmatpush3.bf16.msra.mxu0 %v612_v8  ;;  %590 = vmatprep.mubr.msk.bf16.mxu0 %vm628_vm1, %v627_v2 }
  0x20   : > { %588 = vmatprep.subr.bf16.mxu0 %v627_v2  ;;  %575 = vmatmul.mubr.msk.bf16.vlgmr.msra.gmra.mrb[0].mxu1 %vm260_vm2, %v247_v14 }
  0x23   : > { %589 = vmatpush3.bf16.msra.mxu0 %v615_v13 }
  0x2a   : > { %591 = vmatmul.mubr.msk.bf16.vlgmr.msra.gmra.mrb[0].mxu0 %vm260_vm2, %v364_v15 }
  0xf3   : > { %v298_v16 = vpop.f32.mrb[0].mxu1 }
  0xf4   : > { %v576_v17 = vpop.f32.mrb[1].mxu1 }
  0xf5   : > { %v301_v18 = vpop.f32.mrb[2].mxu1 }
  0xf6   : > { %v577_v19 = vpop.f32.mrb[3].mxu1 }
  0xfd   : > { %v414_v20 = vpop.f32.mrb[0].mxu0 }
  0xfe   : > { %v594_v21 = vadd.f32 %v414_v20, %v298_v16  ;;  %v592_v22 = vpop.f32.mrb[1].mxu0 }
  0xff   : > { %v417_v23 = vpop.f32.mrb[2].mxu0 }
 0x100   : > { %422 = vst.msk [vmem:[%s677_s28] sm:$0xff] %vm421_vm3, %v594_v21  ;;  %v424_v24 = vsel %vm421_vm3, %v594_v21, 0.0  ;;  %v435_v25 = vmul.f32 %v594_v21, %v594_v21  ;;  %v593_v26 = vpop.f32.mrb[3].mxu0 }
 0x101   : > { %v425_v27 = vrot.slane %v424_v24, 4 }
 0x102   : > { %v436_v28 = vsel %vm421_vm3, %v435_v25, 0.0 }
 0x103   : > { %v426_v29 = vadd.f32 %v425_v27, %v424_v24  ;;  %v437_v30 = vrot.slane %v436_v28, 4 }
 0x105   : > { %v427_v31 = vrot.slane %v426_v29, 2  ;;  %v438_v32 = vadd.f32 %v437_v30, %v436_v28 }
 0x107   : > { %v428_v33 = vadd.f32 %v427_v31, %v426_v29  ;;  %v439_v34 = vrot.slane %v438_v32, 2 }
 0x109   : > { %v429_v35 = vrot.slane %v428_v33, 1  ;;  %v440_v36 = vadd.f32 %v439_v34, %v438_v32 }
 0x10b   : > { %v430_v38 = vadd.f32 %v429_v35, %v428_v33  ;;  %v441_v39 = vrot.slane %v440_v36, 1  ;;  %448 = sbr.rel (%p557_p5) target bundleno = 308 (0x134), region = 44 }
 0x10d   : > { %v431_v41 = vadd.f32 %v430_v38, %v423_v37  ;;  %v442_v42 = vadd.f32 %v441_v39, %v440_v36 }
 0x10f   : > { %433 = vst.msk [vmem:[#allocation2] sm:$0x1] %vm432_vm4, %v431_v41  ;;  %v443_v43 = vadd.f32 %v442_v42, %v434_v40 }
 0x111   : > { %444 = vst.msk [vmem:[#allocation3] sm:$0x1] %vm432_vm4, %v443_v43 }
 0x116   : > { %v449_v44 = vld [vmem:[#allocation2] sm:$0x1] }
 0x117   : > { %v450_v46 = vmul.f32 0.0625, %v449_v44 }
 0x118   : > { %v451_v45 = vld [vmem:[#allocation3] sm:$0x1] }
 0x119   : > { %v452_v47 = vmul.f32 0.0625, %v451_v45  ;;  %v453_v48 = vmul.f32 %v450_v46, %v450_v46 }
 0x11b   : > { %v454_v49 = vsub.f32 %v452_v47, %v453_v48 }
 0x11d   : > { %v456_v50 = vadd.f32 1e-05, %v454_v49 }
 0x11f   : > { %616 = vrsqrt.f32 %v456_v50 }
 0x129   : > { %v617_v54 = vpop.eup %616 }
 0x12a   : > { %v458_v55 = vmul.f32 %v617_v54, %v455_v52 }
 0x12c   : > { %v460_v57 = vmul.f32 %v458_v55, %v450_v46 }
 0x12e   : > { %v461_v59 = vsub.f32 %v459_v56, %v460_v57 }
 0x130   : > { %v466_v60 = vrot.slane %v461_v59, %v465_v58 }
 0x132   : > { %v469_v61 = vsel %vm468_vm5, %v458_v55, %v466_v60 }
 0x133   : > { %471 = vst.msk [vmem:[%s723_s5] sm:$0x3] %vm470_vm6, %v469_v61 }
 0x134 PF: > { %s16_s18 = sadd.s32 1, %s624_s18  }
 0x135   : > { %p13_p6 = scmp.ge.s32.totalorder %s16_s18, 4  }
 0x137   :  { %15 = sbr.rel (!%p13_p6) target bundleno = 1 (0x1), region = 84 }

// kernel: tacotron_forward.63
= control target key start
LH: loop header
LB: loop body
LE: loop exit
PB: predicated region body
PF: predicated region fallthrough
CT: control target
= control target key end

     0   :  { %vm27_vm0 = vcmask 130048   ;;  %s69_s0 = inlined_call_operand.vmem [shape: f32[16,16], index: 0, kind: input, shape index: {}]   ;;  %s70_s1 = inlined_call_operand.vmem [shape: f32[2,16], index: 1, kind: input, shape index: {}]   ;;  %s71_s2 = inlined_call_operand.vmem [shape: f32[16,16], index: 2, kind: output, shape index: {}]  }
   0x1   :  { %v11_v0 = vld [vmem:[%s69_s0] sm:$0xff]  ;;  %v12_v4 = vld [vmem:[%s69_s0 + $0x8] sm:$0xff] }
   0x2   :  { %v34_v1 = vld [vmem:[%s70_s1] ss:$0 sm:$0xff]  ;;  %v35_v2 = vld [vmem:[%s70_s1 + $0x1] ss:$0 sm:$0xff] }
   0x3   :  { %v18_v3 = vmul.f32 %v34_v1, %v11_v0  ;;  %v19_v5 = vmul.f32 %v34_v1, %v12_v4 }
   0x5   :  { %v25_v6 = vadd.f32 %v35_v2, %v18_v3  ;;  %v26_v7 = vadd.f32 %v35_v2, %v19_v5 }
   0x7   :  { %28 = vst.msk [vmem:[%s71_s2] sm:$0xff] %vm27_vm0, %v25_v6  ;;  %29 = vst.msk [vmem:[%s71_s2 + $0x8] sm:$0xff] %vm27_vm0, %v26_v7 }

// kernel: tacotron_forward.64
= control target key start
LH: loop header
LB: loop body
LE: loop exit
PB: predicated region body
PF: predicated region fallthrough
CT: control target
= control target key end

     0   :  { %v372_v0 = vmov 0.0   ;;  %vm373_vm0 = vmmov 0   ;;  %vm29_vm1 = vcmask 130048   ;;  %vm98_vm2 = vcmask 261120   ;;  %s447_s1 = inlined_call_operand.vmem [shape: bf16[16,32], index: 1, kind: input, shape index: {}]   ;;  %s448_s0 = inlined_call_operand.vmem [shape: f32[16,16], index: 0, kind: input, shape index: {}]   ;;  %s449_s2 = inlined_call_operand.vmem [shape: bf16[2,32,64], index: 2, kind: input, shape index: {}]   ;;  %s450_s3 = inlined_call_operand.vmem [shape: f32[2,1,64], index: 3, kind: input, shape index: {}]   ;;  %s451_s4 = inlined_call_operand.vmem [shape: f32[16,32], index: 4, kind: output, shape index: {}]  }
   0x1   :  { %325 = vmatprep.subr.bf16.mxu0 %v372_v0  ;;  %v351_v1 = vld [vmem:[%s447_s1] sm:$0xff]   ;;  %327 = vmatprep.mubr.msk.bf16.mxu0 %vm373_vm0, %v372_v0  ;;  %v19_v3 = vld [vmem:[%s448_s0 + $0x8] sm:$0xff]  ;;  %v354_v17 = vld [vmem:[%s449_s2 + $0x10] sm:$0xff]  }
   0x2   :  { %v18_v2 = vld [vmem:[%s448_s0] sm:$0xff]  ;;  %331 = vmatprep.subr.bf16.mxu1 %v372_v0  ;;  %335 = vmatprep.mubr.msk.bf16.mxu1 %vm373_vm0, %v372_v0  ;;  %v353_v6 = vld [vmem:[%s449_s2 + $0x8] sm:$0xff]   ;;  %s374_s0 = smov 32   ;;  %v355_v21 = vld [vmem:[%s449_s2 + $0x18] sm:$0xff]  }
   0x3   :  { %326 = vmatpush3.bf16.msra.mxu0 %v351_v1  ;;  %v20_v4 = vpack.c.bf16 %v19_v3, %v18_v2  ;;  %v352_v5 = vld [vmem:[%s449_s2] sm:$0xff]   ;;  %s375_s2 = smov 96  }
   0x4   :  { %339 = vmatprep.subr.bf16.mxu0 %v372_v0  ;;  %332 = vmatpush3.bf16.msra.mxu1 %v352_v5  ;;  %v300_v12 = vld [vmem:[%s450_s3] ss:$0 sm:$0xff]  ;;  %v311_v45 = vld [vmem:[%s450_s3 + $0x1] ss:$0 sm:$0xff] }
   0x5   :  { %333 = vmatprep.subr.bf16.mxu1 %v372_v0 }
   0x6   :  { %328 = vmatmul.mubr.msk.bf16.vlgmr.msra.gmra.mrb[0].mxu0 %vm29_vm1, %v20_v4 }
   0x7   :  { %343 = vmatprep.mubr.msk.bf16.mxu0 %vm373_vm0, %v372_v0  ;;  %340 = vmatpush3.bf16.msra.mxu0 %v354_v17 }
   0x8   :  { %334 = vmatpush3.bf16.msra.mxu1 %v353_v6  ;;  %341 = vmatprep.subr.bf16.mxu0 %v372_v0 }
   0xb   :  { %342 = vmatpush3.bf16.msra.mxu0 %v355_v21 }
  0xd9   :  { %v67_v7 = vpop.f32.mrb[0].mxu0 }
  0xda   :  { %171 = vrot.lane.b32.xlu1 %v67_v7, %s374_s0  ;;  %v329_v8 = vpop.f32.mrb[1].mxu0 }
  0xdb   :  { %v70_v9 = vpop.f32.mrb[2].mxu0 }
  0xdc   :  { %v74_v10 = vpack.c.bf16 %v70_v9, %v67_v7  ;;  %v330_v11 = vpop.f32.mrb[3].mxu0 }
  0xde   :  { %173 = vrot.lane.b32.xlu1 %v70_v9, %s374_s0  ;;  %336 = vmatmul.mubr.msk.bf16.vlgmr.msra.gmra.mrb[0].mxu1 %vm98_vm2, %v74_v10 }
 0x14c   :  { %v172_v31 = vpop.permute.xlu1 %171 }
 0x150   :  { %v174_v36 = vpop.permute.xlu1 %173 }
 0x1b1   :  { %v136_v13 = vpop.f32.mrb[0].mxu1 }
 0x1b2   :  { %v137_v14 = vadd.f32 %v300_v12, %v136_v13  ;;  %v337_v15 = vpop.f32.mrb[1].mxu1 }
 0x1b3   :  { %v139_v16 = vpop.f32.mrb[2].mxu1 }
 0x1b4   :  { %v140_v18 = vadd.f32 %v300_v12, %v139_v16  ;;  %v338_v19 = vpop.f32.mrb[3].mxu1  ;;  %v155_v20 = vmax.f32 %v137_v14, 0.0  ;;  %v304_v23 = vmul.f32 -1.442695, %v137_v14 }
 0x1b6   :  { %159 = vrot.lane.b32.xlu0 %v155_v20, %s374_s0  ;;  %v156_v22 = vmax.f32 %v140_v18, 0.0  ;;  %v305_v24 = vmul.f32 -1.442695, %v140_v18  ;;  %356 = vpow2.f32 %v304_v23 }
 0x1b8   :  { %358 = vpow2.f32 %v305_v24 }
 0x1ba   :  { %161 = vrot.lane.b32.xlu0 %v156_v22, %s374_s0 }
 0x1c0   :  { %v357_v25 = vpop.eup %356 }
 0x1c1   :  { %v149_v27 = vadd.f32 1.0, %v357_v25 }
 0x1c2   :  { %v359_v26 = vpop.eup %358 }
 0x1c3   :  { %v150_v28 = vadd.f32 1.0, %v359_v26  ;;  %360 = vrcp.f32 %v149_v27 }
 0x1c5   :  { %362 = vrcp.f32 %v150_v28 }
 0x1cd   :  { %v361_v29 = vpop.eup %360 }
 0x1ce   :  { %v167_v33 = vsub.f32 1.0, %v361_v29 }
 0x1cf   :  { %v363_v30 = vpop.eup %362 }
 0x1d0   :  { %v168_v34 = vsub.f32 1.0, %v363_v30  ;;  %v177_v38 = vmul.f32 %v172_v31, %v167_v33 }
 0x1d2   :  { %v178_v40 = vmul.f32 %v174_v36, %v168_v34 }
 0x228   :  { %v160_v32 = vpop.permute.xlu0 %159 }
 0x229   :  { %v165_v35 = vmul.f32 %v361_v29, %v160_v32 }
 0x22b   :  { %v179_v41 = vadd.f32 %v177_v38, %v165_v35 }
 0x22c   :  { %v162_v37 = vpop.permute.xlu0 %161 }
 0x22d   :  { %v166_v39 = vmul.f32 %v363_v30, %v162_v37 }
 0x22f   :  { %v180_v42 = vadd.f32 %v178_v40, %v166_v39 }
 0x231   :  { %v181_v43 = vpack.c.bf16 %v180_v42, %v179_v41 }
 0x233   :  { %196 = vrot.lane.b32.xlu0 %v181_v43, %s375_s2 }
 0x2a5   :  { %v197_v44 = vpop.permute.xlu0 %196 }
 0x2a6   :  { %344 = vmatmul.mubr.msk.bf16.vlgmr.msra.gmra.mrb[4].mxu0 %vm98_vm2, %v197_v44 }
 0x379   :  { %v247_v46 = vpop.f32.mrb[4].mxu0 }
 0x37a   :  { %v248_v47 = vadd.f32 %v311_v45, %v247_v46  ;;  %v345_v48 = vpop.f32.mrb[5].mxu0 }
 0x37b   :  { %v250_v49 = vpop.f32.mrb[6].mxu0 }
 0x37c   :  { %v266_v50 = vmax.f32 %v248_v47, 0.0  ;;  %v251_v51 = vadd.f32 %v311_v45, %v250_v49  ;;  %v346_v52 = vpop.f32.mrb[7].mxu0  ;;  %v315_v54 = vmul.f32 -1.442695, %v248_v47 }
 0x37e   :  { %v267_v53 = vmax.f32 %v251_v51, 0.0  ;;  %270 = vrot.lane.b32.xlu1 %v266_v50, %s374_s0  ;;  %v316_v55 = vmul.f32 -1.442695, %v251_v51  ;;  %364 = vpow2.f32 %v315_v54 }
 0x380   :  { %272 = vrot.lane.b32.xlu0 %v267_v53, %s374_s0  ;;  %366 = vpow2.f32 %v316_v55 }
 0x388   :  { %v365_v56 = vpop.eup %364 }
 0x389   :  { %v260_v58 = vadd.f32 1.0, %v365_v56 }
 0x38a   :  { %v367_v57 = vpop.eup %366 }
 0x38b   :  { %v261_v59 = vadd.f32 1.0, %v367_v57  ;;  %368 = vrcp.f32 %v260_v58 }
 0x38d   :  { %370 = vrcp.f32 %v261_v59 }
 0x395   :  { %v369_v60 = vpop.eup %368 }
 0x396   :  { %v278_v62 = vsub.f32 1.0, %v369_v60 }
 0x397   :  { %v371_v61 = vpop.eup %370 }
 0x398   :  { %v279_v63 = vsub.f32 1.0, %v371_v61  ;;  %v280_v2 = vmul.f32 %v278_v62, %v179_v41 }
 0x39a   :  { %v281_v6 = vmul.f32 %v279_v63, %v180_v42 }
 0x3f0   :  { %v271_v0 = vpop.permute.xlu1 %270 }
 0x3f1   :  { %v276_v1 = vmul.f32 %v369_v60, %v271_v0 }
 0x3f2   :  { %v273_v3 = vpop.permute.xlu0 %272 }
 0x3f3   :  { %v282_v4 = vadd.f32 %v280_v2, %v276_v1  ;;  %v277_v5 = vmul.f32 %v371_v61, %v273_v3 }
 0x3f5   :  { %v283_v7 = vadd.f32 %v281_v6, %v277_v5  ;;  %286 = vrot.lane.b32.xlu1 %v282_v4, %s375_s2 }
 0x3f7   :  { %288 = vrot.lane.b32.xlu0 %v283_v7, %s375_s2 }
 0x467   :  { %v287_v8 = vpop.permute.xlu1 %286 }
 0x468   :  { %292 = vst.msk [vmem:[%s451_s4] sm:$0xff] %vm98_vm2, %v287_v8 }
 0x469   :  { %v289_v9 = vpop.permute.xlu0 %288 }
 0x46a   :  { %293 = vst.msk [vmem:[%s451_s4 + $0x8] sm:$0xff] %vm98_vm2, %v289_v9 }

// kernel: tacotron_forward.67
= control target key start
LH: loop header
LB: loop body
LE: loop exit
PB: predicated region body
PF: predicated region fallthrough
CT: control target
= control target key end

     0   :  { %v141_v1 = vmov 0.0   ;;  %vm142_vm0 = vmmov 0   ;;  %s185_s0 = inlined_call_operand.vmem [shape: f32[16,32], index: 0, kind: input, shape index: {}]   ;;  %s186_s1 = inlined_call_operand.vmem [shape: bf16[32,16], index: 1, kind: input, shape index: {}]   ;;  %s187_s2 = inlined_call_operand.hbm [shape: f32[16,16], index: 2, kind: output, shape index: {}]  }
   0x1   :  { %v115_v0 = vld [vmem:[%s186_s1] sm:$0xff]   ;;  %102 = vmatprep.subr.bf16.mxu0 %v141_v1  ;;  %v116_v2 = vld [vmem:[%s186_s1 + $0x8] sm:$0xff]   ;;  %106 = vmatprep.mubr.msk.bf16.mxu0 %vm142_vm0, %v141_v1 }
   0x2   :  { %103 = vmatpush3.bf16.msra.mxu0 %v115_v0  ;;  %v13_v3 = vld [vmem:[%s185_s0] sm:$0xff]  ;;  %v14_v4 = vld [vmem:[%s185_s0 + $0x8] sm:$0xff] }
   0x3   :  { %7 = vsyncpa [#allocation3], 0  ;;  %104 = vmatprep.subr.bf16.mxu0 %v141_v1  ;;  %v15_v5 = vpack.c.bf16 %v14_v4, %v13_v3  ;;  %vm32_vm1 = vcmask 261120   ;;  %s143_s17 = smov [#allocation2]   ;;  %vm77_vm2 = vcmask 130048  }
   0x4   :  { %s85_s18 = sshll.u32 %s143_s17, 4  ;;  %s86_s18 = int_to_ptr.vmem [resolvable:$true] %s85_s18 }
   0x5   :  { %s117_s1 = scalar_lea.vmem %s86_s18, 256  ;;  %p122_p1 = scmp.lt.s32.totalorder %s86_s18, %s86_s18 }
   0x6   :  { %105 = vmatpush3.bf16.msra.mxu0 %v116_v2  ;;  %p118_p0 = scmp.ne.s32.totalorder %s86_s18, %s117_s1  ;;  %p123_p2 = scmp.lt.s32.totalorder %s117_s1, %s117_s1 }
   0x8   :  { %p124_p3 = por %p123_p2, %p122_p1 }
   0x9   :  { %107 = vmatmul.mubr.msk.bf16.vlgmr.msra.gmra.mrb[0].mxu0 %vm32_vm1, %v15_v5 }
   0xa   :  { %p125_p4 = pnand %p124_p3, %p118_p0 }
  0xdc   :  { %v70_v6 = vpop.f32.mrb[0].mxu0 }
  0xdd   :  { %78 = vst.msk [vmem:[#allocation2] sm:$0xff] %vm77_vm2, %v70_v6  ;;  %v108_v7 = vpop.f32.mrb[1].mxu0 }
  0xde   :  { %v73_v8 = vpop.f32.mrb[2].mxu0 }
  0xdf   :  { %79 = vst.msk [vmem:[#allocation2 + $0x8] sm:$0xff] %vm77_vm2, %v73_v8  ;;  %v109_v9 = vpop.f32.mrb[3].mxu0 }
  0xe0   :  { %128 = shalt.err (!%p125_p4)
}
  0xe1   :  { %s129_s20 = scalar_lea.hbm %s187_s2, 256 }
  0xe2   :  { %p130_p5 = scmp.ne.s32.totalorder %s187_s2, %s129_s20  ;;  %p133_p6 = scmp.lt.u32.totalorder %s129_s20, %s187_s2 }
  0xe4   :  { %p135_p7 = pnand %p133_p6, %p130_p5 }
  0xe6   :  { %138 = shalt.err (!%p135_p7)
}
  0xe7   :  { %s144_s25 = smov 128   ;;  %s145_s26 = smov 8  }
  0xe8   :  { %91 = dma.vmem_to_hbm [thread:$0]  %s86_s18, 256, %s187_s2, [#allocation3], %s144_s25, %s144_s25, %s145_s26  }
  0xe9   :  { %139 = dma.done.wait [#allocation3], 256  }
  0xea   :  { %140 = vsyncadd [#allocation3], 4294967040 }
  0xeb   :  { %95 = vsyncpa [#allocation3], 1 }

</bundles_post_ra>
